<compile_context>
chip_gen: v6e
topology: v6e:2x2x1
jax: 0.10.0
libtpu: 0.0.40
codegen_flags: <defaults>
</compile_context>

<pallas_src>
import functools

import numpy as np
import jax
import jax.numpy as jnp
from jax.experimental import pallas as pl
from jax.experimental.pallas import tpu as pltpu

# ----------------- small shapes consistent with the module -----------------
B = 2          # batch
NUM_IM = 3     # burst frames (module default 9, shrunk)
H = W = 16     # LR spatial size
SR = 3         # sr_ratio
C_ENC = 16     # Encoder_num_features == PCAF_num_features (default 64, shrunk)
KS = 11        # GaussianBlur(11, sigma=1)
SIGMA = 1.0

_g = np.exp(-0.5 * ((np.arange(KS) - KS // 2) / SIGMA) ** 2)
GW = (_g / _g.sum()).astype(np.float32)   # static 11-tap Gaussian weights

_gelu = lambda v: jax.nn.gelu(v, approximate=True)


# ------------------------- Pallas kernels ----------------------------------
def _gauss_blur_kernel(xp_ref, o_ref):
    # Separable 11-tap Gaussian blur of ALL b*num_im (reflect-padded) images in
    # one grid step (whole padded input is only a few KB); f32 VPU math.
    xp = xp_ref[...]                               # (N, Hp, Wp)
    n, hp, wp = xp.shape
    h = hp - (KS - 1)
    w = wp - (KS - 1)
    tmp = float(GW[0]) * xp[:, :, 0:w]             # horizontal pass
    for k in range(1, KS):
        tmp = tmp + float(GW[k]) * xp[:, :, k:k + w]
    out = float(GW[0]) * tmp[:, 0:h, :]            # vertical pass
    for k in range(1, KS):
        out = out + float(GW[k]) * tmp[:, k:k + h, :]
    o_ref[...] = out


def gaussian_blur(x):
    # x: (N, H, W) f32 -> (N, H, W) f32 ; single grid step, no per-image overhead.
    n, h, w = x.shape
    pad = KS // 2
    xp = jnp.pad(x, ((0, 0), (pad, pad), (pad, pad)), mode="reflect")
    return pl.pallas_call(
        _gauss_blur_kernel,
        out_shape=jax.ShapeDtypeStruct((n, h, w), jnp.float32),
        grid=(1,),
        in_specs=[pl.BlockSpec((n, h + 2 * pad, w + 2 * pad), lambda i: (0, 0, 0))],
        out_specs=pl.BlockSpec((n, h, w), lambda i: (0, 0, 0)),
        compiler_params=pltpu.CompilerParams(dimension_semantics=("arbitrary",)),
    )(xp)


def _conv3x3_kernel(x_ref, w_ref, m_ref, o_ref, *, width, hw, cin, cout, activation):
    # Fused-im2col 3x3 same-conv on a flattened image row.
    #   x_ref: (1, cin, hw + 2*(width+1))  bf16   flat image, zero-padded by W+1
    #   w_ref: (9, cout, cin)              bf16   taps in (dy, dx) row-major order
    #   m_ref: (3, hw)                     f32    column-wrap masks per dx
    #   o_ref: (1, cout, hw)               f32    lane-dense output
    padf = width + 1
    x = x_ref[0]                                   # (cin, hw + 2*padf)
    wts = w_ref[...]                               # (9, cout, cin)
    m = m_ref[...]                                 # (3, hw)
    acc = jnp.zeros((cout, hw), jnp.float32)
    for a in range(3):                             # dy = a - 1  (zero pad handles rows)
        for b in range(3):                         # dx = b - 1  (mask handles columns)
            start = padf + (a - 1) * width + (b - 1)
            patch = x[:, start:start + hw]         # (cin, hw)
            wt = wts[a * 3 + b]                    # (cout, cin)
            if cin == 1:
                # degenerate K=1 "matmul": keep it on the VPU in f32; mask the
                # single patch row (1 x hw) BEFORE the broadcast multiply so the
                # mask costs hw mults instead of cout*hw.
                pf = patch.astype(jnp.float32)
                if b != 1:
                    pf = m[b:b + 1, :] * pf
                contrib = wt.astype(jnp.float32) * pf
            else:
                contrib = jnp.dot(wt, patch, preferred_element_type=jnp.float32)
                if b != 1:                         # dx != 0 needs the column mask
                    contrib = m[b:b + 1, :] * contrib
            acc = acc + contrib
    if activation is not None:
        acc = activation(acc)
    o_ref[0] = acc


def conv3x3(x, w, activation=None):
    # x: (N, Cin, H, W) f32, w: (9, Cout, Cin) f32 -> (N, Cout, H, W) f32.
    # No HBM im2col: only a (W+1)-wide zero pad of the flat row (~13% extra),
    # output last dim = H*W (multiple of 128 here) -> unmasked lane-dense stores.
    # TODO(synk): for full-size configs also tile H*W with a halo'd manual DMA.
    n, cin, h, width = x.shape
    _, cout, _ = w.shape
    hw = h * width
    padf = width + 1
    xf = jnp.pad(x.reshape(n, cin, hw), ((0, 0), (0, 0), (padf, padf)))
    xf = xf.astype(jnp.bfloat16)                   # MXU operands in bf16
    wb = w.astype(jnp.bfloat16)
    col = np.arange(hw) % width
    masks = jnp.asarray(
        np.stack([(col >= 1), np.ones(hw, bool), (col <= width - 2)]).astype(np.float32))
    kern = functools.partial(_conv3x3_kernel, width=width, hw=hw,
                             cin=cin, cout=cout, activation=activation)
    out = pl.pallas_call(
        kern,
        out_shape=jax.ShapeDtypeStruct((n, cout, hw), jnp.float32),
        grid=(n,),
        in_specs=[pl.BlockSpec((1, cin, hw + 2 * padf), lambda i: (i, 0, 0)),
                  pl.BlockSpec((9, cout, cin), lambda i: (0, 0, 0)),
                  pl.BlockSpec((3, hw), lambda i: (0, 0))],
        out_specs=pl.BlockSpec((1, cout, hw), lambda i: (i, 0, 0)),
        compiler_params=pltpu.CompilerParams(dimension_semantics=("parallel",)),
    )(xf, wb, masks)
    return out.reshape(n, cout, h, width)


def _fuse_pcaf_agf_kernel(wp_ref, wa_ref, dadd_ref, dacc_ref, o_ref, *, num_im):
    # Fused torch.div(dadd, dacc) normalization + PCAF burst fusion + AGF
    # (1x1 conv + GELU) on one lane-dense S tile.
    #   wp_ref:   (num_im,)            f32 in SMEM   PCAF convex-combination weights
    #   wa_ref:   (C, C)               bf16          AGF 1x1 conv weight
    #   dadd_ref: (1, num_im, C, ST)   f32
    #   dacc_ref: (1, num_im, 1, ST)   f32
    #   o_ref:    (1, C, ST)           f32
    _, c, st = o_ref.shape
    acc = jnp.zeros((c, st), jnp.float32)
    for i in range(num_im):
        # TODO(synk): torch.div(dadd, dacc) gives inf/NaN for HR cells with no
        # splatted samples; clamp as a stand-in. Reciprocal goes to the EUP slot.
        # The PCAF weight is folded into the (1, ST) scale so the per-frame cost
        # is a single C*ST FMA on the VPU.
        scale = wp_ref[i] * pl.reciprocal(
            jnp.maximum(dacc_ref[0, i], 1e-6), approx=True)          # (1, ST)
        # TODO(synk): PCAFNet architecture not provided; learned convex combination.
        acc = acc + dadd_ref[0, i] * scale
    # TODO(synk): AGFNet architecture not provided; 1x1 conv (C->C) + GELU stand-in.
    out = jnp.dot(wa_ref[...], acc.astype(jnp.bfloat16),
                  preferred_element_type=jnp.float32)
    o_ref[0] = _gelu(out)


def _pick_s_tile(s, max_tile=1024):
    # Largest multiple of 128 that divides s and is <= max_tile (VMEM budget that
    # also fits v7x's smaller 64 MiB VMEM at real sizes); fall back to s.
    best = None
    t = 128
    while t <= min(s, max_tile):
        if s % t == 0:
            best = t
        t += 128
    return best if best is not None else s


def fuse_pcaf_agf(dadd, dacc, w_pcaf, w_agf):
    # dadd: (B, num_im, C, S), dacc: (B, num_im, 1, S) -> (B, C, S)
    b, num_im, c, s = dadd.shape
    st = _pick_s_tile(s)
    kern = functools.partial(_fuse_pcaf_agf_kernel, num_im=num_im)
    return pl.pallas_call(
        kern,
        out_shape=jax.ShapeDtypeStruct((b, c, s), jnp.float32),
        grid=(b, s // st),
        in_specs=[pl.BlockSpec(memory_space=pltpu.MemorySpace.SMEM),
                  pl.BlockSpec((c, c), lambda i, j: (0, 0)),
                  pl.BlockSpec((1, num_im, c, st), lambda i, j: (i, 0, 0, j)),
                  pl.BlockSpec((1, num_im, 1, st), lambda i, j: (i, 0, 0, j))],
        out_specs=pl.BlockSpec((1, c, st), lambda i, j: (i, 0, j)),
        compiler_params=pltpu.CompilerParams(
            dimension_semantics=("parallel", "parallel")),
    )(w_pcaf, w_agf.astype(jnp.bfloat16), dadd, dacc)


# --------------------------- plain-JAX glue ---------------------------------
def splat_with_ones(features, flow, sr):
    # TODO(synk): featureAdd/featureWeight sources not provided; bilinear
    # forward-splat onto the sr-upsampled grid. A ones channel is appended so a
    # single scatter pass yields both dadd and dacc (no per-channel flow repeat).
    # TODO(synk): the scatter-add itself stays as an XLA scatter; a Pallas
    # gather-per-output-tile kernel is future work.
    n, c, h, w = features.shape
    hs, ws = sr * h, sr * w
    vals = jnp.concatenate(
        [features, jnp.ones((n, 1, h, w), jnp.float32)], axis=1)     # (N, C+1, H, W)
    gy = (jnp.arange(h, dtype=jnp.float32)[None, :, None] + flow[:, 1]) * sr
    gx = (jnp.arange(w, dtype=jnp.float32)[None, None, :] + flow[:, 0]) * sr
    y0 = jnp.floor(gy)
    x0 = jnp.floor(gx)
    wy = gy - y0
    wx = gx - x0
    out = jnp.zeros((n, c + 1, hs, ws), jnp.float32)
    bidx = jnp.arange(n)[:, None, None, None]
    cidx = jnp.arange(c + 1)[None, :, None, None]
    for dy in (0, 1):
        for dx in (0, 1):
            yi = jnp.clip(y0.astype(jnp.int32) + dy, 0, hs - 1)[:, None, :, :]
            xi = jnp.clip(x0.astype(jnp.int32) + dx, 0, ws - 1)[:, None, :, :]
            wgt = ((wy if dy else 1.0 - wy) * (wx if dx else 1.0 - wx))[:, None, :, :]
            out = out.at[bidx, cidx, yi, xi].add(vals * wgt)
    return out[:, :c], out[:, c:]                  # dadd (N,C,HS,WS), dacc (N,1,HS,WS)


def bilinear_warp(img, flow):
    # img: (N, h, w), flow: (N, 2, h, w); sample img at (x+fx, y+fy).
    n, h, w = img.shape
    gy = jnp.arange(h, dtype=jnp.float32)[None, :, None] + flow[:, 1]
    gx = jnp.arange(w, dtype=jnp.float32)[None, None, :] + flow[:, 0]
    x0 = jnp.floor(gx)
    y0 = jnp.floor(gy)
    wx = gx - x0
    wy = gy - y0
    x0i = jnp.clip(x0.astype(jnp.int32), 0, w - 1)
    x1i = jnp.clip(x0i + 1, 0, w - 1)
    y0i = jnp.clip(y0.astype(jnp.int32), 0, h - 1)
    y1i = jnp.clip(y0i + 1, 0, h - 1)
    bidx = jnp.arange(n)[:, None, None]
    v00 = img[bidx, y0i, x0i]
    v01 = img[bidx, y0i, x1i]
    v10 = img[bidx, y1i, x0i]
    v11 = img[bidx, y1i, x1i]
    return (v00 * (1 - wy) * (1 - wx) + v01 * (1 - wy) * wx
            + v10 * wy * (1 - wx) + v11 * wy * wx)


# ------------------------- parameters (deterministic) -----------------------
def init_params(key):
    k1, k2, k3, k4, k5 = jax.random.split(key, 5)
    return {
        # TODO(synk): FNet architecture not provided; 3x3 conv (2->2) motion head.
        "w_fnet": 0.05 * jax.random.normal(k1, (9, 2, 2), jnp.float32),
        # TODO(synk): EncoderNet transformer blocks not provided; 3x3 conv (1->C)+GELU.
        "w_enc": 0.3 * jax.random.normal(k2, (9, C_ENC, 1), jnp.float32),
        # TODO(synk): PCAFNet not provided; convex combination weights over the burst.
        "w_pcaf": jax.nn.softmax(jax.random.normal(k3, (NUM_IM,), jnp.float32)),
        # TODO(synk): AGFNet not provided; 1x1 conv (C->C)+GELU.
        "w_agf": (1.0 / np.sqrt(C_ENC)) * jax.random.normal(k4, (C_ENC, C_ENC), jnp.float32),
        # TODO(synk): DecoderNet not provided; 3x3 conv (C->1).
        "w_dec": (1.0 / np.sqrt(C_ENC * 9)) * jax.random.normal(k5, (9, 1, C_ENC), jnp.float32),
    }


# ------------------------------ forward -------------------------------------
def flow_estimation(params, samplesLR):
    b, num_im, h, w = samplesLR.shape
    flat = samplesLR.reshape(-1, h, w)
    blur = gaussian_blur(flat)                                   # Pallas blur
    blur_r = blur.reshape(b, num_im, h, w)
    ref = jnp.broadcast_to(blur_r[:, :1], (b, num_im, h, w)).reshape(-1, h, w)
    concat = jnp.stack([blur, ref], axis=1)                      # (b*num_im, 2, h, w)
    flow = conv3x3(concat, params["w_fnet"])                     # Pallas fused conv
    flow = flow.at[::num_im].set(0.0)                            # flow[::num_im] = 0
    # TODO(synk): WarpedLoss('Detail', bicubicTorch) not provided; bilinear warp + L1.
    warped = bilinear_warp(blur, flow)
    warploss = jnp.mean(jnp.abs(warped - ref))
    return flow.reshape(b, num_im, 2, h, w), warploss


def deepsr_forward(params, samplesLR, shift_key):
    b, num_im, h, w = samplesLR.shape
    flow, warploss = flow_estimation(params, samplesLR)

    random_shifts = (jax.random.randint(shift_key, (b, 1, 2, 1, 1), 0, SR)
                     .astype(jnp.float32) / SR)
    flow = flow - random_shifts

    # encoder: fused-im2col 3x3 conv (1->C) + GELU
    x = samplesLR.reshape(-1, 1, h, w)
    features = conv3x3(x, params["w_enc"], activation=_gelu)     # (b*num_im, C, h, w)

    # SPMC splat: single pass produces dadd and dacc (featureAdd/featureWeight stand-in)
    flow_flat = flow.reshape(-1, 2, h, w)
    dadd, dacc = splat_with_ones(features, flow_flat, SR)

    hs, ws = SR * h, SR * w
    s = hs * ws
    dadd = dadd.reshape(b, num_im, C_ENC, s)
    dacc = dacc.reshape(b, num_im, 1, s)

    # fused normalize + PCAF + AGF (Pallas, S-tiled, lane-dense)
    fused = fuse_pcaf_agf(dadd, dacc, params["w_pcaf"], params["w_agf"])   # (b, C, s)

    # decoder: 3x3 conv (C->1)
    SRout = conv3x3(fused.reshape(b, C_ENC, hs, ws), params["w_dec"])      # (b, 1, 3h, 3w)
    return SRout, flow, warploss


if __name__ == "__main__":
    key = jax.random.PRNGKey(0)
    kparam, kdata, kshift = jax.random.split(key, 3)
    params = init_params(kparam)
    samplesLR = jax.random.uniform(kdata, (B, NUM_IM, H, W), jnp.float32)

    fwd = jax.jit(deepsr_forward)
    SRout, flow, warploss = fwd(params, samplesLR, kshift)
    jax.block_until_ready((SRout, flow, warploss))

    assert SRout.shape == (B, 1, SR * H, SR * W)
    assert flow.shape == (B, NUM_IM, 2, H, W)
    assert warploss.shape == ()
    print("KERNEL_OK")
</pallas_src>

<mosaic_0001>
module attributes {stable_mosaic.version = 11 : i64} {
  func.func private @main(%arg0: i32) attributes {dimension_semantics = [#tpu.dimension_semantics<core_parallel>], iteration_bounds = array<i64: 2>, tpu.core_type = #tpu.core_type<sc_scalar_subcore>, window_params = []} {
    return
  }
}

module attributes {stable_mosaic.version = 11 : i64} {
  func.func private @main(%arg0: i32) attributes {dimension_semantics = [#tpu.dimension_semantics<core_parallel>], iteration_bounds = array<i64: 2>, tpu.core_type = #tpu.core_type<sc_scalar_subcore>, window_params = []} {
    return
  }
}

module attributes {stable_mosaic.version = 11 : i64} {
  func.func @_gauss_blur_kernel(%arg0: i32, %arg1: memref<6x26x26xf32, #tpu.memory_space<vmem>>, %arg2: memref<6x16x16xf32, #tpu.memory_space<vmem>>) attributes {dimension_semantics = [#tpu.dimension_semantics<arbitrary>], iteration_bounds = array<i64: 1>, scalar_prefetch = 0 : i64, scratch_operands = 0 : i64, tpu.core_type = #tpu.core_type<tc>, window_params = [{pipeline_mode = #tpu.pipeline_mode<synchronous>, transform_indices = @transform_0, window_bounds = array<i64: 6, 26, 26>}, {pipeline_mode = #tpu.pipeline_mode<synchronous>, transform_indices = @transform_1, window_bounds = array<i64: 6, 16, 16>}]} {
    %c0 = arith.constant 0 : index
    %c0_0 = arith.constant 0 : index
    %c0_1 = arith.constant 0 : index
    %0 = vector.load %arg1[%c0, %c0_0, %c0_1] : memref<6x26x26xf32, #tpu.memory_space<vmem>>, vector<6x26x26xf32>
    %1 = vector.extract_strided_slice %0 {offsets = [0, 0, 0], sizes = [6, 26, 16], strides = [1, 1, 1]} : vector<6x26x26xf32> to vector<6x26x16xf32>
    %cst = arith.constant 1.4867195E-6 : f32
    %2 = vector.broadcast %cst : f32 to vector<6x26x16xf32>
    %3 = arith.mulf %2, %1 : vector<6x26x16xf32>
    %4 = vector.extract_strided_slice %0 {offsets = [0, 0, 1], sizes = [6, 26, 16], strides = [1, 1, 1]} : vector<6x26x26xf32> to vector<6x26x16xf32>
    %cst_2 = arith.constant 1.33830225E-4 : f32
    %5 = vector.broadcast %cst_2 : f32 to vector<6x26x16xf32>
    %6 = arith.mulf %5, %4 : vector<6x26x16xf32>
    %7 = arith.addf %3, %6 : vector<6x26x16xf32>
    %8 = vector.extract_strided_slice %0 {offsets = [0, 0, 2], sizes = [6, 26, 16], strides = [1, 1, 1]} : vector<6x26x26xf32> to vector<6x26x16xf32>
    %cst_3 = arith.constant 0.00443184841 : f32
    %9 = vector.broadcast %cst_3 : f32 to vector<6x26x16xf32>
    %10 = arith.mulf %9, %8 : vector<6x26x16xf32>
    %11 = arith.addf %7, %10 : vector<6x26x16xf32>
    %12 = vector.extract_strided_slice %0 {offsets = [0, 0, 3], sizes = [6, 26, 16], strides = [1, 1, 1]} : vector<6x26x26xf32> to vector<6x26x16xf32>
    %cst_4 = arith.constant 0.0539909676 : f32
    %13 = vector.broadcast %cst_4 : f32 to vector<6x26x16xf32>
    %14 = arith.mulf %13, %12 : vector<6x26x16xf32>
    %15 = arith.addf %11, %14 : vector<6x26x16xf32>
    %16 = vector.extract_strided_slice %0 {offsets = [0, 0, 4], sizes = [6, 26, 16], strides = [1, 1, 1]} : vector<6x26x26xf32> to vector<6x26x16xf32>
    %cst_5 = arith.constant 0.241970733 : f32
    %17 = vector.broadcast %cst_5 : f32 to vector<6x26x16xf32>
    %18 = arith.mulf %17, %16 : vector<6x26x16xf32>
    %19 = arith.addf %15, %18 : vector<6x26x16xf32>
    %20 = vector.extract_strided_slice %0 {offsets = [0, 0, 5], sizes = [6, 26, 16], strides = [1, 1, 1]} : vector<6x26x26xf32> to vector<6x26x16xf32>
    %cst_6 = arith.constant 0.398942292 : f32
    %21 = vector.broadcast %cst_6 : f32 to vector<6x26x16xf32>
    %22 = arith.mulf %21, %20 : vector<6x26x16xf32>
    %23 = arith.addf %19, %22 : vector<6x26x16xf32>
    %24 = vector.extract_strided_slice %0 {offsets = [0, 0, 6], sizes = [6, 26, 16], strides = [1, 1, 1]} : vector<6x26x26xf32> to vector<6x26x16xf32>
    %cst_7 = arith.constant 0.241970733 : f32
    %25 = vector.broadcast %cst_7 : f32 to vector<6x26x16xf32>
    %26 = arith.mulf %25, %24 : vector<6x26x16xf32>
    %27 = arith.addf %23, %26 : vector<6x26x16xf32>
    %28 = vector.extract_strided_slice %0 {offsets = [0, 0, 7], sizes = [6, 26, 16], strides = [1, 1, 1]} : vector<6x26x26xf32> to vector<6x26x16xf32>
    %cst_8 = arith.constant 0.0539909676 : f32
    %29 = vector.broadcast %cst_8 : f32 to vector<6x26x16xf32>
    %30 = arith.mulf %29, %28 : vector<6x26x16xf32>
    %31 = arith.addf %27, %30 : vector<6x26x16xf32>
    %32 = vector.extract_strided_slice %0 {offsets = [0, 0, 8], sizes = [6, 26, 16], strides = [1, 1, 1]} : vector<6x26x26xf32> to vector<6x26x16xf32>
    %cst_9 = arith.constant 0.00443184841 : f32
    %33 = vector.broadcast %cst_9 : f32 to vector<6x26x16xf32>
    %34 = arith.mulf %33, %32 : vector<6x26x16xf32>
    %35 = arith.addf %31, %34 : vector<6x26x16xf32>
    %36 = vector.extract_strided_slice %0 {offsets = [0, 0, 9], sizes = [6, 26, 16], strides = [1, 1, 1]} : vector<6x26x26xf32> to vector<6x26x16xf32>
    %cst_10 = arith.constant 1.33830225E-4 : f32
    %37 = vector.broadcast %cst_10 : f32 to vector<6x26x16xf32>
    %38 = arith.mulf %37, %36 : vector<6x26x16xf32>
    %39 = arith.addf %35, %38 : vector<6x26x16xf32>
    %40 = vector.extract_strided_slice %0 {offsets = [0, 0, 10], sizes = [6, 26, 16], strides = [1, 1, 1]} : vector<6x26x26xf32> to vector<6x26x16xf32>
    %cst_11 = arith.constant 1.4867195E-6 : f32
    %41 = vector.broadcast %cst_11 : f32 to vector<6x26x16xf32>
    %42 = arith.mulf %41, %40 : vector<6x26x16xf32>
    %43 = arith.addf %39, %42 : vector<6x26x16xf32>
    %44 = vector.extract_strided_slice %43 {offsets = [0, 0, 0], sizes = [6, 16, 16], strides = [1, 1, 1]} : vector<6x26x16xf32> to vector<6x16x16xf32>
    %cst_12 = arith.constant 1.4867195E-6 : f32
    %45 = vector.broadcast %cst_12 : f32 to vector<6x16x16xf32>
    %46 = arith.mulf %45, %44 : vector<6x16x16xf32>
    %47 = vector.extract_strided_slice %43 {offsets = [0, 1, 0], sizes = [6, 16, 16], strides = [1, 1, 1]} : vector<6x26x16xf32> to vector<6x16x16xf32>
    %cst_13 = arith.constant 1.33830225E-4 : f32
    %48 = vector.broadcast %cst_13 : f32 to vector<6x16x16xf32>
    %49 = arith.mulf %48, %47 : vector<6x16x16xf32>
    %50 = arith.addf %46, %49 : vector<6x16x16xf32>
    %51 = vector.extract_strided_slice %43 {offsets = [0, 2, 0], sizes = [6, 16, 16], strides = [1, 1, 1]} : vector<6x26x16xf32> to vector<6x16x16xf32>
    %cst_14 = arith.constant 0.00443184841 : f32
    %52 = vector.broadcast %cst_14 : f32 to vector<6x16x16xf32>
    %53 = arith.mulf %52, %51 : vector<6x16x16xf32>
    %54 = arith.addf %50, %53 : vector<6x16x16xf32>
    %55 = vector.extract_strided_slice %43 {offsets = [0, 3, 0], sizes = [6, 16, 16], strides = [1, 1, 1]} : vector<6x26x16xf32> to vector<6x16x16xf32>
    %cst_15 = arith.constant 0.0539909676 : f32
    %56 = vector.broadcast %cst_15 : f32 to vector<6x16x16xf32>
    %57 = arith.mulf %56, %55 : vector<6x16x16xf32>
    %58 = arith.addf %54, %57 : vector<6x16x16xf32>
    %59 = vector.extract_strided_slice %43 {offsets = [0, 4, 0], sizes = [6, 16, 16], strides = [1, 1, 1]} : vector<6x26x16xf32> to vector<6x16x16xf32>
    %cst_16 = arith.constant 0.241970733 : f32
    %60 = vector.broadcast %cst_16 : f32 to vector<6x16x16xf32>
    %61 = arith.mulf %60, %59 : vector<6x16x16xf32>
    %62 = arith.addf %58, %61 : vector<6x16x16xf32>
    %63 = vector.extract_strided_slice %43 {offsets = [0, 5, 0], sizes = [6, 16, 16], strides = [1, 1, 1]} : vector<6x26x16xf32> to vector<6x16x16xf32>
    %cst_17 = arith.constant 0.398942292 : f32
    %64 = vector.broadcast %cst_17 : f32 to vector<6x16x16xf32>
    %65 = arith.mulf %64, %63 : vector<6x16x16xf32>
    %66 = arith.addf %62, %65 : vector<6x16x16xf32>
    %67 = vector.extract_strided_slice %43 {offsets = [0, 6, 0], sizes = [6, 16, 16], strides = [1, 1, 1]} : vector<6x26x16xf32> to vector<6x16x16xf32>
    %cst_18 = arith.constant 0.241970733 : f32
    %68 = vector.broadcast %cst_18 : f32 to vector<6x16x16xf32>
    %69 = arith.mulf %68, %67 : vector<6x16x16xf32>
    %70 = arith.addf %66, %69 : vector<6x16x16xf32>
    %71 = vector.extract_strided_slice %43 {offsets = [0, 7, 0], sizes = [6, 16, 16], strides = [1, 1, 1]} : vector<6x26x16xf32> to vector<6x16x16xf32>
    %cst_19 = arith.constant 0.0539909676 : f32
    %72 = vector.broadcast %cst_19 : f32 to vector<6x16x16xf32>
    %73 = arith.mulf %72, %71 : vector<6x16x16xf32>
    %74 = arith.addf %70, %73 : vector<6x16x16xf32>
    %75 = vector.extract_strided_slice %43 {offsets = [0, 8, 0], sizes = [6, 16, 16], strides = [1, 1, 1]} : vector<6x26x16xf32> to vector<6x16x16xf32>
    %cst_20 = arith.constant 0.00443184841 : f32
    %76 = vector.broadcast %cst_20 : f32 to vector<6x16x16xf32>
    %77 = arith.mulf %76, %75 : vector<6x16x16xf32>
    %78 = arith.addf %74, %77 : vector<6x16x16xf32>
    %79 = vector.extract_strided_slice %43 {offsets = [0, 9, 0], sizes = [6, 16, 16], strides = [1, 1, 1]} : vector<6x26x16xf32> to vector<6x16x16xf32>
    %cst_21 = arith.constant 1.33830225E-4 : f32
    %80 = vector.broadcast %cst_21 : f32 to vector<6x16x16xf32>
    %81 = arith.mulf %80, %79 : vector<6x16x16xf32>
    %82 = arith.addf %78, %81 : vector<6x16x16xf32>
    %83 = vector.extract_strided_slice %43 {offsets = [0, 10, 0], sizes = [6, 16, 16], strides = [1, 1, 1]} : vector<6x26x16xf32> to vector<6x16x16xf32>
    %cst_22 = arith.constant 1.4867195E-6 : f32
    %84 = vector.broadcast %cst_22 : f32 to vector<6x16x16xf32>
    %85 = arith.mulf %84, %83 : vector<6x16x16xf32>
    %86 = arith.addf %82, %85 : vector<6x16x16xf32>
    %c0_23 = arith.constant 0 : index
    %c0_24 = arith.constant 0 : index
    %c0_25 = arith.constant 0 : index
    %87 = vector.load %arg2[%c0_23, %c0_24, %c0_25] : memref<6x16x16xf32, #tpu.memory_space<vmem>>, vector<6x16x16xf32>
    tpu.vector_store %arg2[%c0_23, %c0_24, %c0_25], %86 {strides = array<i32>} : memref<6x16x16xf32, #tpu.memory_space<vmem>>, vector<6x16x16xf32>,
    return
  }
  func.func @transform_0(%arg0: i32) -> (i32, i32, i32) {
    %c0_i32 = arith.constant 0 : i32
    %c0_i32_0 = arith.constant 0 : i32
    %c0_i32_1 = arith.constant 0 : i32
    %c0_i32_2 = arith.constant 0 : i32
    return %c0_i32, %c0_i32_0, %c0_i32_1 : i32, i32, i32
  }
  func.func @transform_1(%arg0: i32) -> (i32, i32, i32) {
    %c0_i32 = arith.constant 0 : i32
    %c0_i32_0 = arith.constant 0 : i32
    %c0_i32_1 = arith.constant 0 : i32
    %c0_i32_2 = arith.constant 0 : i32
    return %c0_i32, %c0_i32_0, %c0_i32_1 : i32, i32, i32
  }
}

module attributes {stable_mosaic.version = 11 : i64} {
  func.func @_conv3x3_kernel(%arg0: i32, %arg1: memref<1x2x290xbf16, #tpu.memory_space<vmem>>, %arg2: memref<9x2x2xbf16, #tpu.memory_space<vmem>>, %arg3: memref<3x256xf32, #tpu.memory_space<vmem>>, %arg4: memref<1x2x256xf32, #tpu.memory_space<vmem>>) attributes {dimension_semantics = [#tpu.dimension_semantics<parallel>], iteration_bounds = array<i64: 6>, scalar_prefetch = 0 : i64, scratch_operands = 0 : i64, tpu.core_type = #tpu.core_type<tc>, window_params = [{transform_indices = @transform_0, window_bounds = array<i64: 1, 2, 290>}, {pipeline_mode = #tpu.pipeline_mode<synchronous>, transform_indices = @transform_1, window_bounds = array<i64: 9, 2, 2>}, {pipeline_mode = #tpu.pipeline_mode<synchronous>, transform_indices = @transform_2, window_bounds = array<i64: 3, 256>}, {transform_indices = @transform_3, window_bounds = array<i64: 1, 2, 256>}]} {
    %c0 = arith.constant 0 : index
    %c0_0 = arith.constant 0 : index
    %c0_1 = arith.constant 0 : index
    %0 = vector.load %arg1[%c0, %c0_0, %c0_1] : memref<1x2x290xbf16, #tpu.memory_space<vmem>>, vector<1x2x290xbf16>
    %1 = vector.shape_cast %0 : vector<1x2x290xbf16> to vector<2x290xbf16>
    %c0_2 = arith.constant 0 : index
    %c0_3 = arith.constant 0 : index
    %c0_4 = arith.constant 0 : index
    %2 = vector.load %arg2[%c0_2, %c0_3, %c0_4] : memref<9x2x2xbf16, #tpu.memory_space<vmem>>, vector<9x2x2xbf16>
    %c0_5 = arith.constant 0 : index
    %c0_6 = arith.constant 0 : index
    %3 = vector.load %arg3[%c0_5, %c0_6] : memref<3x256xf32, #tpu.memory_space<vmem>>, vector<3x256xf32>
    %cst = arith.constant 0.000000e+00 : f32
    %4 = vector.broadcast %cst : f32 to vector<2x256xf32>
    %5 = vector.extract_strided_slice %1 {offsets = [0, 0], sizes = [2, 256], strides = [1, 1]} : vector<2x290xbf16> to vector<2x256xbf16>
    %6 = vector.extract_strided_slice %2 {offsets = [0, 0, 0], sizes = [1, 2, 2], strides = [1, 1, 1]} : vector<9x2x2xbf16> to vector<1x2x2xbf16>
    %7 = vector.shape_cast %6 : vector<1x2x2xbf16> to vector<2x2xbf16>
    %cst_7 = arith.constant dense<0.000000e+00> : vector<2x256xf32>
    %8 = tpu.matmul %7, %5, %cst_7 {dimension_numbers = #tpu.dot_dimension_numbers<[1], [0], [0], [1], [0, 0, 1, 1], [], []>} : vector<2x2xbf16>, vector<2x256xbf16>, vector<2x256xf32> -> vector<2x256xf32>
    %9 = vector.extract_strided_slice %3 {offsets = [0, 0], sizes = [1, 256], strides = [1, 1]} : vector<3x256xf32> to vector<1x256xf32>
    %10 = vector.broadcast %9 : vector<1x256xf32> to vector<2x256xf32>
    %11 = arith.mulf %10, %8 : vector<2x256xf32>
    %12 = arith.addf %4, %11 : vector<2x256xf32>
    %13 = vector.extract_strided_slice %1 {offsets = [0, 1], sizes = [2, 256], strides = [1, 1]} : vector<2x290xbf16> to vector<2x256xbf16>
    %14 = vector.extract_strided_slice %2 {offsets = [1, 0, 0], sizes = [1, 2, 2], strides = [1, 1, 1]} : vector<9x2x2xbf16> to vector<1x2x2xbf16>
    %15 = vector.shape_cast %14 : vector<1x2x2xbf16> to vector<2x2xbf16>
    %cst_8 = arith.constant dense<0.000000e+00> : vector<2x256xf32>
    %16 = tpu.matmul %15, %13, %cst_8 {dimension_numbers = #tpu.dot_dimension_numbers<[1], [0], [0], [1], [0, 0, 1, 1], [], []>} : vector<2x2xbf16>, vector<2x256xbf16>, vector<2x256xf32> -> vector<2x256xf32>
    %17 = arith.addf %12, %16 : vector<2x256xf32>
    %18 = vector.extract_strided_slice %1 {offsets = [0, 2], sizes = [2, 256], strides = [1, 1]} : vector<2x290xbf16> to vector<2x256xbf16>
    %19 = vector.extract_strided_slice %2 {offsets = [2, 0, 0], sizes = [1, 2, 2], strides = [1, 1, 1]} : vector<9x2x2xbf16> to vector<1x2x2xbf16>
    %20 = vector.shape_cast %19 : vector<1x2x2xbf16> to vector<2x2xbf16>
    %cst_9 = arith.constant dense<0.000000e+00> : vector<2x256xf32>
    %21 = tpu.matmul %20, %18, %cst_9 {dimension_numbers = #tpu.dot_dimension_numbers<[1], [0], [0], [1], [0, 0, 1, 1], [], []>} : vector<2x2xbf16>, vector<2x256xbf16>, vector<2x256xf32> -> vector<2x256xf32>
    %22 = vector.extract_strided_slice %3 {offsets = [2, 0], sizes = [1, 256], strides = [1, 1]} : vector<3x256xf32> to vector<1x256xf32>
    %23 = vector.broadcast %22 : vector<1x256xf32> to vector<2x256xf32>
    %24 = arith.mulf %23, %21 : vector<2x256xf32>
    %25 = arith.addf %17, %24 : vector<2x256xf32>
    %26 = vector.extract_strided_slice %1 {offsets = [0, 16], sizes = [2, 256], strides = [1, 1]} : vector<2x290xbf16> to vector<2x256xbf16>
    %27 = vector.extract_strided_slice %2 {offsets = [3, 0, 0], sizes = [1, 2, 2], strides = [1, 1, 1]} : vector<9x2x2xbf16> to vector<1x2x2xbf16>
    %28 = vector.shape_cast %27 : vector<1x2x2xbf16> to vector<2x2xbf16>
    %cst_10 = arith.constant dense<0.000000e+00> : vector<2x256xf32>
    %29 = tpu.matmul %28, %26, %cst_10 {dimension_numbers = #tpu.dot_dimension_numbers<[1], [0], [0], [1], [0, 0, 1, 1], [], []>} : vector<2x2xbf16>, vector<2x256xbf16>, vector<2x256xf32> -> vector<2x256xf32>
    %30 = vector.extract_strided_slice %3 {offsets = [0, 0], sizes = [1, 256], strides = [1, 1]} : vector<3x256xf32> to vector<1x256xf32>
    %31 = vector.broadcast %30 : vector<1x256xf32> to vector<2x256xf32>
    %32 = arith.mulf %31, %29 : vector<2x256xf32>
    %33 = arith.addf %25, %32 : vector<2x256xf32>
    %34 = vector.extract_strided_slice %1 {offsets = [0, 17], sizes = [2, 256], strides = [1, 1]} : vector<2x290xbf16> to vector<2x256xbf16>
    %35 = vector.extract_strided_slice %2 {offsets = [4, 0, 0], sizes = [1, 2, 2], strides = [1, 1, 1]} : vector<9x2x2xbf16> to vector<1x2x2xbf16>
    %36 = vector.shape_cast %35 : vector<1x2x2xbf16> to vector<2x2xbf16>
    %cst_11 = arith.constant dense<0.000000e+00> : vector<2x256xf32>
    %37 = tpu.matmul %36, %34, %cst_11 {dimension_numbers = #tpu.dot_dimension_numbers<[1], [0], [0], [1], [0, 0, 1, 1], [], []>} : vector<2x2xbf16>, vector<2x256xbf16>, vector<2x256xf32> -> vector<2x256xf32>
    %38 = arith.addf %33, %37 : vector<2x256xf32>
    %39 = vector.extract_strided_slice %1 {offsets = [0, 18], sizes = [2, 256], strides = [1, 1]} : vector<2x290xbf16> to vector<2x256xbf16>
    %40 = vector.extract_strided_slice %2 {offsets = [5, 0, 0], sizes = [1, 2, 2], strides = [1, 1, 1]} : vector<9x2x2xbf16> to vector<1x2x2xbf16>
    %41 = vector.shape_cast %40 : vector<1x2x2xbf16> to vector<2x2xbf16>
    %cst_12 = arith.constant dense<0.000000e+00> : vector<2x256xf32>
    %42 = tpu.matmul %41, %39, %cst_12 {dimension_numbers = #tpu.dot_dimension_numbers<[1], [0], [0], [1], [0, 0, 1, 1], [], []>} : vector<2x2xbf16>, vector<2x256xbf16>, vector<2x256xf32> -> vector<2x256xf32>
    %43 = vector.extract_strided_slice %3 {offsets = [2, 0], sizes = [1, 256], strides = [1, 1]} : vector<3x256xf32> to vector<1x256xf32>
    %44 = vector.broadcast %43 : vector<1x256xf32> to vector<2x256xf32>
    %45 = arith.mulf %44, %42 : vector<2x256xf32>
    %46 = arith.addf %38, %45 : vector<2x256xf32>
    %47 = vector.extract_strided_slice %1 {offsets = [0, 32], sizes = [2, 256], strides = [1, 1]} : vector<2x290xbf16> to vector<2x256xbf16>
    %48 = vector.extract_strided_slice %2 {offsets = [6, 0, 0], sizes = [1, 2, 2], strides = [1, 1, 1]} : vector<9x2x2xbf16> to vector<1x2x2xbf16>
    %49 = vector.shape_cast %48 : vector<1x2x2xbf16> to vector<2x2xbf16>
    %cst_13 = arith.constant dense<0.000000e+00> : vector<2x256xf32>
    %50 = tpu.matmul %49, %47, %cst_13 {dimension_numbers = #tpu.dot_dimension_numbers<[1], [0], [0], [1], [0, 0, 1, 1], [], []>} : vector<2x2xbf16>, vector<2x256xbf16>, vector<2x256xf32> -> vector<2x256xf32>
    %51 = vector.extract_strided_slice %3 {offsets = [0, 0], sizes = [1, 256], strides = [1, 1]} : vector<3x256xf32> to vector<1x256xf32>
    %52 = vector.broadcast %51 : vector<1x256xf32> to vector<2x256xf32>
    %53 = arith.mulf %52, %50 : vector<2x256xf32>
    %54 = arith.addf %46, %53 : vector<2x256xf32>
    %55 = vector.extract_strided_slice %1 {offsets = [0, 33], sizes = [2, 256], strides = [1, 1]} : vector<2x290xbf16> to vector<2x256xbf16>
    %56 = vector.extract_strided_slice %2 {offsets = [7, 0, 0], sizes = [1, 2, 2], strides = [1, 1, 1]} : vector<9x2x2xbf16> to vector<1x2x2xbf16>
    %57 = vector.shape_cast %56 : vector<1x2x2xbf16> to vector<2x2xbf16>
    %cst_14 = arith.constant dense<0.000000e+00> : vector<2x256xf32>
    %58 = tpu.matmul %57, %55, %cst_14 {dimension_numbers = #tpu.dot_dimension_numbers<[1], [0], [0], [1], [0, 0, 1, 1], [], []>} : vector<2x2xbf16>, vector<2x256xbf16>, vector<2x256xf32> -> vector<2x256xf32>
    %59 = arith.addf %54, %58 : vector<2x256xf32>
    %60 = vector.extract_strided_slice %1 {offsets = [0, 34], sizes = [2, 256], strides = [1, 1]} : vector<2x290xbf16> to vector<2x256xbf16>
    %61 = vector.extract_strided_slice %2 {offsets = [8, 0, 0], sizes = [1, 2, 2], strides = [1, 1, 1]} : vector<9x2x2xbf16> to vector<1x2x2xbf16>
    %62 = vector.shape_cast %61 : vector<1x2x2xbf16> to vector<2x2xbf16>
    %cst_15 = arith.constant dense<0.000000e+00> : vector<2x256xf32>
    %63 = tpu.matmul %62, %60, %cst_15 {dimension_numbers = #tpu.dot_dimension_numbers<[1], [0], [0], [1], [0, 0, 1, 1], [], []>} : vector<2x2xbf16>, vector<2x256xbf16>, vector<2x256xf32> -> vector<2x256xf32>
    %64 = vector.extract_strided_slice %3 {offsets = [2, 0], sizes = [1, 256], strides = [1, 1]} : vector<3x256xf32> to vector<1x256xf32>
    %65 = vector.broadcast %64 : vector<1x256xf32> to vector<2x256xf32>
    %66 = arith.mulf %65, %63 : vector<2x256xf32>
    %67 = arith.addf %59, %66 : vector<2x256xf32>
    %c0_16 = arith.constant 0 : index
    %c0_17 = arith.constant 0 : index
    %c0_18 = arith.constant 0 : index
    %68 = vector.load %arg4[%c0_16, %c0_17, %c0_18] : memref<1x2x256xf32, #tpu.memory_space<vmem>>, vector<1x2x256xf32>
    %69 = vector.shape_cast %68 : vector<1x2x256xf32> to vector<2x256xf32>
    %70 = vector.shape_cast %67 : vector<2x256xf32> to vector<1x2x256xf32>
    tpu.vector_store %arg4[%c0_16, %c0_17, %c0_18], %70 {strides = array<i32>} : memref<1x2x256xf32, #tpu.memory_space<vmem>>, vector<1x2x256xf32>,
    return
  }
  func.func @transform_0(%arg0: i32) -> (i32, i32, i32) {
    %c0_i32 = arith.constant 0 : i32
    %c0_i32_0 = arith.constant 0 : i32
    %c0_i32_1 = arith.constant 0 : i32
    return %arg0, %c0_i32, %c0_i32_0 : i32, i32, i32
  }
  func.func @transform_1(%arg0: i32) -> (i32, i32, i32) {
    %c0_i32 = arith.constant 0 : i32
    %c0_i32_0 = arith.constant 0 : i32
    %c0_i32_1 = arith.constant 0 : i32
    %c0_i32_2 = arith.constant 0 : i32
    return %c0_i32, %c0_i32_0, %c0_i32_1 : i32, i32, i32
  }
  func.func @transform_2(%arg0: i32) -> (i32, i32) {
    %c0_i32 = arith.constant 0 : i32
    %c0_i32_0 = arith.constant 0 : i32
    %c0_i32_1 = arith.constant 0 : i32
    return %c0_i32, %c0_i32_0 : i32, i32
  }
  func.func @transform_3(%arg0: i32) -> (i32, i32, i32) {
    %c0_i32 = arith.constant 0 : i32
    %c0_i32_0 = arith.constant 0 : i32
    %c0_i32_1 = arith.constant 0 : i32
    return %arg0, %c0_i32, %c0_i32_0 : i32, i32, i32
  }
}

module attributes {stable_mosaic.version = 11 : i64} {
  func.func @_conv3x3_kernel(%arg0: i32, %arg1: memref<1x1x290xbf16, #tpu.memory_space<vmem>>, %arg2: memref<9x16x1xbf16, #tpu.memory_space<vmem>>, %arg3: memref<3x256xf32, #tpu.memory_space<vmem>>, %arg4: memref<1x16x256xf32, #tpu.memory_space<vmem>>) attributes {dimension_semantics = [#tpu.dimension_semantics<parallel>], iteration_bounds = array<i64: 6>, scalar_prefetch = 0 : i64, scratch_operands = 0 : i64, tpu.core_type = #tpu.core_type<tc>, window_params = [{transform_indices = @transform_0, window_bounds = array<i64: 1, 1, 290>}, {pipeline_mode = #tpu.pipeline_mode<synchronous>, transform_indices = @transform_1, window_bounds = array<i64: 9, 16, 1>}, {pipeline_mode = #tpu.pipeline_mode<synchronous>, transform_indices = @transform_2, window_bounds = array<i64: 3, 256>}, {transform_indices = @transform_3, window_bounds = array<i64: 1, 16, 256>}]} {
    %c0 = arith.constant 0 : index
    %c0_0 = arith.constant 0 : index
    %c0_1 = arith.constant 0 : index
    %0 = vector.load %arg1[%c0, %c0_0, %c0_1] : memref<1x1x290xbf16, #tpu.memory_space<vmem>>, vector<1x1x290xbf16>
    %1 = vector.shape_cast %0 : vector<1x1x290xbf16> to vector<1x290xbf16>
    %c0_2 = arith.constant 0 : index
    %c0_3 = arith.constant 0 : index
    %c0_4 = arith.constant 0 : index
    %2 = vector.load %arg2[%c0_2, %c0_3, %c0_4] : memref<9x16x1xbf16, #tpu.memory_space<vmem>>, vector<9x16x1xbf16>
    %c0_5 = arith.constant 0 : index
    %c0_6 = arith.constant 0 : index
    %3 = vector.load %arg3[%c0_5, %c0_6] : memref<3x256xf32, #tpu.memory_space<vmem>>, vector<3x256xf32>
    %cst = arith.constant 0.000000e+00 : f32
    %4 = vector.broadcast %cst : f32 to vector<16x256xf32>
    %5 = vector.extract_strided_slice %1 {offsets = [0, 0], sizes = [1, 256], strides = [1, 1]} : vector<1x290xbf16> to vector<1x256xbf16>
    %6 = vector.extract_strided_slice %2 {offsets = [0, 0, 0], sizes = [1, 16, 1], strides = [1, 1, 1]} : vector<9x16x1xbf16> to vector<1x16x1xbf16>
    %7 = vector.shape_cast %6 : vector<1x16x1xbf16> to vector<16x1xbf16>
    %8 = arith.extf %5 : vector<1x256xbf16> to vector<1x256xf32>
    %9 = vector.extract_strided_slice %3 {offsets = [0, 0], sizes = [1, 256], strides = [1, 1]} : vector<3x256xf32> to vector<1x256xf32>
    %10 = arith.mulf %9, %8 : vector<1x256xf32>
    %11 = arith.extf %7 : vector<16x1xbf16> to vector<16x1xf32>
    %12 = vector.broadcast %11 : vector<16x1xf32> to vector<16x256xf32>
    %13 = vector.broadcast %10 : vector<1x256xf32> to vector<16x256xf32>
    %14 = arith.mulf %12, %13 : vector<16x256xf32>
    %15 = arith.addf %4, %14 : vector<16x256xf32>
    %16 = vector.extract_strided_slice %1 {offsets = [0, 1], sizes = [1, 256], strides = [1, 1]} : vector<1x290xbf16> to vector<1x256xbf16>
    %17 = vector.extract_strided_slice %2 {offsets = [1, 0, 0], sizes = [1, 16, 1], strides = [1, 1, 1]} : vector<9x16x1xbf16> to vector<1x16x1xbf16>
    %18 = vector.shape_cast %17 : vector<1x16x1xbf16> to vector<16x1xbf16>
    %19 = arith.extf %16 : vector<1x256xbf16> to vector<1x256xf32>
    %20 = arith.extf %18 : vector<16x1xbf16> to vector<16x1xf32>
    %21 = vector.broadcast %20 : vector<16x1xf32> to vector<16x256xf32>
    %22 = vector.broadcast %19 : vector<1x256xf32> to vector<16x256xf32>
    %23 = arith.mulf %21, %22 : vector<16x256xf32>
    %24 = arith.addf %15, %23 : vector<16x256xf32>
    %25 = vector.extract_strided_slice %1 {offsets = [0, 2], sizes = [1, 256], strides = [1, 1]} : vector<1x290xbf16> to vector<1x256xbf16>
    %26 = vector.extract_strided_slice %2 {offsets = [2, 0, 0], sizes = [1, 16, 1], strides = [1, 1, 1]} : vector<9x16x1xbf16> to vector<1x16x1xbf16>
    %27 = vector.shape_cast %26 : vector<1x16x1xbf16> to vector<16x1xbf16>
    %28 = arith.extf %25 : vector<1x256xbf16> to vector<1x256xf32>
    %29 = vector.extract_strided_slice %3 {offsets = [2, 0], sizes = [1, 256], strides = [1, 1]} : vector<3x256xf32> to vector<1x256xf32>
    %30 = arith.mulf %29, %28 : vector<1x256xf32>
    %31 = arith.extf %27 : vector<16x1xbf16> to vector<16x1xf32>
    %32 = vector.broadcast %31 : vector<16x1xf32> to vector<16x256xf32>
    %33 = vector.broadcast %30 : vector<1x256xf32> to vector<16x256xf32>
    %34 = arith.mulf %32, %33 : vector<16x256xf32>
    %35 = arith.addf %24, %34 : vector<16x256xf32>
    %36 = vector.extract_strided_slice %1 {offsets = [0, 16], sizes = [1, 256], strides = [1, 1]} : vector<1x290xbf16> to vector<1x256xbf16>
    %37 = vector.extract_strided_slice %2 {offsets = [3, 0, 0], sizes = [1, 16, 1], strides = [1, 1, 1]} : vector<9x16x1xbf16> to vector<1x16x1xbf16>
    %38 = vector.shape_cast %37 : vector<1x16x1xbf16> to vector<16x1xbf16>
    %39 = arith.extf %36 : vector<1x256xbf16> to vector<1x256xf32>
    %40 = vector.extract_strided_slice %3 {offsets = [0, 0], sizes = [1, 256], strides = [1, 1]} : vector<3x256xf32> to vector<1x256xf32>
    %41 = arith.mulf %40, %39 : vector<1x256xf32>
    %42 = arith.extf %38 : vector<16x1xbf16> to vector<16x1xf32>
    %43 = vector.broadcast %42 : vector<16x1xf32> to vector<16x256xf32>
    %44 = vector.broadcast %41 : vector<1x256xf32> to vector<16x256xf32>
    %45 = arith.mulf %43, %44 : vector<16x256xf32>
    %46 = arith.addf %35, %45 : vector<16x256xf32>
    %47 = vector.extract_strided_slice %1 {offsets = [0, 17], sizes = [1, 256], strides = [1, 1]} : vector<1x290xbf16> to vector<1x256xbf16>
    %48 = vector.extract_strided_slice %2 {offsets = [4, 0, 0], sizes = [1, 16, 1], strides = [1, 1, 1]} : vector<9x16x1xbf16> to vector<1x16x1xbf16>
    %49 = vector.shape_cast %48 : vector<1x16x1xbf16> to vector<16x1xbf16>
    %50 = arith.extf %47 : vector<1x256xbf16> to vector<1x256xf32>
    %51 = arith.extf %49 : vector<16x1xbf16> to vector<16x1xf32>
    %52 = vector.broadcast %51 : vector<16x1xf32> to vector<16x256xf32>
    %53 = vector.broadcast %50 : vector<1x256xf32> to vector<16x256xf32>
    %54 = arith.mulf %52, %53 : vector<16x256xf32>
    %55 = arith.addf %46, %54 : vector<16x256xf32>
    %56 = vector.extract_strided_slice %1 {offsets = [0, 18], sizes = [1, 256], strides = [1, 1]} : vector<1x290xbf16> to vector<1x256xbf16>
    %57 = vector.extract_strided_slice %2 {offsets = [5, 0, 0], sizes = [1, 16, 1], strides = [1, 1, 1]} : vector<9x16x1xbf16> to vector<1x16x1xbf16>
    %58 = vector.shape_cast %57 : vector<1x16x1xbf16> to vector<16x1xbf16>
    %59 = arith.extf %56 : vector<1x256xbf16> to vector<1x256xf32>
    %60 = vector.extract_strided_slice %3 {offsets = [2, 0], sizes = [1, 256], strides = [1, 1]} : vector<3x256xf32> to vector<1x256xf32>
    %61 = arith.mulf %60, %59 : vector<1x256xf32>
    %62 = arith.extf %58 : vector<16x1xbf16> to vector<16x1xf32>
    %63 = vector.broadcast %62 : vector<16x1xf32> to vector<16x256xf32>
    %64 = vector.broadcast %61 : vector<1x256xf32> to vector<16x256xf32>
    %65 = arith.mulf %63, %64 : vector<16x256xf32>
    %66 = arith.addf %55, %65 : vector<16x256xf32>
    %67 = vector.extract_strided_slice %1 {offsets = [0, 32], sizes = [1, 256], strides = [1, 1]} : vector<1x290xbf16> to vector<1x256xbf16>
    %68 = vector.extract_strided_slice %2 {offsets = [6, 0, 0], sizes = [1, 16, 1], strides = [1, 1, 1]} : vector<9x16x1xbf16> to vector<1x16x1xbf16>
    %69 = vector.shape_cast %68 : vector<1x16x1xbf16> to vector<16x1xbf16>
    %70 = arith.extf %67 : vector<1x256xbf16> to vector<1x256xf32>
    %71 = vector.extract_strided_slice %3 {offsets = [0, 0], sizes = [1, 256], strides = [1, 1]} : vector<3x256xf32> to vector<1x256xf32>
    %72 = arith.mulf %71, %70 : vector<1x256xf32>
    %73 = arith.extf %69 : vector<16x1xbf16> to vector<16x1xf32>
    %74 = vector.broadcast %73 : vector<16x1xf32> to vector<16x256xf32>
    %75 = vector.broadcast %72 : vector<1x256xf32> to vector<16x256xf32>
    %76 = arith.mulf %74, %75 : vector<16x256xf32>
    %77 = arith.addf %66, %76 : vector<16x256xf32>
    %78 = vector.extract_strided_slice %1 {offsets = [0, 33], sizes = [1, 256], strides = [1, 1]} : vector<1x290xbf16> to vector<1x256xbf16>
    %79 = vector.extract_strided_slice %2 {offsets = [7, 0, 0], sizes = [1, 16, 1], strides = [1, 1, 1]} : vector<9x16x1xbf16> to vector<1x16x1xbf16>
    %80 = vector.shape_cast %79 : vector<1x16x1xbf16> to vector<16x1xbf16>
    %81 = arith.extf %78 : vector<1x256xbf16> to vector<1x256xf32>
    %82 = arith.extf %80 : vector<16x1xbf16> to vector<16x1xf32>
    %83 = vector.broadcast %82 : vector<16x1xf32> to vector<16x256xf32>
    %84 = vector.broadcast %81 : vector<1x256xf32> to vector<16x256xf32>
    %85 = arith.mulf %83, %84 : vector<16x256xf32>
    %86 = arith.addf %77, %85 : vector<16x256xf32>
    %87 = vector.extract_strided_slice %1 {offsets = [0, 34], sizes = [1, 256], strides = [1, 1]} : vector<1x290xbf16> to vector<1x256xbf16>
    %88 = vector.extract_strided_slice %2 {offsets = [8, 0, 0], sizes = [1, 16, 1], strides = [1, 1, 1]} : vector<9x16x1xbf16> to vector<1x16x1xbf16>
    %89 = vector.shape_cast %88 : vector<1x16x1xbf16> to vector<16x1xbf16>
    %90 = arith.extf %87 : vector<1x256xbf16> to vector<1x256xf32>
    %91 = vector.extract_strided_slice %3 {offsets = [2, 0], sizes = [1, 256], strides = [1, 1]} : vector<3x256xf32> to vector<1x256xf32>
    %92 = arith.mulf %91, %90 : vector<1x256xf32>
    %93 = arith.extf %89 : vector<16x1xbf16> to vector<16x1xf32>
    %94 = vector.broadcast %93 : vector<16x1xf32> to vector<16x256xf32>
    %95 = vector.broadcast %92 : vector<1x256xf32> to vector<16x256xf32>
    %96 = arith.mulf %94, %95 : vector<16x256xf32>
    %97 = arith.addf %86, %96 : vector<16x256xf32>
    %98 = arith.mulf %97, %97 : vector<16x256xf32>
    %99 = arith.mulf %97, %98 : vector<16x256xf32>
    %cst_7 = arith.constant 4.471500e-02 : f32
    %100 = vector.broadcast %cst_7 : f32 to vector<16x256xf32>
    %101 = arith.mulf %100, %99 : vector<16x256xf32>
    %102 = arith.addf %97, %101 : vector<16x256xf32>
    %cst_8 = arith.constant 0.797884583 : f32
    %103 = vector.broadcast %cst_8 : f32 to vector<16x256xf32>
    %104 = arith.mulf %103, %102 : vector<16x256xf32>
    %105 = math.tanh %104 : vector<16x256xf32>
    %cst_9 = arith.constant 1.000000e+00 : f32
    %106 = vector.broadcast %cst_9 : f32 to vector<16x256xf32>
    %107 = arith.addf %106, %105 : vector<16x256xf32>
    %cst_10 = arith.constant 5.000000e-01 : f32
    %108 = vector.broadcast %cst_10 : f32 to vector<16x256xf32>
    %109 = arith.mulf %108, %107 : vector<16x256xf32>
    %110 = arith.mulf %97, %109 : vector<16x256xf32>
    %c0_11 = arith.constant 0 : index
    %c0_12 = arith.constant 0 : index
    %c0_13 = arith.constant 0 : index
    %111 = vector.load %arg4[%c0_11, %c0_12, %c0_13] : memref<1x16x256xf32, #tpu.memory_space<vmem>>, vector<1x16x256xf32>
    %112 = vector.shape_cast %111 : vector<1x16x256xf32> to vector<16x256xf32>
    %113 = vector.shape_cast %110 : vector<16x256xf32> to vector<1x16x256xf32>
    tpu.vector_store %arg4[%c0_11, %c0_12, %c0_13], %113 {strides = array<i32>} : memref<1x16x256xf32, #tpu.memory_space<vmem>>, vector<1x16x256xf32>,
    return
  }
  func.func @transform_0(%arg0: i32) -> (i32, i32, i32) {
    %c0_i32 = arith.constant 0 : i32
    %c0_i32_0 = arith.constant 0 : i32
    %c0_i32_1 = arith.constant 0 : i32
    return %arg0, %c0_i32, %c0_i32_0 : i32, i32, i32
  }
  func.func @transform_1(%arg0: i32) -> (i32, i32, i32) {
    %c0_i32 = arith.constant 0 : i32
    %c0_i32_0 = arith.constant 0 : i32
    %c0_i32_1 = arith.constant 0 : i32
    %c0_i32_2 = arith.constant 0 : i32
    return %c0_i32, %c0_i32_0, %c0_i32_1 : i32, i32, i32
  }
  func.func @transform_2(%arg0: i32) -> (i32, i32) {
    %c0_i32 = arith.constant 0 : i32
    %c0_i32_0 = arith.constant 0 : i32
    %c0_i32_1 = arith.constant 0 : i32
    return %c0_i32, %c0_i32_0 : i32, i32
  }
  func.func @transform_3(%arg0: i32) -> (i32, i32, i32) {
    %c0_i32 = arith.constant 0 : i32
    %c0_i32_0 = arith.constant 0 : i32
    %c0_i32_1 = arith.constant 0 : i32
    return %arg0, %c0_i32, %c0_i32_0 : i32, i32, i32
  }
}

module attributes {stable_mosaic.version = 11 : i64} {
  func.func @_fuse_pcaf_agf_kernel(%arg0: i32, %arg1: i32, %arg2: memref<3xf32, #tpu.memory_space<smem>>, %arg3: memref<16x16xbf16, #tpu.memory_space<vmem>>, %arg4: memref<1x3x16x768xf32, #tpu.memory_space<vmem>>, %arg5: memref<1x3x1x768xf32, #tpu.memory_space<vmem>>, %arg6: memref<1x16x768xf32, #tpu.memory_space<vmem>>) attributes {dimension_semantics = [#tpu.dimension_semantics<parallel>, #tpu.dimension_semantics<parallel>], iteration_bounds = array<i64: 2, 3>, scalar_prefetch = 0 : i64, scratch_operands = 0 : i64, tpu.core_type = #tpu.core_type<tc>, window_params = [{transform_indices = @transform_0, window_bounds = array<i64: 3>}, {pipeline_mode = #tpu.pipeline_mode<synchronous>, transform_indices = @transform_1, window_bounds = array<i64: 16, 16>}, {transform_indices = @transform_2, window_bounds = array<i64: 1, 3, 16, 768>}, {transform_indices = @transform_3, window_bounds = array<i64: 1, 3, 1, 768>}, {transform_indices = @transform_4, window_bounds = array<i64: 1, 16, 768>}]} {
    %cst = arith.constant 0.000000e+00 : f32
    %0 = vector.broadcast %cst : f32 to vector<16x768xf32>
    %c0 = arith.constant 0 : index
    %1 = memref.load %arg2[%c0] : memref<3xf32, #tpu.memory_space<smem>>
    %c0_0 = arith.constant 0 : index
    %c0_1 = arith.constant 0 : index
    %c0_2 = arith.constant 0 : index
    %c0_3 = arith.constant 0 : index
    %2 = vector.load %arg5[%c0_0, %c0_1, %c0_2, %c0_3] : memref<1x3x1x768xf32, #tpu.memory_space<vmem>>, vector<1x1x1x768xf32>
    %3 = vector.shape_cast %2 : vector<1x1x1x768xf32> to vector<1x768xf32>
    %cst_4 = arith.constant 9.99999997E-7 : f32
    %4 = vector.broadcast %cst_4 : f32 to vector<1x768xf32>
    %5 = arith.maximumf %3, %4 : vector<1x768xf32>
    %6 = tpu.reciprocal %5 {approx = true} : vector<1x768xf32> -> vector<1x768xf32>
    %7 = vector.broadcast %1 : f32 to vector<1x768xf32>
    %8 = arith.mulf %7, %6 : vector<1x768xf32>
    %c0_5 = arith.constant 0 : index
    %c0_6 = arith.constant 0 : index
    %c0_7 = arith.constant 0 : index
    %c0_8 = arith.constant 0 : index
    %9 = vector.load %arg4[%c0_5, %c0_6, %c0_7, %c0_8] : memref<1x3x16x768xf32, #tpu.memory_space<vmem>>, vector<1x1x16x768xf32>
    %10 = vector.shape_cast %9 : vector<1x1x16x768xf32> to vector<16x768xf32>
    %11 = vector.broadcast %8 : vector<1x768xf32> to vector<16x768xf32>
    %12 = arith.mulf %10, %11 : vector<16x768xf32>
    %13 = arith.addf %0, %12 : vector<16x768xf32>
    %c1 = arith.constant 1 : index
    %14 = memref.load %arg2[%c1] : memref<3xf32, #tpu.memory_space<smem>>
    %c0_9 = arith.constant 0 : index
    %c1_10 = arith.constant 1 : index
    %c0_11 = arith.constant 0 : index
    %c0_12 = arith.constant 0 : index
    %15 = vector.load %arg5[%c0_9, %c1_10, %c0_11, %c0_12] : memref<1x3x1x768xf32, #tpu.memory_space<vmem>>, vector<1x1x1x768xf32>
    %16 = vector.shape_cast %15 : vector<1x1x1x768xf32> to vector<1x768xf32>
    %cst_13 = arith.constant 9.99999997E-7 : f32
    %17 = vector.broadcast %cst_13 : f32 to vector<1x768xf32>
    %18 = arith.maximumf %16, %17 : vector<1x768xf32>
    %19 = tpu.reciprocal %18 {approx = true} : vector<1x768xf32> -> vector<1x768xf32>
    %20 = vector.broadcast %14 : f32 to vector<1x768xf32>
    %21 = arith.mulf %20, %19 : vector<1x768xf32>
    %c0_14 = arith.constant 0 : index
    %c1_15 = arith.constant 1 : index
    %c0_16 = arith.constant 0 : index
    %c0_17 = arith.constant 0 : index
    %22 = vector.load %arg4[%c0_14, %c1_15, %c0_16, %c0_17] : memref<1x3x16x768xf32, #tpu.memory_space<vmem>>, vector<1x1x16x768xf32>
    %23 = vector.shape_cast %22 : vector<1x1x16x768xf32> to vector<16x768xf32>
    %24 = vector.broadcast %21 : vector<1x768xf32> to vector<16x768xf32>
    %25 = arith.mulf %23, %24 : vector<16x768xf32>
    %26 = arith.addf %13, %25 : vector<16x768xf32>
    %c2 = arith.constant 2 : index
    %27 = memref.load %arg2[%c2] : memref<3xf32, #tpu.memory_space<smem>>
    %c0_18 = arith.constant 0 : index
    %c2_19 = arith.constant 2 : index
    %c0_20 = arith.constant 0 : index
    %c0_21 = arith.constant 0 : index
    %28 = vector.load %arg5[%c0_18, %c2_19, %c0_20, %c0_21] : memref<1x3x1x768xf32, #tpu.memory_space<vmem>>, vector<1x1x1x768xf32>
    %29 = vector.shape_cast %28 : vector<1x1x1x768xf32> to vector<1x768xf32>
    %cst_22 = arith.constant 9.99999997E-7 : f32
    %30 = vector.broadcast %cst_22 : f32 to vector<1x768xf32>
    %31 = arith.maximumf %29, %30 : vector<1x768xf32>
    %32 = tpu.reciprocal %31 {approx = true} : vector<1x768xf32> -> vector<1x768xf32>
    %33 = vector.broadcast %27 : f32 to vector<1x768xf32>
    %34 = arith.mulf %33, %32 : vector<1x768xf32>
    %c0_23 = arith.constant 0 : index
    %c2_24 = arith.constant 2 : index
    %c0_25 = arith.constant 0 : index
    %c0_26 = arith.constant 0 : index
    %35 = vector.load %arg4[%c0_23, %c2_24, %c0_25, %c0_26] : memref<1x3x16x768xf32, #tpu.memory_space<vmem>>, vector<1x1x16x768xf32>
    %36 = vector.shape_cast %35 : vector<1x1x16x768xf32> to vector<16x768xf32>
    %37 = vector.broadcast %34 : vector<1x768xf32> to vector<16x768xf32>
    %38 = arith.mulf %36, %37 : vector<16x768xf32>
    %39 = arith.addf %26, %38 : vector<16x768xf32>
    %c0_27 = arith.constant 0 : index
    %c0_28 = arith.constant 0 : index
    %40 = vector.load %arg3[%c0_27, %c0_28] : memref<16x16xbf16, #tpu.memory_space<vmem>>, vector<16x16xbf16>
    %41 = arith.truncf %39 : vector<16x768xf32> to vector<16x768xbf16>
    %cst_29 = arith.constant dense<0.000000e+00> : vector<16x768xf32>
    %42 = tpu.matmul %40, %41, %cst_29 {dimension_numbers = #tpu.dot_dimension_numbers<[1], [0], [0], [1], [0, 0, 1, 1], [], []>} : vector<16x16xbf16>, vector<16x768xbf16>, vector<16x768xf32> -> vector<16x768xf32>
    %43 = arith.mulf %42, %42 : vector<16x768xf32>
    %44 = arith.mulf %42, %43 : vector<16x768xf32>
    %cst_30 = arith.constant 4.471500e-02 : f32
    %45 = vector.broadcast %cst_30 : f32 to vector<16x768xf32>
    %46 = arith.mulf %45, %44 : vector<16x768xf32>
    %47 = arith.addf %42, %46 : vector<16x768xf32>
    %cst_31 = arith.constant 0.797884583 : f32
    %48 = vector.broadcast %cst_31 : f32 to vector<16x768xf32>
    %49 = arith.mulf %48, %47 : vector<16x768xf32>
    %50 = math.tanh %49 : vector<16x768xf32>
    %cst_32 = arith.constant 1.000000e+00 : f32
    %51 = vector.broadcast %cst_32 : f32 to vector<16x768xf32>
    %52 = arith.addf %51, %50 : vector<16x768xf32>
    %cst_33 = arith.constant 5.000000e-01 : f32
    %53 = vector.broadcast %cst_33 : f32 to vector<16x768xf32>
    %54 = arith.mulf %53, %52 : vector<16x768xf32>
    %55 = arith.mulf %42, %54 : vector<16x768xf32>
    %c0_34 = arith.constant 0 : index
    %c0_35 = arith.constant 0 : index
    %c0_36 = arith.constant 0 : index
    %56 = vector.load %arg6[%c0_34, %c0_35, %c0_36] : memref<1x16x768xf32, #tpu.memory_space<vmem>>, vector<1x16x768xf32>
    %57 = vector.shape_cast %56 : vector<1x16x768xf32> to vector<16x768xf32>
    %58 = vector.shape_cast %55 : vector<16x768xf32> to vector<1x16x768xf32>
    tpu.vector_store %arg6[%c0_34, %c0_35, %c0_36], %58 {strides = array<i32>} : memref<1x16x768xf32, #tpu.memory_space<vmem>>, vector<1x16x768xf32>,
    return
  }
  func.func @transform_0(%arg0: i32, %arg1: i32) -> i32 {
    %c0_i32 = arith.constant 0 : i32
    %c0_i32_0 = arith.constant 0 : i32
    return %c0_i32 : i32
  }
  func.func @transform_1(%arg0: i32, %arg1: i32) -> (i32, i32) {
    %c0_i32 = arith.constant 0 : i32
    %c0_i32_0 = arith.constant 0 : i32
    %c0_i32_1 = arith.constant 0 : i32
    return %c0_i32, %c0_i32_0 : i32, i32
  }
  func.func @transform_2(%arg0: i32, %arg1: i32) -> (i32, i32, i32, i32) {
    %c0_i32 = arith.constant 0 : i32
    %c0_i32_0 = arith.constant 0 : i32
    %c0_i32_1 = arith.constant 0 : i32
    return %arg0, %c0_i32, %c0_i32_0, %arg1 : i32, i32, i32, i32
  }
  func.func @transform_3(%arg0: i32, %arg1: i32) -> (i32, i32, i32, i32) {
    %c0_i32 = arith.constant 0 : i32
    %c0_i32_0 = arith.constant 0 : i32
    %c0_i32_1 = arith.constant 0 : i32
    return %arg0, %c0_i32, %c0_i32_0, %arg1 : i32, i32, i32, i32
  }
  func.func @transform_4(%arg0: i32, %arg1: i32) -> (i32, i32, i32) {
    %c0_i32 = arith.constant 0 : i32
    %c0_i32_0 = arith.constant 0 : i32
    return %arg0, %c0_i32, %arg1 : i32, i32, i32
  }
}

module attributes {stable_mosaic.version = 11 : i64} {
  func.func @_conv3x3_kernel(%arg0: i32, %arg1: memref<1x16x2402xbf16, #tpu.memory_space<vmem>>, %arg2: memref<9x1x16xbf16, #tpu.memory_space<vmem>>, %arg3: memref<3x2304xf32, #tpu.memory_space<vmem>>, %arg4: memref<1x1x2304xf32, #tpu.memory_space<vmem>>) attributes {dimension_semantics = [#tpu.dimension_semantics<parallel>], iteration_bounds = array<i64: 2>, scalar_prefetch = 0 : i64, scratch_operands = 0 : i64, tpu.core_type = #tpu.core_type<tc>, window_params = [{transform_indices = @transform_0, window_bounds = array<i64: 1, 16, 2402>}, {pipeline_mode = #tpu.pipeline_mode<synchronous>, transform_indices = @transform_1, window_bounds = array<i64: 9, 1, 16>}, {pipeline_mode = #tpu.pipeline_mode<synchronous>, transform_indices = @transform_2, window_bounds = array<i64: 3, 2304>}, {transform_indices = @transform_3, window_bounds = array<i64: 1, 1, 2304>}]} {
    %c0 = arith.constant 0 : index
    %c0_0 = arith.constant 0 : index
    %c0_1 = arith.constant 0 : index
    %0 = vector.load %arg1[%c0, %c0_0, %c0_1] : memref<1x16x2402xbf16, #tpu.memory_space<vmem>>, vector<1x16x2402xbf16>
    %1 = vector.shape_cast %0 : vector<1x16x2402xbf16> to vector<16x2402xbf16>
    %c0_2 = arith.constant 0 : index
    %c0_3 = arith.constant 0 : index
    %c0_4 = arith.constant 0 : index
    %2 = vector.load %arg2[%c0_2, %c0_3, %c0_4] : memref<9x1x16xbf16, #tpu.memory_space<vmem>>, vector<9x1x16xbf16>
    %c0_5 = arith.constant 0 : index
    %c0_6 = arith.constant 0 : index
    %3 = vector.load %arg3[%c0_5, %c0_6] : memref<3x2304xf32, #tpu.memory_space<vmem>>, vector<3x2304xf32>
    %cst = arith.constant 0.000000e+00 : f32
    %4 = vector.broadcast %cst : f32 to vector<1x2304xf32>
    %5 = vector.extract_strided_slice %1 {offsets = [0, 0], sizes = [16, 2304], strides = [1, 1]} : vector<16x2402xbf16> to vector<16x2304xbf16>
    %6 = vector.extract_strided_slice %2 {offsets = [0, 0, 0], sizes = [1, 1, 16], strides = [1, 1, 1]} : vector<9x1x16xbf16> to vector<1x1x16xbf16>
    %7 = vector.shape_cast %6 : vector<1x1x16xbf16> to vector<1x16xbf16>
    %cst_7 = arith.constant dense<0.000000e+00> : vector<1x2304xf32>
    %8 = tpu.matmul %7, %5, %cst_7 {dimension_numbers = #tpu.dot_dimension_numbers<[1], [0], [0], [1], [0, 0, 1, 1], [], []>} : vector<1x16xbf16>, vector<16x2304xbf16>, vector<1x2304xf32> -> vector<1x2304xf32>
    %9 = vector.extract_strided_slice %3 {offsets = [0, 0], sizes = [1, 2304], strides = [1, 1]} : vector<3x2304xf32> to vector<1x2304xf32>
    %10 = arith.mulf %9, %8 : vector<1x2304xf32>
    %11 = arith.addf %4, %10 : vector<1x2304xf32>
    %12 = vector.extract_strided_slice %1 {offsets = [0, 1], sizes = [16, 2304], strides = [1, 1]} : vector<16x2402xbf16> to vector<16x2304xbf16>
    %13 = vector.extract_strided_slice %2 {offsets = [1, 0, 0], sizes = [1, 1, 16], strides = [1, 1, 1]} : vector<9x1x16xbf16> to vector<1x1x16xbf16>
    %14 = vector.shape_cast %13 : vector<1x1x16xbf16> to vector<1x16xbf16>
    %cst_8 = arith.constant dense<0.000000e+00> : vector<1x2304xf32>
    %15 = tpu.matmul %14, %12, %cst_8 {dimension_numbers = #tpu.dot_dimension_numbers<[1], [0], [0], [1], [0, 0, 1, 1], [], []>} : vector<1x16xbf16>, vector<16x2304xbf16>, vector<1x2304xf32> -> vector<1x2304xf32>
    %16 = arith.addf %11, %15 : vector<1x2304xf32>
    %17 = vector.extract_strided_slice %1 {offsets = [0, 2], sizes = [16, 2304], strides = [1, 1]} : vector<16x2402xbf16> to vector<16x2304xbf16>
    %18 = vector.extract_strided_slice %2 {offsets = [2, 0, 0], sizes = [1, 1, 16], strides = [1, 1, 1]} : vector<9x1x16xbf16> to vector<1x1x16xbf16>
    %19 = vector.shape_cast %18 : vector<1x1x16xbf16> to vector<1x16xbf16>
    %cst_9 = arith.constant dense<0.000000e+00> : vector<1x2304xf32>
    %20 = tpu.matmul %19, %17, %cst_9 {dimension_numbers = #tpu.dot_dimension_numbers<[1], [0], [0], [1], [0, 0, 1, 1], [], []>} : vector<1x16xbf16>, vector<16x2304xbf16>, vector<1x2304xf32> -> vector<1x2304xf32>
    %21 = vector.extract_strided_slice %3 {offsets = [2, 0], sizes = [1, 2304], strides = [1, 1]} : vector<3x2304xf32> to vector<1x2304xf32>
    %22 = arith.mulf %21, %20 : vector<1x2304xf32>
    %23 = arith.addf %16, %22 : vector<1x2304xf32>
    %24 = vector.extract_strided_slice %1 {offsets = [0, 48], sizes = [16, 2304], strides = [1, 1]} : vector<16x2402xbf16> to vector<16x2304xbf16>
    %25 = vector.extract_strided_slice %2 {offsets = [3, 0, 0], sizes = [1, 1, 16], strides = [1, 1, 1]} : vector<9x1x16xbf16> to vector<1x1x16xbf16>
    %26 = vector.shape_cast %25 : vector<1x1x16xbf16> to vector<1x16xbf16>
    %cst_10 = arith.constant dense<0.000000e+00> : vector<1x2304xf32>
    %27 = tpu.matmul %26, %24, %cst_10 {dimension_numbers = #tpu.dot_dimension_numbers<[1], [0], [0], [1], [0, 0, 1, 1], [], []>} : vector<1x16xbf16>, vector<16x2304xbf16>, vector<1x2304xf32> -> vector<1x2304xf32>
    %28 = vector.extract_strided_slice %3 {offsets = [0, 0], sizes = [1, 2304], strides = [1, 1]} : vector<3x2304xf32> to vector<1x2304xf32>
    %29 = arith.mulf %28, %27 : vector<1x2304xf32>
    %30 = arith.addf %23, %29 : vector<1x2304xf32>
    %31 = vector.extract_strided_slice %1 {offsets = [0, 49], sizes = [16, 2304], strides = [1, 1]} : vector<16x2402xbf16> to vector<16x2304xbf16>
    %32 = vector.extract_strided_slice %2 {offsets = [4, 0, 0], sizes = [1, 1, 16], strides = [1, 1, 1]} : vector<9x1x16xbf16> to vector<1x1x16xbf16>
    %33 = vector.shape_cast %32 : vector<1x1x16xbf16> to vector<1x16xbf16>
    %cst_11 = arith.constant dense<0.000000e+00> : vector<1x2304xf32>
    %34 = tpu.matmul %33, %31, %cst_11 {dimension_numbers = #tpu.dot_dimension_numbers<[1], [0], [0], [1], [0, 0, 1, 1], [], []>} : vector<1x16xbf16>, vector<16x2304xbf16>, vector<1x2304xf32> -> vector<1x2304xf32>
    %35 = arith.addf %30, %34 : vector<1x2304xf32>
    %36 = vector.extract_strided_slice %1 {offsets = [0, 50], sizes = [16, 2304], strides = [1, 1]} : vector<16x2402xbf16> to vector<16x2304xbf16>
    %37 = vector.extract_strided_slice %2 {offsets = [5, 0, 0], sizes = [1, 1, 16], strides = [1, 1, 1]} : vector<9x1x16xbf16> to vector<1x1x16xbf16>
    %38 = vector.shape_cast %37 : vector<1x1x16xbf16> to vector<1x16xbf16>
    %cst_12 = arith.constant dense<0.000000e+00> : vector<1x2304xf32>
    %39 = tpu.matmul %38, %36, %cst_12 {dimension_numbers = #tpu.dot_dimension_numbers<[1], [0], [0], [1], [0, 0, 1, 1], [], []>} : vector<1x16xbf16>, vector<16x2304xbf16>, vector<1x2304xf32> -> vector<1x2304xf32>
    %40 = vector.extract_strided_slice %3 {offsets = [2, 0], sizes = [1, 2304], strides = [1, 1]} : vector<3x2304xf32> to vector<1x2304xf32>
    %41 = arith.mulf %40, %39 : vector<1x2304xf32>
    %42 = arith.addf %35, %41 : vector<1x2304xf32>
    %43 = vector.extract_strided_slice %1 {offsets = [0, 96], sizes = [16, 2304], strides = [1, 1]} : vector<16x2402xbf16> to vector<16x2304xbf16>
    %44 = vector.extract_strided_slice %2 {offsets = [6, 0, 0], sizes = [1, 1, 16], strides = [1, 1, 1]} : vector<9x1x16xbf16> to vector<1x1x16xbf16>
    %45 = vector.shape_cast %44 : vector<1x1x16xbf16> to vector<1x16xbf16>
    %cst_13 = arith.constant dense<0.000000e+00> : vector<1x2304xf32>
    %46 = tpu.matmul %45, %43, %cst_13 {dimension_numbers = #tpu.dot_dimension_numbers<[1], [0], [0], [1], [0, 0, 1, 1], [], []>} : vector<1x16xbf16>, vector<16x2304xbf16>, vector<1x2304xf32> -> vector<1x2304xf32>
    %47 = vector.extract_strided_slice %3 {offsets = [0, 0], sizes = [1, 2304], strides = [1, 1]} : vector<3x2304xf32> to vector<1x2304xf32>
    %48 = arith.mulf %47, %46 : vector<1x2304xf32>
    %49 = arith.addf %42, %48 : vector<1x2304xf32>
    %50 = vector.extract_strided_slice %1 {offsets = [0, 97], sizes = [16, 2304], strides = [1, 1]} : vector<16x2402xbf16> to vector<16x2304xbf16>
    %51 = vector.extract_strided_slice %2 {offsets = [7, 0, 0], sizes = [1, 1, 16], strides = [1, 1, 1]} : vector<9x1x16xbf16> to vector<1x1x16xbf16>
    %52 = vector.shape_cast %51 : vector<1x1x16xbf16> to vector<1x16xbf16>
    %cst_14 = arith.constant dense<0.000000e+00> : vector<1x2304xf32>
    %53 = tpu.matmul %52, %50, %cst_14 {dimension_numbers = #tpu.dot_dimension_numbers<[1], [0], [0], [1], [0, 0, 1, 1], [], []>} : vector<1x16xbf16>, vector<16x2304xbf16>, vector<1x2304xf32> -> vector<1x2304xf32>
    %54 = arith.addf %49, %53 : vector<1x2304xf32>
    %55 = vector.extract_strided_slice %1 {offsets = [0, 98], sizes = [16, 2304], strides = [1, 1]} : vector<16x2402xbf16> to vector<16x2304xbf16>
    %56 = vector.extract_strided_slice %2 {offsets = [8, 0, 0], sizes = [1, 1, 16], strides = [1, 1, 1]} : vector<9x1x16xbf16> to vector<1x1x16xbf16>
    %57 = vector.shape_cast %56 : vector<1x1x16xbf16> to vector<1x16xbf16>
    %cst_15 = arith.constant dense<0.000000e+00> : vector<1x2304xf32>
    %58 = tpu.matmul %57, %55, %cst_15 {dimension_numbers = #tpu.dot_dimension_numbers<[1], [0], [0], [1], [0, 0, 1, 1], [], []>} : vector<1x16xbf16>, vector<16x2304xbf16>, vector<1x2304xf32> -> vector<1x2304xf32>
    %59 = vector.extract_strided_slice %3 {offsets = [2, 0], sizes = [1, 2304], strides = [1, 1]} : vector<3x2304xf32> to vector<1x2304xf32>
    %60 = arith.mulf %59, %58 : vector<1x2304xf32>
    %61 = arith.addf %54, %60 : vector<1x2304xf32>
    %c0_16 = arith.constant 0 : index
    %c0_17 = arith.constant 0 : index
    %c0_18 = arith.constant 0 : index
    %62 = vector.load %arg4[%c0_16, %c0_17, %c0_18] : memref<1x1x2304xf32, #tpu.memory_space<vmem>>, vector<1x1x2304xf32>
    %63 = vector.shape_cast %62 : vector<1x1x2304xf32> to vector<1x2304xf32>
    %64 = vector.shape_cast %61 : vector<1x2304xf32> to vector<1x1x2304xf32>
    tpu.vector_store %arg4[%c0_16, %c0_17, %c0_18], %64 {strides = array<i32>} : memref<1x1x2304xf32, #tpu.memory_space<vmem>>, vector<1x1x2304xf32>,
    return
  }
  func.func @transform_0(%arg0: i32) -> (i32, i32, i32) {
    %c0_i32 = arith.constant 0 : i32
    %c0_i32_0 = arith.constant 0 : i32
    %c0_i32_1 = arith.constant 0 : i32
    return %arg0, %c0_i32, %c0_i32_0 : i32, i32, i32
  }
  func.func @transform_1(%arg0: i32) -> (i32, i32, i32) {
    %c0_i32 = arith.constant 0 : i32
    %c0_i32_0 = arith.constant 0 : i32
    %c0_i32_1 = arith.constant 0 : i32
    %c0_i32_2 = arith.constant 0 : i32
    return %c0_i32, %c0_i32_0, %c0_i32_1 : i32, i32, i32
  }
  func.func @transform_2(%arg0: i32) -> (i32, i32) {
    %c0_i32 = arith.constant 0 : i32
    %c0_i32_0 = arith.constant 0 : i32
    %c0_i32_1 = arith.constant 0 : i32
    return %c0_i32, %c0_i32_0 : i32, i32
  }
  func.func @transform_3(%arg0: i32) -> (i32, i32, i32) {
    %c0_i32 = arith.constant 0 : i32
    %c0_i32_0 = arith.constant 0 : i32
    %c0_i32_1 = arith.constant 0 : i32
    return %arg0, %c0_i32, %c0_i32_0 : i32, i32, i32
  }
}

</mosaic_0001>

<bundles_post_ra>
// kernel: deepsr_forward.6
= control target key start
LH: loop header
LB: loop body
LE: loop exit
PB: predicated region body
PF: predicated region fallthrough
CT: control target
= control target key end

     0   :  { %8 = vsyncpa [#allocation3], 0  ;;  %s1018_s12 = smov 0   ;;  %s1123_s0 = inlined_call_operand.vmem [shape: bf16[6,2,290], index: 0, kind: input, shape index: {}]   ;;  %s1124_s1 = inlined_call_operand.vmem [shape: bf16[9,2,2], index: 1, kind: input, shape index: {}]   ;;  %s1125_s2 = inlined_call_operand.hbm [shape: f32[3,256], index: 2, kind: input, shape index: {}]   ;;  %s1126_s3 = inlined_call_operand.vmem [shape: f32[6,2,256], index: 3, kind: output, shape index: {}]  }
   0x1 LB: > { %s887_s13 = sadd.s32 4294967295, %s985_s12   ;;  %p889_p0 = scmp.ge.s32.totalorder %s985_s12, 1  ;;  %s985_s12 = sphi %s1018_s12, %s14_s12  }
   0x2   : > { %p113_p1 = scmp.lt.s32.totalorder %s985_s12, 7  ;;  %p928_p3 = scmp.eq.s32.totalorder %s887_s13, 0 }
   0x3   : > { %s987_s15 = smov [#allocation2]  }
   0x4   : > { %p1026_p2 = pnand %p889_p0, %p113_p1  ;;  %s129_s16 = sshll.u32 %s987_s15, 4  ;;  %s130_s16 = int_to_ptr.vmem [resolvable:$true] %s129_s16 }
   0x5   : > { %s960_s17 = scalar_lea.vmem %s130_s16, 128  ;;  %p968_p10 = scmp.lt.s32.totalorder %s130_s16, %s130_s16 }
   0x6   : > { %p924_p4 = pneg %p1026_p2  ;;  %p961_p7 = scmp.ne.s32.totalorder %s130_s16, %s960_s17 }
   0x7   : > { %p969_p11 = scmp.lt.s32.totalorder %s960_s17, %s960_s17 }
   0x8   : > { %p925_p5 = pnand %p928_p3, %p924_p4 }
   0x9   : > { %p970_p12 = por %p969_p11, %p968_p10 }
   0xa   : > { %p951_p6 = pneg %p925_p5 }
   0xc   : > { %p963_p8 = pnand %p961_p7, %p951_p6 }
   0xe   : > { %p964_p9 = pneg %p963_p8 }
  0x10   : > { %p971_p13 = pnand %p970_p12, %p964_p9 }
  0x12   : > { %974 = shalt.err (!%p971_p13)
}
  0x13   : > { %927 = dma.hbm_to_vmem [thread:$0]  (!%p925_p5), %s1125_s2, 128, %s130_s16, [#allocation3]  }
  0x14   : > { %149 = sbr.rel (%p1026_p2) target bundleno = 401 (0x191), region = 32 }
  0x19   : > { %980 = dma.done.wait (%p928_p3), [#allocation3], 128  }
  0x1a   : > { %982 = vsyncadd (%p928_p3), [#allocation3], 4294967168  ;;  %p172_p0 = scmp.lt.s32.totalorder %s887_s13, 5  ;;  %v205_v0 = vlaneseq  ;;  %v988_v1 = vmov 1966171168   ;;  %v989_v6 = vmov 0  }
  0x1b   : > { %v203_v2 = vunpack.c.l.s4 %v988_v1  ;;  %259 = vmatprep.mubr.bf16.mxu0 %v989_v6  ;;  %342 = vmatprep.mubr.bf16.mxu1 %v989_v6  ;;  %vm220_vm0 = vcmask 1040384   ;;  %s990_s24 = smov 126   ;;  %s991_s25 = smov 127   ;;  %v183_v13 = vld [vmem:[%s1124_s1] sm:$0x1]  ;;  %vm216_vm1 = vcmask 15360  }
  0x1c   : > { %s1129_s13 = smov (!%p172_p0, %s887_s13), 5  ;;  %v1042_v3 = vshrl.u32 %v205_v0, 7  ;;  %s992_s28 = smov 112   ;;  %vm298_vm2 = vcmask 1039360   ;;  %vm359_vm3 = vcmask 1031168   ;;  %vm440_vm4 = vcmask 916480  }
  0x1d   : > { %v204_v4 = vunpack.c.0.s8 %v203_v2  ;;  %s919_s20 = smul.u32 3, %s1129_s13  ;;  %s993_s29 = smov 111   ;;  %v184_v23 = vld [vmem:[%s1124_s1 + $0x1] sm:$0x1]  ;;  %v185_v30 = vld [vmem:[%s1124_s1 + $0x2] sm:$0x1] }
  0x1e   : > { %s994_s30 = smov 110   ;;  %s995_s4 = smov 96   ;;  %vm503_vm5 = vcmask 908288   ;;  %v186_v35 = vld [vmem:[%s1124_s1 + $0x3] sm:$0x1]  ;;  %vm564_vm6 = vcmask 900096  }
  0x1f   : > { %v207_v5 = vsub.s32 %v204_v4, %v1042_v3  ;;  %s175_s23 = scalar_lea.vmem %s1123_s0, %s919_s20  ;;  %s996_s5 = smov 95   ;;  %v187_v41 = vld [vmem:[%s1124_s1 + $0x4] sm:$0x1]  ;;  %vm627_vm7 = vcmask 785408   ;;  %v188_v49 = vld [vmem:[%s1124_s1 + $0x5] sm:$0x1] }
  0x20   : > { %v896_v7 = vld.sshfl [vmem:[%s175_s23] sm:$0x13 pattern:$0x75316420]  ;;  %s997_s6 = smov 94   ;;  %vm690_vm8 = vcmask 777216  }
  0x21   : > { %v208_v8 = vrot.slane %v896_v7, %v207_v5  ;;  %v201_v9 = vcombine.high %v896_v7, %v896_v7  ;;  %v189_v55 = vld [vmem:[%s1124_s1 + $0x6] sm:$0x1]  ;;  %vm751_vm9 = vcmask 769024   ;;  %v190_v63 = vld [vmem:[%s1124_s1 + $0x7] sm:$0x1] }
  0x23   : > { %353 = vrot.lane.b32.xlu1 %v208_v8, %s990_s24  ;;  %292 = vrot.lane.b32.xlu0 %v208_v8, %s991_s25  ;;  %v291_v10 = vcombine.high %v208_v8, %v208_v8  ;;  %v215_v11 = vrot.slane %v201_v9, %v207_v5  ;;  %v222_v12 = vsel %vm220_vm0, %v208_v8, 0 }
  0x25   : > { %897 = vmatprep.subr.msk.bf16.mxu0 %vm220_vm0, %v215_v11 }
  0x26   : > { %242 = vmatpush1.bf16.msra.mxu0 %v222_v12 }
  0x27   : > { %434 = vrot.lane.b32.xlu0 %v208_v8, %s992_s28  ;;  %296 = vrot.lane.b32.xlu1 %v291_v10, %s991_s25 }
  0x29   : > { %898 = vmatmul.mubr.msk.bf16.vlgmr.msra.gmra.mxu0 %vm216_vm1, %v183_v13 }
  0x2a   : > { %403 = vmatprep.mubr.bf16.mxu0 %v989_v6 }
  0x2b   : > { %357 = vrot.lane.b32.xlu1 %v291_v10, %s990_s24  ;;  %294 = vrot.lane.b32.xlu0 %v215_v11, %s991_s25  ;;  %s918_s25 = sshll.u32 %s1129_s13, 2 }
  0x2f   : > { %436 = vrot.lane.b32.xlu1 %v215_v11, %s992_s28  ;;  %355 = vrot.lane.b32.xlu0 %v215_v11, %s990_s24 }
  0x33   : > { %497 = vrot.lane.b32.xlu1 %v208_v8, %s993_s29  ;;  %438 = vrot.lane.b32.xlu0 %v291_v10, %s992_s28  ;;  %s180_s28 = scalar_lea.vmem %s1126_s3, %s918_s25 }
  0x37   : > { %501 = vrot.lane.b32.xlu1 %v291_v10, %s993_s29  ;;  %499 = vrot.lane.b32.xlu0 %v215_v11, %s993_s29 }
  0x3b   : > { %560 = vrot.lane.b32.xlu1 %v215_v11, %s994_s30  ;;  %558 = vrot.lane.b32.xlu0 %v208_v8, %s994_s30 }
  0x3f   : > { %621 = vrot.lane.b32.xlu1 %v208_v8, %s995_s4  ;;  %562 = vrot.lane.b32.xlu0 %v291_v10, %s994_s30 }
  0x43   : > { %625 = vrot.lane.b32.xlu1 %v291_v10, %s995_s4  ;;  %623 = vrot.lane.b32.xlu0 %v215_v11, %s995_s4 }
  0x47   : > { %686 = vrot.lane.b32.xlu1 %v215_v11, %s996_s5  ;;  %684 = vrot.lane.b32.xlu0 %v208_v8, %s996_s5 }
  0x4b   : > { %745 = vrot.lane.b32.xlu1 %v208_v8, %s997_s6  ;;  %688 = vrot.lane.b32.xlu0 %v291_v10, %s996_s5 }
  0x4f   : > { %749 = vrot.lane.b32.xlu1 %v291_v10, %s997_s6  ;;  %747 = vrot.lane.b32.xlu0 %v215_v11, %s997_s6 }
  0x95   : > { %v354_v14 = vpop.permute.xlu1 %353  ;;  %v293_v15 = vpop.permute.xlu0 %292 }
  0x99   : > { %v435_v16 = vpop.permute.xlu0 %434  ;;  %v297_v17 = vpop.permute.xlu1 %296 }
  0x9d   : > { %v358_v18 = vpop.permute.xlu1 %357  ;;  %v295_v19 = vpop.permute.xlu0 %294 }
  0x9e   : > { %v300_v20 = vsel %vm298_vm2, %v295_v19, %v297_v17  ;;  %v299_v21 = vsel %vm298_vm2, %v293_v15, %v295_v19  ;;  %v271_v15 = vsub.s32 0, %v1042_v3  ;;  %v275_v19 = vsub.s32 4, %v1042_v3 }
  0x9f   : > { %899 = vmatprep.subr.msk.bf16.mxu1 %vm220_vm0, %v300_v20  ;;  %v305_v22 = vsel %vm220_vm0, %v299_v21, 0 }
  0xa0   : > { %325 = vmatpush1.bf16.msra.mxu1 %v305_v22 }
  0xa1   : > { %v437_v24 = vpop.permute.xlu1 %436  ;;  %v356_v25 = vpop.permute.xlu0 %355 }
  0xa2   : > { %v360_v26 = vsel %vm359_vm3, %v354_v14, %v356_v25  ;;  %v361_v27 = vsel %vm359_vm3, %v356_v25, %v358_v18  ;;  %v441_v29 = vsel %vm440_vm4, %v435_v16, %v437_v24  ;;  %v192_v16 = vld [vmem:[#allocation2] sm:$0x77] }
  0xa3   : > { %v366_v28 = vsel %vm220_vm0, %v360_v26, 0  ;;  %901 = vmatprep.subr.msk.bf16.mxu0 %vm220_vm0, %v361_v27  ;;  %900 = vmatmul.mubr.msk.bf16.vlgmr.msra.gmra.mxu1 %vm216_vm1, %v184_v23  ;;  %v447_v34 = vsel %vm220_vm0, %v441_v29, 0  ;;  %v272_v22 = vrot.slane %v192_v16, %v271_v15  ;;  %v414_v23 = vsub.s32 2, %v1042_v3 }
  0xa4   : > { %386 = vmatpush1.bf16.msra.mxu0 %v366_v28  ;;  %484 = vmatprep.mubr.bf16.mxu1 %v989_v6  ;;  %v276_v26 = vrot.slane %v192_v16, %v275_v19  ;;  %v418_v27 = vsub.s32 6, %v1042_v3 }
  0xa5   : > { %v498_v31 = vpop.permute.xlu1 %497  ;;  %v439_v32 = vpop.permute.xlu0 %438 }
  0xa6   : > { %v442_v33 = vsel %vm440_vm4, %v437_v24, %v439_v32 }
  0xa7   : > { %903 = vmatprep.subr.msk.bf16.mxu1 %vm220_vm0, %v442_v33  ;;  %902 = vmatmul.mubr.msk.bf16.vlgmr.msra.gmra.mxu0 %vm216_vm1, %v185_v30  ;;  %v282_v30 = vrot.slane %v272_v22, %v271_v15 }
  0xa8   : > { %467 = vmatpush1.bf16.msra.mxu1 %v447_v34  ;;  %547 = vmatprep.mubr.bf16.mxu0 %v989_v6  ;;  %v286_v34 = vrot.slane %v276_v26, %v271_v15 }
  0xa9   : > { %v502_v36 = vpop.permute.xlu1 %501  ;;  %v500_v37 = vpop.permute.xlu0 %499 }
  0xaa   : > { %v504_v38 = vsel %vm503_vm5, %v498_v31, %v500_v37  ;;  %v505_v39 = vsel %vm503_vm5, %v500_v37, %v502_v36  ;;  %v415_v31 = vrot.slane %v192_v16, %v414_v23 }
  0xab   : > { %v510_v40 = vsel %vm220_vm0, %v504_v38, 0  ;;  %905 = vmatprep.subr.msk.bf16.mxu0 %vm220_vm0, %v505_v39  ;;  %904 = vmatmul.mubr.msk.bf16.vlgmr.msra.gmra.mxu1 %vm216_vm1, %v186_v35  ;;  %v419_v35 = vrot.slane %v192_v16, %v418_v27 }
  0xac   : > { %530 = vmatpush1.bf16.msra.mxu0 %v510_v40  ;;  %608 = vmatprep.mubr.bf16.mxu1 %v989_v6  ;;  %v425_v38 = vrot.slane %v415_v31, %v414_v23 }
  0xad   : > { %v561_v42 = vpop.permute.xlu1 %560  ;;  %v559_v43 = vpop.permute.xlu0 %558 }
  0xae   : > { %v565_v44 = vsel %vm564_vm6, %v559_v43, %v561_v42 }
  0xaf   : > { %906 = vmatmul.mubr.msk.bf16.vlgmr.msra.gmra.mxu0 %vm216_vm1, %v187_v41  ;;  %v571_v48 = vsel %vm220_vm0, %v565_v44, 0  ;;  %v429_v41 = vrot.slane %v419_v35, %v414_v23 }
  0xb0   : > { %671 = vmatprep.mubr.bf16.mxu0 %v989_v6 }
  0xb1   : > { %v622_v45 = vpop.permute.xlu1 %621  ;;  %v563_v46 = vpop.permute.xlu0 %562 }
  0xb2   : > { %v566_v47 = vsel %vm564_vm6, %v561_v42, %v563_v46 }
  0xb3   : > { %907 = vmatprep.subr.msk.bf16.mxu1 %vm220_vm0, %v566_v47 }
  0xb4   : > { %591 = vmatpush1.bf16.msra.mxu1 %v571_v48 }
  0xb5   : > { %v626_v50 = vpop.permute.xlu1 %625  ;;  %v624_v51 = vpop.permute.xlu0 %623 }
  0xb6   : > { %v628_v52 = vsel %vm627_vm7, %v622_v45, %v624_v51  ;;  %v629_v53 = vsel %vm627_vm7, %v624_v51, %v626_v50 }
  0xb7   : > { %v634_v54 = vsel %vm220_vm0, %v628_v52, 0  ;;  %908 = vmatmul.mubr.msk.bf16.vlgmr.msra.gmra.mxu1 %vm216_vm1, %v188_v49  ;;  %909 = vmatprep.subr.msk.bf16.mxu0 %vm220_vm0, %v629_v53 }
  0xb8   : > { %654 = vmatpush1.bf16.msra.mxu0 %v634_v54  ;;  %734 = vmatprep.mubr.bf16.mxu1 %v989_v6 }
  0xb9   : > { %v687_v56 = vpop.permute.xlu1 %686  ;;  %v685_v57 = vpop.permute.xlu0 %684 }
  0xba   : > { %v691_v58 = vsel %vm690_vm8, %v685_v57, %v687_v56 }
  0xbb   : > { %910 = vmatmul.mubr.msk.bf16.vlgmr.msra.gmra.mxu0 %vm216_vm1, %v189_v55  ;;  %v697_v62 = vsel %vm220_vm0, %v691_v58, 0 }
  0xbc   : > { %795 = vmatprep.mubr.bf16.mxu0 %v989_v6  ;;  %v191_v6 = vld [vmem:[%s1124_s1 + $0x8] sm:$0x1] }
  0xbd   : > { %v746_v59 = vpop.permute.xlu1 %745  ;;  %v689_v60 = vpop.permute.xlu0 %688 }
  0xbe   : > { %v692_v61 = vsel %vm690_vm8, %v687_v56, %v689_v60 }
  0xbf   : > { %911 = vmatprep.subr.msk.bf16.mxu1 %vm220_vm0, %v692_v61 }
  0xc0   : > { %717 = vmatpush1.bf16.msra.mxu1 %v697_v62 }
  0xc1   : > { %v750_v0 = vpop.permute.xlu1 %749  ;;  %v748_v1 = vpop.permute.xlu0 %747 }
  0xc2   : > { %v752_v2 = vsel %vm751_vm9, %v746_v59, %v748_v1  ;;  %v753_v4 = vsel %vm751_vm9, %v748_v1, %v750_v0 }
  0xc3   : > { %v758_v5 = vsel %vm220_vm0, %v752_v2, 0  ;;  %912 = vmatmul.mubr.msk.bf16.vlgmr.msra.gmra.mxu1 %vm216_vm1, %v190_v63  ;;  %913 = vmatprep.subr.msk.bf16.mxu0 %vm220_vm0, %v753_v4 }
  0xc4   : > { %778 = vmatpush1.bf16.msra.mxu0 %v758_v5 }
  0xc7   : > { %914 = vmatmul.mubr.msk.bf16.vlgmr.msra.gmra.mxu0 %vm216_vm1, %v191_v6 }
  0xe9   : > { %v261_v7 = vpop.f32.mrf.mxu0 }
  0xea   : > { %v287_v37 = vmul.f32 %v282_v30, %v261_v7 }
  0xeb   : > { %v263_v8 = vpop.f32.mrf.mxu0 }
  0xec   : > { %v288_v40 = vmul.f32 %v286_v34, %v263_v8 }
  0xed   : > { %v265_v9 = vpop.f32.mrf.mxu0 }
  0xef   : > { %v266_v10 = vpop.f32.mrf.mxu0 }
 0x163   : > { %v344_v11 = vpop.f32.mrf.mxu1 }
 0x164   : > { %v351_v43 = vadd.f32 %v344_v11, %v287_v37 }
 0x165   : > { %v346_v12 = vpop.f32.mrf.mxu1 }
 0x166   : > { %v352_v46 = vadd.f32 %v346_v12, %v288_v40 }
 0x167   : > { %v348_v13 = vpop.f32.mrf.mxu1  ;;  %v405_v14 = vpop.f32.mrf.mxu0 }
 0x168   : > { %v430_v44 = vmul.f32 %v425_v38, %v405_v14 }
 0x169   : > { %v349_v17 = vpop.f32.mrf.mxu1  ;;  %v407_v18 = vpop.f32.mrf.mxu0 }
 0x16a   : > { %v431_v3 = vmul.f32 %v429_v41, %v407_v18  ;;  %v432_v49 = vadd.f32 %v430_v44, %v351_v43 }
 0x16b   : > { %v409_v20 = vpop.f32.mrf.mxu0  ;;  %v486_v21 = vpop.f32.mrf.mxu1 }
 0x16c   : > { %v493_v50 = vmul.f32 %v486_v21, %v282_v30  ;;  %v433_v54 = vadd.f32 %v431_v3, %v352_v46 }
 0x16d   : > { %v410_v24 = vpop.f32.mrf.mxu0  ;;  %v488_v25 = vpop.f32.mrf.mxu1 }
 0x16e   : > { %v494_v51 = vmul.f32 %v488_v25, %v286_v34  ;;  %v495_v56 = vadd.f32 %v493_v50, %v432_v49 }
 0x16f   : > { %v549_v28 = vpop.f32.mrf.mxu0  ;;  %v490_v29 = vpop.f32.mrf.mxu1 }
 0x170   : > { %v496_v57 = vadd.f32 %v494_v51, %v433_v54  ;;  %v556_v62 = vadd.f32 %v549_v28, %v495_v56 }
 0x171   : > { %v551_v32 = vpop.f32.mrf.mxu0  ;;  %v491_v33 = vpop.f32.mrf.mxu1 }
 0x172   : > { %v557_v63 = vadd.f32 %v551_v32, %v496_v57 }
 0x173   : > { %v553_v36 = vpop.f32.mrf.mxu0 }
 0x175   : > { %v554_v39 = vpop.f32.mrf.mxu0 }
 0x177   : > { %v610_v42 = vpop.f32.mrf.mxu1 }
 0x178   : > { %v617_v59 = vmul.f32 %v610_v42, %v425_v38 }
 0x179   : > { %v612_v45 = vpop.f32.mrf.mxu1 }
 0x17a   : > { %v618_v60 = vmul.f32 %v612_v45, %v429_v41  ;;  %v619_v4 = vadd.f32 %v617_v59, %v556_v62 }
 0x17b   : > { %v673_v47 = vpop.f32.mrf.mxu0  ;;  %v614_v48 = vpop.f32.mrf.mxu1 }
 0x17c   : > { %v680_v0 = vmul.f32 %v673_v47, %v282_v30  ;;  %v620_v5 = vadd.f32 %v618_v60, %v557_v63 }
 0x17d   : > { %v675_v52 = vpop.f32.mrf.mxu0  ;;  %v615_v53 = vpop.f32.mrf.mxu1 }
 0x17e   : > { %v681_v1 = vmul.f32 %v675_v52, %v286_v34  ;;  %v682_v8 = vadd.f32 %v680_v0, %v619_v4 }
 0x17f   : > { %v677_v55 = vpop.f32.mrf.mxu0 }
 0x180   : > { %v683_v9 = vadd.f32 %v681_v1, %v620_v5 }
 0x181   : > { %v678_v58 = vpop.f32.mrf.mxu0 }
 0x183   : > { %v736_v61 = vpop.f32.mrf.mxu1 }
 0x184   : > { %v743_v13 = vadd.f32 %v736_v61, %v682_v8 }
 0x185   : > { %v738_v2 = vpop.f32.mrf.mxu1 }
 0x186   : > { %v744_v14 = vadd.f32 %v738_v2, %v683_v9 }
 0x187   : > { %v797_v6 = vpop.f32.mrf.mxu0  ;;  %v740_v7 = vpop.f32.mrf.mxu1 }
 0x188   : > { %v804_v10 = vmul.f32 %v797_v6, %v425_v38 }
 0x189   : > { %v799_v11 = vpop.f32.mrf.mxu0  ;;  %v741_v12 = vpop.f32.mrf.mxu1 }
 0x18a   : > { %v805_v15 = vmul.f32 %v799_v11, %v429_v41  ;;  %v806_v17 = vadd.f32 %v804_v10, %v743_v13 }
 0x18b   : > { %v801_v16 = vpop.f32.mrf.mxu0 }
 0x18c   : > { %v807_v18 = vadd.f32 %v805_v15, %v744_v14 }
 0x18d   : > { %v802_v19 = vpop.f32.mrf.mxu0 }
 0x18e   : > { %v810_v20 = vcombine.low %v806_v17, %v807_v18 }
 0x190   : > { %915 = vst.sshfl [vmem:[%s180_s28] sm:$0x33 pattern:$0x76325410] %v810_v20 }
 0x191 PF: > { %s14_s12 = sadd.s32 1, %s985_s12  }
 0x192   : > { %p11_p1 = scmp.ge.s32.totalorder %s14_s12, 8  }
 0x194   :  { %13 = sbr.rel (!%p11_p1) target bundleno = 1 (0x1), region = 67 }
 0x199   :  { %841 = vsyncpa [#allocation3], 1 }
 0x19a   :  { %843 = vsyncpa [#allocation3 + $0x1], 1 }

// kernel: deepsr_forward.5
= control target key start
LH: loop header
LB: loop body
LE: loop exit
PB: predicated region body
PF: predicated region fallthrough
CT: control target
= control target key end

     0   :  { %s2037_s14 = smov 127   ;;  %s2038_s27 = smov 126   ;;  %vm1328_vm0 = vcmask 1046528   ;;  %vm1419_vm1 = vcmask 1045504   ;;  %vm1510_vm2 = vcmask 1044480   ;;  %vm1601_vm3 = vcmask 1043456   ;;  %s4339_s0 = inlined_call_operand.vmem [shape: f32[6,26,26], index: 0, kind: input, shape index: {}]   ;;  %s4340_s1 = inlined_call_operand.vmem [shape: f32[6,16,16], index: 1, kind: output, shape index: {}]  }
   0x1   :  { %v2060_v0 = vld [vmem:[%s4339_s0 + $0x10] sm:$0xff]  ;;  %v2065_v1 = vld [vmem:[%s4339_s0] sm:$0xff]  ;;  %v2070_v2 = vld [vmem:[%s4339_s0 + $0x18] sm:$0x3]  ;;  %s2040_s28 = smov 124   ;;  %s2041_s29 = smov 123  }
   0x2   :  { %v2073_v3 = vmul.f32 0.00013383022, %v2060_v0  ;;  %v2076_v4 = vmul.f32 0.00013383022, %v2065_v1  ;;  %v2081_v5 = vld [vmem:[%s4339_s0 + $0x8] sm:$0xff]  ;;  %v2101_v9 = vld [vmem:[%s4339_s0 + $0x20] sm:$0xff] }
   0x3   :  { %v2088_v6 = vmul.f32 0.00013383022, %v2070_v2  ;;  %v2091_v7 = vmul.f32 0.00013383022, %v2081_v5  ;;  %v2096_v8 = vld [vmem:[%s4339_s0 + $0x28] sm:$0xff]  ;;  %v2121_v13 = vld [vmem:[%s4339_s0 + $0x30] sm:$0xff] }
   0x4   :  { %4481 = vst [vmem:[#allocation2_spill] sm:$0xff] %v2073_v3  ;;  %4482 = vst [vmem:[#allocation3_spill] sm:$0xff] %v2076_v4  ;;  %108 = vrot.lane.b32.xlu1 %v2073_v3, %s2037_s14  ;;  %104 = vrot.lane.b32.xlu0 %v2076_v4, %s2037_s14  ;;  %v2108_v10 = vmul.f32 0.00013383022, %v2096_v8  ;;  %v2111_v11 = vmul.f32 0.00013383022, %v2101_v9 }
   0x5   :  { %4483 = vst [vmem:[#allocation4_spill] sm:$0xff] %v2088_v6  ;;  %4484 = vst [vmem:[#allocation5_spill] sm:$0xff] %v2091_v7  ;;  %v2116_v12 = vld [vmem:[%s4339_s0 + $0x38] sm:$0x3]  ;;  %v2131_v15 = vmul.f32 0.00013383022, %v2121_v13 }
   0x6   :  { %4485 = vst [vmem:[#allocation6_spill] sm:$0xff] %v2108_v10  ;;  %4486 = vst [vmem:[#allocation7_spill] sm:$0xff] %v2111_v11  ;;  %v2128_v14 = vmul.f32 0.00013383022, %v2116_v12  ;;  %v2136_v16 = vld [vmem:[%s4339_s0 + $0x48] sm:$0xff]  ;;  %v2141_v17 = vld [vmem:[%s4339_s0 + $0x40] sm:$0xff] }
   0x7   :  { %4488 = vst [vmem:[#allocation9_spill] sm:$0xff] %v2131_v15  ;;  %v2148_v18 = vmul.f32 0.00013383022, %v2136_v16  ;;  %v2151_v19 = vmul.f32 0.00013383022, %v2141_v17  ;;  %v2161_v21 = vld [vmem:[%s4339_s0 + $0x50] sm:$0xff] }
   0x8   :  { %110 = vrot.lane.b32.xlu1 %v2088_v6, %s2037_s14  ;;  %106 = vrot.lane.b32.xlu0 %v2091_v7, %s2037_s14  ;;  %4487 = vst [vmem:[#allocation8_spill] sm:$0xff] %v2128_v14  ;;  %v2156_v20 = vld [vmem:[%s4339_s0 + $0x58] sm:$0x3]  ;;  %v2171_v23 = vmul.f32 0.00013383022, %v2161_v21  ;;  %v2176_v24 = vld [vmem:[%s4339_s0 + $0x68] sm:$0xff] }
   0x9   :  { %4489 = vst [vmem:[#allocation10_spill] sm:$0xff] %v2148_v18  ;;  %4490 = vst [vmem:[#allocation11_spill] sm:$0xff] %v2151_v19  ;;  %v2168_v22 = vmul.f32 0.00013383022, %v2156_v20  ;;  %v2181_v25 = vld [vmem:[%s4339_s0 + $0x60] sm:$0xff]  ;;  %v2201_v29 = vld [vmem:[%s4339_s0 + $0x70] sm:$0xff] }
   0xa   :  { %4492 = vst [vmem:[#allocation13_spill] sm:$0xff] %v2171_v23  ;;  %v2188_v26 = vmul.f32 0.00013383022, %v2176_v24  ;;  %v2191_v27 = vmul.f32 0.00013383022, %v2181_v25  ;;  %v2216_v32 = vld [vmem:[%s4339_s0 + $0x88] sm:$0xff] }
   0xb   :  { %4491 = vst [vmem:[#allocation12_spill] sm:$0xff] %v2168_v22  ;;  %v2196_v28 = vld [vmem:[%s4339_s0 + $0x78] sm:$0x3]  ;;  %v2211_v31 = vmul.f32 0.00013383022, %v2201_v29  ;;  %v2221_v33 = vld [vmem:[%s4339_s0 + $0x80] sm:$0xff] }
   0xc   :  { %114 = vrot.lane.b32.xlu1 %v2108_v10, %s2037_s14  ;;  %112 = vrot.lane.b32.xlu0 %v2111_v11, %s2037_s14  ;;  %4493 = vst [vmem:[#allocation14_spill] sm:$0xff] %v2188_v26  ;;  %4494 = vst [vmem:[#allocation15_spill] sm:$0xff] %v2191_v27  ;;  %v2208_v30 = vmul.f32 0.00013383022, %v2196_v28  ;;  %v2228_v34 = vmul.f32 0.00013383022, %v2216_v32 }
   0xd   :  { %4496 = vst [vmem:[#allocation17_spill] sm:$0xff] %v2211_v31  ;;  %v2231_v35 = vmul.f32 0.00013383022, %v2221_v33  ;;  %v2236_v36 = vld [vmem:[%s4339_s0 + $0x98] sm:$0x3]  ;;  %v2241_v37 = vld [vmem:[%s4339_s0 + $0x90] sm:$0xff] }
   0xe   :  { %4495 = vst [vmem:[#allocation16_spill] sm:$0xff] %v2208_v30  ;;  %4497 = vst [vmem:[#allocation18_spill] sm:$0xff] %v2228_v34  ;;  %v2248_v38 = vmul.f32 0.00013383022, %v2236_v36  ;;  %v2251_v39 = vmul.f32 0.00013383022, %v2241_v37 }
   0xf   :  { %4498 = vst [vmem:[#allocation19_spill] sm:$0xff] %v2231_v35  ;;  %v2256_v40 = vld [vmem:[%s4339_s0 + $0xa8] sm:$0xff]  ;;  %v2261_v41 = vld [vmem:[%s4339_s0 + $0xa0] sm:$0xff]  ;;  %v2276_v44 = vld [vmem:[%s4339_s0 + $0xb8] sm:$0x3]  ;;  %s2042_s30 = smov 122  }
  0x10   :  { %118 = vrot.lane.b32.xlu1 %v2128_v14, %s2037_s14  ;;  %116 = vrot.lane.b32.xlu0 %v2131_v15, %s2037_s14  ;;  %4499 = vst [vmem:[#allocation20_spill] sm:$0xff] %v2248_v38  ;;  %4500 = vst [vmem:[#allocation21_spill] sm:$0xff] %v2251_v39  ;;  %v2268_v42 = vmul.f32 0.00013383022, %v2256_v40  ;;  %v2271_v43 = vmul.f32 0.00013383022, %v2261_v41 }
  0x11   :  { %v2281_v45 = vld [vmem:[%s4339_s0 + $0xb0] sm:$0xff]  ;;  %v2288_v46 = vmul.f32 0.00013383022, %v2276_v44  ;;  %v2298_v48 = vmul.f32 0.0044318484, %v2081_v5  ;;  %s2043_s2 = smov 121  }
  0x12   :  { %4501 = vst [vmem:[#allocation22_spill] sm:$0xff] %v2268_v42  ;;  %4502 = vst [vmem:[#allocation23_spill] sm:$0xff] %v2271_v43  ;;  %v2291_v47 = vmul.f32 0.00013383022, %v2281_v45  ;;  %v2301_v49 = vmul.f32 0.0044318484, %v2065_v1 }
  0x13   :  { %4503 = vst [vmem:[#allocation24_spill] sm:$0xff] %v2288_v46  ;;  %4505 = vst [vmem:[#allocation26_spill] sm:$0xff] %v2298_v48  ;;  %v2308_v50 = vmul.f32 0.0044318484, %v2070_v2  ;;  %v2311_v51 = vmul.f32 0.0044318484, %v2060_v0 }
  0x14   :  { %122 = vrot.lane.b32.xlu1 %v2148_v18, %s2037_s14  ;;  %120 = vrot.lane.b32.xlu0 %v2151_v19, %s2037_s14  ;;  %4504 = vst [vmem:[#allocation25_spill] sm:$0xff] %v2291_v47  ;;  %4506 = vst [vmem:[#allocation27_spill] sm:$0xff] %v2301_v49  ;;  %v2318_v52 = vmul.f32 0.0044318484, %v2096_v8  ;;  %v2321_v53 = vmul.f32 0.0044318484, %v2101_v9 }
  0x15   :  { %4507 = vst [vmem:[#allocation28_spill] sm:$0xff] %v2308_v50  ;;  %4508 = vst [vmem:[#allocation29_spill] sm:$0xff] %v2311_v51  ;;  %v2328_v54 = vmul.f32 0.0044318484, %v2116_v12  ;;  %v2331_v55 = vmul.f32 0.0044318484, %v2121_v13 }
  0x16   :  { %4509 = vst [vmem:[#allocation30_spill] sm:$0xff] %v2318_v52  ;;  %4510 = vst [vmem:[#allocation31_spill] sm:$0xff] %v2321_v53  ;;  %v2338_v56 = vmul.f32 0.0044318484, %v2136_v16  ;;  %v2341_v57 = vmul.f32 0.0044318484, %v2141_v17 }
  0x17   :  { %4511 = vst [vmem:[#allocation32_spill] sm:$0xff] %v2328_v54  ;;  %4512 = vst [vmem:[#allocation33_spill] sm:$0xff] %v2331_v55  ;;  %v2348_v58 = vmul.f32 0.0044318484, %v2156_v20  ;;  %v2351_v59 = vmul.f32 0.0044318484, %v2161_v21 }
  0x18   :  { %126 = vrot.lane.b32.xlu1 %v2168_v22, %s2037_s14  ;;  %124 = vrot.lane.b32.xlu0 %v2171_v23, %s2037_s14  ;;  %4513 = vst [vmem:[#allocation34_spill] sm:$0xff] %v2338_v56  ;;  %4514 = vst [vmem:[#allocation35_spill] sm:$0xff] %v2341_v57  ;;  %v2358_v60 = vmul.f32 0.0044318484, %v2176_v24  ;;  %v2361_v61 = vmul.f32 0.0044318484, %v2181_v25 }
  0x19   :  { %4515 = vst [vmem:[#allocation36_spill] sm:$0xff] %v2348_v58  ;;  %4516 = vst [vmem:[#allocation37_spill] sm:$0xff] %v2351_v59  ;;  %v2368_v62 = vmul.f32 0.0044318484, %v2196_v28  ;;  %v2371_v63 = vmul.f32 0.0044318484, %v2201_v29 }
  0x1a   :  { %4517 = vst [vmem:[#allocation38_spill] sm:$0xff] %v2358_v60  ;;  %4518 = vst [vmem:[#allocation39_spill] sm:$0xff] %v2361_v61  ;;  %v2391_v22 = vmul.f32 0.0044318484, %v2241_v37  ;;  %v2398_v14 = vmul.f32 0.0044318484, %v2256_v40 }
  0x1b   :  { %4519 = vst [vmem:[#allocation40_spill] sm:$0xff] %v2368_v62  ;;  %4520 = vst [vmem:[#allocation41_spill] sm:$0xff] %v2371_v63  ;;  %v2448_v18 = vmul.f32 0.053990968, %v2116_v12  ;;  %v2451_v23 = vmul.f32 0.053990968, %v2121_v13 }
  0x1c   :  { %130 = vrot.lane.b32.xlu1 %v2188_v26, %s2037_s14  ;;  %128 = vrot.lane.b32.xlu0 %v2191_v27, %s2037_s14  ;;  %4524 = vst [vmem:[#allocation45_spill] sm:$0xff] %v2391_v22  ;;  %4525 = vst [vmem:[#allocation46_spill] sm:$0xff] %v2398_v14  ;;  %v2438_v27 = vmul.f32 0.053990968, %v2096_v8  ;;  %v2441_v26 = vmul.f32 0.053990968, %v2101_v9 }
  0x1d   :  { %v2458_v15 = vmul.f32 0.053990968, %v2136_v16  ;;  %v2461_v19 = vmul.f32 0.053990968, %v2141_v17  ;;  %v2468_v11 = vmul.f32 0.053990968, %v2156_v20 }
  0x1e   :  { %v2471_v10 = vmul.f32 0.053990968, %v2161_v21  ;;  %v2482_v4 = vmul.f32 0.053990968, %v2176_v24  ;;  %v2485_v7 = vmul.f32 0.053990968, %v2181_v25 }
  0x1f   :  { %4529 = vst [vmem:[#allocation50_spill] sm:$0xff] %v2458_v15  ;;  %4530 = vst [vmem:[#allocation51_spill] sm:$0xff] %v2461_v19  ;;  %s2044_s3 = smov 120   ;;  %s2045_s4 = smov 119   ;;  %vm1692_vm4 = vcmask 1042432   ;;  %vm1747_vm5 = vcmask 1041408  }
  0x20   :  { %134 = vrot.lane.b32.xlu1 %v2208_v30, %s2037_s14  ;;  %132 = vrot.lane.b32.xlu0 %v2211_v31, %s2037_s14  ;;  %v2388_v30 = vmul.f32 0.0044318484, %v2236_v36  ;;  %v2428_v31 = vmul.f32 0.053990968, %v2070_v2  ;;  %4531 = vst [vmem:[#allocation52_spill] sm:$0xff] %v2468_v11  ;;  %4532 = vst [vmem:[#allocation53_spill] sm:$0xff] %v2471_v10 }
  0x21   :  { %4535 = vst [vmem:[#allocation56_spill] sm:$0xff] %v2482_v4  ;;  %4536 = vst [vmem:[#allocation57_spill] sm:$0xff] %v2485_v7  ;;  %s2046_s7 = smov 118   ;;  %vm1802_vm6 = vcmask 1040384   ;;  %vm1995_vm7 = vcmask 130048  }
  0x22   :  { %4523 = vst [vmem:[#allocation44_spill] sm:$0xff] %v2388_v30 }
  0x24   :  { %138 = vrot.lane.b32.xlu1 %v2228_v34, %s2037_s14  ;;  %136 = vrot.lane.b32.xlu0 %v2231_v35, %s2037_s14  ;;  %v2418_v34 = vmul.f32 0.053990968, %v2081_v5  ;;  %v2431_v35 = vmul.f32 0.053990968, %v2060_v0 }
  0x28   :  { %142 = vrot.lane.b32.xlu1 %v2248_v38, %s2037_s14  ;;  %140 = vrot.lane.b32.xlu0 %v2251_v39, %s2037_s14  ;;  %v2381_v38 = vmul.f32 0.0044318484, %v2221_v33  ;;  %v2421_v39 = vmul.f32 0.053990968, %v2065_v1 }
  0x2a   :  { %4522 = vst [vmem:[#allocation43_spill] sm:$0xff] %v2381_v38 }
  0x2c   :  { %146 = vrot.lane.b32.xlu1 %v2268_v42, %s2037_s14  ;;  %144 = vrot.lane.b32.xlu0 %v2271_v43, %s2037_s14  ;;  %v2408_v43 = vmul.f32 0.0044318484, %v2276_v44  ;;  %v2411_v42 = vmul.f32 0.0044318484, %v2281_v45 }
  0x2e   :  { %4527 = vst [vmem:[#allocation48_spill] sm:$0xff] %v2408_v43  ;;  %4528 = vst [vmem:[#allocation49_spill] sm:$0xff] %v2411_v42 }
  0x30   :  { %150 = vrot.lane.b32.xlu1 %v2288_v46, %s2037_s14  ;;  %148 = vrot.lane.b32.xlu0 %v2291_v47, %s2037_s14  ;;  %v2378_v46 = vmul.f32 0.0044318484, %v2216_v32  ;;  %v2401_v47 = vmul.f32 0.0044318484, %v2261_v41  ;;  %s2039_s14 = smov 125  }
  0x32   :  { %4521 = vst [vmem:[#allocation42_spill] sm:$0xff] %v2378_v46  ;;  %4526 = vst [vmem:[#allocation47_spill] sm:$0xff] %v2401_v47 }
  0x34   :  { %250 = vrot.lane.b32.xlu1 %v2298_v48, %s2038_s27  ;;  %248 = vrot.lane.b32.xlu0 %v2301_v49, %s2038_s27 }
  0x38   :  { %254 = vrot.lane.b32.xlu1 %v2308_v50, %s2038_s27  ;;  %252 = vrot.lane.b32.xlu0 %v2311_v51, %s2038_s27 }
  0x3c   :  { %258 = vrot.lane.b32.xlu1 %v2318_v52, %s2038_s27  ;;  %256 = vrot.lane.b32.xlu0 %v2321_v53, %s2038_s27 }
  0x40   :  { %262 = vrot.lane.b32.xlu1 %v2328_v54, %s2038_s27  ;;  %260 = vrot.lane.b32.xlu0 %v2331_v55, %s2038_s27 }
  0x44   :  { %266 = vrot.lane.b32.xlu1 %v2338_v56, %s2038_s27  ;;  %264 = vrot.lane.b32.xlu0 %v2341_v57, %s2038_s27 }
  0x48   :  { %270 = vrot.lane.b32.xlu1 %v2348_v58, %s2038_s27  ;;  %268 = vrot.lane.b32.xlu0 %v2351_v59, %s2038_s27 }
  0x4c   :  { %274 = vrot.lane.b32.xlu1 %v2358_v60, %s2038_s27  ;;  %272 = vrot.lane.b32.xlu0 %v2361_v61, %s2038_s27 }
  0x50   :  { %278 = vrot.lane.b32.xlu1 %v2368_v62, %s2038_s27  ;;  %276 = vrot.lane.b32.xlu0 %v2371_v63, %s2038_s27 }
  0x54   :  { %282 = vrot.lane.b32.xlu1 %v2378_v46, %s2038_s27  ;;  %280 = vrot.lane.b32.xlu0 %v2381_v38, %s2038_s27 }
  0x58   :  { %286 = vrot.lane.b32.xlu1 %v2388_v30, %s2038_s27  ;;  %284 = vrot.lane.b32.xlu0 %v2391_v22, %s2038_s27 }
  0x5c   :  { %290 = vrot.lane.b32.xlu1 %v2398_v14, %s2038_s27  ;;  %288 = vrot.lane.b32.xlu0 %v2401_v47, %s2038_s27 }
  0x60   :  { %294 = vrot.lane.b32.xlu1 %v2408_v43, %s2038_s27  ;;  %292 = vrot.lane.b32.xlu0 %v2411_v42, %s2038_s27 }
  0x64   :  { %394 = vrot.lane.b32.xlu1 %v2418_v34, %s2039_s14  ;;  %392 = vrot.lane.b32.xlu0 %v2421_v39, %s2039_s14 }
  0x68   :  { %398 = vrot.lane.b32.xlu1 %v2428_v31, %s2039_s14  ;;  %396 = vrot.lane.b32.xlu0 %v2431_v35, %s2039_s14 }
  0x6c   :  { %402 = vrot.lane.b32.xlu1 %v2438_v27, %s2039_s14  ;;  %400 = vrot.lane.b32.xlu0 %v2441_v26, %s2039_s14 }
  0x70   :  { %406 = vrot.lane.b32.xlu1 %v2448_v18, %s2039_s14  ;;  %404 = vrot.lane.b32.xlu0 %v2451_v23, %s2039_s14 }
  0x74   :  { %410 = vrot.lane.b32.xlu1 %v2458_v15, %s2039_s14  ;;  %408 = vrot.lane.b32.xlu0 %v2461_v19, %s2039_s14 }
  0x76   :  { %v2473_v3 = vpop.permute.xlu1 %108  ;;  %v2475_v6 = vpop.permute.xlu0 %104 }
  0x77   :  { %4533 = vst [vmem:[#allocation54_spill] sm:$0xff] %v2473_v3  ;;  %4534 = vst [vmem:[#allocation55_spill] sm:$0xff] %v2475_v6  ;;  %v2496_v6 = vmul.f32 0.053990968, %v2196_v28  ;;  %v2499_v3 = vmul.f32 0.053990968, %v2201_v29 }
  0x78   :  { %414 = vrot.lane.b32.xlu1 %v2468_v11, %s2039_s14  ;;  %412 = vrot.lane.b32.xlu0 %v2471_v10, %s2039_s14 }
  0x79   :  { %4539 = vst [vmem:[#allocation60_spill] sm:$0xff] %v2496_v6  ;;  %4540 = vst [vmem:[#allocation61_spill] sm:$0xff] %v2499_v3 }
  0x7a   :  { %v2487_v42 = vpop.permute.xlu1 %110  ;;  %v2489_v43 = vpop.permute.xlu0 %106 }
  0x7b   :  { %4537 = vst [vmem:[#allocation58_spill] sm:$0xff] %v2487_v42  ;;  %4538 = vst [vmem:[#allocation59_spill] sm:$0xff] %v2489_v43  ;;  %v2510_v43 = vmul.f32 0.053990968, %v2216_v32  ;;  %v2513_v42 = vmul.f32 0.053990968, %v2221_v33 }
  0x7c   :  { %418 = vrot.lane.b32.xlu1 %v2482_v4, %s2039_s14  ;;  %416 = vrot.lane.b32.xlu0 %v2485_v7, %s2039_s14 }
  0x7d   :  { %4543 = vst [vmem:[#allocation64_spill] sm:$0xff] %v2510_v43  ;;  %4544 = vst [vmem:[#allocation65_spill] sm:$0xff] %v2513_v42 }
  0x7e   :  { %v2501_v47 = vpop.permute.xlu1 %114  ;;  %v2503_v14 = vpop.permute.xlu0 %112 }
  0x7f   :  { %4541 = vst [vmem:[#allocation62_spill] sm:$0xff] %v2501_v47  ;;  %4542 = vst [vmem:[#allocation63_spill] sm:$0xff] %v2503_v14  ;;  %v2524_v14 = vmul.f32 0.053990968, %v2236_v36  ;;  %v2527_v47 = vmul.f32 0.053990968, %v2241_v37 }
  0x80   :  { %422 = vrot.lane.b32.xlu1 %v2496_v6, %s2039_s14  ;;  %420 = vrot.lane.b32.xlu0 %v2499_v3, %s2039_s14 }
  0x81   :  { %4547 = vst [vmem:[#allocation68_spill] sm:$0xff] %v2524_v14  ;;  %4548 = vst [vmem:[#allocation69_spill] sm:$0xff] %v2527_v47 }
  0x82   :  { %v2515_v22 = vpop.permute.xlu1 %118  ;;  %v2517_v30 = vpop.permute.xlu0 %116 }
  0x83   :  { %4545 = vst [vmem:[#allocation66_spill] sm:$0xff] %v2515_v22  ;;  %4546 = vst [vmem:[#allocation67_spill] sm:$0xff] %v2517_v30  ;;  %v2538_v30 = vmul.f32 0.053990968, %v2256_v40  ;;  %v2541_v22 = vmul.f32 0.053990968, %v2261_v41 }
  0x84   :  { %426 = vrot.lane.b32.xlu1 %v2510_v43, %s2039_s14  ;;  %424 = vrot.lane.b32.xlu0 %v2513_v42, %s2039_s14 }
  0x85   :  { %4551 = vst [vmem:[#allocation72_spill] sm:$0xff] %v2538_v30  ;;  %4552 = vst [vmem:[#allocation73_spill] sm:$0xff] %v2541_v22 }
  0x86   :  { %v2529_v38 = vpop.permute.xlu1 %122  ;;  %v2531_v46 = vpop.permute.xlu0 %120 }
  0x87   :  { %4549 = vst [vmem:[#allocation70_spill] sm:$0xff] %v2529_v38  ;;  %4550 = vst [vmem:[#allocation71_spill] sm:$0xff] %v2531_v46  ;;  %v2552_v46 = vmul.f32 0.053990968, %v2276_v44  ;;  %v2555_v38 = vmul.f32 0.053990968, %v2281_v45 }
  0x88   :  { %430 = vrot.lane.b32.xlu1 %v2524_v14, %s2039_s14  ;;  %428 = vrot.lane.b32.xlu0 %v2527_v47, %s2039_s14 }
  0x89   :  { %4555 = vst [vmem:[#allocation76_spill] sm:$0xff] %v2552_v46  ;;  %4556 = vst [vmem:[#allocation77_spill] sm:$0xff] %v2555_v38 }
  0x8a   :  { %v2543_v63 = vpop.permute.xlu1 %126  ;;  %v2545_v62 = vpop.permute.xlu0 %124 }
  0x8b   :  { %4553 = vst [vmem:[#allocation74_spill] sm:$0xff] %v2543_v63  ;;  %4554 = vst [vmem:[#allocation75_spill] sm:$0xff] %v2545_v62  ;;  %v2566_v62 = vmul.f32 0.24197073, %v2081_v5  ;;  %v2569_v63 = vmul.f32 0.24197073, %v2065_v1 }
  0x8c   :  { %434 = vrot.lane.b32.xlu1 %v2538_v30, %s2039_s14  ;;  %432 = vrot.lane.b32.xlu0 %v2541_v22, %s2039_s14 }
  0x8e   :  { %v2557_v61 = vpop.permute.xlu1 %130  ;;  %v2559_v60 = vpop.permute.xlu0 %128 }
  0x8f   :  { %4557 = vst [vmem:[#allocation78_spill] sm:$0xff] %v2557_v61  ;;  %4558 = vst [vmem:[#allocation79_spill] sm:$0xff] %v2559_v60  ;;  %v2580_v60 = vmul.f32 0.24197073, %v2070_v2  ;;  %v2583_v61 = vmul.f32 0.24197073, %v2060_v0 }
  0x90   :  { %438 = vrot.lane.b32.xlu1 %v2552_v46, %s2039_s14  ;;  %436 = vrot.lane.b32.xlu0 %v2555_v38, %s2039_s14 }
  0x92   :  { %v2571_v59 = vpop.permute.xlu1 %134  ;;  %v2573_v58 = vpop.permute.xlu0 %132 }
  0x93   :  { %4559 = vst [vmem:[#allocation80_spill] sm:$0xff] %v2571_v59  ;;  %4560 = vst [vmem:[#allocation81_spill] sm:$0xff] %v2573_v58  ;;  %v2594_v58 = vmul.f32 0.24197073, %v2096_v8  ;;  %v2597_v59 = vmul.f32 0.24197073, %v2101_v9 }
  0x94   :  { %538 = vrot.lane.b32.xlu1 %v2566_v62, %s2040_s28  ;;  %536 = vrot.lane.b32.xlu0 %v2569_v63, %s2040_s28 }
  0x96   :  { %v2585_v57 = vpop.permute.xlu1 %138  ;;  %v2587_v56 = vpop.permute.xlu0 %136 }
  0x97   :  { %4561 = vst [vmem:[#allocation82_spill] sm:$0xff] %v2585_v57  ;;  %4562 = vst [vmem:[#allocation83_spill] sm:$0xff] %v2587_v56  ;;  %v2608_v56 = vmul.f32 0.24197073, %v2116_v12  ;;  %v2611_v57 = vmul.f32 0.24197073, %v2121_v13 }
  0x98   :  { %542 = vrot.lane.b32.xlu1 %v2580_v60, %s2040_s28  ;;  %540 = vrot.lane.b32.xlu0 %v2583_v61, %s2040_s28 }
  0x9a   :  { %v2599_v55 = vpop.permute.xlu1 %142  ;;  %v2601_v54 = vpop.permute.xlu0 %140 }
  0x9b   :  { %4563 = vst [vmem:[#allocation84_spill] sm:$0xff] %v2599_v55  ;;  %4564 = vst [vmem:[#allocation85_spill] sm:$0xff] %v2601_v54  ;;  %v2622_v54 = vmul.f32 0.24197073, %v2136_v16  ;;  %v2625_v55 = vmul.f32 0.24197073, %v2141_v17 }
  0x9c   :  { %546 = vrot.lane.b32.xlu1 %v2594_v58, %s2040_s28  ;;  %544 = vrot.lane.b32.xlu0 %v2597_v59, %s2040_s28 }
  0x9e   :  { %v2613_v53 = vpop.permute.xlu1 %146  ;;  %v2615_v52 = vpop.permute.xlu0 %144 }
  0x9f   :  { %4565 = vst [vmem:[#allocation86_spill] sm:$0xff] %v2613_v53  ;;  %4566 = vst [vmem:[#allocation87_spill] sm:$0xff] %v2615_v52  ;;  %v2636_v52 = vmul.f32 0.24197073, %v2156_v20  ;;  %v2639_v53 = vmul.f32 0.24197073, %v2161_v21 }
  0xa0   :  { %550 = vrot.lane.b32.xlu1 %v2608_v56, %s2040_s28  ;;  %548 = vrot.lane.b32.xlu0 %v2611_v57, %s2040_s28 }
  0xa2   :  { %v2627_v51 = vpop.permute.xlu1 %150  ;;  %v2629_v50 = vpop.permute.xlu0 %148 }
  0xa3   :  { %4567 = vst [vmem:[#allocation88_spill] sm:$0xff] %v2627_v51  ;;  %4568 = vst [vmem:[#allocation89_spill] sm:$0xff] %v2629_v50  ;;  %v2650_v50 = vmul.f32 0.24197073, %v2176_v24  ;;  %v2653_v51 = vmul.f32 0.24197073, %v2181_v25 }
  0xa4   :  { %554 = vrot.lane.b32.xlu1 %v2622_v54, %s2040_s28  ;;  %552 = vrot.lane.b32.xlu0 %v2625_v55, %s2040_s28 }
  0xa6   :  { %v2641_v49 = vpop.permute.xlu1 %250  ;;  %v2643_v48 = vpop.permute.xlu0 %248 }
  0xa7   :  { %4569 = vst [vmem:[#allocation90_spill] sm:$0xff] %v2641_v49  ;;  %4570 = vst [vmem:[#allocation91_spill] sm:$0xff] %v2643_v48  ;;  %v2664_v48 = vmul.f32 0.24197073, %v2196_v28  ;;  %v2667_v49 = vmul.f32 0.24197073, %v2201_v29 }
  0xa8   :  { %558 = vrot.lane.b32.xlu1 %v2636_v52, %s2040_s28  ;;  %556 = vrot.lane.b32.xlu0 %v2639_v53, %s2040_s28 }
  0xaa   :  { %v2655_v38 = vpop.permute.xlu1 %254  ;;  %v2657_v46 = vpop.permute.xlu0 %252 }
  0xab   :  { %4571 = vst [vmem:[#allocation92_spill] sm:$0xff] %v2655_v38  ;;  %4572 = vst [vmem:[#allocation93_spill] sm:$0xff] %v2657_v46  ;;  %v2678_v46 = vmul.f32 0.24197073, %v2216_v32  ;;  %v2681_v38 = vmul.f32 0.24197073, %v2221_v33 }
  0xac   :  { %562 = vrot.lane.b32.xlu1 %v2650_v50, %s2040_s28  ;;  %560 = vrot.lane.b32.xlu0 %v2653_v51, %s2040_s28 }
  0xae   :  { %v2669_v22 = vpop.permute.xlu1 %258  ;;  %v2671_v30 = vpop.permute.xlu0 %256 }
  0xaf   :  { %4573 = vst [vmem:[#allocation94_spill] sm:$0xff] %v2669_v22  ;;  %4574 = vst [vmem:[#allocation95_spill] sm:$0xff] %v2671_v30  ;;  %v2692_v30 = vmul.f32 0.24197073, %v2236_v36  ;;  %v2695_v22 = vmul.f32 0.24197073, %v2241_v37 }
  0xb0   :  { %566 = vrot.lane.b32.xlu1 %v2664_v48, %s2040_s28  ;;  %564 = vrot.lane.b32.xlu0 %v2667_v49, %s2040_s28 }
  0xb2   :  { %v2683_v47 = vpop.permute.xlu1 %262  ;;  %v2685_v14 = vpop.permute.xlu0 %260 }
  0xb3   :  { %4575 = vst [vmem:[#allocation96_spill] sm:$0xff] %v2683_v47  ;;  %4576 = vst [vmem:[#allocation97_spill] sm:$0xff] %v2685_v14  ;;  %v2706_v14 = vmul.f32 0.24197073, %v2256_v40  ;;  %v2709_v47 = vmul.f32 0.24197073, %v2261_v41 }
  0xb4   :  { %570 = vrot.lane.b32.xlu1 %v2678_v46, %s2040_s28  ;;  %568 = vrot.lane.b32.xlu0 %v2681_v38, %s2040_s28 }
  0xb6   :  { %v2697_v42 = vpop.permute.xlu1 %266  ;;  %v2699_v43 = vpop.permute.xlu0 %264 }
  0xb7   :  { %4577 = vst [vmem:[#allocation98_spill] sm:$0xff] %v2697_v42  ;;  %4578 = vst [vmem:[#allocation99_spill] sm:$0xff] %v2699_v43  ;;  %v2720_v43 = vmul.f32 0.24197073, %v2276_v44  ;;  %v2723_v42 = vmul.f32 0.24197073, %v2281_v45 }
  0xb8   :  { %574 = vrot.lane.b32.xlu1 %v2692_v30, %s2040_s28  ;;  %572 = vrot.lane.b32.xlu0 %v2695_v22, %s2040_s28 }
  0xba   :  { %v2711_v3 = vpop.permute.xlu1 %270  ;;  %v2713_v6 = vpop.permute.xlu0 %268 }
  0xbb   :  { %4579 = vst [vmem:[#allocation100_spill] sm:$0xff] %v2711_v3  ;;  %4580 = vst [vmem:[#allocation101_spill] sm:$0xff] %v2713_v6  ;;  %v633_v6 = vmul.f32 0.3989423, %v2081_v5  ;;  %v632_v3 = vmul.f32 0.3989423, %v2065_v1 }
  0xbc   :  { %578 = vrot.lane.b32.xlu1 %v2706_v14, %s2040_s28  ;;  %576 = vrot.lane.b32.xlu0 %v2709_v47, %s2040_s28  ;;  %v637_v1 = vmul.f32 0.3989423, %v2096_v8  ;;  %v636_v5 = vmul.f32 0.3989423, %v2101_v9  ;;  %v640_v8 = vmul.f32 0.3989423, %v2141_v17 }
  0xbe   :  { %v2725_v7 = vpop.permute.xlu1 %274  ;;  %v2727_v4 = vpop.permute.xlu0 %272 }
  0xbf   :  { %4581 = vst [vmem:[#allocation102_spill] sm:$0xff] %v2725_v7  ;;  %4582 = vst [vmem:[#allocation103_spill] sm:$0xff] %v2727_v4  ;;  %v635_v4 = vmul.f32 0.3989423, %v2070_v2  ;;  %v634_v7 = vmul.f32 0.3989423, %v2060_v0 }
  0xc0   :  { %582 = vrot.lane.b32.xlu1 %v2720_v43, %s2040_s28  ;;  %580 = vrot.lane.b32.xlu0 %v2723_v42, %s2040_s28  ;;  %v639_v0 = vmul.f32 0.3989423, %v2116_v12  ;;  %v638_v2 = vmul.f32 0.3989423, %v2121_v13  ;;  %v643_v12 = vmul.f32 0.3989423, %v2156_v20 }
  0xc1   :  { %v642_v13 = vmul.f32 0.3989423, %v2161_v21  ;;  %v647_v20 = vmul.f32 0.3989423, %v2196_v28  ;;  %v646_v21 = vmul.f32 0.3989423, %v2201_v29 }
  0xc2   :  { %v2735_v10 = vpop.permute.xlu1 %278  ;;  %v2737_v11 = vpop.permute.xlu0 %276 }
  0xc3   :  { %4583 = vst [vmem:[#allocation104_spill] sm:$0xff] %v2735_v10  ;;  %4584 = vst [vmem:[#allocation105_spill] sm:$0xff] %v2737_v11 }
  0xc4   :  { %682 = vrot.lane.b32.xlu1 %v633_v6, %s2041_s29  ;;  %680 = vrot.lane.b32.xlu0 %v632_v3, %s2041_s29 }
  0xc6   :  { %v2743_v19 = vpop.permute.xlu1 %282  ;;  %v2745_v15 = vpop.permute.xlu0 %280 }
  0xc7   :  { %4585 = vst [vmem:[#allocation106_spill] sm:$0xff] %v2743_v19  ;;  %4586 = vst [vmem:[#allocation107_spill] sm:$0xff] %v2745_v15  ;;  %v652_v19 = vmul.f32 0.3989423, %v2261_v41 }
  0xc8   :  { %686 = vrot.lane.b32.xlu1 %v635_v4, %s2041_s29  ;;  %684 = vrot.lane.b32.xlu0 %v634_v7, %s2041_s29  ;;  %v641_v7 = vmul.f32 0.3989423, %v2136_v16  ;;  %v645_v16 = vmul.f32 0.3989423, %v2176_v24 }
  0xca   :  { %v2751_v11 = vpop.permute.xlu1 %286  ;;  %v2753_v6 = vpop.permute.xlu0 %284 }
  0xcb   :  { %4587 = vst [vmem:[#allocation108_spill] sm:$0xff] %v2751_v11  ;;  %4588 = vst [vmem:[#allocation109_spill] sm:$0xff] %v2753_v6  ;;  %v650_v11 = vmul.f32 0.3989423, %v2241_v37  ;;  %v654_v37 = vmul.f32 0.3989423, %v2281_v45 }
  0xcc   :  { %690 = vrot.lane.b32.xlu1 %v637_v1, %s2041_s29  ;;  %688 = vrot.lane.b32.xlu0 %v636_v5, %s2041_s29 }
  0xce   :  { %v2759_v3 = vpop.permute.xlu1 %290  ;;  %v2761_v4 = vpop.permute.xlu0 %288 }
  0xcf   :  { %4589 = vst [vmem:[#allocation110_spill] sm:$0xff] %v2759_v3  ;;  %4590 = vst [vmem:[#allocation111_spill] sm:$0xff] %v2761_v4  ;;  %v648_v3 = vmul.f32 0.3989423, %v2221_v33 }
  0xd0   :  { %694 = vrot.lane.b32.xlu1 %v639_v0, %s2041_s29  ;;  %692 = vrot.lane.b32.xlu0 %v638_v2, %s2041_s29  ;;  %v644_v2 = vmul.f32 0.3989423, %v2181_v25 }
  0xd2   :  { %v2767_v9 = vpop.permute.xlu1 %294  ;;  %v2769_v1 = vpop.permute.xlu0 %292 }
  0xd4   :  { %698 = vrot.lane.b32.xlu1 %v641_v7, %s2041_s29  ;;  %696 = vrot.lane.b32.xlu0 %v640_v8, %s2041_s29 }
  0xd6   :  { %v2775_v5 = vpop.permute.xlu1 %394  ;;  %v2777_v0 = vpop.permute.xlu0 %392 }
  0xd8   :  { %702 = vrot.lane.b32.xlu1 %v643_v12, %s2041_s29  ;;  %700 = vrot.lane.b32.xlu0 %v642_v13, %s2041_s29  ;;  %v649_v13 = vmul.f32 0.3989423, %v2216_v32 }
  0xda   :  { %v2783_v4 = vpop.permute.xlu1 %398  ;;  %v2785_v7 = vpop.permute.xlu0 %396 }
  0xdc   :  { %706 = vrot.lane.b32.xlu1 %v645_v16, %s2041_s29  ;;  %704 = vrot.lane.b32.xlu0 %v644_v2, %s2041_s29  ;;  %v651_v2 = vmul.f32 0.3989423, %v2236_v36  ;;  %v655_v36 = vmul.f32 0.3989423, %v2276_v44 }
  0xde   :  { %v2791_v8 = vpop.permute.xlu1 %402  ;;  %v2793_v12 = vpop.permute.xlu0 %400 }
  0xe0   :  { %710 = vrot.lane.b32.xlu1 %v647_v20, %s2041_s29  ;;  %708 = vrot.lane.b32.xlu0 %v646_v21, %s2041_s29  ;;  %v653_v21 = vmul.f32 0.3989423, %v2256_v40 }
  0xe2   :  { %v2799_v6 = vpop.permute.xlu1 %406  ;;  %v2801_v16 = vpop.permute.xlu0 %404 }
  0xe3   :  { %4591 = vst [vmem:[#allocation112_spill] sm:$0xff] %v2799_v6  ;;  %4592 = vst [vmem:[#allocation113_spill] sm:$0xff] %v2801_v16  ;;  %v4743_v16 = vld [vmem:[#allocation54_spill] sm:$0xff]  ;;  %v4744_v6 = vld [vmem:[#allocation55_spill] sm:$0xff] }
  0xe4   :  { %714 = vrot.lane.b32.xlu1 %v649_v13, %s2041_s29  ;;  %712 = vrot.lane.b32.xlu0 %v648_v3, %s2041_s29 }
  0xe6   :  { %v2807_v15 = vpop.permute.xlu1 %410  ;;  %v2809_v20 = vpop.permute.xlu0 %408 }
  0xe7   :  { %4593 = vst [vmem:[#allocation114_spill] sm:$0xff] %v2807_v15  ;;  %4594 = vst [vmem:[#allocation115_spill] sm:$0xff] %v2809_v20 }
  0xe8   :  { %718 = vrot.lane.b32.xlu1 %v651_v2, %s2041_s29  ;;  %716 = vrot.lane.b32.xlu0 %v650_v11, %s2041_s29 }
  0xea   :  { %v2815_v10 = vpop.permute.xlu1 %414  ;;  %v2817_v13 = vpop.permute.xlu0 %412 }
  0xeb   :  { %4595 = vst [vmem:[#allocation116_spill] sm:$0xff] %v2815_v10  ;;  %4596 = vst [vmem:[#allocation117_spill] sm:$0xff] %v2817_v13  ;;  %v4717_v10 = vld [vmem:[#allocation19_spill] sm:$0xff] }
  0xec   :  { %722 = vrot.lane.b32.xlu1 %v653_v21, %s2041_s29  ;;  %720 = vrot.lane.b32.xlu0 %v652_v19, %s2041_s29 }
  0xee   :  { %v2823_v3 = vpop.permute.xlu1 %418  ;;  %v2825_v2 = vpop.permute.xlu0 %416 }
  0xef   :  { %4597 = vst [vmem:[#allocation118_spill] sm:$0xff] %v2823_v3  ;;  %4598 = vst [vmem:[#allocation119_spill] sm:$0xff] %v2825_v2  ;;  %v4681_v3 = vld [vmem:[#allocation42_spill] sm:$0xff] }
  0xf0   :  { %726 = vrot.lane.b32.xlu1 %v655_v36, %s2041_s29  ;;  %724 = vrot.lane.b32.xlu0 %v654_v37, %s2041_s29  ;;  %v4625_v37 = vld [vmem:[#allocation50_spill] sm:$0xff] }
  0xf2   :  { %v2829_v11 = vpop.permute.xlu1 %422  ;;  %v2831_v40 = vpop.permute.xlu0 %420 }
  0xf3   :  { %4599 = vst [vmem:[#allocation120_spill] sm:$0xff] %v2829_v11  ;;  %4600 = vst [vmem:[#allocation121_spill] sm:$0xff] %v2831_v40  ;;  %v4661_v11 = vld [vmem:[#allocation30_spill] sm:$0xff] }
  0xf4   :  { %778 = vrot.lane.b32.xlu1 %v2566_v62, %s2042_s30  ;;  %776 = vrot.lane.b32.xlu0 %v2569_v63, %s2042_s30 }
  0xf6   :  { %v2837_v19 = vpop.permute.xlu1 %426  ;;  %v2839_v41 = vpop.permute.xlu0 %424 }
  0xf7   :  { %4601 = vst [vmem:[#allocation122_spill] sm:$0xff] %v2837_v19  ;;  %4602 = vst [vmem:[#allocation123_spill] sm:$0xff] %v2839_v41  ;;  %v4645_v19 = vld [vmem:[#allocation72_spill] sm:$0xff] }
  0xf8   :  { %782 = vrot.lane.b32.xlu1 %v2580_v60, %s2042_s30  ;;  %780 = vrot.lane.b32.xlu0 %v2583_v61, %s2042_s30 }
  0xfa   :  { %v2845_v21 = vpop.permute.xlu1 %430  ;;  %v2847_v36 = vpop.permute.xlu0 %428 }
  0xfb   :  { %4603 = vst [vmem:[#allocation124_spill] sm:$0xff] %v2845_v21  ;;  %4604 = vst [vmem:[#allocation125_spill] sm:$0xff] %v2847_v36  ;;  %v4637_v21 = vld [vmem:[#allocation64_spill] sm:$0xff] }
  0xfc   :  { %786 = vrot.lane.b32.xlu1 %v2594_v58, %s2042_s30  ;;  %784 = vrot.lane.b32.xlu0 %v2597_v59, %s2042_s30 }
  0xfe   :  { %v2853_v62 = vpop.permute.xlu1 %434  ;;  %v2855_v63 = vpop.permute.xlu0 %432 }
  0xff   :  { %4605 = vst [vmem:[#allocation126_spill] sm:$0xff] %v2853_v62  ;;  %4606 = vst [vmem:[#allocation127_spill] sm:$0xff] %v2855_v63  ;;  %v4629_v62 = vld [vmem:[#allocation56_spill] sm:$0xff] }
 0x100   :  { %790 = vrot.lane.b32.xlu1 %v2608_v56, %s2042_s30  ;;  %788 = vrot.lane.b32.xlu0 %v2611_v57, %s2042_s30 }
 0x102   :  { %v2861_v60 = vpop.permute.xlu1 %438  ;;  %v2863_v61 = vpop.permute.xlu0 %436 }
 0x104   :  { %794 = vrot.lane.b32.xlu1 %v2622_v54, %s2042_s30  ;;  %792 = vrot.lane.b32.xlu0 %v2625_v55, %s2042_s30 }
 0x106   :  { %v2869_v58 = vpop.permute.xlu1 %538  ;;  %v2871_v59 = vpop.permute.xlu0 %536 }
 0x108   :  { %798 = vrot.lane.b32.xlu1 %v2636_v52, %s2042_s30  ;;  %796 = vrot.lane.b32.xlu0 %v2639_v53, %s2042_s30 }
 0x10a   :  { %v2877_v56 = vpop.permute.xlu1 %542  ;;  %v2879_v57 = vpop.permute.xlu0 %540 }
 0x10c   :  { %802 = vrot.lane.b32.xlu1 %v2650_v50, %s2042_s30  ;;  %800 = vrot.lane.b32.xlu0 %v2653_v51, %s2042_s30 }
 0x10e   :  { %v2885_v54 = vpop.permute.xlu1 %546  ;;  %v2887_v55 = vpop.permute.xlu0 %544 }
 0x10f   :  { %4607 = vst [vmem:[#allocation128_spill] sm:$0xff] %v2885_v54  ;;  %4608 = vst [vmem:[#allocation129_spill] sm:$0xff] %v2887_v55 }
 0x110   :  { %806 = vrot.lane.b32.xlu1 %v2664_v48, %s2042_s30  ;;  %804 = vrot.lane.b32.xlu0 %v2667_v49, %s2042_s30 }
 0x112   :  { %v2893_v52 = vpop.permute.xlu1 %550  ;;  %v2895_v53 = vpop.permute.xlu0 %548 }
 0x113   :  { %4609 = vst [vmem:[#allocation130_spill] sm:$0xff] %v2893_v52  ;;  %4610 = vst [vmem:[#allocation131_spill] sm:$0xff] %v2895_v53  ;;  %v45_v53 = vmul.f32 1.4867195e-06, %v2176_v24 }
 0x114   :  { %810 = vrot.lane.b32.xlu1 %v2678_v46, %s2042_s30  ;;  %808 = vrot.lane.b32.xlu0 %v2681_v38, %s2042_s30 }
 0x116   :  { %v2901_v50 = vpop.permute.xlu1 %554  ;;  %v2903_v51 = vpop.permute.xlu0 %552 }
 0x117   :  { %4611 = vst [vmem:[#allocation132_spill] sm:$0xff] %v2901_v50  ;;  %4612 = vst [vmem:[#allocation133_spill] sm:$0xff] %v2903_v51  ;;  %v4725_v50 = vld [vmem:[#allocation22_spill] sm:$0xff] }
 0x118   :  { %814 = vrot.lane.b32.xlu1 %v2692_v30, %s2042_s30  ;;  %812 = vrot.lane.b32.xlu0 %v2695_v22, %s2042_s30 }
 0x11a   :  { %v2909_v48 = vpop.permute.xlu1 %558  ;;  %v2911_v49 = vpop.permute.xlu0 %556 }
 0x11b   :  { %4613 = vst [vmem:[#allocation134_spill] sm:$0xff] %v2909_v48  ;;  %4614 = vst [vmem:[#allocation135_spill] sm:$0xff] %v2911_v49  ;;  %v4685_v48 = vld [vmem:[#allocation44_spill] sm:$0xff] }
 0x11c   :  { %818 = vrot.lane.b32.xlu1 %v2706_v14, %s2042_s30  ;;  %816 = vrot.lane.b32.xlu0 %v2709_v47, %s2042_s30 }
 0x11e   :  { %v2917_v38 = vpop.permute.xlu1 %562  ;;  %v2919_v46 = vpop.permute.xlu0 %560 }
 0x11f   :  { %4615 = vst [vmem:[#allocation136_spill] sm:$0xff] %v2917_v38  ;;  %4616 = vst [vmem:[#allocation137_spill] sm:$0xff] %v2919_v46  ;;  %v4673_v38 = vld [vmem:[#allocation38_spill] sm:$0xff] }
 0x120   :  { %822 = vrot.lane.b32.xlu1 %v2720_v43, %s2042_s30  ;;  %820 = vrot.lane.b32.xlu0 %v2723_v42, %s2042_s30 }
 0x122   :  { %v2925_v22 = vpop.permute.xlu1 %566  ;;  %v2927_v30 = vpop.permute.xlu0 %564 }
 0x123   :  { %4617 = vst [vmem:[#allocation138_spill] sm:$0xff] %v2925_v22  ;;  %4618 = vst [vmem:[#allocation139_spill] sm:$0xff] %v2927_v30  ;;  %v4649_v22 = vld [vmem:[#allocation76_spill] sm:$0xff] }
 0x124   :  { %874 = vrot.lane.b32.xlu1 %v2418_v34, %s2043_s2  ;;  %872 = vrot.lane.b32.xlu0 %v2421_v39, %s2043_s2 }
 0x126   :  { %v2933_v14 = vpop.permute.xlu1 %570  ;;  %v2935_v47 = vpop.permute.xlu0 %568 }
 0x127   :  { %4619 = vst [vmem:[#allocation140_spill] sm:$0xff] %v2933_v14  ;;  %4620 = vst [vmem:[#allocation141_spill] sm:$0xff] %v2935_v47  ;;  %v4641_v14 = vld [vmem:[#allocation68_spill] sm:$0xff] }
 0x128   :  { %878 = vrot.lane.b32.xlu1 %v2428_v31, %s2043_s2  ;;  %876 = vrot.lane.b32.xlu0 %v2431_v35, %s2043_s2 }
 0x12a   :  { %v2941_v42 = vpop.permute.xlu1 %574  ;;  %v2943_v43 = vpop.permute.xlu0 %572 }
 0x12b   :  { %4621 = vst [vmem:[#allocation142_spill] sm:$0xff] %v2941_v42  ;;  %4622 = vst [vmem:[#allocation143_spill] sm:$0xff] %v2943_v43  ;;  %v4633_v42 = vld [vmem:[#allocation60_spill] sm:$0xff] }
 0x12c   :  { %882 = vrot.lane.b32.xlu1 %v2438_v27, %s2043_s2  ;;  %880 = vrot.lane.b32.xlu0 %v2441_v26, %s2043_s2  ;;  %v4626_v27 = vld [vmem:[#allocation51_spill] sm:$0xff] }
 0x12e   :  { %v2949_v34 = vpop.permute.xlu1 %578  ;;  %v2951_v39 = vpop.permute.xlu0 %576 }
 0x12f   :  { %4623 = vst [vmem:[#allocation144_spill] sm:$0xff] %v2949_v34  ;;  %4624 = vst [vmem:[#allocation145_spill] sm:$0xff] %v2951_v39  ;;  %v4627_v39 = vld [vmem:[#allocation52_spill] sm:$0xff] }
 0x130   :  { %886 = vrot.lane.b32.xlu1 %v2448_v18, %s2043_s2  ;;  %884 = vrot.lane.b32.xlu0 %v2451_v23, %s2043_s2  ;;  %v4628_v18 = vld [vmem:[#allocation53_spill] sm:$0xff] }
 0x132   :  { %v2957_v31 = vpop.permute.xlu1 %582  ;;  %v2959_v35 = vpop.permute.xlu0 %580 }
 0x134   :  { %890 = vrot.lane.b32.xlu1 %v4625_v37, %s2043_s2  ;;  %888 = vrot.lane.b32.xlu0 %v4626_v27, %s2043_s2  ;;  %v4630_v37 = vld [vmem:[#allocation57_spill] sm:$0xff] }
 0x136   :  { %v2965_v26 = vpop.permute.xlu1 %682  ;;  %v2967_v34 = vpop.permute.xlu0 %680 }
 0x138   :  { %894 = vrot.lane.b32.xlu1 %v4627_v39, %s2043_s2  ;;  %892 = vrot.lane.b32.xlu0 %v4628_v18, %s2043_s2  ;;  %v4634_v39 = vld [vmem:[#allocation61_spill] sm:$0xff] }
 0x13a   :  { %v2973_v23 = vpop.permute.xlu1 %686  ;;  %v2975_v63 = vpop.permute.xlu0 %684 }
 0x13c   :  { %898 = vrot.lane.b32.xlu1 %v4629_v62, %s2043_s2  ;;  %896 = vrot.lane.b32.xlu0 %v4630_v37, %s2043_s2  ;;  %v4638_v62 = vld [vmem:[#allocation65_spill] sm:$0xff] }
 0x13e   :  { %v2981_v27 = vpop.permute.xlu1 %690  ;;  %v2983_v43 = vpop.permute.xlu0 %688 }
 0x13f   :  { %4631 = vst [vmem:[#allocation50_spill] sm:$0xff] %v2981_v27  ;;  %4632 = vst [vmem:[#allocation51_spill] sm:$0xff] %v2983_v43  ;;  %v4742_v27 = vld [vmem:[#allocation89_spill] sm:$0xff] }
 0x140   :  { %902 = vrot.lane.b32.xlu1 %v4633_v42, %s2043_s2  ;;  %900 = vrot.lane.b32.xlu0 %v4634_v39, %s2043_s2  ;;  %v4642_v42 = vld [vmem:[#allocation69_spill] sm:$0xff] }
 0x142   :  { %v2989_v18 = vpop.permute.xlu1 %694  ;;  %v2991_v36 = vpop.permute.xlu0 %692 }
 0x143   :  { %4635 = vst [vmem:[#allocation52_spill] sm:$0xff] %v2989_v18  ;;  %4636 = vst [vmem:[#allocation53_spill] sm:$0xff] %v2991_v36 }
 0x144   :  { %906 = vrot.lane.b32.xlu1 %v4637_v21, %s2043_s2  ;;  %904 = vrot.lane.b32.xlu0 %v4638_v62, %s2043_s2  ;;  %v4646_v21 = vld [vmem:[#allocation73_spill] sm:$0xff] }
 0x146   :  { %v2997_v37 = vpop.permute.xlu1 %698  ;;  %v2999_v47 = vpop.permute.xlu0 %696 }
 0x147   :  { %4639 = vst [vmem:[#allocation56_spill] sm:$0xff] %v2997_v37  ;;  %4640 = vst [vmem:[#allocation57_spill] sm:$0xff] %v2999_v47  ;;  %v4689_v37 = vld [vmem:[#allocation46_spill] sm:$0xff] }
 0x148   :  { %910 = vrot.lane.b32.xlu1 %v4641_v14, %s2043_s2  ;;  %908 = vrot.lane.b32.xlu0 %v4642_v42, %s2043_s2  ;;  %v4650_v14 = vld [vmem:[#allocation77_spill] sm:$0xff] }
 0x14a   :  { %v3005_v39 = vpop.permute.xlu1 %702  ;;  %v3007_v41 = vpop.permute.xlu0 %700 }
 0x14b   :  { %4643 = vst [vmem:[#allocation60_spill] sm:$0xff] %v3005_v39  ;;  %4644 = vst [vmem:[#allocation61_spill] sm:$0xff] %v3007_v41  ;;  %v4677_v39 = vld [vmem:[#allocation40_spill] sm:$0xff] }
 0x14c   :  { %914 = vrot.lane.b32.xlu1 %v4645_v19, %s2043_s2  ;;  %912 = vrot.lane.b32.xlu0 %v4646_v21, %s2043_s2  ;;  %v4653_v19 = vld [vmem:[#allocation26_spill] sm:$0xff]  ;;  %v4654_v21 = vld [vmem:[#allocation27_spill] sm:$0xff] }
 0x14e   :  { %v3013_v62 = vpop.permute.xlu1 %706  ;;  %v3015_v30 = vpop.permute.xlu0 %704 }
 0x14f   :  { %4647 = vst [vmem:[#allocation64_spill] sm:$0xff] %v3013_v62  ;;  %4648 = vst [vmem:[#allocation65_spill] sm:$0xff] %v3015_v30 }
 0x150   :  { %918 = vrot.lane.b32.xlu1 %v4649_v22, %s2043_s2  ;;  %916 = vrot.lane.b32.xlu0 %v4650_v14, %s2043_s2  ;;  %v4657_v22 = vld [vmem:[#allocation28_spill] sm:$0xff]  ;;  %v4658_v14 = vld [vmem:[#allocation29_spill] sm:$0xff] }
 0x152   :  { %v3021_v42 = vpop.permute.xlu1 %710  ;;  %v3023_v40 = vpop.permute.xlu0 %708 }
 0x153   :  { %4651 = vst [vmem:[#allocation68_spill] sm:$0xff] %v3021_v42  ;;  %4652 = vst [vmem:[#allocation69_spill] sm:$0xff] %v3023_v40 }
 0x154   :  { %970 = vrot.lane.b32.xlu1 %v4653_v19, %s2044_s3  ;;  %968 = vrot.lane.b32.xlu0 %v4654_v21, %s2044_s3  ;;  %v4662_v19 = vld [vmem:[#allocation31_spill] sm:$0xff] }
 0x156   :  { %v3029_v62 = vpop.permute.xlu1 %714  ;;  %v3031_v30 = vpop.permute.xlu0 %712 }
 0x157   :  { %4655 = vst [vmem:[#allocation72_spill] sm:$0xff] %v3029_v62  ;;  %4656 = vst [vmem:[#allocation73_spill] sm:$0xff] %v3031_v30  ;;  %v4665_v30 = vld [vmem:[#allocation32_spill] sm:$0xff] }
 0x158   :  { %974 = vrot.lane.b32.xlu1 %v4657_v22, %s2044_s3  ;;  %972 = vrot.lane.b32.xlu0 %v4658_v14, %s2044_s3  ;;  %v4666_v22 = vld [vmem:[#allocation33_spill] sm:$0xff] }
 0x15a   :  { %v3037_v42 = vpop.permute.xlu1 %718  ;;  %v3039_v40 = vpop.permute.xlu0 %716 }
 0x15b   :  { %4659 = vst [vmem:[#allocation76_spill] sm:$0xff] %v3037_v42  ;;  %4660 = vst [vmem:[#allocation77_spill] sm:$0xff] %v3039_v40  ;;  %v4667_v40 = vld [vmem:[#allocation34_spill] sm:$0xff] }
 0x15c   :  { %978 = vrot.lane.b32.xlu1 %v4661_v11, %s2044_s3  ;;  %976 = vrot.lane.b32.xlu0 %v4662_v19, %s2044_s3  ;;  %v4668_v11 = vld [vmem:[#allocation35_spill] sm:$0xff] }
 0x15e   :  { %v3045_v21 = vpop.permute.xlu1 %722  ;;  %v3047_v62 = vpop.permute.xlu0 %720 }
 0x15f   :  { %4663 = vst [vmem:[#allocation26_spill] sm:$0xff] %v3045_v21  ;;  %4664 = vst [vmem:[#allocation27_spill] sm:$0xff] %v3047_v62  ;;  %v4669_v62 = vld [vmem:[#allocation36_spill] sm:$0xff] }
 0x160   :  { %982 = vrot.lane.b32.xlu1 %v4665_v30, %s2044_s3  ;;  %980 = vrot.lane.b32.xlu0 %v4666_v22, %s2044_s3  ;;  %v4670_v30 = vld [vmem:[#allocation37_spill] sm:$0xff] }
 0x162   :  { %v3053_v14 = vpop.permute.xlu1 %726  ;;  %v3055_v42 = vpop.permute.xlu0 %724 }
 0x164   :  { %986 = vrot.lane.b32.xlu1 %v4667_v40, %s2044_s3  ;;  %984 = vrot.lane.b32.xlu0 %v4668_v11, %s2044_s3  ;;  %v4674_v40 = vld [vmem:[#allocation39_spill] sm:$0xff] }
 0x166   :  { %v3061_v19 = vpop.permute.xlu1 %778  ;;  %v3063_v21 = vpop.permute.xlu0 %776 }
 0x168   :  { %990 = vrot.lane.b32.xlu1 %v4669_v62, %s2044_s3  ;;  %988 = vrot.lane.b32.xlu0 %v4670_v30, %s2044_s3  ;;  %v4678_v62 = vld [vmem:[#allocation41_spill] sm:$0xff] }
 0x16a   :  { %v3069_v22 = vpop.permute.xlu1 %782  ;;  %v3071_v46 = vpop.permute.xlu0 %780 }
 0x16b   :  { %4671 = vst [vmem:[#allocation28_spill] sm:$0xff] %v3069_v22  ;;  %4672 = vst [vmem:[#allocation29_spill] sm:$0xff] %v3071_v46  ;;  %v4750_v46 = vld [vmem:[#allocation67_spill] sm:$0xff] }
 0x16c   :  { %994 = vrot.lane.b32.xlu1 %v4673_v38, %s2044_s3  ;;  %992 = vrot.lane.b32.xlu0 %v4674_v40, %s2044_s3  ;;  %v4682_v38 = vld [vmem:[#allocation43_spill] sm:$0xff] }
 0x16e   :  { %v3077_v11 = vpop.permute.xlu1 %786  ;;  %v3079_v41 = vpop.permute.xlu0 %784 }
 0x16f   :  { %4675 = vst [vmem:[#allocation30_spill] sm:$0xff] %v3077_v11  ;;  %4676 = vst [vmem:[#allocation31_spill] sm:$0xff] %v3079_v41 }
 0x170   :  { %998 = vrot.lane.b32.xlu1 %v4677_v39, %s2044_s3  ;;  %996 = vrot.lane.b32.xlu0 %v4678_v62, %s2044_s3  ;;  %v4686_v39 = vld [vmem:[#allocation45_spill] sm:$0xff] }
 0x172   :  { %v3085_v30 = vpop.permute.xlu1 %790  ;;  %v3087_v2 = vpop.permute.xlu0 %788 }
 0x173   :  { %4679 = vst [vmem:[#allocation32_spill] sm:$0xff] %v3085_v30  ;;  %4680 = vst [vmem:[#allocation33_spill] sm:$0xff] %v3087_v2  ;;  %v4721_v30 = vld [vmem:[#allocation21_spill] sm:$0xff] }
 0x174   :  { %1002 = vrot.lane.b32.xlu1 %v4681_v3, %s2044_s3  ;;  %1000 = vrot.lane.b32.xlu0 %v4682_v38, %s2044_s3  ;;  %v4690_v3 = vld [vmem:[#allocation47_spill] sm:$0xff] }
 0x176   :  { %v3093_v40 = vpop.permute.xlu1 %794  ;;  %v3095_v49 = vpop.permute.xlu0 %792 }
 0x177   :  { %4683 = vst [vmem:[#allocation34_spill] sm:$0xff] %v3093_v40  ;;  %4684 = vst [vmem:[#allocation35_spill] sm:$0xff] %v3095_v49  ;;  %v4693_v49 = vld [vmem:[#allocation48_spill] sm:$0xff] }
 0x178   :  { %1006 = vrot.lane.b32.xlu1 %v4685_v48, %s2044_s3  ;;  %1004 = vrot.lane.b32.xlu0 %v4686_v39, %s2044_s3  ;;  %v4694_v48 = vld [vmem:[#allocation49_spill] sm:$0xff] }
 0x17a   :  { %v3101_v62 = vpop.permute.xlu1 %798  ;;  %v3103_v47 = vpop.permute.xlu0 %796 }
 0x17b   :  { %4687 = vst [vmem:[#allocation36_spill] sm:$0xff] %v3101_v62  ;;  %4688 = vst [vmem:[#allocation37_spill] sm:$0xff] %v3103_v47  ;;  %v4705_v47 = vld [vmem:[#allocation6_spill] sm:$0xff] }
 0x17c   :  { %1010 = vrot.lane.b32.xlu1 %v4689_v37, %s2044_s3  ;;  %1008 = vrot.lane.b32.xlu0 %v4690_v3, %s2044_s3  ;;  %v4697_v37 = vld [vmem:[#allocation5_spill] sm:$0xff]  ;;  %v4698_v3 = vld [vmem:[#allocation3_spill] sm:$0xff] }
 0x17e   :  { %v3109_v38 = vpop.permute.xlu1 %802  ;;  %v3111_v40 = vpop.permute.xlu0 %800 }
 0x17f   :  { %4691 = vst [vmem:[#allocation38_spill] sm:$0xff] %v3109_v38  ;;  %4692 = vst [vmem:[#allocation39_spill] sm:$0xff] %v3111_v40 }
 0x180   :  { %1014 = vrot.lane.b32.xlu1 %v4693_v49, %s2044_s3  ;;  %1012 = vrot.lane.b32.xlu0 %v4694_v48, %s2044_s3  ;;  %v4701_v49 = vld [vmem:[#allocation4_spill] sm:$0xff]  ;;  %v4702_v48 = vld [vmem:[#allocation2_spill] sm:$0xff] }
 0x182   :  { %v3117_v39 = vpop.permute.xlu1 %806  ;;  %v3119_v62 = vpop.permute.xlu0 %804 }
 0x183   :  { %4695 = vst [vmem:[#allocation40_spill] sm:$0xff] %v3117_v39  ;;  %4696 = vst [vmem:[#allocation41_spill] sm:$0xff] %v3119_v62 }
 0x184   :  { %1066 = vrot.lane.b32.xlu1 %v4697_v37, %s2045_s4  ;;  %1064 = vrot.lane.b32.xlu0 %v4698_v3, %s2045_s4  ;;  %v4706_v37 = vld [vmem:[#allocation7_spill] sm:$0xff] }
 0x186   :  { %v3125_v38 = vpop.permute.xlu1 %810  ;;  %v3127_v40 = vpop.permute.xlu0 %808 }
 0x187   :  { %4699 = vst [vmem:[#allocation42_spill] sm:$0xff] %v3125_v38  ;;  %4700 = vst [vmem:[#allocation43_spill] sm:$0xff] %v3127_v40  ;;  %v4709_v40 = vld [vmem:[#allocation11_spill] sm:$0xff] }
 0x188   :  { %1070 = vrot.lane.b32.xlu1 %v4701_v49, %s2045_s4  ;;  %1068 = vrot.lane.b32.xlu0 %v4702_v48, %s2045_s4  ;;  %v4710_v49 = vld [vmem:[#allocation9_spill] sm:$0xff] }
 0x18a   :  { %v3133_v39 = vpop.permute.xlu1 %814  ;;  %v3135_v62 = vpop.permute.xlu0 %812 }
 0x18b   :  { %4703 = vst [vmem:[#allocation44_spill] sm:$0xff] %v3133_v39  ;;  %4704 = vst [vmem:[#allocation45_spill] sm:$0xff] %v3135_v62  ;;  %v4711_v62 = vld [vmem:[#allocation13_spill] sm:$0xff] }
 0x18c   :  { %1074 = vrot.lane.b32.xlu1 %v4705_v47, %s2045_s4  ;;  %1072 = vrot.lane.b32.xlu0 %v4706_v37, %s2045_s4  ;;  %v4712_v47 = vld [vmem:[#allocation10_spill] sm:$0xff] }
 0x18e   :  { %v3141_v3 = vpop.permute.xlu1 %818  ;;  %v3143_v38 = vpop.permute.xlu0 %816 }
 0x18f   :  { %4707 = vst [vmem:[#allocation46_spill] sm:$0xff] %v3141_v3  ;;  %4708 = vst [vmem:[#allocation47_spill] sm:$0xff] %v3143_v38  ;;  %v4713_v38 = vld [vmem:[#allocation14_spill] sm:$0xff] }
 0x190   :  { %1080 = vrot.lane.b32.xlu1 %v4709_v40, %s2045_s4  ;;  %1076 = vrot.lane.b32.xlu0 %v4710_v49, %s2045_s4  ;;  %v4714_v40 = vld [vmem:[#allocation15_spill] sm:$0xff] }
 0x192   :  { %v3149_v48 = vpop.permute.xlu1 %822  ;;  %v3151_v39 = vpop.permute.xlu0 %820 }
 0x194   :  { %1084 = vrot.lane.b32.xlu1 %v4711_v62, %s2045_s4  ;;  %1082 = vrot.lane.b32.xlu0 %v4712_v47, %s2045_s4  ;;  %v4718_v62 = vld [vmem:[#allocation17_spill] sm:$0xff] }
 0x196   :  { %v3157_v37 = vpop.permute.xlu1 %874  ;;  %v3159_v3 = vpop.permute.xlu0 %872 }
 0x198   :  { %1090 = vrot.lane.b32.xlu1 %v4713_v38, %s2045_s4  ;;  %1088 = vrot.lane.b32.xlu0 %v4714_v40, %s2045_s4  ;;  %v4722_v38 = vld [vmem:[#allocation18_spill] sm:$0xff] }
 0x19a   :  { %v3165_v49 = vpop.permute.xlu1 %878  ;;  %v3167_v13 = vpop.permute.xlu0 %876 }
 0x19b   :  { %4715 = vst [vmem:[#allocation48_spill] sm:$0xff] %v3165_v49  ;;  %4716 = vst [vmem:[#allocation49_spill] sm:$0xff] %v3167_v13  ;;  %v3270_v49 = vmul.f32 1.4867195e-06, %v2201_v29 }
 0x19c   :  { %1096 = vrot.lane.b32.xlu1 %v4717_v10, %s2045_s4  ;;  %1092 = vrot.lane.b32.xlu0 %v4718_v62, %s2045_s4  ;;  %v4726_v10 = vld [vmem:[#allocation23_spill] sm:$0xff]  ;;  %v2022_v62 = vld [vmem:[%s4339_s0] sm:$0xff] }
 0x19e   :  { %v3173_v47 = vpop.permute.xlu1 %882  ;;  %v3175_v2 = vpop.permute.xlu0 %880 }
 0x19f   :  { %4719 = vst [vmem:[#allocation5_spill] sm:$0xff] %v3173_v47  ;;  %4720 = vst [vmem:[#allocation3_spill] sm:$0xff] %v3175_v2  ;;  %v32_v2 = vmul.f32 1.4867195e-06, %v2022_v62 }
 0x1a0   :  { %1100 = vrot.lane.b32.xlu1 %v4721_v30, %s2045_s4  ;;  %1098 = vrot.lane.b32.xlu0 %v4722_v38, %s2045_s4  ;;  %v4729_v38 = vld [vmem:[#allocation25_spill] sm:$0xff] }
 0x1a2   :  { %v3181_v40 = vpop.permute.xlu1 %886  ;;  %v3183_v51 = vpop.permute.xlu0 %884 }
 0x1a3   :  { %4723 = vst [vmem:[#allocation4_spill] sm:$0xff] %v3181_v40  ;;  %4724 = vst [vmem:[#allocation2_spill] sm:$0xff] %v3183_v51  ;;  %v2024_v51 = vld [vmem:[%s4339_s0 + $0x8] sm:$0xff] }
 0x1a4   :  { %1106 = vrot.lane.b32.xlu1 %v4725_v50, %s2045_s4  ;;  %1104 = vrot.lane.b32.xlu0 %v4726_v10, %s2045_s4  ;;  %v2023_v50 = vld [vmem:[%s4339_s0 + $0x10] sm:$0xff]  ;;  %v33_v62 = vmul.f32 1.4867195e-06, %v2024_v51 }
 0x1a5   :  { %v34_v10 = vmul.f32 1.4867195e-06, %v2023_v50  ;;  %v2026_v50 = vld [vmem:[%s4339_s0 + $0x20] sm:$0xff] }
 0x1a6   :  { %v3192_v47 = vpop.permute.xlu1 %890  ;;  %v3194_v30 = vpop.permute.xlu0 %888  ;;  %v36_v36 = vmul.f32 1.4867195e-06, %v2026_v50  ;;  %v3232_v50 = vmul.f32 1.4867195e-06, %v2276_v44  ;;  %v2030_v44 = vld [vmem:[%s4339_s0 + $0x48] sm:$0xff] }
 0x1a7   :  { %4727 = vst [vmem:[#allocation6_spill] sm:$0xff] %v3192_v47  ;;  %4728 = vst [vmem:[#allocation7_spill] sm:$0xff] %v3194_v30  ;;  %v178_v24 = vadd.f32 %v4743_v16, %v34_v10 }
 0x1a8   :  { %1108 = vrot.lane.b32.xlu0 %v4729_v38, %s2045_s4  ;;  %1184 = vrot.lane.b32.xlu1 %v32_v2, %s2046_s7  ;;  %v2025_v38 = vld [vmem:[%s4339_s0 + $0x28] sm:$0xff]  ;;  %4736 = vst [vmem:[#allocation19_spill] sm:$0xff] %v3232_v50 }
 0x1a9   :  { %v37_v30 = vmul.f32 1.4867195e-06, %v2025_v38  ;;  %v40_v38 = vmul.f32 1.4867195e-06, %v2141_v17  ;;  %v2029_v17 = vld [vmem:[%s4339_s0 + $0x38] sm:$0x3] }
 0x1aa   :  { %v3205_v40 = vpop.permute.xlu1 %894  ;;  %v3207_v47 = vpop.permute.xlu0 %892 }
 0x1ab   :  { %4730 = vst [vmem:[#allocation11_spill] sm:$0xff] %v3205_v40  ;;  %4731 = vst [vmem:[#allocation9_spill] sm:$0xff] %v3207_v47  ;;  %v2027_v47 = vld [vmem:[%s4339_s0 + $0x30] sm:$0xff] }
 0x1ac   :  { %1186 = vrot.lane.b32.xlu0 %v33_v62, %s2046_s7  ;;  %1188 = vrot.lane.b32.xlu1 %v34_v10, %s2046_s7  ;;  %v38_v40 = vmul.f32 1.4867195e-06, %v2027_v47  ;;  %v3247_v47 = vmul.f32 1.4867195e-06, %v2029_v17  ;;  %v44_v17 = vmul.f32 1.4867195e-06, %v2181_v25  ;;  %v176_v25 = vadd.f32 %v4744_v6, %v32_v2 }
 0x1ad   :  { %v4747_v6 = vld [vmem:[#allocation62_spill] sm:$0xff] }
 0x1ae   :  { %v3217_v18 = vpop.permute.xlu1 %898  ;;  %v3219_v51 = vpop.permute.xlu0 %896  ;;  %v181_v2 = vadd.f32 %v4747_v6, %v37_v30  ;;  %v182_v22 = vadd.f32 %v4750_v46, %v38_v40  ;;  %v4755_v46 = vld [vmem:[#allocation74_spill] sm:$0xff] }
 0x1af   :  { %4732 = vst [vmem:[#allocation13_spill] sm:$0xff] %v3217_v18  ;;  %4733 = vst [vmem:[#allocation10_spill] sm:$0xff] %v3219_v51  ;;  %v3235_v51 = vmul.f32 1.4867195e-06, %v2281_v45  ;;  %v2028_v18 = vld [vmem:[%s4339_s0 + $0x18] sm:$0x3] }
 0x1b0   :  { %1192 = vrot.lane.b32.xlu0 %v36_v36, %s2046_s7  ;;  %1194 = vrot.lane.b32.xlu1 %v37_v30, %s2046_s7  ;;  %v3240_v41 = vmul.f32 1.4867195e-06, %v2028_v18  ;;  %v41_v45 = vmul.f32 1.4867195e-06, %v2030_v44  ;;  %v2031_v18 = vld [vmem:[%s4339_s0 + $0x58] sm:$0x3] }
 0x1b1   :  { %4737 = vst [vmem:[#allocation17_spill] sm:$0xff] %v3235_v51  ;;  %v3267_v44 = vmul.f32 1.4867195e-06, %v2196_v28  ;;  %v4745_v28 = vld [vmem:[#allocation58_spill] sm:$0xff] }
 0x1b2   :  { %v3227_v20 = vpop.permute.xlu1 %902  ;;  %v3229_v15 = vpop.permute.xlu0 %900  ;;  %4738 = vst [vmem:[#allocation21_spill] sm:$0xff] %v3240_v41  ;;  %v179_v29 = vadd.f32 %v4745_v28, %v3240_v41  ;;  %v4751_v28 = vld [vmem:[#allocation90_spill] sm:$0xff] }
 0x1b3   :  { %4734 = vst [vmem:[#allocation14_spill] sm:$0xff] %v3227_v20  ;;  %4735 = vst [vmem:[#allocation15_spill] sm:$0xff] %v3229_v15  ;;  %v3255_v15 = vmul.f32 1.4867195e-06, %v2031_v18  ;;  %v2032_v20 = vld [vmem:[%s4339_s0 + $0x50] sm:$0xff] }
 0x1b4   :  { %1196 = vrot.lane.b32.xlu0 %v38_v40, %s2046_s7  ;;  %1200 = vrot.lane.b32.xlu1 %v40_v38, %s2046_s7  ;;  %v42_v11 = vmul.f32 1.4867195e-06, %v2032_v20  ;;  %v4741_v18 = vld [vmem:[#allocation88_spill] sm:$0xff]  ;;  %v198_v20 = vadd.f32 %v4742_v27, %v3235_v51 }
 0x1b5   :  { %v199_v43 = vadd.f32 %v4741_v18, %v3232_v50  ;;  %v4746_v18 = vld [vmem:[#allocation59_spill] sm:$0xff]  ;;  %v3312_v40 = vadd.f32 %v4755_v46, %v3255_v15 }
 0x1b6   :  { %v3262_v52 = vpop.permute.xlu1 %906  ;;  %v3264_v13 = vpop.permute.xlu0 %904  ;;  %v177_v50 = vadd.f32 %v4746_v18, %v33_v62  ;;  %v342_v16 = vadd.f32 %v2769_v1, %v198_v20  ;;  %v4752_v62 = vld [vmem:[#allocation91_spill] sm:$0xff] }
 0x1b7   :  { %4739 = vst [vmem:[#allocation18_spill] sm:$0xff] %v3262_v52  ;;  %4740 = vst [vmem:[#allocation22_spill] sm:$0xff] %v3264_v13  ;;  %v3279_v52 = vmul.f32 1.4867195e-06, %v2216_v32  ;;  %v3282_v13 = vmul.f32 1.4867195e-06, %v2221_v33  ;;  %v343_v27 = vadd.f32 %v2767_v9, %v199_v43  ;;  %v320_v18 = vadd.f32 %v4752_v62, %v176_v25 }
 0x1b8   :  { %1202 = vrot.lane.b32.xlu0 %v41_v45, %s2046_s7  ;;  %1204 = vrot.lane.b32.xlu1 %v42_v11, %s2046_s7  ;;  %v4748_v32 = vld [vmem:[#allocation63_spill] sm:$0xff]  ;;  %v4749_v33 = vld [vmem:[#allocation66_spill] sm:$0xff]  ;;  %v321_v41 = vadd.f32 %v4751_v28, %v177_v50  ;;  %v486_v1 = vadd.f32 %v2863_v61, %v342_v16  ;;  %v2033_v50 = vld [vmem:[%s4339_s0 + $0x90] sm:$0xff] }
 0x1b9   :  { %v180_v10 = vadd.f32 %v4748_v32, %v36_v36  ;;  %v183_v51 = vadd.f32 %v4749_v33, %v3247_v47  ;;  %v487_v9 = vadd.f32 %v2861_v60, %v343_v27  ;;  %v4753_v43 = vld [vmem:[#allocation70_spill] sm:$0xff]  ;;  %v4754_v36 = vld [vmem:[#allocation71_spill] sm:$0xff]  ;;  %v3317_v6 = vmul.f32 1.4867195e-06, %v2033_v50  ;;  %v4758_v33 = vld [vmem:[#allocation92_spill] sm:$0xff] }
 0x1ba   :  { %v3296_v55 = vpop.permute.xlu1 %910  ;;  %v3298_v54 = vpop.permute.xlu0 %908  ;;  %v3305_v30 = vadd.f32 %v4753_v43, %v41_v45  ;;  %v3308_v20 = vadd.f32 %v4754_v36, %v40_v38  ;;  %v465_v60 = vadd.f32 %v2775_v5, %v321_v41  ;;  %v464_v61 = vadd.f32 %v2777_v0, %v320_v18  ;;  %v4756_v25 = vld [vmem:[#allocation75_spill] sm:$0xff]  ;;  %v4757_v16 = vld [vmem:[#allocation78_spill] sm:$0xff]  ;;  %v4759_v62 = vld [vmem:[#allocation93_spill] sm:$0xff] }
 0x1bb   :  { %v631_v38 = vadd.f32 %v2957_v31, %v487_v9  ;;  %v630_v45 = vadd.f32 %v2959_v35, %v486_v1  ;;  %v3326_v27 = vadd.f32 %v4756_v25, %v42_v11  ;;  %v3329_v32 = vadd.f32 %v4757_v16, %v45_v53  ;;  %v4760_v35 = vld [vmem:[#allocation79_spill] sm:$0xff] }
 0x1bc   :  { %1208 = vrot.lane.b32.xlu0 %v44_v17, %s2046_s7  ;;  %1210 = vrot.lane.b32.xlu1 %v45_v53, %s2046_s7  ;;  %v323_v28 = vadd.f32 %v4758_v33, %v179_v29  ;;  %v322_v43 = vadd.f32 %v4759_v62, %v178_v24  ;;  %v609_v5 = vadd.f32 %v2869_v58, %v465_v60  ;;  %v2034_v53 = vld [vmem:[%s4339_s0 + $0xa8] sm:$0xff]  ;;  %v4764_v33 = vld [vmem:[#allocation96_spill] sm:$0xff]  ;;  %v4765_v62 = vld [vmem:[#allocation97_spill] sm:$0xff] }
 0x1bd   :  { %v608_v0 = vadd.f32 %v2871_v59, %v464_v61  ;;  %v775_v41 = vadd.f32 %v3053_v14, %v631_v38  ;;  %v774_v31 = vadd.f32 %v3055_v42, %v630_v45  ;;  %v3342_v11 = vadd.f32 %v4760_v35, %v44_v17  ;;  %v4761_v17 = vld [vmem:[#allocation94_spill] sm:$0xff]  ;;  %v4762_v1 = vld [vmem:[#allocation95_spill] sm:$0xff]  ;;  %v4768_v35 = vld [vmem:[#allocation28_spill] sm:$0xff] }
 0x1be   :  { %v3333_v36 = vpop.permute.xlu1 %914  ;;  %v3335_v46 = vpop.permute.xlu0 %912  ;;  %v3347_v24 = vmul.f32 1.4867195e-06, %v2034_v53  ;;  %v467_v29 = vadd.f32 %v2783_v4, %v323_v28  ;;  %v466_v18 = vadd.f32 %v2785_v7, %v322_v43  ;;  %v753_v58 = vadd.f32 %v2965_v26, %v609_v5  ;;  %v4766_v43 = vld [vmem:[#allocation128_spill] sm:$0xff]  ;;  %v4767_v5 = vld [vmem:[#allocation129_spill] sm:$0xff] }
 0x1bf   :  { %v752_v59 = vadd.f32 %v2967_v34, %v608_v0  ;;  %v871_v42 = vadd.f32 %v3149_v48, %v775_v41  ;;  %v870_v14 = vadd.f32 %v3151_v39, %v774_v31  ;;  %v325_v9 = vadd.f32 %v4761_v17, %v181_v2  ;;  %v4763_v39 = vld [vmem:[#allocation80_spill] sm:$0xff]  ;;  %v4774_v17 = vld [vmem:[#allocation51_spill] sm:$0xff] }
 0x1c0   :  { %1212 = vrot.lane.b32.xlu0 %v3270_v49, %s2046_s7  ;;  %1216 = vrot.lane.b32.xlu1 %v3282_v13, %s2046_s7  ;;  %v324_v4 = vadd.f32 %v4762_v1, %v180_v10  ;;  %v611_v7 = vadd.f32 %v2877_v56, %v467_v29  ;;  %v610_v50 = vadd.f32 %v2879_v57, %v466_v18  ;;  %v2035_v56 = vld [vmem:[%s4339_s0 + $0xa0] sm:$0xff]  ;;  %v4769_v29 = vld [vmem:[#allocation29_spill] sm:$0xff]  ;;  %v4775_v1 = vld [vmem:[#allocation48_spill] sm:$0xff] }
 0x1c1   :  { %v849_v38 = vadd.f32 %v3061_v19, %v753_v58  ;;  %v848_v26 = vadd.f32 %v3063_v21, %v752_v59  ;;  %v3371_v48 = vadd.f32 %v4763_v39, %v3267_v44  ;;  %v3376_v2 = vmul.f32 1.4867195e-06, %v2035_v56  ;;  %v4772_v58 = vld [vmem:[#allocation113_spill] sm:$0xff]  ;;  %v4780_v56 = vld [vmem:[#allocation131_spill] sm:$0xff] }
 0x1c2   :  { %v919_v60 = vpop.permute.xlu1 %918  ;;  %v917_v61 = vpop.permute.xlu0 %916  ;;  %v469_v57 = vadd.f32 %v2791_v8, %v325_v9  ;;  %v468_v19 = vadd.f32 %v2793_v12, %v324_v4  ;;  %v755_v21 = vadd.f32 %v2973_v23, %v611_v7  ;;  %v754_v10 = vadd.f32 %v2975_v63, %v610_v50  ;;  %v4776_v7 = vld [vmem:[#allocation49_spill] sm:$0xff] }
 0x1c3   :  { %v3365_v45 = vadd.f32 %v919_v60, %v871_v42  ;;  %v3367_v34 = vadd.f32 %v917_v61, %v870_v14  ;;  %v945_v25 = vadd.f32 %v3157_v37, %v849_v38  ;;  %v944_v16 = vadd.f32 %v3159_v3, %v848_v26  ;;  %v4770_v3 = vld [vmem:[#allocation81_spill] sm:$0xff]  ;;  %v4773_v42 = vld [vmem:[#allocation50_spill] sm:$0xff]  ;;  %v4778_v61 = vld [vmem:[#allocation99_spill] sm:$0xff] }
 0x1c4   :  { %1218 = vrot.lane.b32.xlu0 %v3279_v52, %s2046_s7  ;;  %1220 = vrot.lane.b32.xlu1 %v3317_v6, %s2046_s7  ;;  %v327_v28 = vadd.f32 %v4764_v33, %v183_v51  ;;  %v326_v8 = vadd.f32 %v4765_v62, %v182_v22  ;;  %v613_v12 = vadd.f32 %v4766_v43, %v469_v57  ;;  %v4771_v51 = vld [vmem:[#allocation112_spill] sm:$0xff]  ;;  %v4779_v26 = vld [vmem:[#allocation130_spill] sm:$0xff] }
 0x1c5   :  { %v612_v0 = vadd.f32 %v4767_v5, %v468_v19  ;;  %v851_v53 = vadd.f32 %v4768_v35, %v755_v21  ;;  %v850_v23 = vadd.f32 %v4769_v29, %v754_v10  ;;  %v3400_v37 = vadd.f32 %v4770_v3, %v3270_v49  ;;  %v4777_v49 = vld [vmem:[#allocation98_spill] sm:$0xff] }
 0x1c6   :  { %v971_v41 = vpop.permute.xlu1 %970  ;;  %v969_v31 = vpop.permute.xlu0 %968  ;;  %v471_v22 = vadd.f32 %v4771_v51, %v327_v28  ;;  %v470_v59 = vadd.f32 %v4772_v58, %v326_v8  ;;  %v757_v14 = vadd.f32 %v4773_v42, %v613_v12  ;;  %v329_v60 = vadd.f32 %v4777_v49, %v3305_v30  ;;  %v4781_v10 = vld [vmem:[#allocation30_spill] sm:$0xff]  ;;  %v4785_v12 = vld [vmem:[#allocation115_spill] sm:$0xff] }
 0x1c7   :  { %v3394_v18 = vadd.f32 %v971_v41, %v945_v25  ;;  %v3396_v63 = vadd.f32 %v969_v31, %v944_v16  ;;  %v756_v9 = vadd.f32 %v4774_v17, %v612_v0  ;;  %v947_v4 = vadd.f32 %v4775_v1, %v851_v53  ;;  %v4782_v16 = vld [vmem:[#allocation31_spill] sm:$0xff]  ;;  %v4783_v8 = vld [vmem:[#allocation82_spill] sm:$0xff]  ;;  %v4786_v0 = vld [vmem:[#allocation17_spill] sm:$0xff] }
 0x1c8   :  { %1224 = vrot.lane.b32.xlu0 %v3376_v2, %s2046_s7  ;;  %1226 = vrot.lane.b32.xlu1 %v3347_v24, %s2046_s7  ;;  %v946_v50 = vadd.f32 %v4776_v7, %v850_v23  ;;  %v328_v38 = vadd.f32 %v4778_v61, %v3308_v20  ;;  %v615_v39 = vadd.f32 %v4779_v26, %v471_v22  ;;  %v4784_v43 = vld [vmem:[#allocation114_spill] sm:$0xff]  ;;  %v4787_v41 = vld [vmem:[#allocation8_spill] sm:$0xff]  ;;  %v4789_v53 = vld [vmem:[#allocation53_spill] sm:$0xff] }
 0x1c9   :  { %v614_v57 = vadd.f32 %v4780_v56, %v470_v59  ;;  %v853_v25 = vadd.f32 %v4781_v10, %v757_v14  ;;  %v852_v33 = vadd.f32 %v4782_v16, %v756_v9  ;;  %v3426_v30 = vadd.f32 %v4783_v8, %v3279_v52  ;;  %v4788_v31 = vld [vmem:[#allocation52_spill] sm:$0xff]  ;;  %v4790_v23 = vld [vmem:[#allocation5_spill] sm:$0xff]  ;;  %v4791_v51 = vld [vmem:[#allocation3_spill] sm:$0xff] }
 0x1ca   :  { %v975_v19 = vpop.permute.xlu1 %974  ;;  %v973_v21 = vpop.permute.xlu0 %972  ;;  %v473_v20 = vadd.f32 %v4784_v43, %v329_v60  ;;  %v472_v5 = vadd.f32 %v4785_v12, %v328_v38  ;;  %v759_v35 = vadd.f32 %v4788_v31, %v615_v39  ;;  %v4792_v52 = vld [vmem:[#allocation100_spill] sm:$0xff]  ;;  %v4793_v59 = vld [vmem:[#allocation101_spill] sm:$0xff]  ;;  %v4798_v39 = vld [vmem:[#allocation83_spill] sm:$0xff] }
 0x1cb   :  { %v3420_v28 = vadd.f32 %v975_v19, %v947_v4  ;;  %v3422_v62 = vadd.f32 %v973_v21, %v946_v50  ;;  %v758_v29 = vadd.f32 %v4789_v53, %v614_v57  ;;  %v949_v3 = vadd.f32 %v4790_v23, %v853_v25  ;;  %v4794_v14 = vld [vmem:[#allocation132_spill] sm:$0xff]  ;;  %v4795_v9 = vld [vmem:[#allocation133_spill] sm:$0xff] }
 0x1cc   :  { %1228 = vrot.lane.b32.xlu0 %v4786_v0, %s2046_s7  ;;  %1078 = vrot.lane.b32.xlu1 %v4787_v41, %s2045_s4  ;;  %v948_v22 = vadd.f32 %v4791_v51, %v852_v33  ;;  %v331_v58 = vadd.f32 %v4792_v52, %v3312_v40  ;;  %v330_v42 = vadd.f32 %v4793_v59, %v3326_v27  ;;  %v4796_v50 = vld [vmem:[#allocation32_spill] sm:$0xff]  ;;  %v4797_v60 = vld [vmem:[#allocation33_spill] sm:$0xff]  ;;  %v4807_v41 = vld [vmem:[#allocation102_spill] sm:$0xff] }
 0x1cd   :  { %v617_v17 = vadd.f32 %v4794_v14, %v473_v20  ;;  %v616_v1 = vadd.f32 %v4795_v9, %v472_v5  ;;  %v855_v49 = vadd.f32 %v4796_v50, %v759_v35  ;;  %v854_v61 = vadd.f32 %v4797_v60, %v758_v29  ;;  %v2036_v27 = vld [vmem:[%s4339_s0 + $0x98] sm:$0x3]  ;;  %v4799_v57 = vld [vmem:[#allocation116_spill] sm:$0xff]  ;;  %v4806_v5 = vld [vmem:[#allocation2_spill] sm:$0xff] }
 0x1ce   :  { %v979_v4 = vpop.permute.xlu1 %978  ;;  %v977_v7 = vpop.permute.xlu0 %976  ;;  %v192_v40 = vadd.f32 %v4798_v39, %v3282_v13  ;;  %v3455_v56 = vmul.f32 1.4867195e-06, %v2036_v27  ;;  %v475_v19 = vadd.f32 %v4799_v57, %v331_v58  ;;  %v4800_v21 = vld [vmem:[#allocation117_spill] sm:$0xff]  ;;  %v4801_v25 = vld [vmem:[#allocation12_spill] sm:$0xff]  ;;  %v333_v31 = vadd.f32 %v4807_v41, %v3329_v32  ;;  %v4808_v35 = vld [vmem:[#allocation103_spill] sm:$0xff] }
 0x1cf   :  { %v3446_v38 = vadd.f32 %v979_v4, %v949_v3  ;;  %v3448_v26 = vadd.f32 %v977_v7, %v948_v22  ;;  %v474_v10 = vadd.f32 %v4800_v21, %v330_v42  ;;  %v4802_v16 = vld [vmem:[#allocation16_spill] sm:$0xff]  ;;  %v4804_v43 = vld [vmem:[#allocation57_spill] sm:$0xff]  ;;  %v950_v0 = vadd.f32 %v4806_v5, %v854_v61  ;;  %v4809_v29 = vld [vmem:[#allocation134_spill] sm:$0xff] }
 0x1d0   :  { %1086 = vrot.lane.b32.xlu0 %v4801_v25, %s2045_s4  ;;  %1094 = vrot.lane.b32.xlu1 %v4802_v16, %s2045_s4  ;;  %v4803_v33 = vld [vmem:[#allocation56_spill] sm:$0xff]  ;;  %v760_v13 = vadd.f32 %v4804_v43, %v616_v1  ;;  %v332_v53 = vadd.f32 %v4808_v35, %v3342_v11  ;;  %v619_v23 = vadd.f32 %v4809_v29, %v475_v19  ;;  %v4810_v3 = vld [vmem:[#allocation135_spill] sm:$0xff]  ;;  %v4811_v58 = vld [vmem:[#allocation34_spill] sm:$0xff] }
 0x1d1   :  { %v761_v8 = vadd.f32 %v4803_v33, %v617_v17  ;;  %v4805_v20 = vld [vmem:[#allocation4_spill] sm:$0xff]  ;;  %v618_v51 = vadd.f32 %v4810_v3, %v474_v10  ;;  %v4812_v42 = vld [vmem:[#allocation35_spill] sm:$0xff]  ;;  %v4814_v4 = vld [vmem:[#allocation118_spill] sm:$0xff] }
 0x1d2   :  { %v951_v12 = vadd.f32 %v4805_v20, %v855_v49  ;;  %v983_v22 = vpop.permute.xlu1 %982  ;;  %v981_v52 = vpop.permute.xlu0 %980  ;;  %v856_v14 = vadd.f32 %v4812_v42, %v760_v13  ;;  %v4813_v1 = vld [vmem:[#allocation84_spill] sm:$0xff]  ;;  %v477_v7 = vadd.f32 %v4814_v4, %v333_v31  ;;  %v4815_v11 = vld [vmem:[#allocation119_spill] sm:$0xff]  ;;  %v4819_v27 = vld [vmem:[#allocation61_spill] sm:$0xff] }
 0x1d3   :  { %v857_v59 = vadd.f32 %v4811_v58, %v761_v8  ;;  %v3477_v9 = vadd.f32 %v981_v52, %v950_v0  ;;  %v195_v32 = vadd.f32 %v4813_v1, %v3455_v56  ;;  %v476_v50 = vadd.f32 %v4815_v11, %v332_v53  ;;  %v4816_v49 = vld [vmem:[#allocation20_spill] sm:$0xff]  ;;  %v4820_v19 = vld [vmem:[#allocation6_spill] sm:$0xff]  ;;  %v4821_v10 = vld [vmem:[#allocation7_spill] sm:$0xff] }
 0x1d4   :  { %v3475_v17 = vadd.f32 %v983_v22, %v951_v12  ;;  %1102 = vrot.lane.b32.xlu0 %v4816_v49, %s2045_s4  ;;  %v4817_v60 = vld [vmem:[#allocation24_spill] sm:$0xff]  ;;  %v762_v57 = vadd.f32 %v4819_v27, %v618_v51  ;;  %v952_v25 = vadd.f32 %v4821_v10, %v856_v14  ;;  %v4823_v8 = vld [vmem:[#allocation105_spill] sm:$0xff]  ;;  %v4838_v27 = vld [vmem:[#allocation138_spill] sm:$0xff] }
 0x1d5   :  { %1110 = vrot.lane.b32.xlu1 %v4817_v60, %s2045_s4  ;;  %v4818_v61 = vld [vmem:[#allocation60_spill] sm:$0xff]  ;;  %v953_v21 = vadd.f32 %v4820_v19, %v857_v59  ;;  %v334_v43 = vadd.f32 %v4823_v8, %v3400_v37  ;;  %v4825_v12 = vld [vmem:[#allocation137_spill] sm:$0xff]  ;;  %v4839_v19 = vld [vmem:[#allocation139_spill] sm:$0xff] }
 0x1d6   :  { %v763_v39 = vadd.f32 %v4818_v61, %v619_v23  ;;  %v4822_v16 = vld [vmem:[#allocation104_spill] sm:$0xff]  ;;  %v620_v5 = vadd.f32 %v4825_v12, %v476_v50  ;;  %v987_v0 = vpop.permute.xlu1 %986  ;;  %v985_v41 = vpop.permute.xlu0 %984  ;;  %v4827_v53 = vld [vmem:[#allocation37_spill] sm:$0xff]  ;;  %v4837_v61 = vld [vmem:[#allocation107_spill] sm:$0xff] }
 0x1d7   :  { %v335_v33 = vadd.f32 %v4822_v16, %v3371_v48  ;;  %v4824_v13 = vld [vmem:[#allocation136_spill] sm:$0xff]  ;;  %v858_v29 = vadd.f32 %v4827_v53, %v762_v57  ;;  %v3499_v23 = vadd.f32 %v987_v0, %v953_v21  ;;  %v3501_v3 = vadd.f32 %v985_v41, %v952_v25  ;;  %v4828_v51 = vld [vmem:[#allocation85_spill] sm:$0xff] }
 0x1d8   :  { %v621_v20 = vadd.f32 %v4824_v13, %v477_v7  ;;  %v4826_v31 = vld [vmem:[#allocation36_spill] sm:$0xff]  ;;  %v194_v48 = vadd.f32 %v4828_v51, %v3317_v6  ;;  %v4830_v37 = vld [vmem:[#allocation121_spill] sm:$0xff]  ;;  %v4834_v7 = vld [vmem:[#allocation11_spill] sm:$0xff] }
 0x1d9   :  { %v859_v35 = vadd.f32 %v4826_v31, %v763_v39  ;;  %v4829_v22 = vld [vmem:[#allocation120_spill] sm:$0xff]  ;;  %v478_v58 = vadd.f32 %v4830_v37, %v334_v43  ;;  %v4831_v59 = vld [vmem:[#allocation21_spill] sm:$0xff]  ;;  %1198 = vrot.lane.b32.xlu1 %v3247_v47, %s2046_s7  ;;  %v4836_v6 = vld [vmem:[#allocation106_spill] sm:$0xff]  ;;  %v336_v39 = vadd.f32 %v4837_v61, %v192_v40 }
 0x1da   :  { %v479_v52 = vadd.f32 %v4829_v22, %v335_v33  ;;  %1190 = vrot.lane.b32.xlu0 %v4831_v59, %s2046_s7  ;;  %v4832_v42 = vld [vmem:[#allocation64_spill] sm:$0xff]  ;;  %v4833_v1 = vld [vmem:[#allocation65_spill] sm:$0xff]  ;;  %v337_v60 = vadd.f32 %v4836_v6, %v3426_v30  ;;  %v991_v10 = vpop.permute.xlu1 %990  ;;  %v989_v25 = vpop.permute.xlu0 %988  ;;  %v4840_v47 = vld [vmem:[#allocation38_spill] sm:$0xff] }
 0x1db   :  { %v765_v14 = vadd.f32 %v4832_v42, %v621_v20  ;;  %v764_v4 = vadd.f32 %v4833_v1, %v620_v5  ;;  %v955_v11 = vadd.f32 %v4834_v7, %v859_v35  ;;  %v4835_v50 = vld [vmem:[#allocation9_spill] sm:$0xff]  ;;  %v622_v21 = vadd.f32 %v4839_v19, %v478_v58  ;;  %v4841_v33 = vld [vmem:[#allocation39_spill] sm:$0xff]  ;;  %v4842_v20 = vld [vmem:[#allocation86_spill] sm:$0xff] }
 0x1dc   :  { %v954_v49 = vadd.f32 %v4835_v50, %v858_v29  ;;  %v623_v57 = vadd.f32 %v4838_v27, %v479_v52  ;;  %v197_v12 = vadd.f32 %v4842_v20, %v3347_v24  ;;  %v4843_v30 = vld [vmem:[#allocation122_spill] sm:$0xff]  ;;  %v4844_v40 = vld [vmem:[#allocation123_spill] sm:$0xff]  ;;  %v4845_v41 = vld [vmem:[#allocation68_spill] sm:$0xff] }
 0x1dd   :  { %v861_v16 = vadd.f32 %v4840_v47, %v765_v14  ;;  %v860_v8 = vadd.f32 %v4841_v33, %v764_v4  ;;  %v3522_v43 = vadd.f32 %v991_v10, %v955_v11  ;;  %v481_v5 = vadd.f32 %v4843_v30, %v337_v60  ;;  %1214 = vrot.lane.b32.xlu1 %v3267_v44, %s2046_s7  ;;  %v4846_v35 = vld [vmem:[#allocation69_spill] sm:$0xff]  ;;  %v4848_v22 = vld [vmem:[#allocation10_spill] sm:$0xff]  ;;  %v4849_v37 = vld [vmem:[#allocation108_spill] sm:$0xff] }
 0x1de   :  { %v3524_v13 = vadd.f32 %v989_v25, %v954_v49  ;;  %v480_v0 = vadd.f32 %v4844_v40, %v336_v39  ;;  %1206 = vrot.lane.b32.xlu0 %v3255_v15, %s2046_s7  ;;  %v767_v31 = vadd.f32 %v4845_v41, %v623_v57  ;;  %v766_v53 = vadd.f32 %v4846_v35, %v622_v21  ;;  %v4847_v29 = vld [vmem:[#allocation13_spill] sm:$0xff]  ;;  %v4851_v42 = vld [vmem:[#allocation140_spill] sm:$0xff]  ;;  %v995_v15 = vpop.permute.xlu1 %994  ;;  %v993_v7 = vpop.permute.xlu0 %992  ;;  %v4855_v61 = vld [vmem:[#allocation87_spill] sm:$0xff] }
 0x1df   :  { %v957_v51 = vadd.f32 %v4847_v29, %v861_v16  ;;  %v956_v52 = vadd.f32 %v4848_v22, %v860_v8  ;;  %v339_v24 = vadd.f32 %v4849_v37, %v195_v32  ;;  %v4850_v58 = vld [vmem:[#allocation109_spill] sm:$0xff]  ;;  %v625_v14 = vadd.f32 %v4851_v42, %v481_v5  ;;  %v4853_v11 = vld [vmem:[#allocation40_spill] sm:$0xff]  ;;  %v4858_v19 = vld [vmem:[#allocation19_spill] sm:$0xff] }
 0x1e0   :  { %v338_v59 = vadd.f32 %v4850_v58, %v194_v48  ;;  %v4852_v1 = vld [vmem:[#allocation141_spill] sm:$0xff]  ;;  %v863_v44 = vadd.f32 %v4853_v11, %v767_v31  ;;  %v196_v39 = vadd.f32 %v4855_v61, %v3376_v2  ;;  %v4856_v32 = vld [vmem:[#allocation124_spill] sm:$0xff]  ;;  %v4861_v16 = vld [vmem:[#allocation14_spill] sm:$0xff] }
 0x1e1   :  { %v624_v4 = vadd.f32 %v4852_v1, %v480_v0  ;;  %v4854_v50 = vld [vmem:[#allocation41_spill] sm:$0xff]  ;;  %v3544_v6 = vadd.f32 %v995_v15, %v957_v51  ;;  %v3546_v60 = vadd.f32 %v993_v7, %v956_v52  ;;  %v483_v27 = vadd.f32 %v4856_v32, %v339_v24  ;;  %1230 = vrot.lane.b32.xlu1 %v4858_v19, %s2046_s7  ;;  %v4859_v21 = vld [vmem:[#allocation72_spill] sm:$0xff]  ;;  %v4862_v8 = vld [vmem:[#allocation15_spill] sm:$0xff] }
 0x1e2   :  { %v862_v49 = vadd.f32 %v4854_v50, %v766_v53  ;;  %v4857_v48 = vld [vmem:[#allocation125_spill] sm:$0xff]  ;;  %1222 = vrot.lane.b32.xlu0 %v3455_v56, %s2046_s7  ;;  %v769_v10 = vadd.f32 %v4859_v21, %v625_v14  ;;  %v959_v33 = vadd.f32 %v4861_v16, %v863_v44  ;;  %v4863_v30 = vld [vmem:[#allocation110_spill] sm:$0xff]  ;;  %v4864_v5 = vld [vmem:[#allocation111_spill] sm:$0xff]  ;;  %v999_v56 = vpop.permute.xlu1 %998  ;;  %v997_v53 = vpop.permute.xlu0 %996 }
 0x1e3   :  { %v482_v57 = vadd.f32 %v4857_v48, %v338_v59  ;;  %v4860_v25 = vld [vmem:[#allocation73_spill] sm:$0xff]  ;;  %v341_v2 = vadd.f32 %v4863_v30, %v197_v12  ;;  %v340_v40 = vadd.f32 %v4864_v5, %v196_v39  ;;  %v4865_v0 = vld [vmem:[#allocation142_spill] sm:$0xff]  ;;  %v4866_v31 = vld [vmem:[#allocation143_spill] sm:$0xff] }
 0x1e4   :  { %v768_v47 = vadd.f32 %v4860_v25, %v624_v4  ;;  %v958_v20 = vadd.f32 %v4862_v8, %v862_v49  ;;  %v627_v41 = vadd.f32 %v4865_v0, %v483_v27  ;;  %v4867_v29 = vld [vmem:[#allocation42_spill] sm:$0xff]  ;;  %v4868_v22 = vld [vmem:[#allocation43_spill] sm:$0xff]  ;;  %v3566_v37 = vadd.f32 %v999_v56, %v959_v33  ;;  %v4871_v12 = vld [vmem:[#allocation76_spill] sm:$0xff] }
 0x1e5   :  { %v626_v35 = vadd.f32 %v4866_v31, %v482_v57  ;;  %v865_v51 = vadd.f32 %v4867_v29, %v769_v10  ;;  %v4869_v58 = vld [vmem:[#allocation126_spill] sm:$0xff]  ;;  %v4870_v42 = vld [vmem:[#allocation127_spill] sm:$0xff]  ;;  %v4872_v4 = vld [vmem:[#allocation77_spill] sm:$0xff] }
 0x1e6   :  { %v864_v52 = vadd.f32 %v4868_v22, %v768_v47  ;;  %v1054_v24 = vadd.f32 %v997_v53, %v958_v20  ;;  %v485_v59 = vadd.f32 %v4869_v58, %v341_v2  ;;  %v484_v14 = vadd.f32 %v4870_v42, %v340_v40  ;;  %v4873_v7 = vld [vmem:[#allocation18_spill] sm:$0xff]  ;;  %v4875_v49 = vld [vmem:[#allocation144_spill] sm:$0xff]  ;;  %v4876_v39 = vld [vmem:[#allocation145_spill] sm:$0xff]  ;;  %v1003_v27 = vpop.permute.xlu1 %1002  ;;  %v1001_v48 = vpop.permute.xlu0 %1000 }
 0x1e7   :  { %v771_v1 = vadd.f32 %v4871_v12, %v627_v41  ;;  %v770_v15 = vadd.f32 %v4872_v4, %v626_v35  ;;  %v961_v11 = vadd.f32 %v4873_v7, %v865_v51  ;;  %v4874_v44 = vld [vmem:[#allocation22_spill] sm:$0xff]  ;;  %v4877_v57 = vld [vmem:[#allocation44_spill] sm:$0xff]  ;;  %v4878_v21 = vld [vmem:[#allocation45_spill] sm:$0xff] }
 0x1e8   :  { %v960_v50 = vadd.f32 %v4874_v44, %v864_v52  ;;  %v629_v61 = vadd.f32 %v4875_v49, %v485_v59  ;;  %v628_v32 = vadd.f32 %v4876_v39, %v484_v14  ;;  %v4879_v16 = vld [vmem:[#allocation26_spill] sm:$0xff]  ;;  %v4880_v8 = vld [vmem:[#allocation27_spill] sm:$0xff] }
 0x1e9   :  { %v867_v19 = vadd.f32 %v4877_v57, %v771_v1  ;;  %v866_v10 = vadd.f32 %v4878_v21, %v770_v15  ;;  %v1057_v25 = vadd.f32 %v1003_v27, %v961_v11  ;;  %v4881_v0 = vld [vmem:[#allocation46_spill] sm:$0xff]  ;;  %v4882_v31 = vld [vmem:[#allocation47_spill] sm:$0xff] }
 0x1ea   :  { %v1056_v47 = vadd.f32 %v1001_v48, %v960_v50  ;;  %v773_v33 = vadd.f32 %v4879_v16, %v629_v61  ;;  %v772_v20 = vadd.f32 %v4880_v8, %v628_v32  ;;  %v1007_v5 = vpop.permute.xlu1 %1006  ;;  %v1005_v40 = vpop.permute.xlu0 %1004 }
 0x1eb   :  { %v963_v30 = vadd.f32 %v3296_v55, %v867_v19  ;;  %v962_v2 = vadd.f32 %v3298_v54, %v866_v10 }
 0x1ec   :  { %v869_v41 = vadd.f32 %v4881_v0, %v773_v33  ;;  %v868_v35 = vadd.f32 %v4882_v31, %v772_v20 }
 0x1ed   :  { %v3584_v56 = vadd.f32 %v1007_v5, %v963_v30  ;;  %v1058_v53 = vadd.f32 %v1005_v40, %v962_v2 }
 0x1ee   :  { %v965_v29 = vadd.f32 %v3333_v36, %v869_v41  ;;  %v964_v51 = vadd.f32 %v3335_v46, %v868_v35  ;;  %v1011_v22 = vpop.permute.xlu1 %1010  ;;  %v1009_v52 = vpop.permute.xlu0 %1008 }
 0x1f0   :  { %v1061_v58 = vadd.f32 %v1011_v22, %v965_v29  ;;  %v1060_v59 = vadd.f32 %v1009_v52, %v964_v51 }
 0x1f2   :  { %v1015_v55 = vpop.permute.xlu1 %1014  ;;  %v1013_v42 = vpop.permute.xlu0 %1012 }
 0x1f3   :  { %v3589_v54 = vadd.f32 %v1015_v55, %v3365_v45  ;;  %v1062_v14 = vadd.f32 %v1013_v42, %v3367_v34 }
 0x1f6   :  { %v1067_v12 = vpop.permute.xlu1 %1066  ;;  %v1065_v1 = vpop.permute.xlu0 %1064 }
 0x1fa   :  { %v1071_v4 = vpop.permute.xlu1 %1070  ;;  %v1069_v15 = vpop.permute.xlu0 %1068 }
 0x1fb   :  { %v3593_v7 = vadd.f32 %v1071_v4, %v3420_v28 }
 0x1fe   :  { %v1075_v36 = vpop.permute.xlu1 %1074  ;;  %v1073_v46 = vpop.permute.xlu0 %1072 }
 0x1ff   :  { %v1141_v5 = vadd.f32 %v1075_v36, %v3446_v38  ;;  %v1140_v40 = vadd.f32 %v1073_v46, %v3448_v26 }
 0x202   :  { %v1081_v11 = vpop.permute.xlu1 %1080  ;;  %v1077_v44 = vpop.permute.xlu0 %1076 }
 0x203   :  { %v1144_v0 = vadd.f32 %v1081_v11, %v3501_v3 }
 0x206   :  { %v1085_v50 = vpop.permute.xlu1 %1084  ;;  %v1083_v49 = vpop.permute.xlu0 %1082 }
 0x207   :  { %v3620_v41 = vadd.f32 %v1085_v50, %v3524_v13  ;;  %v3623_v35 = vadd.f32 %v1083_v49, %v3499_v23 }
 0x20a   :  { %v1091_v61 = vpop.permute.xlu1 %1090  ;;  %v1089_v39 = vpop.permute.xlu0 %1088 }
 0x20b   :  { %v3596_v45 = vadd.f32 %v1089_v39, %v3546_v60  ;;  %v1136_v60 = vadd.f32 %v1065_v1, %v3396_v63  ;;  %v1142_v63 = vadd.f32 %v1077_v44, %v3477_v9 }
 0x20e   :  { %v1097_v32 = vpop.permute.xlu1 %1096  ;;  %v1093_v34 = vpop.permute.xlu0 %1092 }
 0x20f   :  { %v3598_v27 = vadd.f32 %v1097_v32, %v1056_v47  ;;  %v3600_v48 = vadd.f32 %v1093_v34, %v1054_v24  ;;  %v1137_v24 = vadd.f32 %v1067_v12, %v3394_v18  ;;  %v3640_v12 = vadd.f32 %v1091_v61, %v3544_v6 }
 0x212   :  { %v1101_v57 = vpop.permute.xlu1 %1100  ;;  %v1099_v28 = vpop.permute.xlu0 %1098 }
 0x213   :  { %v3602_v19 = vadd.f32 %v1101_v57, %v1058_v53  ;;  %v3604_v21 = vadd.f32 %v1099_v28, %v1057_v25  ;;  %v1138_v25 = vadd.f32 %v1069_v15, %v3422_v62 }
 0x216   :  { %v1107_v10 = vpop.permute.xlu1 %1106  ;;  %v1105_v16 = vpop.permute.xlu0 %1104 }
 0x217   :  { %v3606_v33 = vadd.f32 %v1107_v10, %v1061_v58  ;;  %v3608_v8 = vadd.f32 %v1105_v16, %v1060_v59 }
 0x21a   :  { %v1109_v20 = vpop.permute.xlu0 %1108  ;;  %v1185_v30 = vpop.permute.xlu1 %1184 }
 0x21b   :  { %v3612_v47 = vadd.f32 %v1109_v20, %v1062_v14  ;;  %v1256_v2 = vadd.f32 %v1185_v30, %v1136_v60 }
 0x21d   :  { %v1292_v18 = vmul.f32 0.00013383022, %v1256_v2  ;;  %v1383_v31 = vmul.f32 0.0044318484, %v1256_v2  ;;  %v3625_v53 = vmul.f32 0.053990968, %v1256_v2 }
 0x21e   :  { %v3627_v62 = vmul.f32 0.24197073, %v1256_v2  ;;  %v1656_v38 = vmul.f32 0.3989423, %v1256_v2  ;;  %v1187_v29 = vpop.permute.xlu0 %1186  ;;  %v1189_v26 = vpop.permute.xlu1 %1188  ;;  %v1280_v51 = vmul.f32 1.4867195e-06, %v1256_v2 }
 0x21f   :  { %v1329_v3 = vrot.slane %v1292_v18, 1  ;;  %v1257_v22 = vadd.f32 %v1187_v29, %v1137_v24  ;;  %v3629_v52 = vadd.f32 %v1189_v26, %v1138_v25  ;;  %v1420_v9 = vrot.slane %v1383_v31, 2 }
 0x220   :  { %v1511_v13 = vrot.slane %v3625_v53, 3  ;;  %v1602_v58 = vrot.slane %v3627_v62, 4  ;;  %v1693_v59 = vrot.slane %v1656_v38, 5 }
 0x221   :  { %v3635_v42 = vmul.f32 1.4867195e-06, %v1257_v22  ;;  %v3637_v14 = vmul.f32 0.00013383022, %v1257_v22  ;;  %v3642_v1 = vmul.f32 0.0044318484, %v1257_v22 }
 0x222   :  { %v3644_v4 = vmul.f32 0.053990968, %v1257_v22  ;;  %v3646_v15 = vmul.f32 0.24197073, %v1257_v22  ;;  %v1193_v36 = vpop.permute.xlu0 %1192  ;;  %v1195_v46 = vpop.permute.xlu1 %1194  ;;  %v3649_v44 = vmul.f32 0.3989423, %v1257_v22 }
 0x223   :  { %v4409_v11 = vrot.slane %v3637_v14, 1  ;;  %v3653_v49 = vmul.f32 0.053990968, %v3629_v52  ;;  %v4408_v6 = vrot.slane %v3642_v1, 2  ;;  %v3659_v32 = vmul.f32 0.24197073, %v3629_v52 }
 0x224   :  { %v1512_v61 = vrot.slane %v3644_v4, 3  ;;  %v4413_v39 = vrot.slane %v3646_v15, 4  ;;  %v4411_v57 = vrot.slane %v3649_v44, 5  ;;  %v3667_v10 = vmul.f32 0.3989423, %v3629_v52 }
 0x225   :  { %v1331_v34 = vsel %vm1328_vm0, %v1329_v3, %v4409_v11  ;;  %v1514_v28 = vrot.slane %v3653_v49, 3  ;;  %v1422_v60 = vsel %vm1419_vm1, %v1420_v9, %v4408_v6  ;;  %v1260_v38 = vadd.f32 %v1193_v36, %v1140_v40 }
 0x226   :  { %v1371_v16 = vadd.f32 %v1331_v34, %v1280_v51  ;;  %v1513_v20 = vsel %vm1510_vm2, %v1511_v13, %v1512_v61  ;;  %v1604_v30 = vsel %vm1601_vm3, %v1602_v58, %v4413_v39  ;;  %v1197_v24 = vpop.permute.xlu0 %1196  ;;  %v1201_v2 = vpop.permute.xlu1 %1200  ;;  %v1695_v25 = vsel %vm1692_vm4, %v1693_v59, %v4411_v57 }
 0x227   :  { %v1261_v26 = vadd.f32 %v1195_v46, %v1141_v5  ;;  %v3681_v51 = vadd.f32 %v1197_v24, %v1142_v63  ;;  %v1264_v3 = vadd.f32 %v1201_v2, %v1144_v0  ;;  %v1282_v22 = vmul.f32 1.4867195e-06, %v1260_v38 }
 0x228   :  { %v1462_v29 = vadd.f32 %v1422_v60, %v1371_v16  ;;  %v1295_v9 = vmul.f32 0.00013383022, %v1260_v38  ;;  %v1386_v13 = vmul.f32 0.0044318484, %v1260_v38  ;;  %v3684_v58 = vsel %vm1510_vm2, %v1512_v61, %v1514_v28 }
 0x229   :  { %v3686_v50 = vmul.f32 0.053990968, %v1260_v38  ;;  %v3688_v59 = vmul.f32 0.24197073, %v1260_v38  ;;  %v1659_v6 = vmul.f32 0.3989423, %v1260_v38 }
 0x22a   :  { %v1553_v34 = vadd.f32 %v1513_v20, %v1462_v29  ;;  %v1334_v11 = vrot.slane %v1295_v9, 1  ;;  %v1425_v55 = vrot.slane %v1386_v13, 2  ;;  %v3690_v40 = vmul.f32 1.4867195e-06, %v1261_v26  ;;  %v1203_v63 = vpop.permute.xlu0 %1202 }
 0x22b   :  { %4883 = vst [vmem:[#allocation23_spill] sm:$0xff] %v3686_v50  ;;  %4884 = vst [vmem:[#allocation25_spill] sm:$0xff] %v3688_v59  ;;  %v3692_v5 = vmul.f32 0.00013383022, %v1261_v26  ;;  %v1516_v36 = vrot.slane %v3686_v50, 3  ;;  %v1607_v46 = vrot.slane %v3688_v59, 4 }
 0x22c   :  { %4885 = vst [vmem:[#allocation88_spill] sm:$0xff] %v3690_v40  ;;  %v1644_v0 = vadd.f32 %v1604_v30, %v1553_v34  ;;  %v1698_v61 = vrot.slane %v1659_v6, 5  ;;  %v3699_v20 = vmul.f32 0.0044318484, %v1261_v26  ;;  %v3703_v2 = vmul.f32 0.053990968, %v1261_v26  ;;  %v1205_v34 = vpop.permute.xlu1 %1204 }
 0x22d   :  { %4886 = vst [vmem:[#allocation89_spill] sm:$0xff] %v3692_v5  ;;  %v4410_v60 = vrot.slane %v3692_v5, 1  ;;  %v3705_v38 = vmul.f32 0.24197073, %v1261_v26  ;;  %v3707_v30 = vmul.f32 0.3989423, %v1261_v26 }
 0x22e   :  { %4887 = vst [vmem:[#allocation54_spill] sm:$0xff] %v3699_v20  ;;  %v3701_v24 = vadd.f32 %v1695_v25, %v1644_v0  ;;  %v4412_v29 = vrot.slane %v3699_v20, 2  ;;  %v3715_v13 = vmul.f32 0.053990968, %v3681_v51  ;;  %v4415_v0 = vrot.slane %v3703_v2, 3  ;;  %v1209_v23 = vpop.permute.xlu0 %1208 }
 0x22f   :  { %v1336_v6 = vsel %vm1328_vm0, %v1334_v11, %v4410_v60  ;;  %v4416_v16 = vrot.slane %v3705_v38, 4  ;;  %v4417_v26 = vrot.slane %v3707_v30, 5  ;;  %v3725_v60 = vmul.f32 0.24197073, %v3681_v51 }
 0x230   :  { %v1373_v25 = vadd.f32 %v1336_v6, %v1282_v22  ;;  %v1427_v28 = vsel %vm1419_vm1, %v1425_v55, %v4412_v29  ;;  %v3728_v9 = vmul.f32 0.3989423, %v3681_v51  ;;  %v1518_v6 = vsel %vm1510_vm2, %v1516_v36, %v4415_v0 }
 0x231   :  { %v1609_v57 = vsel %vm1601_vm3, %v1607_v46, %v4416_v16  ;;  %v1700_v55 = vsel %vm1692_vm4, %v1698_v61, %v4417_v26  ;;  %v1284_v31 = vmul.f32 1.4867195e-06, %v1264_v3  ;;  %v1298_v39 = vmul.f32 0.00013383022, %v1264_v3  ;;  %v1211_v61 = vpop.permute.xlu1 %1210 }
 0x232   :  { %v1464_v22 = vadd.f32 %v1427_v28, %v1373_v25  ;;  %v1389_v28 = vmul.f32 0.0044318484, %v1264_v3  ;;  %v3741_v25 = vmul.f32 0.053990968, %v1264_v3  ;;  %v3743_v50 = vmul.f32 0.24197073, %v1264_v3 }
 0x233   :  { %v1339_v36 = vrot.slane %v1298_v39, 1  ;;  %v1662_v0 = vmul.f32 0.3989423, %v1264_v3  ;;  %v1265_v46 = vadd.f32 %v1203_v63, %v3623_v35  ;;  %v3747_v16 = vadd.f32 %v1205_v34, %v3620_v41  ;;  %v1213_v39 = vpop.permute.xlu0 %1212 }
 0x234   :  { %v1555_v18 = vadd.f32 %v1518_v6, %v1464_v22  ;;  %4888 = vst [vmem:[#allocation55_spill] sm:$0xff] %v3741_v25  ;;  %4889 = vst [vmem:[#allocation58_spill] sm:$0xff] %v3743_v50  ;;  %v1430_v29 = vrot.slane %v1389_v28, 2  ;;  %v1521_v11 = vrot.slane %v3741_v25, 3  ;;  %v1612_v59 = vrot.slane %v3743_v50, 4 }
 0x235   :  { %4890 = vst [vmem:[#allocation59_spill] sm:$0xff] %v3747_v16  ;;  %v1703_v22 = vrot.slane %v1662_v0, 5  ;;  %v3753_v40 = vmul.f32 1.4867195e-06, %v1265_v46  ;;  %v3757_v35 = vmul.f32 0.00013383022, %v1265_v46  ;;  %v1268_v0 = vadd.f32 %v1209_v23, %v3596_v45  ;;  %v1217_v45 = vpop.permute.xlu1 %1216 }
 0x236   :  { %v1646_v26 = vadd.f32 %v1609_v57, %v1555_v18  ;;  %v3759_v41 = vmul.f32 0.0044318484, %v1265_v46  ;;  %v3761_v57 = vmul.f32 0.053990968, %v1265_v46  ;;  %v3763_v18 = vmul.f32 0.24197073, %v1265_v46 }
 0x237   :  { %4891 = vst [vmem:[#allocation62_spill] sm:$0xff] %v3753_v40  ;;  %4893 = vst [vmem:[#allocation66_spill] sm:$0xff] %v3757_v35  ;;  %v3765_v63 = vmul.f32 0.3989423, %v1265_v46  ;;  %v4431_v28 = vrot.slane %v3757_v35, 1 }
 0x238   :  { %v3755_v3 = vadd.f32 %v1700_v55, %v1646_v26  ;;  %4894 = vst [vmem:[#allocation67_spill] sm:$0xff] %v3759_v41  ;;  %v4432_v20 = vrot.slane %v3759_v41, 2  ;;  %v3773_v55 = vmul.f32 0.053990968, %v3747_v16  ;;  %v3778_v46 = vmul.f32 0.24197073, %v3747_v16 }
 0x239   :  { %4895 = vst [vmem:[#allocation90_spill] sm:$0xff] %v3765_v63  ;;  %v3781_v34 = vmul.f32 0.3989423, %v3747_v16  ;;  %v1341_v23 = vsel %vm1328_vm0, %v1339_v36, %v4431_v28  ;;  %v4899_v40 = vrot.slane %v3761_v57, 3  ;;  %v4901_v5 = vrot.slane %v3765_v63, 5  ;;  %v1219_v28 = vpop.permute.xlu0 %1218 }
 0x23a   :  { %4892 = vst [vmem:[#allocation63_spill] sm:$0xff] %v3755_v3  ;;  %4896 = vst [vmem:[#allocation91_spill] sm:$0xff] %v3773_v55  ;;  %v1432_v26 = vsel %vm1419_vm1, %v1430_v29, %v4432_v20  ;;  %v1375_v50 = vadd.f32 %v1341_v23, %v1284_v31  ;;  %v4900_v3 = vrot.slane %v3763_v18, 4  ;;  %v1286_v20 = vmul.f32 1.4867195e-06, %v1268_v0 }
 0x23b   :  { %4897 = vst [vmem:[#allocation70_spill] sm:$0xff] %v3778_v46  ;;  %4898 = vst [vmem:[#allocation71_spill] sm:$0xff] %v3781_v34  ;;  %v1523_v6 = vsel %vm1510_vm2, %v1521_v11, %v4899_v40  ;;  %v1705_v35 = vsel %vm1692_vm4, %v1703_v22, %v4901_v5  ;;  %v1301_v41 = vmul.f32 0.00013383022, %v1268_v0  ;;  %v1269_v40 = vadd.f32 %v1211_v61, %v3640_v12  ;;  %v1221_v12 = vpop.permute.xlu1 %1220 }
 0x23c   :  { %v1614_v16 = vsel %vm1601_vm3, %v1612_v59, %v4900_v3  ;;  %v1466_v11 = vadd.f32 %v1432_v26, %v1375_v50  ;;  %v1392_v25 = vmul.f32 0.0044318484, %v1268_v0  ;;  %v3802_v31 = vmul.f32 0.053990968, %v1268_v0 }
 0x23d   :  { %v3804_v23 = vmul.f32 0.24197073, %v1268_v0  ;;  %v1344_v59 = vrot.slane %v1301_v41, 1  ;;  %v1665_v3 = vmul.f32 0.3989423, %v1268_v0  ;;  %v3809_v5 = vadd.f32 %v1213_v39, %v3600_v48 }
 0x23e   :  { %4902 = vst [vmem:[#allocation74_spill] sm:$0xff] %v3802_v31  ;;  %v3806_v63 = vmul.f32 1.4867195e-06, %v1269_v40  ;;  %v1557_v22 = vadd.f32 %v1523_v6, %v1466_v11  ;;  %v1435_v36 = vrot.slane %v1392_v25, 2  ;;  %v1526_v29 = vrot.slane %v3802_v31, 3  ;;  %v1225_v25 = vpop.permute.xlu0 %1224 }
 0x23f   :  { %4903 = vst [vmem:[#allocation75_spill] sm:$0xff] %v3804_v23  ;;  %v1617_v34 = vrot.slane %v3804_v23, 4  ;;  %v1708_v50 = vrot.slane %v1665_v3, 5  ;;  %v3815_v46 = vmul.f32 0.00013383022, %v1269_v40 }
 0x240   :  { %4904 = vst [vmem:[#allocation78_spill] sm:$0xff] %v3806_v63  ;;  %v1648_v41 = vadd.f32 %v1614_v16, %v1557_v22  ;;  %v3817_v0 = vmul.f32 0.0044318484, %v1269_v40  ;;  %v3819_v55 = vmul.f32 0.053990968, %v1269_v40 }
 0x241   :  { %4905 = vst [vmem:[#allocation92_spill] sm:$0xff] %v3815_v46  ;;  %v3821_v48 = vmul.f32 0.24197073, %v1269_v40  ;;  %v4445_v6 = vrot.slane %v3815_v46, 1  ;;  %v3824_v39 = vmul.f32 0.3989423, %v1269_v40 }
 0x242   :  { %4906 = vst [vmem:[#allocation93_spill] sm:$0xff] %v3817_v0  ;;  %v3828_v3 = vmul.f32 0.053990968, %v3809_v5  ;;  %v3830_v26 = vadd.f32 %v1705_v35, %v1648_v41  ;;  %v4447_v16 = vrot.slane %v3817_v0, 2  ;;  %v4449_v22 = vrot.slane %v3819_v55, 3 }
 0x243   :  { %4907 = vst [vmem:[#allocation79_spill] sm:$0xff] %v3821_v48  ;;  %4908 = vst [vmem:[#allocation94_spill] sm:$0xff] %v3824_v39  ;;  %v4448_v61 = vrot.slane %v3821_v48, 4  ;;  %v1346_v31 = vsel %vm1328_vm0, %v1344_v59, %v4445_v6  ;;  %v4452_v40 = vrot.slane %v3824_v39, 5  ;;  %v3841_v11 = vmul.f32 0.24197073, %v3809_v5  ;;  %v1227_v6 = vpop.permute.xlu1 %1226 }
 0x244   :  { %v1377_v63 = vadd.f32 %v1346_v31, %v1286_v20  ;;  %v1437_v35 = vsel %vm1419_vm1, %v1435_v36, %v4447_v16  ;;  %v1528_v41 = vsel %vm1510_vm2, %v1526_v29, %v4449_v22  ;;  %v3857_v20 = vmul.f32 0.3989423, %v3809_v5 }
 0x245   :  { %v1619_v59 = vsel %vm1601_vm3, %v1617_v34, %v4448_v61  ;;  %v1710_v23 = vsel %vm1692_vm4, %v1708_v50, %v4452_v40  ;;  %v1272_v36 = vadd.f32 %v1217_v45, %v3598_v27  ;;  %v1273_v16 = vadd.f32 %v1219_v28, %v3604_v21  ;;  %v1229_v61 = vpop.permute.xlu0 %1228 }
 0x246   :  { %v1468_v31 = vadd.f32 %v1437_v35, %v1377_v63  ;;  %v3862_v29 = vadd.f32 %v1221_v12, %v3602_v19  ;;  %v1276_v34 = vadd.f32 %v1225_v25, %v3608_v8  ;;  %v3867_v40 = vadd.f32 %v1227_v6, %v3606_v33 }
 0x247   :  { %v1288_v0 = vmul.f32 1.4867195e-06, %v1272_v36  ;;  %v1304_v50 = vmul.f32 0.00013383022, %v1272_v36  ;;  %v1395_v39 = vmul.f32 0.0044318484, %v1272_v36  ;;  %v3876_v8 = vadd.f32 %v1229_v61, %v3612_v47  ;;  %v1079_v6 = vpop.permute.xlu1 %1078 }
 0x248   :  { %4909 = vst [vmem:[#allocation95_spill] sm:$0xff] %v3862_v29  ;;  %v1559_v46 = vadd.f32 %v1528_v41, %v1468_v31  ;;  %v3869_v48 = vmul.f32 0.053990968, %v1272_v36  ;;  %v3871_v27 = vmul.f32 0.24197073, %v1272_v36 }
 0x249   :  { %v1349_v21 = vrot.slane %v1304_v50, 1  ;;  %v1668_v63 = vmul.f32 0.3989423, %v1272_v36  ;;  %v3873_v19 = vmul.f32 1.4867195e-06, %v1273_v16  ;;  %v1440_v45 = vrot.slane %v1395_v39, 2 }
 0x24a   :  { %4910 = vst [vmem:[#allocation80_spill] sm:$0xff] %v3869_v48  ;;  %4911 = vst [vmem:[#allocation96_spill] sm:$0xff] %v3871_v27  ;;  %v1650_v28 = vadd.f32 %v1619_v59, %v1559_v46  ;;  %v1531_v12 = vrot.slane %v3869_v48, 3  ;;  %v1622_v33 = vrot.slane %v3871_v27, 4  ;;  %v3882_v41 = vmul.f32 0.00013383022, %v1273_v16 }
 0x24b   :  { %4912 = vst [vmem:[#allocation97_spill] sm:$0xff] %v3873_v19  ;;  %v1713_v25 = vrot.slane %v1668_v63, 5  ;;  %v3886_v36 = vmul.f32 0.0044318484, %v1273_v16  ;;  %v3888_v50 = vmul.f32 0.053990968, %v1273_v16  ;;  %v1087_v63 = vpop.permute.xlu0 %1086  ;;  %v1095_v39 = vpop.permute.xlu1 %1094 }
 0x24c   :  { %4913 = vst [vmem:[#allocation128_spill] sm:$0xff] %v3882_v41  ;;  %v3884_v31 = vadd.f32 %v1710_v23, %v1650_v28  ;;  %v3890_v47 = vmul.f32 0.24197073, %v1273_v16  ;;  %v4461_v46 = vrot.slane %v3882_v41, 1  ;;  %v3893_v61 = vmul.f32 0.3989423, %v1273_v16 }
 0x24d   :  { %4915 = vst [vmem:[#allocation28_spill] sm:$0xff] %v3886_v36  ;;  %v3897_v59 = vmul.f32 0.053990968, %v3862_v29  ;;  %v3903_v35 = vmul.f32 0.24197073, %v3862_v29  ;;  %v4920_v23 = vrot.slane %v3886_v36, 2 }
 0x24e   :  { %4914 = vst [vmem:[#allocation129_spill] sm:$0xff] %v3884_v31  ;;  %4916 = vst [vmem:[#allocation29_spill] sm:$0xff] %v3893_v61  ;;  %v1351_v16 = vsel %vm1328_vm0, %v1349_v21, %v4461_v46  ;;  %v4468_v22 = vrot.slane %v3893_v61, 5  ;;  %v3911_v48 = vmul.f32 0.3989423, %v3862_v29  ;;  %v4921_v27 = vrot.slane %v3888_v50, 3 }
 0x24f   :  { %4917 = vst [vmem:[#allocation81_spill] sm:$0xff] %v3897_v59  ;;  %4918 = vst [vmem:[#allocation112_spill] sm:$0xff] %v3903_v35  ;;  %v1379_v19 = vadd.f32 %v1351_v16, %v1288_v0  ;;  %v1442_v28 = vsel %vm1419_vm1, %v1440_v45, %v4920_v23  ;;  %v4922_v41 = vrot.slane %v3890_v47, 4  ;;  %v1290_v16 = vmul.f32 1.4867195e-06, %v1276_v34 }
 0x250   :  { %4919 = vst [vmem:[#allocation113_spill] sm:$0xff] %v3911_v48  ;;  %v1533_v31 = vsel %vm1510_vm2, %v1531_v12, %v4921_v27  ;;  %v1715_v46 = vsel %vm1692_vm4, %v1713_v25, %v4468_v22  ;;  %v1307_v59 = vmul.f32 0.00013383022, %v1276_v34  ;;  %v1398_v45 = vmul.f32 0.0044318484, %v1276_v34  ;;  %v1103_v48 = vpop.permute.xlu0 %1102 }
 0x251   :  { %v1624_v21 = vsel %vm1601_vm3, %v1622_v33, %v4922_v41  ;;  %v1470_v36 = vadd.f32 %v1442_v28, %v1379_v19  ;;  %v3927_v23 = vmul.f32 0.053990968, %v1276_v34  ;;  %v3929_v29 = vmul.f32 0.24197073, %v1276_v34 }
 0x252   :  { %v1671_v27 = vmul.f32 0.3989423, %v1276_v34  ;;  %v3932_v12 = vmul.f32 1.4867195e-06, %v3867_v40  ;;  %v3935_v33 = vadd.f32 %v1079_v6, %v3475_v17  ;;  %v1354_v41 = vrot.slane %v1307_v59, 1 }
 0x253   :  { %4923 = vst [vmem:[#allocation50_spill] sm:$0xff] %v3927_v23  ;;  %4924 = vst [vmem:[#allocation51_spill] sm:$0xff] %v3929_v29  ;;  %v1561_v25 = vadd.f32 %v1533_v31, %v1470_v36  ;;  %v1445_v22 = vrot.slane %v1398_v45, 2  ;;  %v1536_v0 = vrot.slane %v3927_v23, 3  ;;  %v1627_v19 = vrot.slane %v3929_v29, 4  ;;  %v1111_v29 = vpop.permute.xlu1 %1110 }
 0x254   :  { %4925 = vst [vmem:[#allocation48_spill] sm:$0xff] %v3932_v12  ;;  %v1718_v28 = vrot.slane %v1671_v27, 5  ;;  %v3942_v17 = vmul.f32 0.00013383022, %v3867_v40  ;;  %v3945_v6 = vmul.f32 0.0044318484, %v3867_v40  ;;  %v3958_v27 = vadd.f32 %v1087_v63, %v3522_v43 }
 0x255   :  { %v1652_v35 = vadd.f32 %v1624_v21, %v1561_v25  ;;  %v3948_v31 = vmul.f32 0.053990968, %v3867_v40  ;;  %v3951_v36 = vmul.f32 0.24197073, %v3867_v40  ;;  %v3954_v59 = vmul.f32 0.3989423, %v3867_v40 }
 0x256   :  { %4926 = vst [vmem:[#allocation49_spill] sm:$0xff] %v3942_v17  ;;  %v4478_v25 = vrot.slane %v3942_v17, 1  ;;  %v4479_v34 = vrot.slane %v3945_v6, 2  ;;  %v3968_v40 = vmul.f32 0.053990968, %v3876_v8 }
 0x257   :  { %v3960_v21 = vadd.f32 %v1715_v46, %v1652_v35  ;;  %v4480_v61 = vrot.slane %v3948_v31, 3  ;;  %v3971_v45 = vmul.f32 0.24197073, %v3876_v8  ;;  %v3983_v63 = vmul.f32 0.3989423, %v3876_v8 }
 0x258   :  { %v1356_v43 = vsel %vm1328_vm0, %v1354_v41, %v4478_v25  ;;  %v1447_v35 = vsel %vm1419_vm1, %v1445_v22, %v4479_v34  ;;  %v4928_v12 = vrot.slane %v3951_v36, 4  ;;  %v4929_v17 = vrot.slane %v3954_v59, 5  ;;  %v1191_v22 = vpop.permute.xlu0 %1190 }
 0x259   :  { %4927 = vst [vmem:[#allocation98_spill] sm:$0xff] %v3960_v21  ;;  %v1538_v46 = vsel %vm1510_vm2, %v1536_v0, %v4480_v61  ;;  %v1381_v23 = vadd.f32 %v1356_v43, %v1290_v16  ;;  %v3995_v61 = vadd.f32 %v1095_v39, %v3566_v37  ;;  %v3998_v16 = vadd.f32 %v1103_v48, %v3584_v56 }
 0x25a   :  { %v1629_v21 = vsel %vm1601_vm3, %v1627_v19, %v4928_v12  ;;  %v1720_v41 = vsel %vm1692_vm4, %v1718_v28, %v4929_v17  ;;  %v4001_v12 = vadd.f32 %v1111_v29, %v3589_v54  ;;  %v1749_v19 = vrot.slane %v3646_v15, 6 }
 0x25b   :  { %v1472_v43 = vadd.f32 %v1447_v35, %v1381_v23  ;;  %v1804_v28 = vrot.slane %v3644_v4, 7  ;;  %v1259_v17 = vadd.f32 %v1191_v22, %v3593_v7  ;;  %v1294_v34 = vmul.f32 0.00013383022, %v3629_v52 }
 0x25c   :  { %v4008_v0 = vmul.f32 0.0044318484, %v3629_v52  ;;  %v4930_v37 = vrot.slane %v3659_v32, 4  ;;  %v4931_v56 = vrot.slane %v3646_v15, 4  ;;  %v4932_v54 = vrot.slane %v3667_v10, 5 }
 0x25d   :  { %v1563_v39 = vadd.f32 %v1538_v46, %v1472_v43  ;;  %v4933_v29 = vrot.slane %v3649_v44, 5  ;;  %v4934_v7 = vrot.slane %v3627_v62, 6  ;;  %v1751_v35 = vrot.slane %v3659_v32, 6 }
 0x25e   :  { %v1606_v48 = vsel %vm1601_vm3, %v4931_v56, %v4930_v37  ;;  %v1332_v22 = vrot.slane %v1294_v34, 1  ;;  %v1423_v25 = vrot.slane %v4008_v0, 2  ;;  %v4935_v46 = vrot.slane %v3625_v53, 7 }
 0x25f   :  { %v1697_v4 = vsel %vm1692_vm4, %v4933_v29, %v4932_v54  ;;  %v1750_v23 = vsel %vm1747_vm5, %v4934_v7, %v1749_v19  ;;  %v1654_v10 = vadd.f32 %v1629_v21, %v1563_v39  ;;  %v1752_v44 = vsel %vm1747_vm5, %v1749_v19, %v1751_v35 }
 0x260   :  { %v1790_v15 = vadd.f32 %v1750_v23, %v3701_v24  ;;  %v1805_v43 = vsel %vm1802_vm6, %v4935_v46, %v1804_v28  ;;  %v1806_v37 = vrot.slane %v3653_v49, 7  ;;  %v1869_v56 = vmul.f32 0.00013383022, %v1259_v17 }
 0x261   :  { %v4936_v62 = vrot.slane %v3637_v14, 1  ;;  %v4937_v32 = vrot.slane %v3642_v1, 2  ;;  %v1911_v24 = vmul.f32 1.4867195e-06, %v3629_v52  ;;  %v4038_v53 = vadd.f32 %v1720_v41, %v1654_v10 }
 0x262   :  { %v1845_v29 = vadd.f32 %v1805_v43, %v1790_v15  ;;  %v1807_v19 = vsel %vm1802_vm6, %v1804_v28, %v1806_v37  ;;  %v1881_v39 = vrot.slane %v1869_v56, 1  ;;  %v1912_v7 = vmul.f32 1.4867195e-06, %v1259_v17 }
 0x263   :  { %v1333_v54 = vsel %vm1328_vm0, %v4936_v62, %v1332_v22  ;;  %v1424_v34 = vsel %vm1419_vm1, %v4937_v32, %v1423_v25  ;;  %v1942_v14 = vrot.slane %v1911_v24, 2  ;;  %v1297_v23 = vmul.f32 0.00013383022, %v3681_v51 }
 0x264   :  { %v1372_v21 = vadd.f32 %v1333_v54, %v3635_v42  ;;  %v1857_v49 = vadd.f32 %v1845_v29, %v3642_v1  ;;  %v1882_v46 = vsel %vm1328_vm0, %v1332_v22, %v1881_v39  ;;  %v4046_v25 = vmul.f32 0.0044318484, %v3681_v51 }
 0x265   :  { %v4938_v52 = vrot.slane %v3715_v13, 3  ;;  %v4939_v41 = vrot.slane %v3703_v2, 3  ;;  %v4940_v43 = vrot.slane %v3635_v42, 2  ;;  %v1944_v17 = vrot.slane %v1912_v7, 2 }
 0x266   :  { %v1463_v35 = vadd.f32 %v1424_v34, %v1372_v21  ;;  %v1899_v28 = vadd.f32 %v1857_v49, %v1333_v54  ;;  %v1337_v10 = vrot.slane %v1297_v23, 1  ;;  %v1428_v22 = vrot.slane %v4046_v25, 2  ;;  %v4945_v21 = vld [vmem:[#allocation89_spill] sm:$0xff]  ;;  %v4947_v23 = vld [vmem:[#allocation88_spill] sm:$0xff] }
 0x267   :  { %v1520_v15 = vsel %vm1510_vm2, %v4939_v41, %v4938_v52  ;;  %v1943_v1 = vsel %vm1419_vm1, %v4940_v43, %v1942_v14  ;;  %v4941_v56 = vrot.slane %v3725_v60, 4  ;;  %v4942_v62 = vrot.slane %v3705_v38, 4  ;;  %v4948_v52 = vld [vmem:[#allocation54_spill] sm:$0xff]  ;;  %v1199_v43 = vpop.permute.xlu1 %1198 }
 0x268   :  { %v1554_v37 = vadd.f32 %v3684_v58, %v1463_v35  ;;  %v4943_v34 = vrot.slane %v3728_v9, 5  ;;  %v4944_v54 = vrot.slane %v3707_v30, 5  ;;  %v1945_v29 = vsel %vm1419_vm1, %v1942_v14, %v1944_v17  ;;  %v4950_v14 = vld [vmem:[#allocation25_spill] sm:$0xff] }
 0x269   :  { %v1611_v32 = vsel %vm1601_vm3, %v4942_v62, %v4941_v56  ;;  %v1983_v24 = vadd.f32 %v1943_v1, %v1899_v28  ;;  %v4946_v39 = vrot.slane %v4945_v21, 1  ;;  %v1754_v49 = vrot.slane %v3705_v38, 6  ;;  %v4952_v56 = vld [vmem:[#allocation63_spill] sm:$0xff] }
 0x26a   :  { %v1702_v42 = vsel %vm1692_vm4, %v4944_v54, %v4943_v34  ;;  %v1645_v7 = vadd.f32 %v1606_v48, %v1554_v37  ;;  %v4949_v41 = vrot.slane %v4948_v52, 2  ;;  %v1756_v30 = vrot.slane %v3725_v60, 6  ;;  %v4953_v34 = vld [vmem:[#allocation23_spill] sm:$0xff] }
 0x26b   :  { %v1338_v58 = vsel %vm1328_vm0, %v4946_v39, %v1337_v10  ;;  %1996 = vst.msk [vmem:[%s4340_s1] sm:$0xff] %vm1995_vm7, %v1983_v24  ;;  %v4951_v28 = vrot.slane %v4950_v14, 6  ;;  %v1809_v38 = vrot.slane %v3703_v2, 7  ;;  %v1811_v48 = vrot.slane %v3715_v13, 7  ;;  %v1207_v2 = vpop.permute.xlu0 %1206 }
 0x26c   :  { %v1374_v35 = vadd.f32 %v1338_v58, %v4947_v23  ;;  %v1429_v9 = vsel %vm1419_vm1, %v4949_v41, %v1428_v22  ;;  %v1913_v17 = vmul.f32 1.4867195e-06, %v3681_v51  ;;  %v1736_v37 = vadd.f32 %v1697_v4, %v1645_v7 }
 0x26d   :  { %v1755_v1 = vsel %vm1747_vm5, %v4951_v28, %v1754_v49  ;;  %v1757_v60 = vsel %vm1747_vm5, %v1754_v49, %v1756_v30  ;;  %v4954_v54 = vrot.slane %v4953_v34, 7  ;;  %v1812_v21 = vsel %vm1802_vm6, %v1809_v38, %v1811_v48 }
 0x26e   :  { %v1465_v22 = vadd.f32 %v1429_v9, %v1374_v35  ;;  %v1792_v62 = vadd.f32 %v1755_v1, %v4952_v56  ;;  %v1947_v39 = vrot.slane %v1913_v17, 2  ;;  %v1263_v41 = vadd.f32 %v1199_v43, %v3935_v33  ;;  %v4957_v56 = vld [vmem:[#allocation91_spill] sm:$0xff] }
 0x26f   :  { %v1810_v24 = vsel %vm1802_vm6, %v4954_v54, %v1809_v38  ;;  %v1791_v14 = vadd.f32 %v1752_v44, %v1736_v37  ;;  %v1759_v51 = vrot.slane %v3763_v18, 6  ;;  %v4955_v4 = vrot.slane %v4947_v23, 2 }
 0x270   :  { %v1556_v13 = vadd.f32 %v1520_v15, %v1465_v22  ;;  %v1847_v28 = vadd.f32 %v1810_v24, %v1792_v62  ;;  %v1870_v7 = vmul.f32 0.00013383022, %v1263_v41  ;;  %v1914_v35 = vmul.f32 1.4867195e-06, %v1263_v41  ;;  %v4956_v15 = vld [vmem:[#allocation59_spill] sm:$0xff] }
 0x271   :  { %v1948_v49 = vsel %vm1419_vm1, %v4955_v4, %v1947_v39  ;;  %v1814_v9 = vrot.slane %v3761_v57, 7  ;;  %v1846_v30 = vadd.f32 %v1807_v19, %v1791_v14  ;;  %v1267_v33 = vadd.f32 %v1207_v2, %v3958_v27  ;;  %v4960_v14 = vld [vmem:[#allocation70_spill] sm:$0xff]  ;;  %v4965_v4 = vld [vmem:[#allocation67_spill] sm:$0xff] }
 0x272   :  { %v1647_v1 = vadd.f32 %v1611_v32, %v1556_v13  ;;  %v1859_v38 = vadd.f32 %v1847_v28, %v4948_v52  ;;  %v1883_v43 = vrot.slane %v1870_v7, 1  ;;  %v1949_v44 = vrot.slane %v1914_v35, 2  ;;  %v4963_v13 = vld [vmem:[#allocation66_spill] sm:$0xff]  ;;  %v4967_v7 = vld [vmem:[#allocation71_spill] sm:$0xff] }
 0x273   :  { %v1300_v48 = vmul.f32 0.00013383022, %v4956_v15  ;;  %v4104_v17 = vmul.f32 0.0044318484, %v4956_v15  ;;  %v1858_v23 = vadd.f32 %v1846_v30, %v4008_v0  ;;  %v4958_v62 = vrot.slane %v4957_v56, 3  ;;  %v4969_v30 = vld [vmem:[#allocation90_spill] sm:$0xff] }
 0x274   :  { %v1738_v37 = vadd.f32 %v1702_v42, %v1647_v1  ;;  %v1901_v22 = vadd.f32 %v1859_v38, %v1338_v58  ;;  %v4959_v19 = vrot.slane %v3761_v57, 3  ;;  %v1884_v52 = vsel %vm1328_vm0, %v1337_v10, %v1883_v43 }
 0x275   :  { %v1950_v27 = vsel %vm1419_vm1, %v1947_v39, %v1949_v44  ;;  %v1342_v34 = vrot.slane %v1300_v48, 1  ;;  %v1433_v54 = vrot.slane %v4104_v17, 2  ;;  %v1900_v24 = vadd.f32 %v1882_v46, %v1858_v23  ;;  %v4973_v44 = vld [vmem:[#allocation62_spill] sm:$0xff] }
 0x276   :  { %v1525_v32 = vsel %vm1510_vm2, %v4959_v19, %v4958_v62  ;;  %v1793_v41 = vadd.f32 %v1757_v60, %v1738_v37  ;;  %v1985_v2 = vadd.f32 %v1948_v49, %v1901_v22  ;;  %v4961_v0 = vrot.slane %v4960_v14, 4  ;;  %v4971_v49 = vld [vmem:[#allocation58_spill] sm:$0xff]  ;;  %v4974_v22 = vld [vmem:[#allocation55_spill] sm:$0xff] }
 0x277   :  { %v4962_v42 = vrot.slane %v3763_v18, 4  ;;  %v4964_v57 = vrot.slane %v4963_v13, 1  ;;  %v4966_v10 = vrot.slane %v4965_v4, 2  ;;  %v4968_v35 = vrot.slane %v4967_v7, 5 }
 0x278   :  { %v4970_v46 = vrot.slane %v4969_v30, 5  ;;  %v4972_v1 = vrot.slane %v4971_v49, 6  ;;  %v1984_v38 = vadd.f32 %v1945_v29, %v1900_v24  ;;  %v1848_v43 = vadd.f32 %v1812_v21, %v1793_v41  ;;  %1998 = vst.msk [vmem:[%s4340_s1 + $0x10] sm:$0xff] %vm1995_vm7, %v1985_v2 }
 0x279   :  { %v1616_v58 = vsel %vm1601_vm3, %v4962_v42, %v4961_v0  ;;  %v1343_v28 = vsel %vm1328_vm0, %v4964_v57, %v1342_v34  ;;  %v1434_v39 = vsel %vm1419_vm1, %v4966_v10, %v1433_v54  ;;  %v1761_v23 = vrot.slane %v4960_v14, 6 }
 0x27a   :  { %v1707_v60 = vsel %vm1692_vm4, %v4970_v46, %v4968_v35  ;;  %v1760_v18 = vsel %vm1747_vm5, %v4972_v1, %v1759_v51  ;;  %v1376_v48 = vadd.f32 %v1343_v28, %v4973_v44  ;;  %v4975_v62 = vrot.slane %v4974_v22, 7  ;;  %1997 = vst.msk [vmem:[%s4340_s1 + $0x8] sm:$0xff] %vm1995_vm7, %v1984_v38  ;;  %v4982_v38 = vld [vmem:[#allocation79_spill] sm:$0xff] }
 0x27b   :  { %v1794_v37 = vadd.f32 %v1760_v18, %v3830_v26  ;;  %v1816_v54 = vrot.slane %v4957_v56, 7  ;;  %v1871_v0 = vmul.f32 0.00013383022, %v1267_v33  ;;  %v1860_v29 = vadd.f32 %v1848_v43, %v4046_v25 }
 0x27c   :  { %v1815_v19 = vsel %vm1802_vm6, %v4975_v62, %v1814_v9  ;;  %v1467_v21 = vadd.f32 %v1434_v39, %v1376_v48  ;;  %v1762_v24 = vsel %vm1747_vm5, %v1759_v51, %v1761_v23  ;;  %v1915_v41 = vmul.f32 1.4867195e-06, %v4956_v15  ;;  %v4985_v23 = vld [vmem:[#allocation94_spill] sm:$0xff]  ;;  %v1215_v62 = vpop.permute.xlu1 %1214 }
 0x27d   :  { %v1817_v26 = vsel %vm1802_vm6, %v1814_v9, %v1816_v54  ;;  %v1849_v2 = vadd.f32 %v1815_v19, %v1794_v37  ;;  %v1885_v14 = vrot.slane %v1871_v0, 1  ;;  %v1916_v42 = vmul.f32 1.4867195e-06, %v1267_v33  ;;  %v4987_v54 = vld [vmem:[#allocation78_spill] sm:$0xff]  ;;  %v4988_v0 = vld [vmem:[#allocation93_spill] sm:$0xff] }
 0x27e   :  { %v1902_v13 = vadd.f32 %v1884_v52, %v1860_v29  ;;  %v1558_v56 = vadd.f32 %v1525_v32, %v1467_v21  ;;  %v1952_v57 = vrot.slane %v1915_v41, 2  ;;  %v1303_v10 = vmul.f32 0.00013383022, %v3809_v5 }
 0x27f   :  { %v1861_v7 = vadd.f32 %v1849_v2, %v4965_v4  ;;  %v1886_v35 = vsel %vm1328_vm0, %v1342_v34, %v1885_v14  ;;  %v1954_v25 = vrot.slane %v1916_v42, 2  ;;  %v4157_v39 = vmul.f32 0.0044318484, %v3809_v5 }
 0x280   :  { %v1986_v51 = vadd.f32 %v1950_v27, %v1902_v13  ;;  %v1649_v15 = vadd.f32 %v1616_v58, %v1558_v56  ;;  %v4976_v9 = vrot.slane %v4973_v44, 2  ;;  %v1347_v33 = vrot.slane %v1303_v10, 1  ;;  %v4979_v58 = vld [vmem:[#allocation92_spill] sm:$0xff]  ;;  %v4990_v56 = vld [vmem:[#allocation75_spill] sm:$0xff] }
 0x281   :  { %v1903_v52 = vadd.f32 %v1861_v7, %v1343_v28  ;;  %v1955_v32 = vsel %vm1419_vm1, %v1952_v57, %v1954_v25  ;;  %v1438_v46 = vrot.slane %v4157_v39, 2  ;;  %v4977_v4 = vrot.slane %v3828_v3, 3 }
 0x282   :  { %v1953_v30 = vsel %vm1419_vm1, %v4976_v9, %v1952_v57  ;;  %v4978_v34 = vrot.slane %v3819_v55, 3  ;;  %1999 = vst.msk [vmem:[%s4340_s1 + $0x18] sm:$0xff] %vm1995_vm7, %v1986_v51  ;;  %v1740_v27 = vadd.f32 %v1707_v60, %v1649_v15  ;;  %v4980_v1 = vrot.slane %v4979_v58, 1 }
 0x283   :  { %v4981_v18 = vrot.slane %v3841_v11, 4  ;;  %v4983_v43 = vrot.slane %v4982_v38, 4  ;;  %v4984_v48 = vrot.slane %v3857_v20, 5  ;;  %v4986_v37 = vrot.slane %v4985_v23, 5 }
 0x284   :  { %v1530_v49 = vsel %vm1510_vm2, %v4978_v34, %v4977_v4  ;;  %v1348_v28 = vsel %vm1328_vm0, %v4980_v1, %v1347_v33  ;;  %v1987_v19 = vadd.f32 %v1953_v30, %v1903_v52  ;;  %v4989_v29 = vrot.slane %v4988_v0, 2  ;;  %v1223_v34 = vpop.permute.xlu0 %1222 }
 0x285   :  { %v1621_v44 = vsel %vm1601_vm3, %v4983_v43, %v4981_v18  ;;  %v1712_v22 = vsel %vm1692_vm4, %v4986_v37, %v4984_v48  ;;  %v1378_v60 = vadd.f32 %v1348_v28, %v4987_v54  ;;  %v1764_v41 = vrot.slane %v4982_v38, 6 }
 0x286   :  { %v1439_v21 = vsel %vm1419_vm1, %v4989_v29, %v1438_v46  ;;  %v1795_v2 = vadd.f32 %v1762_v24, %v1740_v27  ;;  %v1766_v14 = vrot.slane %v3841_v11, 6  ;;  %v1819_v42 = vrot.slane %v3819_v55, 7  ;;  %2000 = vst.msk [vmem:[%s4340_s1 + $0x20] sm:$0xff] %vm1995_vm7, %v1987_v19  ;;  %v4992_v55 = vld [vmem:[#allocation129_spill] sm:$0xff]  ;;  %v4996_v19 = vld [vmem:[#allocation95_spill] sm:$0xff] }
 0x287   :  { %v1821_v20 = vrot.slane %v3828_v3, 7  ;;  %v1469_v13 = vadd.f32 %v1439_v21, %v1378_v60  ;;  %v4991_v57 = vrot.slane %v4990_v56, 6  ;;  %v1917_v7 = vmul.f32 1.4867195e-06, %v3809_v5  ;;  %v4993_v3 = vld [vmem:[#allocation74_spill] sm:$0xff]  ;;  %v5005_v56 = vld [vmem:[#allocation29_spill] sm:$0xff] }
 0x288   :  { %v1271_v24 = vadd.f32 %v1215_v62, %v3995_v61  ;;  %v1850_v25 = vadd.f32 %v1817_v26, %v1795_v2  ;;  %v1767_v11 = vsel %vm1747_vm5, %v1764_v41, %v1766_v14  ;;  %v4994_v15 = vrot.slane %v4993_v3, 7 }
 0x289   :  { %v1765_v10 = vsel %vm1747_vm5, %v4991_v57, %v1764_v41  ;;  %v1560_v30 = vadd.f32 %v1530_v49, %v1469_v13  ;;  %v1822_v52 = vsel %vm1802_vm6, %v1819_v42, %v1821_v20  ;;  %v1957_v46 = vrot.slane %v1917_v7, 2  ;;  %v4997_v41 = vld [vmem:[#allocation81_spill] sm:$0xff]  ;;  %v5007_v7 = vld [vmem:[#allocation96_spill] sm:$0xff] }
 0x28a   :  { %v1796_v51 = vadd.f32 %v1765_v10, %v4992_v55  ;;  %v1820_v9 = vsel %vm1802_vm6, %v4994_v15, %v1819_v42  ;;  %v1872_v4 = vmul.f32 0.00013383022, %v1271_v24  ;;  %v1862_v27 = vadd.f32 %v1850_v25, %v4104_v17  ;;  %v5009_v55 = vld [vmem:[#allocation128_spill] sm:$0xff] }
 0x28b   :  { %v1918_v58 = vmul.f32 1.4867195e-06, %v1271_v24  ;;  %v1769_v61 = vrot.slane %v3890_v47, 6  ;;  %v1651_v26 = vadd.f32 %v1621_v44, %v1560_v30  ;;  %v4995_v1 = vrot.slane %v4987_v54, 2  ;;  %v5011_v15 = vld [vmem:[#allocation28_spill] sm:$0xff] }
 0x28c   :  { %v1851_v5 = vadd.f32 %v1820_v9, %v1796_v51  ;;  %v1887_v38 = vrot.slane %v1872_v4, 1  ;;  %v1824_v43 = vrot.slane %v3888_v50, 7  ;;  %v1904_v49 = vadd.f32 %v1886_v35, %v1862_v27 }
 0x28d   :  { %v1958_v18 = vsel %vm1419_vm1, %v4995_v1, %v1957_v46  ;;  %v1959_v23 = vrot.slane %v1918_v58, 2  ;;  %v1275_v37 = vadd.f32 %v1223_v34, %v3998_v16  ;;  %v1742_v62 = vadd.f32 %v1712_v22, %v1651_v26  ;;  %v5014_v34 = vld [vmem:[#allocation97_spill] sm:$0xff] }
 0x28e   :  { %v1863_v48 = vadd.f32 %v1851_v5, %v4988_v0  ;;  %v1888_v17 = vsel %vm1328_vm0, %v1347_v33, %v1887_v38  ;;  %v1306_v60 = vmul.f32 0.00013383022, %v4996_v19  ;;  %v4220_v44 = vmul.f32 0.0044318484, %v4996_v19  ;;  %v5000_v33 = vld [vmem:[#allocation112_spill] sm:$0xff] }
 0x28f   :  { %v1988_v54 = vadd.f32 %v1955_v32, %v1904_v49  ;;  %v1960_v21 = vsel %vm1419_vm1, %v1957_v46, %v1959_v23  ;;  %v4998_v2 = vrot.slane %v4997_v41, 3  ;;  %v4999_v35 = vrot.slane %v3888_v50, 3  ;;  %v5013_v46 = vld [vmem:[#allocation98_spill] sm:$0xff] }
 0x290   :  { %v1905_v29 = vadd.f32 %v1863_v48, %v1348_v28  ;;  %v1797_v14 = vadd.f32 %v1767_v11, %v1742_v62  ;;  %v1352_v16 = vrot.slane %v1306_v60, 1  ;;  %v1443_v22 = vrot.slane %v4220_v44, 2  ;;  %v5003_v28 = vld [vmem:[#allocation113_spill] sm:$0xff] }
 0x291   :  { %v1535_v0 = vsel %vm1510_vm2, %v4999_v35, %v4998_v2  ;;  %v5001_v42 = vrot.slane %v5000_v33, 4  ;;  %v5002_v20 = vrot.slane %v3890_v47, 4  ;;  %2001 = vst.msk [vmem:[%s4340_s1 + $0x28] sm:$0xff] %vm1995_vm7, %v1988_v54  ;;  %v5004_v50 = vrot.slane %v5003_v28, 5 }
 0x292   :  { %v1989_v32 = vadd.f32 %v1958_v18, %v1905_v29  ;;  %v5006_v57 = vrot.slane %v5005_v56, 5  ;;  %v5008_v24 = vrot.slane %v5007_v7, 6  ;;  %v1771_v47 = vrot.slane %v5000_v33, 6 }
 0x293   :  { %v1626_v13 = vsel %vm1601_vm3, %v5002_v20, %v5001_v42  ;;  %v1852_v11 = vadd.f32 %v1822_v52, %v1797_v14  ;;  %v5010_v51 = vrot.slane %v5009_v55, 1  ;;  %v5012_v9 = vrot.slane %v5011_v15, 2  ;;  %v5015_v52 = vld [vmem:[#allocation80_spill] sm:$0xff] }
 0x294   :  { %v1717_v10 = vsel %vm1692_vm4, %v5006_v57, %v5004_v50  ;;  %v1770_v25 = vsel %vm1747_vm5, %v5008_v24, %v1769_v61  ;;  %2002 = vst.msk [vmem:[%s4340_s1 + $0x30] sm:$0xff] %vm1995_vm7, %v1989_v32  ;;  %v1772_v5 = vsel %vm1747_vm5, %v1769_v61, %v1771_v47  ;;  %v5016_v58 = vrot.slane %v5015_v52, 7  ;;  %v5018_v32 = vld [vmem:[#allocation49_spill] sm:$0xff] }
 0x295   :  { %v1353_v3 = vsel %vm1328_vm0, %v5010_v51, %v1352_v16  ;;  %v1444_v30 = vsel %vm1419_vm1, %v5012_v9, %v1443_v22  ;;  %v1798_v4 = vadd.f32 %v1770_v25, %v5013_v46  ;;  %v1826_v1 = vrot.slane %v4997_v41, 7 }
 0x296   :  { %v1380_v27 = vadd.f32 %v1353_v3, %v5014_v34  ;;  %v1825_v26 = vsel %vm1802_vm6, %v5016_v58, %v1824_v43  ;;  %v1864_v18 = vadd.f32 %v1852_v11, %v4157_v39  ;;  %v1873_v49 = vmul.f32 0.00013383022, %v1275_v37  ;;  %v1231_v11 = vpop.permute.xlu1 %1230 }
 0x297   :  { %v1853_v38 = vadd.f32 %v1825_v26, %v1798_v4  ;;  %v1919_v48 = vmul.f32 1.4867195e-06, %v4996_v19  ;;  %v1827_v62 = vsel %vm1802_vm6, %v1824_v43, %v1826_v1  ;;  %v1920_v60 = vmul.f32 1.4867195e-06, %v1275_v37 }
 0x298   :  { %v1471_v23 = vadd.f32 %v1444_v30, %v1380_v27  ;;  %v1309_v54 = vmul.f32 0.00013383022, %v3876_v8  ;;  %v1906_v29 = vadd.f32 %v1888_v17, %v1864_v18  ;;  %v1889_v2 = vrot.slane %v1873_v49, 1  ;;  %v5030_v49 = vld [vmem:[#allocation50_spill] sm:$0xff] }
 0x299   :  { %v1865_v61 = vadd.f32 %v1853_v38, %v5011_v15  ;;  %v1962_v35 = vrot.slane %v1919_v48, 2  ;;  %v1964_v22 = vrot.slane %v1920_v60, 2  ;;  %v1400_v39 = vmul.f32 0.0044318484, %v3876_v8 }
 0x29a   :  { %v1562_v14 = vadd.f32 %v1535_v0, %v1471_v23  ;;  %v1357_v41 = vrot.slane %v1309_v54, 1  ;;  %v1990_v33 = vadd.f32 %v1960_v21, %v1906_v29  ;;  %v1890_v42 = vsel %vm1328_vm0, %v1352_v16, %v1889_v2  ;;  %v5020_v16 = vld [vmem:[#allocation48_spill] sm:$0xff] }
 0x29b   :  { %v1907_v19 = vadd.f32 %v1865_v61, %v1353_v3  ;;  %v5017_v20 = vrot.slane %v5014_v34, 2  ;;  %v1965_v17 = vsel %vm1419_vm1, %v1962_v35, %v1964_v22  ;;  %v5019_v28 = vrot.slane %v5018_v32, 1 }
 0x29c   :  { %v1653_v37 = vadd.f32 %v1626_v13, %v1562_v14  ;;  %v1448_v0 = vrot.slane %v1400_v39, 2  ;;  %2003 = vst.msk [vmem:[%s4340_s1 + $0x38] sm:$0xff] %vm1995_vm7, %v1990_v33  ;;  %v5021_v57 = vrot.slane %v3968_v40, 3  ;;  %v5022_v7 = vrot.slane %v3948_v31, 3 }
 0x29d   :  { %v1963_v43 = vsel %vm1419_vm1, %v5017_v20, %v1962_v35  ;;  %v1358_v50 = vsel %vm1328_vm0, %v5019_v28, %v1357_v41  ;;  %v5023_v24 = vrot.slane %v3971_v45, 4  ;;  %v5024_v25 = vrot.slane %v3951_v36, 4 }
 0x29e   :  { %v1991_v21 = vadd.f32 %v1963_v43, %v1907_v19  ;;  %v1382_v56 = vadd.f32 %v1358_v50, %v5020_v16  ;;  %v1540_v13 = vsel %vm1510_vm2, %v5022_v7, %v5021_v57  ;;  %v1744_v55 = vadd.f32 %v1717_v10, %v1653_v37 }
 0x29f   :  { %v1631_v47 = vsel %vm1601_vm3, %v5024_v25, %v5023_v24  ;;  %v5025_v51 = vrot.slane %v3945_v6, 2  ;;  %v5026_v15 = vrot.slane %v3983_v63, 5  ;;  %v5027_v9 = vrot.slane %v3954_v59, 5  ;;  %v5028_v63 = vld [vmem:[#allocation51_spill] sm:$0xff] }
 0x2a0   :  { %v1774_v46 = vrot.slane %v3951_v36, 6  ;;  %2004 = vst.msk [vmem:[%s4340_s1 + $0x40] sm:$0xff] %vm1995_vm7, %v1991_v21  ;;  %v1776_v10 = vrot.slane %v3971_v45, 6  ;;  %v1829_v34 = vrot.slane %v3948_v31, 7  ;;  %v1831_v27 = vrot.slane %v3968_v40, 7 }
 0x2a1   :  { %v1449_v3 = vsel %vm1419_vm1, %v5025_v51, %v1448_v0  ;;  %v1722_v30 = vsel %vm1692_vm4, %v5027_v9, %v5026_v15  ;;  %v1799_v52 = vadd.f32 %v1772_v5, %v1744_v55  ;;  %v5029_v58 = vrot.slane %v5028_v63, 6 }
 0x2a2   :  { %v1473_v4 = vadd.f32 %v1449_v3, %v1382_v56  ;;  %v1921_v26 = vmul.f32 1.4867195e-06, %v3876_v8  ;;  %v1279_v36 = vadd.f32 %v1231_v11, %v4001_v12  ;;  %v1777_v18 = vsel %vm1747_vm5, %v1774_v46, %v1776_v10 }
 0x2a3   :  { %v1775_v59 = vsel %vm1747_vm5, %v5029_v58, %v1774_v46  ;;  %v5031_v45 = vrot.slane %v5030_v49, 7  ;;  %v1854_v48 = vadd.f32 %v1827_v62, %v1799_v52  ;;  %v1832_v40 = vsel %vm1802_vm6, %v1829_v34, %v1831_v27 }
 0x2a4   :  { %v1564_v1 = vadd.f32 %v1540_v13, %v1473_v4  ;;  %v1800_v38 = vadd.f32 %v1775_v59, %v4038_v53  ;;  %v1967_v5 = vrot.slane %v1921_v26, 2  ;;  %v1874_v23 = vmul.f32 0.00013383022, %v1279_v36 }
 0x2a5   :  { %v1830_v31 = vsel %vm1802_vm6, %v5031_v45, %v1829_v34  ;;  %v1922_v29 = vmul.f32 1.4867195e-06, %v1279_v36  ;;  %v1866_v8 = vadd.f32 %v1854_v48, %v4220_v44  ;;  %v5032_v12 = vrot.slane %v5020_v16, 2 }
 0x2a6   :  { %v1655_v60 = vadd.f32 %v1631_v47, %v1564_v1  ;;  %v1855_v54 = vadd.f32 %v1830_v31, %v1800_v38  ;;  %v1891_v2 = vrot.slane %v1874_v23, 1 }
 0x2a7   :  { %v1968_v61 = vsel %vm1419_vm1, %v5032_v12, %v1967_v5  ;;  %v1969_v14 = vrot.slane %v1922_v29, 2  ;;  %v1908_v22 = vadd.f32 %v1890_v42, %v1866_v8 }
 0x2a8   :  { %v1746_v53 = vadd.f32 %v1722_v30, %v1655_v60  ;;  %v1867_v35 = vadd.f32 %v1855_v54, %v3945_v6  ;;  %v1892_v62 = vsel %vm1328_vm0, %v1357_v41, %v1891_v2 }
 0x2a9   :  { %v1970_v20 = vsel %vm1419_vm1, %v1967_v5, %v1969_v14  ;;  %v1992_v43 = vadd.f32 %v1965_v17, %v1908_v22 }
 0x2aa   :  { %v1801_v33 = vadd.f32 %v1777_v18, %v1746_v53  ;;  %v1909_v19 = vadd.f32 %v1867_v35, %v1358_v50 }
 0x2ab   :  { %2005 = vst.msk [vmem:[%s4340_s1 + $0x48] sm:$0xff] %vm1995_vm7, %v1992_v43 }
 0x2ac   :  { %v1856_v37 = vadd.f32 %v1832_v40, %v1801_v33  ;;  %v1993_v32 = vadd.f32 %v1968_v61, %v1909_v19 }
 0x2ae   :  { %v1868_v44 = vadd.f32 %v1856_v37, %v1400_v39  ;;  %2006 = vst.msk [vmem:[%s4340_s1 + $0x50] sm:$0xff] %vm1995_vm7, %v1993_v32 }
 0x2b0   :  { %v1910_v6 = vadd.f32 %v1892_v62, %v1868_v44 }
 0x2b2   :  { %v1994_v41 = vadd.f32 %v1970_v20, %v1910_v6 }
 0x2b4   :  { %2007 = vst.msk [vmem:[%s4340_s1 + $0x58] sm:$0xff] %vm1995_vm7, %v1994_v41 }

// kernel: deepsr_forward.7
= control target key start
LH: loop header
LB: loop body
LE: loop exit
PB: predicated region body
PF: predicated region fallthrough
CT: control target
= control target key end

     0   :  { %s958_s12 = smov 0   ;;  %s1125_s0 = inlined_call_operand.vmem [shape: bf16[6,1,290], index: 0, kind: input, shape index: {}]   ;;  %s1126_s1 = inlined_call_operand.vmem [shape: bf16[9,16,1], index: 1, kind: input, shape index: {}]   ;;  %s1127_s2 = inlined_call_operand.vmem [shape: f32[3,256], index: 2, kind: input, shape index: {}]   ;;  %s1128_s3 = inlined_call_operand.vmem [shape: f32[6,16,256], index: 3, kind: output, shape index: {}]  }
   0x1 LB: > { %s765_s13 = sadd.s32 4294967295, %s925_s12   ;;  %p769_p0 = scmp.ge.s32.totalorder %s925_s12, 1  ;;  %s925_s12 = sphi %s958_s12, %s13_s12  }
   0x2   : > { %p136_p1 = scmp.lt.s32.totalorder %s925_s12, 7 }
   0x4   : > { %p137_p2 = pnand %p769_p0, %p136_p1 }
   0x5   : > { %p975_p3 = scmp.lt.s32.totalorder (!%p137_p2), %s765_s13, 5  ;;  %s930_s6 = smov (!%p137_p2), 126  }
   0x6   : > { %140 = sbr.rel (%p137_p2) target bundleno = 328 (0x148), region = 32  ;;  %s931_s7 = smov (!%p137_p2), 112  }
   0x7   : > { %s932_s10 = smov (!%p137_p2), 110   ;;  %s933_s15 = smov (!%p137_p2), 96  }
   0x8   : > { %s934_s16 = smov (!%p137_p2), 94   ;;  %s935_s17 = smov (!%p137_p2), 127  }
   0x9   : > { %s936_s18 = smov (!%p137_p2), 111   ;;  %s937_s19 = smov (!%p137_p2), 95  }
   0xb   : > { %v817_v0 = vld [vmem:[%s1126_s1 + $0x38] sm:$0xff]   ;;  %v811_v1 = vld [vmem:[%s1126_s1 + $0x8] sm:$0xff]   ;;  %v814_v2 = vld [vmem:[%s1126_s1 + $0x20] sm:$0xff]   ;;  %v193_v3 = vlaneseq  ;;  %v927_v4 = vmov 0   ;;  %s1131_s13 = smov (!%p975_p3, %s765_s13), 5  ;;  %v928_v18 = vmov 572653568  }
   0xc   : > { %850 = vset.pattern.permute.xlu1 %v927_v4  ;;  %839 = vset.pattern.permute.xlu0 %v927_v4  ;;  %v805_v5 = vunpack.c.l.bf16 %v817_v0  ;;  %v806_v6 = vunpack.c.h.bf16 %v817_v0  ;;  %v781_v7 = vunpack.c.l.bf16 %v811_v1  ;;  %v782_v8 = vunpack.c.h.bf16 %v811_v1  ;;  %v776_v9 = vld [vmem:[%s1126_s1] sm:$0xff]   ;;  %v812_v10 = vld [vmem:[%s1126_s1 + $0x10] sm:$0xff]   ;;  %s819_s25 = smul.u32 3, %s1131_s13  ;;  %v813_v34 = vld [vmem:[%s1126_s1 + $0x18] sm:$0xff]   ;;  %s774_s22 = sshll.u32 %s1131_s13, 5 }
   0xd   : > { %v793_v11 = vunpack.c.l.bf16 %v814_v2  ;;  %v794_v12 = vunpack.c.h.bf16 %v814_v2  ;;  %v777_v13 = vunpack.c.l.bf16 %v776_v9  ;;  %v778_v14 = vunpack.c.h.bf16 %v776_v9  ;;  %v815_v39 = vld [vmem:[%s1126_s1 + $0x28] sm:$0xff]   ;;  %v816_v43 = vld [vmem:[%s1126_s1 + $0x30] sm:$0xff]   ;;  %v818_v47 = vld [vmem:[%s1126_s1 + $0x40] sm:$0xff]  }
   0xe   : > { %v851_v15 = vpack.i.bf16 %v806_v6, %v805_v5  ;;  %v840_v16 = vpack.i.bf16 %v782_v8, %v781_v7  ;;  %v785_v17 = vunpack.c.l.bf16 %v812_v10  ;;  %v191_v19 = vunpack.c.l.s4 %v928_v18  ;;  %s162_s28 = scalar_lea.vmem %s1125_s0, %s819_s25  ;;  %s167_s25 = scalar_lea.vmem %s1128_s3, %s774_s22 }
   0xf   : > { %v990_v20 = vshrl.u32 %v193_v3, 7  ;;  %v845_v21 = vpack.i.bf16 %v794_v12, %v793_v11  ;;  %v856_v22 = vpack.i.bf16 %v778_v14, %v777_v13  ;;  %v786_v23 = vunpack.c.h.bf16 %v812_v10  ;;  %v168_v27 = vld [vmem:[%s162_s28] sm:$0x7] }
  0x10   : > { %852 = vperm.xlu1 %850, %v851_v15   ;;  %841 = vperm.xlu0 %839, %v840_v16   ;;  %v192_v24 = vunpack.c.0.s8 %v191_v19  ;;  %v929_v25 = vmov 1717978180   ;;  %v188_v28 = vunpack.c.l.bf16 %v168_v27  ;;  %v789_v36 = vunpack.c.l.bf16 %v813_v34 }
  0x11   : > { %v315_v26 = vunpack.c.l.s4 %v929_v25  ;;  %v861_v31 = vpack.i.bf16 %v786_v23, %v785_v17  ;;  %v790_v37 = vunpack.c.h.bf16 %v813_v34  ;;  %v797_v41 = vunpack.c.l.bf16 %v815_v39 }
  0x12   : > { %v195_v29 = vsub.s32 %v192_v24, %v990_v20  ;;  %v798_v42 = vunpack.c.h.bf16 %v815_v39  ;;  %v801_v45 = vunpack.c.l.bf16 %v816_v43  ;;  %v802_v46 = vunpack.c.h.bf16 %v816_v43 }
  0x13   : > { %v316_v30 = vunpack.c.0.s8 %v315_v26  ;;  %v876_v40 = vpack.i.bf16 %v790_v37, %v789_v36  ;;  %v809_v48 = vunpack.c.l.bf16 %v818_v47  ;;  %v810_v49 = vunpack.c.h.bf16 %v818_v47 }
  0x14   : > { %846 = vperm.xlu0 %839, %v845_v21   ;;  %857 = vperm.xlu1 %850, %v856_v22   ;;  %v996_v32 = vrot.slane %v188_v28, %v195_v29  ;;  %v891_v44 = vpack.i.bf16 %v798_v42, %v797_v41  ;;  %v901_v50 = vpack.i.bf16 %v802_v46, %v801_v45  ;;  %v1013_v52 = vsub.s32 0, %v990_v20 }
  0x15   : > { %v319_v33 = vsub.s32 %v316_v30, %v990_v20  ;;  %v906_v51 = vpack.i.bf16 %v810_v49, %v809_v48  ;;  %v1016_v53 = vsub.s32 2, %v990_v20  ;;  %v1019_v54 = vsub.s32 4, %v990_v20 }
  0x16   : > { %v253_v55 = vrot.slane %v188_v28, %v1013_v52  ;;  %vm327_vm0 = vcmask 1043456   ;;  %vm329_vm1 = vcmask 1031168   ;;  %v1048_v49 = vsub.s32 6, %v990_v20 }
  0x17   : > { %v320_v35 = vrot.slane %v188_v28, %v319_v33  ;;  %v257_v56 = vrot.slane %v188_v28, %v1016_v53  ;;  %v261_v57 = vrot.slane %v188_v28, %v1019_v54  ;;  %vm379_vm2 = vcmask 916480  }
  0x18   : > { %862 = vperm.xlu0 %839, %v861_v31   ;;  %v268_v58 = vrot.slane %v253_v55, %v1013_v52  ;;  %vm478_vm3 = vcmask 900096   ;;  %vm301_vm4 = vcmask 1039360   ;;  %vm528_vm5 = vcmask 785408  }
  0x19   : > { %v866_v38 = vpack.i.bf16 %v320_v35, %v996_v32  ;;  %v272_v59 = vrot.slane %v257_v56, %v1013_v52  ;;  %v276_v1 = vrot.slane %v261_v57, %v1013_v52  ;;  %vm627_vm6 = vcmask 769024  }
  0x1a   : > { %vm458_vm7 = vcmask 908288   ;;  %vm607_vm8 = vcmask 777216  }
  0x1b   : > { %867 = vrot.lane.b32.xlu1 %v866_v38, %s930_s6 }
  0x1c   : > { %872 = vrot.lane.b32.xlu0 %v866_v38, %s931_s7 }
  0x1f   : > { %882 = vrot.lane.b32.xlu1 %v866_v38, %s932_s10 }
  0x20   : > { %877 = vperm.xlu0 %839, %v876_v40   ;;  %v1039_v40 = vld [vmem:[%s1127_s2] sm:$0x77] }
  0x21   : > { %v198_v45 = vmul.f32 %v996_v32, %v1039_v40 }
  0x23   : > { %887 = vrot.lane.b32.xlu1 %v866_v38, %s933_s15  ;;  %v215_v55 = vrot.slane %v198_v45, %v1013_v52  ;;  %v219_v56 = vrot.slane %v198_v45, %v1019_v54 }
  0x24   : > { %892 = vperm.xlu0 %839, %v891_v44  }
  0x27   : > { %897 = vrot.lane.b32.xlu1 %v866_v38, %s934_s16 }
  0x28   : > { %902 = vperm.xlu0 %839, %v901_v50  }
  0x2b   : > { %907 = vperm.xlu1 %850, %v906_v51  }
  0x8b   : > { %v842_v60 = vpop.permute.xlu0 %841  ;;  %v853_v13 = vpop.permute.xlu1 %852 }
  0x8c   : > { %v843_v61 = vunpack.i.l.bf16 %v842_v60  ;;  %v844_v62 = vunpack.i.h.bf16 %v842_v60  ;;  %v854_v14 = vunpack.i.l.bf16 %v853_v13  ;;  %v855_v19 = vunpack.i.h.bf16 %v853_v13 }
  0x8e   : > { %v277_v63 = vmul.f32 %v843_v61, %v268_v58  ;;  %v278_v0 = vmul.f32 %v843_v61, %v272_v59  ;;  %v279_v2 = vmul.f32 %v843_v61, %v276_v1  ;;  %v280_v3 = vmul.f32 %v844_v62, %v268_v58 }
  0x8f   : > { %v847_v4 = vpop.permute.xlu0 %846  ;;  %v281_v6 = vmul.f32 %v844_v62, %v272_v59  ;;  %v282_v7 = vmul.f32 %v844_v62, %v276_v1  ;;  %v583_v17 = vmul.f32 %v854_v14, %v268_v58  ;;  %v584_v18 = vmul.f32 %v854_v14, %v272_v59  ;;  %v1027_v25 = vpop.permute.xlu1 %857 }
  0x90   : > { %289 = vrot.lane.b32.xlu0 %v277_v63, %s935_s17  ;;  %291 = vrot.lane.b32.xlu1 %v278_v0, %s935_s17  ;;  %v848_v5 = vunpack.i.l.bf16 %v847_v4  ;;  %v849_v8 = vunpack.i.h.bf16 %v847_v4  ;;  %v585_v21 = vmul.f32 %v854_v14, %v276_v1  ;;  %v586_v22 = vmul.f32 %v855_v19, %v268_v58 }
  0x91   : > { %v587_v23 = vmul.f32 %v855_v19, %v272_v59  ;;  %v588_v24 = vmul.f32 %v855_v19, %v276_v1  ;;  %v859_v63 = vunpack.i.l.bf16 %v1027_v25  ;;  %v225_v0 = vrot.slane %v215_v55, %v1013_v52 }
  0x92   : > { %v435_v9 = vmul.f32 %v848_v5, %v272_v59  ;;  %v434_v10 = vmul.f32 %v848_v5, %v268_v58  ;;  %v437_v11 = vmul.f32 %v849_v8, %v268_v58  ;;  %v436_v12 = vmul.f32 %v848_v5, %v276_v1 }
  0x93   : > { %v439_v15 = vmul.f32 %v849_v8, %v276_v1  ;;  %v438_v16 = vmul.f32 %v849_v8, %v272_v59  ;;  %v1029_v26 = vpop.permute.xlu0 %862  ;;  %v868_v27 = vpop.permute.xlu1 %867  ;;  %v229_v1 = vrot.slane %v219_v56, %v1013_v52  ;;  %v230_v13 = vmul.f32 %v859_v63, %v225_v0 }
  0x94   : > { %293 = vrot.lane.b32.xlu0 %v279_v2, %s935_s17  ;;  %295 = vrot.lane.b32.xlu1 %v280_v3, %s935_s17  ;;  %v870_v30 = vunpack.i.h.bf16 %v868_v27  ;;  %v869_v31 = vunpack.i.l.bf16 %v868_v27 }
  0x95   : > { %v231_v14 = vmul.f32 %v859_v63, %v229_v1 }
  0x96   : > { %v326_v33 = vrot.slane %v870_v30, 4  ;;  %v325_v34 = vrot.slane %v869_v31, 4 }
  0x97   : > { %v873_v28 = vpop.permute.xlu0 %872  ;;  %v883_v29 = vpop.permute.xlu1 %882 }
  0x98   : > { %297 = vrot.lane.b32.xlu0 %v281_v6, %s935_s17  ;;  %299 = vrot.lane.b32.xlu1 %v282_v7, %s935_s17  ;;  %v875_v37 = vunpack.i.h.bf16 %v873_v28  ;;  %v874_v38 = vunpack.i.l.bf16 %v873_v28  ;;  %v328_v39 = vsel %vm327_vm0, %v325_v34, %v326_v33  ;;  %v885_v47 = vunpack.i.h.bf16 %v883_v29 }
  0x99   : > { %v330_v46 = vsel %vm329_vm1, %v869_v31, %v328_v39  ;;  %v884_v48 = vunpack.i.l.bf16 %v883_v29  ;;  %v865_v34 = vunpack.i.h.bf16 %v1029_v26 }
  0x9a   : > { %v377_v41 = vrot.slane %v875_v37, 4  ;;  %v376_v42 = vrot.slane %v874_v38, 4  ;;  %v332_v50 = vmul.f32 %v330_v46, %v1039_v40  ;;  %v476_v57 = vrot.slane %v885_v47, 4 }
  0x9b   : > { %v1031_v35 = vpop.permute.xlu0 %877  ;;  %v1033_v36 = vpop.permute.xlu1 %887  ;;  %v475_v58 = vrot.slane %v884_v48, 4 }
  0x9c   : > { %448 = vrot.lane.b32.xlu0 %v435_v9, %s936_s18  ;;  %446 = vrot.lane.b32.xlu1 %v434_v10, %s936_s18  ;;  %v378_v51 = vsel %vm327_vm0, %v376_v42, %v377_v41  ;;  %v890_v61 = vunpack.i.h.bf16 %v1033_v36  ;;  %v889_v20 = vunpack.i.l.bf16 %v1033_v36  ;;  %v353_v62 = vrot.slane %v332_v50, %v1048_v49 }
  0x9d   : > { %v380_v60 = vsel %vm379_vm2, %v874_v38, %v378_v51  ;;  %v349_v2 = vrot.slane %v332_v50, %v1016_v53  ;;  %v477_v4 = vsel %vm327_vm0, %v475_v58, %v476_v57  ;;  %v879_v37 = vunpack.i.l.bf16 %v1031_v35 }
  0x9e   : > { %v382_v3 = vmul.f32 %v380_v60, %v1039_v40  ;;  %v526_v7 = vrot.slane %v890_v61, 4  ;;  %v525_v8 = vrot.slane %v889_v20, 4 }
  0x9f   : > { %v1041_v43 = vpop.permute.xlu0 %892  ;;  %v1043_v44 = vpop.permute.xlu1 %897  ;;  %v359_v19 = vrot.slane %v349_v2, %v1016_v53 }
  0xa0   : > { %452 = vrot.lane.b32.xlu0 %v437_v11, %s936_s18  ;;  %450 = vrot.lane.b32.xlu1 %v436_v12, %s936_s18  ;;  %v900_v9 = vunpack.i.h.bf16 %v1043_v44  ;;  %v899_v10 = vunpack.i.l.bf16 %v1043_v44  ;;  %v363_v11 = vrot.slane %v353_v62, %v1016_v53  ;;  %v860_v12 = vunpack.i.h.bf16 %v1027_v25 }
  0xa1   : > { %v403_v29 = vrot.slane %v382_v3, %v1019_v54 }
  0xa2   : > { %v624_v27 = vrot.slane %v899_v10, 4  ;;  %v233_v33 = vmul.f32 %v860_v12, %v229_v1  ;;  %v367_v51 = vmul.f32 %v865_v34, %v363_v11  ;;  %v232_v60 = vmul.f32 %v860_v12, %v225_v0 }
  0xa3   : > { %v1054_v59 = vpop.permute.xlu0 %902  ;;  %v894_v0 = vunpack.i.l.bf16 %v1041_v43 }
  0xa4   : > { %456 = vrot.lane.b32.xlu0 %v439_v15, %s936_s18  ;;  %454 = vrot.lane.b32.xlu1 %v438_v16, %s936_s18  ;;  %v479_v15 = vsel %vm478_vm3, %v884_v48, %v477_v4  ;;  %v864_v16 = vunpack.i.l.bf16 %v1029_v26  ;;  %v413_v48 = vrot.slane %v403_v29, %v1013_v52 }
  0xa5   : > { %v481_v28 = vmul.f32 %v479_v15, %v1039_v40 }
  0xa6   : > { %v1056_v32 = vpop.permute.xlu1 %907  ;;  %v365_v31 = vmul.f32 %v864_v16, %v363_v11  ;;  %v364_v46 = vmul.f32 %v864_v16, %v359_v19  ;;  %v415_v2 = vmul.f32 %v879_v37, %v413_v48 }
  0xa7   : > { %v502_v26 = vrot.slane %v481_v28, %v1048_v49  ;;  %v498_v56 = vrot.slane %v481_v28, %v1016_v53 }
  0xa8   : > { %595 = vrot.lane.b32.xlu0 %v583_v17, %s937_s19  ;;  %597 = vrot.lane.b32.xlu1 %v584_v18, %s937_s19  ;;  %v399_v17 = vrot.slane %v382_v3, %v1013_v52 }
  0xa9   : > { %v512_v3 = vrot.slane %v502_v26, %v1016_v53 }
  0xaa   : > { %v409_v44 = vrot.slane %v399_v17, %v1013_v52 }
  0xac   : > { %599 = vrot.lane.b32.xlu0 %v585_v21, %s937_s19  ;;  %601 = vrot.lane.b32.xlu1 %v586_v22, %s937_s19  ;;  %v414_v1 = vmul.f32 %v879_v37, %v409_v44 }
  0xb0   : > { %603 = vrot.lane.b32.xlu0 %v587_v23, %s937_s19  ;;  %605 = vrot.lane.b32.xlu1 %v588_v24, %s937_s19  ;;  %v527_v23 = vsel %vm327_vm0, %v525_v8, %v526_v7  ;;  %v625_v24 = vrot.slane %v900_v9, 4 }
  0xb1   : > { %v529_v38 = vsel %vm528_vm5, %v889_v20, %v527_v23 }
  0xb2   : > { %v626_v45 = vsel %vm327_vm0, %v624_v27, %v625_v24  ;;  %v531_v55 = vmul.f32 %v529_v38, %v1039_v40 }
  0xb3   : > { %v628_v61 = vsel %vm627_vm6, %v899_v10, %v626_v45  ;;  %v366_v10 = vmul.f32 %v865_v34, %v359_v19 }
  0xb4   : > { %v630_v7 = vmul.f32 %v628_v61, %v1039_v40  ;;  %v548_v8 = vrot.slane %v531_v55, %v1013_v52  ;;  %v552_v15 = vrot.slane %v531_v55, %v1019_v54  ;;  %v904_v54 = vunpack.i.l.bf16 %v1054_v59 }
  0xb6   : > { %v558_v24 = vrot.slane %v548_v8, %v1013_v52  ;;  %v647_v27 = vrot.slane %v630_v7, %v1016_v53  ;;  %v651_v34 = vrot.slane %v630_v7, %v1048_v49 }
  0xb8   : > { %v661_v49 = vrot.slane %v651_v34, %v1016_v53 }
 0x102   : > { %v290_v5 = vpop.permute.xlu0 %289  ;;  %v292_v6 = vpop.permute.xlu1 %291 }
 0x103   : > { %v302_v18 = vsel %vm301_vm4, %v290_v5, %v292_v6 }
 0x104   : > { %v310_v36 = vadd.f32 %v302_v18, %v230_v13  ;;  %v514_v18 = vmul.f32 %v894_v0, %v512_v3 }
 0x106   : > { %v294_v21 = vpop.permute.xlu0 %293  ;;  %v296_v22 = vpop.permute.xlu1 %295  ;;  %v368_v57 = vadd.f32 %v364_v46, %v310_v36  ;;  %v909_v46 = vunpack.i.l.bf16 %v1056_v32 }
 0x107   : > { %v303_v25 = vsel %vm301_vm4, %v292_v6, %v294_v21  ;;  %v508_v6 = vrot.slane %v498_v56, %v1016_v53 }
 0x108   : > { %v311_v30 = vadd.f32 %v303_v25, %v231_v14  ;;  %v418_v9 = vadd.f32 %v414_v1, %v368_v57  ;;  %v880_v14 = vunpack.i.h.bf16 %v1031_v35  ;;  %v895_v25 = vunpack.i.h.bf16 %v1041_v43 }
 0x109   : > { %v513_v23 = vmul.f32 %v894_v0, %v508_v6  ;;  %v562_v35 = vrot.slane %v552_v15, %v1013_v52  ;;  %v657_v43 = vrot.slane %v647_v27, %v1016_v53  ;;  %v905_v57 = vunpack.i.h.bf16 %v1054_v59 }
 0x10a   : > { %v369_v39 = vadd.f32 %v365_v31, %v311_v30  ;;  %v298_v41 = vpop.permute.xlu0 %297  ;;  %v300_v42 = vpop.permute.xlu1 %299  ;;  %v417_v40 = vmul.f32 %v880_v14, %v413_v48  ;;  %v416_v19 = vmul.f32 %v880_v14, %v409_v44  ;;  %v515_v26 = vmul.f32 %v895_v25, %v508_v6 }
 0x10b   : > { %v305_v47 = vsel %vm301_vm4, %v298_v41, %v300_v42  ;;  %v304_v58 = vsel %vm301_vm4, %v296_v22, %v298_v41  ;;  %v563_v41 = vmul.f32 %v904_v54, %v558_v24  ;;  %v662_v55 = vmul.f32 %v909_v46, %v657_v43 }
 0x10c   : > { %v313_v50 = vadd.f32 %v305_v47, %v233_v33  ;;  %v312_v4 = vadd.f32 %v304_v58, %v232_v60  ;;  %v419_v13 = vadd.f32 %v415_v2, %v369_v39  ;;  %v516_v39 = vmul.f32 %v895_v25, %v512_v3 }
 0x10d   : > { %v565_v1 = vmul.f32 %v905_v57, %v558_v24  ;;  %v663_v2 = vmul.f32 %v909_v46, %v661_v49  ;;  %v910_v53 = vunpack.i.h.bf16 %v1056_v32 }
 0x10e   : > { %v371_v20 = vadd.f32 %v367_v51, %v313_v50  ;;  %v449_v62 = vpop.permute.xlu0 %448  ;;  %v447_v63 = vpop.permute.xlu1 %446  ;;  %v370_v21 = vadd.f32 %v366_v10, %v312_v4  ;;  %v564_v50 = vmul.f32 %v904_v54, %v562_v35  ;;  %v566_v4 = vmul.f32 %v905_v57, %v562_v35 }
 0x10f   : > { %v459_v5 = vsel %vm458_vm7, %v447_v63, %v449_v62  ;;  %v665_v15 = vmul.f32 %v910_v53, %v661_v49 }
 0x110   : > { %v467_v16 = vadd.f32 %v459_v5, %v418_v9  ;;  %v421_v33 = vadd.f32 %v417_v40, %v371_v20  ;;  %v420_v36 = vadd.f32 %v416_v19, %v370_v21 }
 0x112   : > { %v453_v11 = vpop.permute.xlu0 %452  ;;  %v451_v12 = vpop.permute.xlu1 %450  ;;  %v517_v30 = vadd.f32 %v513_v23, %v467_v16 }
 0x113   : > { %v460_v17 = vsel %vm458_vm7, %v449_v62, %v451_v12 }
 0x114   : > { %v468_v22 = vadd.f32 %v460_v17, %v419_v13  ;;  %v567_v48 = vadd.f32 %v563_v41, %v517_v30 }
 0x116   : > { %v518_v28 = vadd.f32 %v514_v18, %v468_v22  ;;  %v457_v29 = vpop.permute.xlu0 %456  ;;  %v455_v31 = vpop.permute.xlu1 %454 }
 0x117   : > { %v461_v37 = vsel %vm458_vm7, %v453_v11, %v455_v31  ;;  %v462_v38 = vsel %vm458_vm7, %v455_v31, %v457_v29  ;;  %v664_v11 = vmul.f32 %v910_v53, %v657_v43 }
 0x118   : > { %v470_v42 = vadd.f32 %v462_v38, %v421_v33  ;;  %v469_v44 = vadd.f32 %v461_v37, %v420_v36  ;;  %v568_v61 = vadd.f32 %v564_v50, %v518_v28 }
 0x11a   : > { %v596_v45 = vpop.permute.xlu0 %595  ;;  %v520_v52 = vadd.f32 %v516_v39, %v470_v42  ;;  %v598_v47 = vpop.permute.xlu1 %597  ;;  %v519_v58 = vadd.f32 %v515_v26, %v469_v44 }
 0x11b   : > { %v608_v51 = vsel %vm607_vm8, %v596_v45, %v598_v47 }
 0x11c   : > { %v616_v56 = vadd.f32 %v608_v51, %v567_v48  ;;  %v569_v8 = vadd.f32 %v565_v1, %v519_v58  ;;  %v570_v10 = vadd.f32 %v566_v4, %v520_v52 }
 0x11e   : > { %v600_v60 = vpop.permute.xlu0 %599  ;;  %v666_v20 = vadd.f32 %v662_v55, %v616_v56  ;;  %v602_v63 = vpop.permute.xlu1 %601 }
 0x11f   : > { %v609_v62 = vsel %vm607_vm8, %v598_v47, %v600_v60 }
 0x120   : > { %v617_v3 = vadd.f32 %v609_v62, %v568_v61  ;;  %v670_v5 = vmul.f32 %v666_v20, %v666_v20 }
 0x122   : > { %v667_v6 = vadd.f32 %v663_v2, %v617_v3  ;;  %v604_v7 = vpop.permute.xlu0 %603  ;;  %v674_v9 = vmul.f32 %v670_v5, %v666_v20  ;;  %v606_v0 = vpop.permute.xlu1 %605 }
 0x123   : > { %v610_v59 = vsel %vm607_vm8, %v602_v63, %v604_v7  ;;  %v611_v14 = vsel %vm607_vm8, %v604_v7, %v606_v0 }
 0x124   : > { %v671_v12 = vmul.f32 %v667_v6, %v667_v6  ;;  %v618_v13 = vadd.f32 %v610_v59, %v569_v8  ;;  %v678_v16 = vmul.f32 0.044715, %v674_v9  ;;  %v619_v17 = vadd.f32 %v611_v14, %v570_v10 }
 0x126   : > { %v675_v18 = vmul.f32 %v671_v12, %v667_v6  ;;  %v668_v21 = vadd.f32 %v664_v11, %v618_v13  ;;  %v682_v22 = vadd.f32 %v678_v16, %v666_v20  ;;  %v669_v32 = vadd.f32 %v665_v15, %v619_v17 }
 0x128   : > { %v679_v40 = vmul.f32 0.044715, %v675_v18  ;;  %v672_v23 = vmul.f32 %v668_v21, %v668_v21  ;;  %v686_v24 = vmul.f32 0.7978846, %v682_v22  ;;  %v673_v27 = vmul.f32 %v669_v32, %v669_v32 }
 0x12a   : > { %v683_v19 = vadd.f32 %v679_v40, %v667_v6  ;;  %v676_v25 = vmul.f32 %v672_v23, %v668_v21  ;;  %911 = vtanh.f32 %v686_v24  ;;  %v677_v28 = vmul.f32 %v673_v27, %v669_v32 }
 0x12c   : > { %v687_v29 = vmul.f32 0.7978846, %v683_v19  ;;  %v680_v54 = vmul.f32 0.044715, %v676_v25  ;;  %v681_v35 = vmul.f32 0.044715, %v677_v28 }
 0x12e   : > { %913 = vtanh.f32 %v687_v29  ;;  %v684_v30 = vadd.f32 %v680_v54, %v668_v21  ;;  %v685_v31 = vadd.f32 %v681_v35, %v669_v32 }
 0x130   : > { %v688_v33 = vmul.f32 0.7978846, %v684_v30  ;;  %v689_v34 = vmul.f32 0.7978846, %v685_v31 }
 0x132   : > { %915 = vtanh.f32 %v688_v33 }
 0x133   : > { %917 = vtanh.f32 %v689_v34 }
 0x137   : > { %v912_v36 = vpop.eup %911 }
 0x138   : > { %v694_v37 = vadd.f32 1.0, %v912_v36 }
 0x13a   : > { %v698_v39 = vmul.f32 0.5, %v694_v37 }
 0x13b   : > { %v914_v38 = vpop.eup %913 }
 0x13c   : > { %v695_v41 = vadd.f32 1.0, %v914_v38  ;;  %v702_v43 = vmul.f32 %v698_v39, %v666_v20 }
 0x13e   : > { %v699_v42 = vmul.f32 0.5, %v695_v41  ;;  %706 = vst [vmem:[%s167_s25] sm:$0xff] %v702_v43 }
 0x13f   : > { %v916_v44 = vpop.eup %915 }
 0x140   : > { %v918_v45 = vpop.eup %917  ;;  %v703_v46 = vmul.f32 %v699_v42, %v667_v6  ;;  %v696_v52 = vadd.f32 1.0, %v916_v44 }
 0x141   : > { %v697_v47 = vadd.f32 1.0, %v918_v45 }
 0x142   : > { %707 = vst [vmem:[%s167_s25 + $0x8] sm:$0xff] %v703_v46  ;;  %v700_v48 = vmul.f32 0.5, %v696_v52 }
 0x143   : > { %v701_v26 = vmul.f32 0.5, %v697_v47 }
 0x144   : > { %v704_v50 = vmul.f32 %v700_v48, %v668_v21 }
 0x145   : > { %v705_v49 = vmul.f32 %v701_v26, %v669_v32 }
 0x146   : > { %708 = vst [vmem:[%s167_s25 + $0x10] sm:$0xff] %v704_v50 }
 0x147   : > { %709 = vst [vmem:[%s167_s25 + $0x18] sm:$0xff] %v705_v49 }
 0x148 PF: > { %s13_s12 = sadd.s32 1, %s925_s12  }
 0x149   : > { %p10_p4 = scmp.ge.s32.totalorder %s13_s12, 8  }
 0x14b   :  { %12 = sbr.rel (!%p10_p4) target bundleno = 1 (0x1), region = 62 }

// kernel: deepsr_forward.8
= control target key start
LH: loop header
LB: loop body
LE: loop exit
PB: predicated region body
PF: predicated region fallthrough
CT: control target
= control target key end

     0   :  { %9 = vsyncpa [#allocation3], 0  ;;  %s1291_s15 = smov 0   ;;  %s1293_s16 = smov 0   ;;  %s1704_s0 = inlined_call_operand.vmem [shape: f32[3], index: 0, kind: input, shape index: {}]   ;;  %s1705_s1 = inlined_call_operand.vmem [shape: bf16[16,16], index: 1, kind: input, shape index: {}]   ;;  %s1706_s2 = inlined_call_operand.vmem [shape: f32[2,3,16,2304], index: 2, kind: input, shape index: {}]   ;;  %s1707_s3 = inlined_call_operand.vmem [shape: f32[2,3,1,2304], index: 3, kind: input, shape index: {}]   ;;  %s1708_s4 = inlined_call_operand.vmem [shape: f32[2,16,2304], index: 4, kind: output, shape index: {}]  }
   0x1   :  { %s1295_s17 = smov 0   ;;  %s1297_s18 = smov 0  }
   0x2   :  { %s1299_s19 = smov 0   ;;  %s1301_s20 = smov 0  }
   0x3   :  { %s1303_s21 = smov 0  }
   0x4 LB: > { %s1039_s22 = sadd.s32 4294967295, %s1262_s21   ;;  %s24_s23 = sadd.s32 1, %s1254_s19  ;;  %s1262_s21 = sphi %s1303_s21, %s15_s21   ;;  %s1258_s20 = sphi %s1301_s20, %s1721_s20   ;;  %s1254_s19 = sphi %s1299_s19, %s1720_s19   ;;  %s1250_s18 = sphi %s1297_s18, %s1719_s18   ;;  %s1246_s17 = sphi %s1295_s17, %s1718_s17   ;;  %s1242_s16 = sphi %s1293_s16, %s1717_s16   ;;  %s1238_s15 = sphi %s1291_s15, %s1716_s15  }
   0x5   : > { %p25_p0 = scmp.ge.s32.totalorder %s24_s23, 3  ;;  %s27_s24 = sadd.s32 1, %s1258_s20 }
   0x6   : > { %s78_s25 = sadd.s32 1, %s1242_s16  ;;  %p85_p1 = scmp.ne.s32.totalorder %s1242_s16, %s1238_s15 }
   0x7   : > { %s1723_s23 = smov (%p25_p0, %s24_s23), 0  ;;  %s1725_s24 = smov (!%p25_p0, %s27_s24), %s1258_s20 }
   0x8   : > { %s74_s26 = ssub.s32 %s1254_s19, %s1723_s23  ;;  %p86_p2 = scmp.eq.s32.totalorder %s1262_s21, 0 }
   0x9   : > { %p29_p3 = scmp.ge.s32.totalorder %s1725_s24, 2  ;;  %p145_p4 = scmp.eq.s32.totalorder %s1039_s22, 5 }
   0xa   : > { %p1338_p5 = por %p86_p2, %p85_p1  ;;  %p1041_p6 = scmp.ge.s32.totalorder %s1262_s21, 1 }
   0xb   : > { %s1727_s24 = smov (%p29_p3, %s1725_s24), 0  ;;  %p1345_p7 = por %p145_p4, %p85_p1 }
   0xc   : > { %p158_p8 = scmp.lt.s32.totalorder %s1262_s21, 7  ;;  %s73_s29 = ssub.s32 %s1258_s20, %s1727_s24 }
   0xd   : > { %s1711_s28 = scalar_select %p1345_p7, 1, 0 }
   0xe   : > { %s75_s30 = sor.u32 %s74_s26, %s73_s29  ;;  %p1352_p9 = pnand %p1041_p6, %p158_p8 }
   0xf   : > { %p76_p10 = scmp.eq.s32.totalorder %s75_s30, 0  ;;  %p1356_p11 = scmp.eq.s32.totalorder %s1039_s22, 0 }
  0x10   : > { %s1712_s5 = scalar_select %p1352_p9, 1, 0 }
  0x11   : > { %p1094_p12 = pneg %p1352_p9  ;;  %s171_s9 = sshll.u32 %s1704_s0, 4  ;;  %s172_s9 = int_to_ptr.vmem [resolvable:$true] %s171_s9 }
  0x12   : > { %s1366_s10 = scalar_select %p76_p10, %s1242_s16, %s78_s25  }
  0x13   : > { %p1095_p13 = pnand %p1356_p11, %p1094_p12  ;;  %s1189_s11 = scalar_lea.vmem %s172_s9, 16 }
  0x14   : > { %p1190_p0 = scmp.ne.s32.totalorder %s172_s9, %s1189_s11  ;;  %p1197_p4 = scmp.lt.s32.totalorder %s172_s9, %s172_s9 }
  0x15   : > { %p1191_p1 = pneg %p1095_p13  ;;  %p1198_p6 = scmp.lt.s32.totalorder %s1189_s11, %s1189_s11 }
  0x17   : > { %p1192_p2 = pnand %p1191_p1, %p1190_p0  ;;  %p1199_p8 = por %p1198_p6, %p1197_p4 }
  0x19   : > { %p1193_p3 = pneg %p1192_p2 }
  0x1b   : > { %p1200_p7 = pnand %p1199_p8, %p1193_p3 }
  0x1d   : > { %1203 = shalt.err (!%p1200_p7)
}
  0x1e   : > { %s1264_s12 = smov [#allocation2]   ;;  %p1043_p9 = scmp.ge.s32.totalorder %s1262_s21, 6 }
  0x1f   : > { %1097 = dma.vmem_to_smem (!%p1095_p13), %s172_s9, 16, %s1264_s12, [#allocation3]  }
  0x20   : > { %181 = sbr.rel (%p1043_p9) target bundleno = 74 (0x4a), region = 24 }
  0x25   : > { %184 = sbr.rel (!%p1338_p5) target bundleno = 64 (0x40), region = 28  ;;  %s186_s13 = sand.u32 (%p1338_p5), 1, %s1242_s16  }
  0x26   : > { %s189_s14 = smul.u32 (%p1338_p5), 6, %s1254_s19 }
  0x27   : > { %s1082_s22 = smul.u32 (%p1338_p5), 288, %s186_s13 }
  0x28   : > { %s1083_s25 = smul.u32 (%p1338_p5), 108, %s1258_s20 }
  0x29   : > { %s1384_s9 = scalar_lea.vmem (%p1338_p5), [#allocation4], %s1082_s22 }
  0x2a   : > { %s191_s26 = sadd.s32 %s1083_s25, %s189_s14 }
  0x2b   : > { %s1044_s29 = sshll.u32 %s191_s26, 3 }
  0x2c   : > { %s1379_s8 = scalar_lea.vmem %s1706_s2, %s1044_s29 }
  0x2d   : > { %v206_v0 = vld [vmem:[%s1379_s8] sm:$0xff]  ;;  %v208_v1 = vld [vmem:[%s1379_s8 + $0x8] sm:$0xff]  ;;  %v210_v2 = vld [vmem:[%s1379_s8 + $0x10] sm:$0xff] }
  0x2e   : > { %207 = vst [vmem:[%s1384_s9] sm:$0xff] %v206_v0  ;;  %209 = vst [vmem:[%s1384_s9 + $0x8] sm:$0xff] %v208_v1  ;;  %v212_v3 = vld [vmem:[%s1379_s8 + $0x18] sm:$0xff]  ;;  %v214_v4 = vld [vmem:[%s1379_s8 + $0x20] sm:$0xff] }
  0x2f   : > { %211 = vst [vmem:[%s1384_s9 + $0x10] sm:$0xff] %v210_v2  ;;  %v216_v5 = vld [vmem:[%s1379_s8 + $0x28] sm:$0xff]  ;;  %213 = vst [vmem:[%s1384_s9 + $0x18] sm:$0xff] %v212_v3  ;;  %v218_v6 = vld [vmem:[%s1379_s8 + $0x90] sm:$0xff] }
  0x30   : > { %215 = vst [vmem:[%s1384_s9 + $0x20] sm:$0xff] %v214_v4  ;;  %217 = vst [vmem:[%s1384_s9 + $0x28] sm:$0xff] %v216_v5  ;;  %v220_v7 = vld [vmem:[%s1379_s8 + $0x98] sm:$0xff]  ;;  %v222_v8 = vld [vmem:[%s1379_s8 + $0xa0] sm:$0xff] }
  0x31   : > { %219 = vst [vmem:[%s1384_s9 + $0x30] sm:$0xff] %v218_v6  ;;  %221 = vst [vmem:[%s1384_s9 + $0x38] sm:$0xff] %v220_v7  ;;  %v224_v9 = vld [vmem:[%s1379_s8 + $0xa8] sm:$0xff]  ;;  %v226_v10 = vld [vmem:[%s1379_s8 + $0xb0] sm:$0xff] }
  0x32   : > { %223 = vst [vmem:[%s1384_s9 + $0x40] sm:$0xff] %v222_v8  ;;  %v228_v11 = vld [vmem:[%s1379_s8 + $0xb8] sm:$0xff]  ;;  %225 = vst [vmem:[%s1384_s9 + $0x48] sm:$0xff] %v224_v9  ;;  %v230_v12 = vld [vmem:[%s1379_s8 + $0x120] sm:$0xff] }
  0x33   : > { %227 = vst [vmem:[%s1384_s9 + $0x50] sm:$0xff] %v226_v10  ;;  %229 = vst [vmem:[%s1384_s9 + $0x58] sm:$0xff] %v228_v11  ;;  %v232_v13 = vld [vmem:[%s1379_s8 + $0x128] sm:$0xff]  ;;  %v234_v14 = vld [vmem:[%s1379_s8 + $0x130] sm:$0xff] }
  0x34   : > { %231 = vst [vmem:[%s1384_s9 + $0x60] sm:$0xff] %v230_v12  ;;  %233 = vst [vmem:[%s1384_s9 + $0x68] sm:$0xff] %v232_v13  ;;  %v236_v15 = vld [vmem:[%s1379_s8 + $0x138] sm:$0xff]  ;;  %v238_v16 = vld [vmem:[%s1379_s8 + $0x140] sm:$0xff] }
  0x35   : > { %235 = vst [vmem:[%s1384_s9 + $0x70] sm:$0xff] %v234_v14  ;;  %v240_v17 = vld [vmem:[%s1379_s8 + $0x148] sm:$0xff]  ;;  %237 = vst [vmem:[%s1384_s9 + $0x78] sm:$0xff] %v236_v15  ;;  %v242_v18 = vld [vmem:[%s1379_s8 + $0x1b0] sm:$0xff] }
  0x36   : > { %239 = vst [vmem:[%s1384_s9 + $0x80] sm:$0xff] %v238_v16  ;;  %241 = vst [vmem:[%s1384_s9 + $0x88] sm:$0xff] %v240_v17  ;;  %v244_v19 = vld [vmem:[%s1379_s8 + $0x1b8] sm:$0xff]  ;;  %v246_v20 = vld [vmem:[%s1379_s8 + $0x1c0] sm:$0xff] }
  0x37   : > { %243 = vst [vmem:[%s1384_s9 + $0x90] sm:$0xff] %v242_v18  ;;  %245 = vst [vmem:[%s1384_s9 + $0x98] sm:$0xff] %v244_v19  ;;  %v248_v21 = vld [vmem:[%s1379_s8 + $0x1c8] sm:$0xff]  ;;  %v250_v22 = vld [vmem:[%s1379_s8 + $0x1d0] sm:$0xff] }
  0x38   : > { %247 = vst [vmem:[%s1384_s9 + $0xa0] sm:$0xff] %v246_v20  ;;  %v252_v23 = vld [vmem:[%s1379_s8 + $0x1d8] sm:$0xff]  ;;  %249 = vst [vmem:[%s1384_s9 + $0xa8] sm:$0xff] %v248_v21  ;;  %v254_v24 = vld [vmem:[%s1379_s8 + $0x240] sm:$0xff] }
  0x39   : > { %251 = vst [vmem:[%s1384_s9 + $0xb0] sm:$0xff] %v250_v22  ;;  %253 = vst [vmem:[%s1384_s9 + $0xb8] sm:$0xff] %v252_v23  ;;  %v256_v25 = vld [vmem:[%s1379_s8 + $0x248] sm:$0xff]  ;;  %v258_v26 = vld [vmem:[%s1379_s8 + $0x250] sm:$0xff] }
  0x3a   : > { %255 = vst [vmem:[%s1384_s9 + $0xc0] sm:$0xff] %v254_v24  ;;  %257 = vst [vmem:[%s1384_s9 + $0xc8] sm:$0xff] %v256_v25  ;;  %v260_v27 = vld [vmem:[%s1379_s8 + $0x258] sm:$0xff]  ;;  %v262_v28 = vld [vmem:[%s1379_s8 + $0x260] sm:$0xff] }
  0x3b   : > { %259 = vst [vmem:[%s1384_s9 + $0xd0] sm:$0xff] %v258_v26  ;;  %v264_v29 = vld [vmem:[%s1379_s8 + $0x268] sm:$0xff]  ;;  %261 = vst [vmem:[%s1384_s9 + $0xd8] sm:$0xff] %v260_v27  ;;  %v266_v30 = vld [vmem:[%s1379_s8 + $0x2d0] sm:$0xff] }
  0x3c   : > { %263 = vst [vmem:[%s1384_s9 + $0xe0] sm:$0xff] %v262_v28  ;;  %265 = vst [vmem:[%s1384_s9 + $0xe8] sm:$0xff] %v264_v29  ;;  %v268_v31 = vld [vmem:[%s1379_s8 + $0x2d8] sm:$0xff]  ;;  %v270_v32 = vld [vmem:[%s1379_s8 + $0x2e0] sm:$0xff] }
  0x3d   : > { %267 = vst [vmem:[%s1384_s9 + $0xf0] sm:$0xff] %v266_v30  ;;  %269 = vst [vmem:[%s1384_s9 + $0xf8] sm:$0xff] %v268_v31  ;;  %v272_v33 = vld [vmem:[%s1379_s8 + $0x2e8] sm:$0xff]  ;;  %v274_v34 = vld [vmem:[%s1379_s8 + $0x2f0] sm:$0xff] }
  0x3e   : > { %271 = vst [vmem:[%s1384_s9 + $0x100] sm:$0xff] %v270_v32  ;;  %v276_v35 = vld [vmem:[%s1379_s8 + $0x2f8] sm:$0xff]  ;;  %273 = vst [vmem:[%s1384_s9 + $0x108] sm:$0xff] %v272_v33 }
  0x3f   : > { %275 = vst [vmem:[%s1384_s9 + $0x110] sm:$0xff] %v274_v34  ;;  %277 = vst [vmem:[%s1384_s9 + $0x118] sm:$0xff] %v276_v35 }
  0x40 PF: > { %283 = sbr.rel (!%p1338_p5) target bundleno = 74 (0x4a), region = 51  ;;  %s285_s11 = sand.u32 (%p1338_p5), 1, %s1242_s16  }
  0x41   : > { %s288_s12 = smul.u32 (%p1338_p5), 6, %s1254_s19 }
  0x42   : > { %s1084_s13 = smul.u32 (%p1338_p5), 18, %s285_s11 }
  0x43   : > { %s1085_s14 = smul.u32 (%p1338_p5), 54, %s1258_s20 }
  0x44   : > { %s287_s30 = scalar_lea.vmem (%p1338_p5), [#allocation5], %s1084_s13 }
  0x45   : > { %s290_s22 = sadd.s32 %s1085_s14, %s288_s12 }
  0x46   : > { %s291_s29 = scalar_lea.vmem %s1707_s3, %s290_s22 }
  0x47   : > { %v308_v36 = vld [vmem:[%s291_s29] sm:$0x3f]  ;;  %v310_v37 = vld [vmem:[%s291_s29 + $0x12] sm:$0x3f] }
  0x48   : > { %v312_v38 = vld [vmem:[%s291_s29 + $0x24] sm:$0x3f]  ;;  %309 = vst [vmem:[%s287_s30] sm:$0x3f] %v308_v36  ;;  %311 = vst [vmem:[%s287_s30 + $0x6] sm:$0x3f] %v310_v37 }
  0x49   : > { %313 = vst [vmem:[%s287_s30 + $0xc] sm:$0x3f] %v312_v38 }
  0x4a PF: > { %p1714_p5 = scmp.ne.s32.totalorder %s1712_s5, 0 }
  0x4c   : > { %346 = sbr.rel (%p1714_p5) target bundleno = 375 (0x177), region = 92 }
  0x51   : > { %1233 = dma.done.wait (%p1356_p11), [#allocation3], 16  }
  0x52   : > { %1235 = vsyncadd (%p1356_p11), [#allocation3], 4294967280  ;;  %s1470_s27 = sand.u32 1, %s1238_s15  }
  0x53   : > { %s1086_s7 = smul.u32 288, %s1470_s27 }
  0x54   : > { %s1087_s8 = smul.u32 18, %s1470_s27 }
  0x55   : > { %s1474_s9 = scalar_lea.vmem [#allocation4], %s1086_s7 }
  0x56   : > { %s362_s11 = scalar_lea.vmem [#allocation5], %s1087_s8 }
  0x57   : > { %366 = sfence }
  0x58   : > { %v394_v39 = vld [vmem:[%s362_s11] sm:$0x3f]  ;;  %v1048_v41 = vld [vmem:[%s362_s11 + $0x6] sm:$0x3f]  ;;  %v1062_v43 = vld [vmem:[%s362_s11 + $0xc] sm:$0x3f]  ;;  %v412_v45 = vlaneseq }
  0x59   : > { %v395_v40 = vmax.f32 %v394_v39, 1e-06  ;;  %v469_v42 = vmax.f32 %v1048_v41, 1e-06  ;;  %v544_v44 = vmax.f32 %v1062_v43, 1e-06 }
  0x5a   : > { %s393_s5 = sld [smem:[#allocation2]]  ;;  %v1265_v46 = vmov 0   ;;  %v413_v47 = vshrl.u32 %v412_v45, 7  ;;  %v400_v57 = vld [vmem:[%s1474_s9 + $0x8] sm:$0xff]  ;;  %v406_v59 = vld [vmem:[%s1474_s9 + $0x38] sm:$0xff]  ;;  %v399_v13 = vld [vmem:[%s1474_s9] sm:$0xff] }
  0x5b   : > { %1159 = vrcp.f32 %v395_v40  ;;  %665 = vmatprep.mubr.bf16.mxu0 %v1265_v46  ;;  %708 = vmatprep.mubr.bf16.mxu1 %v1265_v46  ;;  %s1047_s15 = sld [smem:[#allocation2 + $0x1]]  ;;  %v402_v61 = vld [vmem:[%s1474_s9 + $0x18] sm:$0xff]  ;;  %v408_v62 = vld [vmem:[%s1474_s9 + $0x48] sm:$0xff]  ;;  %v405_v14 = vld [vmem:[%s1474_s9 + $0x30] sm:$0xff]  ;;  %vm629_vm0 = vcmask 130048   ;;  %s1088_s14 = smul.u32 96, %s1470_s27 }
  0x5c   : > { %1161 = vrcp.f32 %v469_v42  ;;  %s1061_s6 = sld [smem:[#allocation2 + $0x2]]  ;;  %v418_v49 = vsub.s32 1, %v413_v47  ;;  %v426_v51 = vsub.s32 3, %v413_v47  ;;  %v1478_v52 = vsub.s32 0, %v413_v47  ;;  %v1050_v3 = vld [vmem:[%s1474_s9 + $0x68] sm:$0xff]  ;;  %v1056_v4 = vld [vmem:[%s1474_s9 + $0x98] sm:$0xff] }
  0x5d   : > { %1163 = vrcp.f32 %v544_v44  ;;  %v1480_v53 = vsub.s32 2, %v413_v47  ;;  %v1490_v63 = vsub.s32 5, %v413_v47  ;;  %v1492_v0 = vsub.s32 4, %v413_v47  ;;  %v1052_v6 = vld [vmem:[%s1474_s9 + $0x78] sm:$0xff]  ;;  %v1058_v11 = vld [vmem:[%s1474_s9 + $0xa8] sm:$0xff]  ;;  %v1049_v32 = vld [vmem:[%s1474_s9 + $0x60] sm:$0xff] }
  0x5e   : > { %v1064_v18 = vld [vmem:[%s1474_s9 + $0xc8] sm:$0xff]  ;;  %v1070_v19 = vld [vmem:[%s1474_s9 + $0xf8] sm:$0xff]  ;;  %v1055_v33 = vld [vmem:[%s1474_s9 + $0x90] sm:$0xff]  ;;  %s1639_s22 = scalar_lea.vmem [#allocation6], %s1088_s14  ;;  %p1715_p7 = scmp.ne.s32.totalorder %s1711_s28, 0 }
  0x5f   : > { %v1066_v26 = vld [vmem:[%s1474_s9 + $0xd8] sm:$0xff]  ;;  %v1072_v27 = vld [vmem:[%s1474_s9 + $0x108] sm:$0xff]  ;;  %v401_v38 = vld [vmem:[%s1474_s9 + $0x10] sm:$0xff]  ;;  %s889_s25 = smul.u32 (%p1715_p7), 6, %s1246_s17 }
  0x60   : > { %v397_v48 = vstv %s393_s5  ;;  %v407_v43 = vld [vmem:[%s1474_s9 + $0x40] sm:$0xff]  ;;  %s1089_s26 = smul.u32 (%p1715_p7), 36, %s1250_s18 }
  0x61   : > { %v471_v50 = vstv %s1047_s15 }
  0x62   : > { %v546_v58 = vstv %s1061_s6  ;;  %s891_s28 = sadd.s32 (%p1715_p7), %s1089_s26, %s889_s25 }
  0x63   : > { %s1079_s29 = sshll.u32 (%p1715_p7), %s891_s28, 3 }
  0x64   : > { %s893_s7 = scalar_lea.vmem (%p1715_p7), %s1708_s4, %s1079_s29 }
  0x68   : > { %v1160_v54 = vpop.eup %1159 }
  0x69   : > { %v1162_v55 = vpop.eup %1161  ;;  %v1482_v56 = vmul.f32 %v1160_v54, %v397_v48 }
  0x6a   : > { %v1486_v60 = vmul.f32 %v1162_v55, %v471_v50  ;;  %v1164_v1 = vpop.eup %1163  ;;  %v1069_v50 = vld [vmem:[%s1474_s9 + $0xf0] sm:$0xff] }
  0x6b   : > { %v419_v2 = vrot.slane %v1482_v56, %v418_v49  ;;  %v427_v5 = vrot.slane %v1482_v56, %v426_v51  ;;  %v415_v7 = vrot.slane %v1482_v56, %v1478_v52  ;;  %v423_v8 = vrot.slane %v1482_v56, %v1480_v53 }
  0x6c   : > { %v494_v9 = vrot.slane %v1486_v60, %v418_v49  ;;  %v1504_v10 = vmul.f32 %v1164_v1, %v546_v58  ;;  %v502_v12 = vrot.slane %v1486_v60, %v426_v51  ;;  %v490_v15 = vrot.slane %v1486_v60, %v1478_v52  ;;  %v1051_v1 = vld [vmem:[%s1474_s9 + $0x70] sm:$0xff] }
  0x6d   : > { %v443_v16 = vmul.f32 %v419_v2, %v400_v57  ;;  %v449_v17 = vmul.f32 %v419_v2, %v406_v59  ;;  %v445_v20 = vmul.f32 %v427_v5, %v402_v61  ;;  %v451_v21 = vmul.f32 %v427_v5, %v408_v62  ;;  %v1057_v2 = vld [vmem:[%s1474_s9 + $0xa0] sm:$0xff] }
  0x6e   : > { %v518_v22 = vmul.f32 %v1050_v3, %v494_v9  ;;  %v524_v23 = vmul.f32 %v1056_v4, %v494_v9  ;;  %v569_v24 = vrot.slane %v1504_v10, %v418_v49  ;;  %v520_v25 = vmul.f32 %v1052_v6, %v502_v12  ;;  %v1063_v49 = vld [vmem:[%s1474_s9 + $0xc0] sm:$0xff]  ;;  %v1065_v3 = vld [vmem:[%s1474_s9 + $0xd0] sm:$0xff]  ;;  %v404_v9 = vld [vmem:[%s1474_s9 + $0x28] sm:$0xff] }
  0x6f   : > { %v526_v28 = vmul.f32 %v1058_v11, %v502_v12  ;;  %v577_v29 = vrot.slane %v1504_v10, %v426_v51  ;;  %v442_v30 = vmul.f32 %v415_v7, %v399_v13  ;;  %v448_v31 = vmul.f32 %v415_v7, %v405_v14  ;;  %v410_v11 = vld [vmem:[%s1474_s9 + $0x58] sm:$0xff]  ;;  %v1054_v13 = vld [vmem:[%s1474_s9 + $0x88] sm:$0xff] }
  0x70   : > { %v530_v34 = vadd.f32 %v518_v22, %v443_v16  ;;  %v536_v35 = vadd.f32 %v524_v23, %v449_v17  ;;  %v593_v36 = vmul.f32 %v1064_v18, %v569_v24  ;;  %v599_v37 = vmul.f32 %v1070_v19, %v569_v24 }
  0x71   : > { %v532_v39 = vadd.f32 %v520_v25, %v445_v20  ;;  %v538_v40 = vadd.f32 %v526_v28, %v451_v21  ;;  %v595_v41 = vmul.f32 %v1066_v26, %v577_v29  ;;  %v601_v42 = vmul.f32 %v1072_v27, %v577_v29  ;;  %v1060_v20 = vld [vmem:[%s1474_s9 + $0xb8] sm:$0xff]  ;;  %v1068_v21 = vld [vmem:[%s1474_s9 + $0xe8] sm:$0xff]  ;;  %v403_v29 = vld [vmem:[%s1474_s9 + $0x20] sm:$0xff] }
  0x72   : > { %v605_v44 = vadd.f32 %v593_v36, %v530_v34  ;;  %v611_v45 = vadd.f32 %v599_v37, %v536_v35  ;;  %v517_v47 = vmul.f32 %v1049_v32, %v490_v15  ;;  %v523_v48 = vmul.f32 %v1055_v33, %v490_v15  ;;  %v1053_v36 = vld [vmem:[%s1474_s9 + $0x80] sm:$0xff]  ;;  %v1059_v37 = vld [vmem:[%s1474_s9 + $0xb0] sm:$0xff] }
  0x73   : > { %v607_v51 = vadd.f32 %v595_v41, %v532_v39  ;;  %v613_v54 = vadd.f32 %v601_v42, %v538_v40  ;;  %v565_v55 = vrot.slane %v1504_v10, %v1478_v52  ;;  %v444_v57 = vmul.f32 %v423_v8, %v401_v38  ;;  %v1071_v52 = vld [vmem:[%s1474_s9 + $0x100] sm:$0xff] }
  0x74   : > { %v619_v58 = vpack.c.bf16 %v611_v45, %v605_v44  ;;  %v529_v59 = vadd.f32 %v517_v47, %v442_v30  ;;  %v535_v61 = vadd.f32 %v523_v48, %v448_v31  ;;  %v450_v62 = vmul.f32 %v423_v8, %v407_v43  ;;  %v409_v30 = vld [vmem:[%s1474_s9 + $0x50] sm:$0xff]  ;;  %v1158_v31 = vld [vmem:[%s1705_s1] sm:$0xff]  }
  0x75   : > { %v621_v4 = vpack.c.bf16 %v613_v54, %v607_v51  ;;  %v592_v5 = vmul.f32 %v1063_v49, %v565_v55  ;;  %v598_v6 = vmul.f32 %v1069_v50, %v565_v55  ;;  %v498_v7 = vrot.slane %v1486_v60, %v1480_v53  ;;  %v1067_v42 = vld [vmem:[%s1474_s9 + $0xe0] sm:$0xff]  ;;  %v1073_v43 = vld [vmem:[%s1474_s9 + $0x110] sm:$0xff] }
  0x76   : > { %647 = vmatprep.subr.bf16.mxu0 %v619_v58  ;;  %v573_v12 = vrot.slane %v1504_v10, %v1480_v53  ;;  %v435_v8 = vrot.slane %v1482_v56, %v1490_v63  ;;  %v510_v14 = vrot.slane %v1486_v60, %v1490_v63  ;;  %v585_v15 = vrot.slane %v1504_v10, %v1490_v63  ;;  %v1074_v53 = vld [vmem:[%s1474_s9 + $0x118] sm:$0xff] }
  0x77   : > { %690 = vmatprep.subr.bf16.mxu1 %v621_v4  ;;  %v604_v16 = vadd.f32 %v592_v5, %v529_v59  ;;  %v610_v17 = vadd.f32 %v598_v6, %v535_v61  ;;  %v519_v18 = vmul.f32 %v1051_v1, %v498_v7  ;;  %v525_v19 = vmul.f32 %v1057_v2, %v498_v7 }
  0x78   : > { %v594_v22 = vmul.f32 %v1065_v3, %v573_v12  ;;  %v600_v23 = vmul.f32 %v1071_v52, %v573_v12  ;;  %v447_v24 = vmul.f32 %v435_v8, %v404_v9  ;;  %v453_v25 = vmul.f32 %v435_v8, %v410_v11 }
  0x79   : > { %v618_v26 = vpack.c.bf16 %v610_v17, %v604_v16  ;;  %v531_v27 = vadd.f32 %v519_v18, %v444_v57  ;;  %v537_v28 = vadd.f32 %v525_v19, %v450_v62  ;;  %v522_v63 = vmul.f32 %v1054_v13, %v510_v14 }
  0x7a   : > { %v528_v32 = vmul.f32 %v1060_v20, %v510_v14  ;;  %v597_v33 = vmul.f32 %v1068_v21, %v585_v15  ;;  %v603_v34 = vmul.f32 %v1074_v53, %v585_v15  ;;  %v431_v35 = vrot.slane %v1482_v56, %v1492_v0 }
  0x7b   : > { %648 = vmatpush1.bf16.msra.mxu0 %v618_v26  ;;  %v606_v38 = vadd.f32 %v594_v22, %v531_v27  ;;  %v612_v39 = vadd.f32 %v600_v23, %v537_v28  ;;  %v534_v40 = vadd.f32 %v522_v63, %v447_v24  ;;  %v506_v41 = vrot.slane %v1486_v60, %v1492_v0 }
  0x7c   : > { %v540_v44 = vadd.f32 %v528_v32, %v453_v25  ;;  %v446_v45 = vmul.f32 %v431_v35, %v403_v29  ;;  %v452_v47 = vmul.f32 %v431_v35, %v409_v30  ;;  %v581_v48 = vrot.slane %v1504_v10, %v1492_v0 }
  0x7d   : > { %v620_v49 = vpack.c.bf16 %v612_v39, %v606_v38  ;;  %v609_v50 = vadd.f32 %v597_v33, %v534_v40  ;;  %v521_v56 = vmul.f32 %v1053_v36, %v506_v41  ;;  %v527_v51 = vmul.f32 %v1059_v37, %v506_v41 }
  0x7e   : > { %1076 = vmatmul.mubr.msk.bf16.vlgmr.msra.gmra.mxu0 %vm629_vm0, %v1158_v31  ;;  %v615_v54 = vadd.f32 %v603_v34, %v540_v44  ;;  %v596_v55 = vmul.f32 %v1067_v42, %v581_v48  ;;  %v602_v57 = vmul.f32 %v1073_v43, %v581_v48 }
  0x7f   : > { %691 = vmatpush1.bf16.msra.mxu1 %v620_v49  ;;  %v533_v58 = vadd.f32 %v521_v56, %v446_v45  ;;  %v539_v60 = vadd.f32 %v527_v51, %v452_v47  ;;  %751 = vmatprep.mubr.bf16.mxu0 %v1265_v46 }
  0x80   : > { %v623_v59 = vpack.c.bf16 %v615_v54, %v609_v50 }
  0x81   : > { %v608_v61 = vadd.f32 %v596_v55, %v533_v58  ;;  %v614_v62 = vadd.f32 %v602_v57, %v539_v60 }
  0x82   : > { %1077 = vmatmul.mubr.msk.bf16.vlgmr.msra.gmra.mxu1 %vm629_vm0, %v1158_v31  ;;  %733 = vmatprep.subr.bf16.mxu0 %v623_v59 }
  0x83   : > { %v622_v0 = vpack.c.bf16 %v614_v62, %v608_v61 }
  0x85   : > { %734 = vmatpush1.bf16.msra.mxu0 %v622_v0 }
  0x88   : > { %1078 = vmatmul.mubr.msk.bf16.vlgmr.msra.gmra.mxu0 %vm629_vm0, %v1158_v31 }
 0x13e   : > { %v1565_v10 = vpop.f32.mrf.mxu0 }
 0x13f   : > { %v762_v1 = vmul.f32 %v1565_v10, %v1565_v10 }
 0x140   : > { %v1569_v2 = vpop.f32.mrf.mxu0 }
 0x141   : > { %v774_v3 = vmul.f32 %v762_v1, %v1565_v10  ;;  %v763_v46 = vmul.f32 %v1569_v2, %v1569_v2 }
 0x142   : > { %v1574_v4 = vpop.f32.mrf.mxu1  ;;  %v1576_v5 = vpop.f32.mrf.mxu0 }
 0x143   : > { %v786_v6 = vmul.f32 0.044715, %v774_v3  ;;  %v764_v7 = vmul.f32 %v1574_v4, %v1574_v4  ;;  %v775_v52 = vmul.f32 %v763_v46, %v1569_v2  ;;  %v768_v9 = vmul.f32 %v1576_v5, %v1576_v5 }
 0x144   : > { %v1583_v11 = vpop.f32.mrf.mxu1  ;;  %v1585_v12 = vpop.f32.mrf.mxu0 }
 0x145   : > { %v798_v8 = vadd.f32 %v786_v6, %v1565_v10  ;;  %v776_v13 = vmul.f32 %v764_v7, %v1574_v4  ;;  %v787_v14 = vmul.f32 0.044715, %v775_v52  ;;  %v765_v15 = vmul.f32 %v1583_v11, %v1583_v11 }
 0x146   : > { %v780_v16 = vmul.f32 %v768_v9, %v1576_v5  ;;  %v1592_v17 = vpop.f32.mrf.mxu1  ;;  %v769_v18 = vmul.f32 %v1585_v12, %v1585_v12 }
 0x147   : > { %v810_v19 = vmul.f32 0.7978846, %v798_v8  ;;  %v788_v20 = vmul.f32 0.044715, %v776_v13  ;;  %v799_v21 = vadd.f32 %v787_v14, %v1569_v2  ;;  %v777_v53 = vmul.f32 %v765_v15, %v1583_v11 }
 0x148   : > { %v792_v22 = vmul.f32 0.044715, %v780_v16  ;;  %v770_v23 = vmul.f32 %v1592_v17, %v1592_v17  ;;  %v781_v24 = vmul.f32 %v769_v18, %v1585_v12  ;;  %v1601_v25 = vpop.f32.mrf.mxu1  ;;  %v1603_v26 = vpop.f32.mrf.mxu0 }
 0x149   : > { %1165 = vtanh.f32 %v810_v19  ;;  %v800_v27 = vadd.f32 %v788_v20, %v1574_v4  ;;  %v811_v28 = vmul.f32 0.7978846, %v799_v21  ;;  %v789_v63 = vmul.f32 0.044715, %v777_v53 }
 0x14a   : > { %v804_v29 = vadd.f32 %v792_v22, %v1576_v5  ;;  %v782_v30 = vmul.f32 %v770_v23, %v1592_v17  ;;  %v793_v31 = vmul.f32 0.044715, %v781_v24  ;;  %v771_v32 = vmul.f32 %v1601_v25, %v1601_v25  ;;  %v1610_v33 = vpop.f32.mrf.mxu0 }
 0x14b   : > { %v812_v34 = vmul.f32 0.7978846, %v800_v27  ;;  %1167 = vtanh.f32 %v811_v28  ;;  %v801_v35 = vadd.f32 %v789_v63, %v1583_v11  ;;  %v766_v36 = vmul.f32 %v1603_v26, %v1603_v26 }
 0x14c   : > { %v816_v37 = vmul.f32 0.7978846, %v804_v29  ;;  %v794_v38 = vmul.f32 0.044715, %v782_v30  ;;  %v805_v39 = vadd.f32 %v793_v31, %v1585_v12  ;;  %v783_v40 = vmul.f32 %v771_v32, %v1601_v25  ;;  %v1617_v41 = vpop.f32.mrf.mxu0 }
 0x14d   : > { %1169 = vtanh.f32 %v812_v34  ;;  %v813_v42 = vmul.f32 0.7978846, %v801_v35  ;;  %v778_v43 = vmul.f32 %v766_v36, %v1603_v26  ;;  %v767_v44 = vmul.f32 %v1610_v33, %v1610_v33 }
 0x14e   : > { %1171 = vtanh.f32 %v816_v37  ;;  %v806_v45 = vadd.f32 %v794_v38, %v1592_v17  ;;  %v817_v47 = vmul.f32 0.7978846, %v805_v39  ;;  %v795_v48 = vmul.f32 0.044715, %v783_v40  ;;  %v1623_v49 = vpop.f32.mrf.mxu0 }
 0x14f   : > { %1173 = vtanh.f32 %v813_v42  ;;  %v790_v50 = vmul.f32 0.044715, %v778_v43  ;;  %v779_v56 = vmul.f32 %v767_v44, %v1610_v33  ;;  %v772_v51 = vmul.f32 %v1617_v41, %v1617_v41 }
 0x150   : > { %v818_v54 = vmul.f32 0.7978846, %v806_v45  ;;  %1175 = vtanh.f32 %v817_v47  ;;  %v807_v55 = vadd.f32 %v795_v48, %v1601_v25  ;;  %v773_v57 = vmul.f32 %v1623_v49, %v1623_v49 }
 0x151   : > { %v802_v58 = vadd.f32 %v790_v50, %v1603_v26  ;;  %v791_v60 = vmul.f32 0.044715, %v779_v56  ;;  %v784_v59 = vmul.f32 %v772_v51, %v1617_v41 }
 0x152   : > { %1177 = vtanh.f32 %v818_v54  ;;  %v819_v61 = vmul.f32 0.7978846, %v807_v55  ;;  %v785_v62 = vmul.f32 %v773_v57, %v1623_v49 }
 0x153   : > { %v814_v0 = vmul.f32 0.7978846, %v802_v58  ;;  %v803_v1 = vadd.f32 %v791_v60, %v1610_v33  ;;  %v796_v3 = vmul.f32 0.044715, %v784_v59 }
 0x154   : > { %1179 = vtanh.f32 %v819_v61  ;;  %v797_v46 = vmul.f32 0.044715, %v785_v62 }
 0x155   : > { %1181 = vtanh.f32 %v814_v0  ;;  %v815_v6 = vmul.f32 0.7978846, %v803_v1  ;;  %v808_v7 = vadd.f32 %v796_v3, %v1617_v41 }
 0x156   : > { %v1166_v52 = vpop.eup %1165  ;;  %v809_v9 = vadd.f32 %v797_v46, %v1623_v49 }
 0x157   : > { %v834_v8 = vadd.f32 1.0, %v1166_v52  ;;  %1183 = vtanh.f32 %v815_v6  ;;  %v820_v13 = vmul.f32 0.7978846, %v808_v7 }
 0x158   : > { %v1168_v14 = vpop.eup %1167  ;;  %v821_v15 = vmul.f32 0.7978846, %v809_v9 }
 0x159   : > { %v846_v16 = vmul.f32 0.5, %v834_v8  ;;  %v835_v18 = vadd.f32 1.0, %v1168_v14  ;;  %1185 = vtanh.f32 %v820_v13 }
 0x15a   : > { %v1170_v19 = vpop.eup %1169  ;;  %1187 = vtanh.f32 %v821_v15 }
 0x15b   : > { %v1172_v20 = vpop.eup %1171  ;;  %v858_v21 = vmul.f32 %v846_v16, %v1565_v10  ;;  %v836_v53 = vadd.f32 1.0, %v1170_v19  ;;  %v847_v22 = vmul.f32 0.5, %v835_v18 }
 0x15c   : > { %v1174_v23 = vpop.eup %1173  ;;  %v840_v24 = vadd.f32 1.0, %v1172_v20 }
 0x15d   : > { %v1176_v27 = vpop.eup %1175  ;;  %870 = vst [vmem:[%s1639_s22] sm:$0xff] %v858_v21  ;;  %v848_v28 = vmul.f32 0.5, %v836_v53  ;;  %v859_v63 = vmul.f32 %v847_v22, %v1569_v2  ;;  %v837_v29 = vadd.f32 1.0, %v1174_v23 }
 0x15e   : > { %v852_v30 = vmul.f32 0.5, %v840_v24  ;;  %v841_v31 = vadd.f32 1.0, %v1176_v27 }
 0x15f   : > { %v1178_v10 = vpop.eup %1177  ;;  %v860_v32 = vmul.f32 %v848_v28, %v1574_v4  ;;  %871 = vst [vmem:[%s1639_s22 + $0x8] sm:$0xff] %v859_v63  ;;  %v849_v34 = vmul.f32 0.5, %v837_v29 }
 0x160   : > { %v864_v35 = vmul.f32 %v852_v30, %v1576_v5  ;;  %v842_v36 = vadd.f32 1.0, %v1178_v10  ;;  %v853_v37 = vmul.f32 0.5, %v841_v31 }
 0x161   : > { %v1180_v38 = vpop.eup %1179  ;;  %872 = vst [vmem:[%s1639_s22 + $0x10] sm:$0xff] %v860_v32  ;;  %v861_v39 = vmul.f32 %v849_v34, %v1583_v11 }
 0x162   : > { %v1182_v2 = vpop.eup %1181  ;;  %876 = vst [vmem:[%s1639_s22 + $0x30] sm:$0xff] %v864_v35  ;;  %v854_v40 = vmul.f32 0.5, %v842_v36  ;;  %v865_v42 = vmul.f32 %v853_v37, %v1585_v12  ;;  %v843_v43 = vadd.f32 1.0, %v1180_v38 }
 0x163   : > { %873 = vst [vmem:[%s1639_s22 + $0x18] sm:$0xff] %v861_v39  ;;  %v838_v4 = vadd.f32 1.0, %v1182_v2 }
 0x164   : > { %v1184_v44 = vpop.eup %1183  ;;  %v866_v5 = vmul.f32 %v854_v40, %v1592_v17  ;;  %877 = vst [vmem:[%s1639_s22 + $0x38] sm:$0xff] %v865_v42  ;;  %v855_v45 = vmul.f32 0.5, %v843_v43 }
 0x165   : > { %v850_v47 = vmul.f32 0.5, %v838_v4  ;;  %v839_v48 = vadd.f32 1.0, %v1184_v44 }
 0x166   : > { %v1186_v50 = vpop.eup %1185  ;;  %878 = vst [vmem:[%s1639_s22 + $0x40] sm:$0xff] %v866_v5  ;;  %v867_v11 = vmul.f32 %v855_v45, %v1601_v25  ;;  %v906_v25 = vld [vmem:[%s1639_s22] sm:$0xff] (%p1715_p7) }
 0x167   : > { %v1188_v12 = vpop.eup %1187  ;;  %v862_v56 = vmul.f32 %v850_v47, %v1603_v26  ;;  %v851_v51 = vmul.f32 0.5, %v839_v48  ;;  %v844_v54 = vadd.f32 1.0, %v1186_v50  ;;  %v908_v26 = vld [vmem:[%s1639_s22 + $0x8] sm:$0xff] (%p1715_p7)  ;;  %907 = vst [vmem:[%s893_s7] sm:$0xff] (%p1715_p7), %v906_v25 }
 0x168   : > { %879 = vst [vmem:[%s1639_s22 + $0x48] sm:$0xff] %v867_v11  ;;  %v845_v55 = vadd.f32 1.0, %v1188_v12  ;;  %909 = vst [vmem:[%s893_s7 + $0x8] sm:$0xff] (%p1715_p7), %v908_v26 }
 0x169   : > { %874 = vst [vmem:[%s1639_s22 + $0x20] sm:$0xff] %v862_v56  ;;  %v863_v17 = vmul.f32 %v851_v51, %v1610_v33  ;;  %v856_v57 = vmul.f32 0.5, %v844_v54  ;;  %v910_v33 = vld [vmem:[%s1639_s22 + $0x10] sm:$0xff] (%p1715_p7) }
 0x16a   : > { %v857_v58 = vmul.f32 0.5, %v845_v55  ;;  %888 = sbr.rel (!%p1715_p7) target bundleno = 375 (0x177), region = 108  ;;  %v918_v62 = vld [vmem:[%s1639_s22 + $0x30] sm:$0xff] (%p1715_p7)  ;;  %911 = vst [vmem:[%s893_s7 + $0x10] sm:$0xff] (%p1715_p7), %v910_v33 }
 0x16b   : > { %875 = vst [vmem:[%s1639_s22 + $0x28] sm:$0xff] %v863_v17  ;;  %v868_v60 = vmul.f32 %v856_v57, %v1617_v41  ;;  %v912_v41 = vld [vmem:[%s1639_s22 + $0x18] sm:$0xff] (%p1715_p7)  ;;  %919 = vst [vmem:[%s893_s7 + $0x90] sm:$0xff] (%p1715_p7), %v918_v62 }
 0x16c   : > { %v869_v59 = vmul.f32 %v857_v58, %v1623_v49  ;;  %v920_v0 = vld [vmem:[%s1639_s22 + $0x38] sm:$0xff] (%p1715_p7)  ;;  %913 = vst [vmem:[%s893_s7 + $0x18] sm:$0xff] (%p1715_p7), %v912_v41 }
 0x16d   : > { %880 = vst [vmem:[%s1639_s22 + $0x50] sm:$0xff] %v868_v60  ;;  %v922_v1 = vld [vmem:[%s1639_s22 + $0x40] sm:$0xff] (%p1715_p7)  ;;  %921 = vst [vmem:[%s893_s7 + $0x98] sm:$0xff] (%p1715_p7), %v920_v0 }
 0x16e   : > { %881 = vst [vmem:[%s1639_s22 + $0x58] sm:$0xff] %v869_v59  ;;  %923 = vst [vmem:[%s893_s7 + $0xa0] sm:$0xff] (%p1715_p7), %v922_v1 }
 0x16f   : > { %v924_v3 = vld [vmem:[%s1639_s22 + $0x48] sm:$0xff] }
 0x170   : > { %v914_v49 = vld [vmem:[%s1639_s22 + $0x20] sm:$0xff]  ;;  %925 = vst [vmem:[%s893_s7 + $0xa8] sm:$0xff] %v924_v3 }
 0x171   : > { %915 = vst [vmem:[%s893_s7 + $0x20] sm:$0xff] %v914_v49 }
 0x172   : > { %v916_v61 = vld [vmem:[%s1639_s22 + $0x28] sm:$0xff] }
 0x173   : > { %917 = vst [vmem:[%s893_s7 + $0x28] sm:$0xff] %v916_v61 }
 0x174   : > { %v926_v46 = vld [vmem:[%s1639_s22 + $0x50] sm:$0xff] }
 0x175   : > { %v928_v6 = vld [vmem:[%s1639_s22 + $0x58] sm:$0xff]  ;;  %927 = vst [vmem:[%s893_s7 + $0xb0] sm:$0xff] %v926_v46 }
 0x176   : > { %929 = vst [vmem:[%s893_s7 + $0xb8] sm:$0xff] %v928_v6 }
 0x177 PF: > { %s15_s21 = sadd.s32 1, %s1262_s21   ;;  %s1716_s15 = smov %s1242_s16 }
 0x178   : > { %p12_p9 = scmp.ge.s32.totalorder %s15_s21, 8   ;;  %s1717_s16 = smov %s1366_s10 }
 0x179   : > { %s1718_s17 = smov %s1254_s19  ;;  %s1719_s18 = smov %s1258_s20 }
 0x17a   : > { %s1720_s19 = smov %s1723_s23  ;;  %s1721_s20 = smov %s1727_s24 }
 0x17b   :  { %14 = sbr.rel (!%p12_p9) target bundleno = 4 (0x4), region = 175 }
 0x180   :  { %945 = vsyncpa [#allocation3], 1 }
 0x181   :  { %947 = vsyncpa [#allocation3 + $0x1], 1 }

// kernel: deepsr_forward.9
= control target key start
LH: loop header
LB: loop body
LE: loop exit
PB: predicated region body
PF: predicated region fallthrough
CT: control target
= control target key end

     0   :  { %s5271_s12 = smov 0   ;;  %s6495_s0 = inlined_call_operand.vmem [shape: bf16[2,16,2402], index: 0, kind: input, shape index: {}]   ;;  %s6496_s1 = inlined_call_operand.vmem [shape: bf16[9,1,16], index: 1, kind: input, shape index: {}]   ;;  %s6497_s2 = inlined_call_operand.vmem [shape: f32[3,2304], index: 2, kind: input, shape index: {}]   ;;  %s6498_s3 = inlined_call_operand.vmem [shape: f32[2,1,2304], index: 3, kind: output, shape index: {}]  }
   0x1 LB: > { %s5022_s13 = sadd.s32 4294967295, %s5239_s12   ;;  %p5026_p0 = scmp.ge.s32.totalorder %s5239_s12, 1  ;;  %s5239_s12 = sphi %s5271_s12, %s13_s12  }
   0x2   : > { %p137_p1 = scmp.lt.s32.totalorder %s5239_s12, 3 }
   0x4   : > { %p138_p2 = pnand %p5026_p0, %p137_p1 }
   0x5   : > { %p160_p3 = scmp.lt.s32.totalorder (!%p138_p2), %s5022_s13, 1  ;;  %s5242_s18 = smov (!%p138_p2), 127  }
   0x6   : > { %141 = sbr.rel (%p138_p2) target bundleno = 648 (0x288), region = 32  ;;  %s5243_s21 = smov (!%p138_p2), 126  }
   0x7   : > { %s5244_s22 = smov (!%p138_p2), 80   ;;  %s5245_s23 = smov (!%p138_p2), 79  }
   0x8   : > { %s5246_s26 = smov (!%p138_p2), 78   ;;  %s5247_s29 = smov (!%p138_p2), 32  }
   0x9   : > { %s5248_s5 = smov (!%p138_p2), 31   ;;  %s5249_s8 = smov (!%p138_p2), 30  }
   0xb   : > { %v5241_v0 = vmov 0   ;;  %s6500_s13 = smov (!%p160_p3, %s5022_s13), 1  ;;  %v5313_v6 = vld [vmem:[%s6496_s1] sm:$0x1]  ;;  %vm298_vm0 = vcmask 130048   ;;  %vm768_vm1 = vcmask 1039360  }
   0xc   : > { %334 = vmatprep.mubr.bf16.mxu0 %v5241_v0  ;;  %375 = vmatprep.mubr.bf16.mxu1 %v5241_v0  ;;  %s5157_s14 = smul.u32 152, %s6500_s13  ;;  %v5487_v27 = vld [vmem:[%s6496_s1 + $0x1] sm:$0x1]  ;;  %vm1260_vm2 = vcmask 1031168   ;;  %vm1806_vm3 = vcmask 654336   ;;  %vm2307_vm4 = vcmask 646144  }
   0xd   : > { %vm2799_vm5 = vcmask 637952   ;;  %vm3345_vm6 = vcmask 261120   ;;  %vm3846_vm7 = vcmask 252928   ;;  %vm4338_vm8 = vcmask 244736   ;;  %s5158_s24 = smul.u32 18, %s6500_s13 }
   0xe   : > { %s5287_s17 = scalar_lea.vmem %s6495_s0, %s5157_s14 }
   0xf   : > { %v5290_v1 = vld [vmem:[%s5287_s17 + $0x4] ss:$76 sps:$4 sm:$0xff]   ;;  %v5293_v2 = vld [vmem:[%s5287_s17] ss:$76 sps:$4 sm:$0xff]   ;;  %v5298_v3 = vld [vmem:[%s5287_s17 + $0x8] ss:$76 sps:$4 sm:$0xff]  }
  0x10   : > { %732 = vrot.lane.b32.xlu0 %v5290_v1, %s5242_s18  ;;  %v5301_v4 = vld [vmem:[%s5287_s17 + $0xc] ss:$76 sps:$4 sm:$0xff]   ;;  %316 = vmatprep.subr.bf16.mxu0 %v5290_v1  ;;  %v5307_v5 = vld [vmem:[%s5287_s17 + $0x14] ss:$76 sps:$4 sm:$0xff]   ;;  %v5317_v7 = vld [vmem:[%s5287_s17 + $0x10] ss:$76 sps:$4 sm:$0xff]  }
  0x11   : > { %730 = vrot.lane.b32.xlu1 %v5293_v2, %s5242_s18  ;;  %317 = vmatpush1.bf16.msra.mxu0 %v5293_v2  ;;  %v5328_v8 = vld [vmem:[%s5287_s17 + $0x1c] ss:$76 sps:$4 sm:$0xff]   ;;  %v5332_v9 = vld [vmem:[%s5287_s17 + $0x18] ss:$76 sps:$4 sm:$0xff]   ;;  %v5353_v12 = vld [vmem:[%s5287_s17 + $0x20] ss:$76 sps:$4 sm:$0xff]  }
  0x12   : > { %357 = vmatprep.subr.bf16.mxu1 %v5301_v4  ;;  %398 = vmatprep.subr.bf16.mxu0 %v5307_v5  ;;  %v5338_v10 = vld [vmem:[%s5287_s17 + $0x24] ss:$76 sps:$4 sm:$0xff]   ;;  %v5345_v11 = vld [vmem:[%s5287_s17 + $0x2c] ss:$76 sps:$4 sm:$0xff]   ;;  %v5362_v13 = vld [vmem:[%s5287_s17 + $0x28] ss:$76 sps:$4 sm:$0xff]  }
  0x13   : > { %358 = vmatpush1.bf16.msra.mxu1 %v5298_v3  ;;  %v5366_v14 = vld [vmem:[%s5287_s17 + $0x34] ss:$76 sps:$4 sm:$0xff]   ;;  %v5372_v15 = vld [vmem:[%s5287_s17 + $0x3c] ss:$76 sps:$4 sm:$0xff]   ;;  %v5392_v17 = vld [vmem:[%s5287_s17 + $0x38] ss:$76 sps:$4 sm:$0xff]  }
  0x14   : > { %734 = vrot.lane.b32.xlu0 %v5298_v3, %s5242_s18  ;;  %5046 = vmatmul.mubr.msk.bf16.vlgmr.msra.gmra.mxu0 %vm298_vm0, %v5313_v6  ;;  %v5383_v16 = vld [vmem:[%s5287_s17 + $0x30] ss:$76 sps:$4 sm:$0xff]   ;;  %v5409_v19 = vld [vmem:[%s5287_s17 + $0x40] ss:$76 sps:$4 sm:$0xff]   ;;  %v5425_v20 = vld [vmem:[%s5287_s17 + $0x48] ss:$76 sps:$4 sm:$0xff]  }
  0x15   : > { %736 = vrot.lane.b32.xlu1 %v5301_v4, %s5242_s18  ;;  %399 = vmatpush1.bf16.msra.mxu0 %v5317_v7  ;;  %v5396_v18 = vld [vmem:[%s5287_s17 + $0x44] ss:$76 sps:$4 sm:$0xff]  }
  0x16   : > { %5047 = vmatmul.mubr.msk.bf16.vlgmr.msra.gmra.mxu1 %vm298_vm0, %v5313_v6  ;;  %416 = vmatprep.mubr.bf16.mxu0 %v5241_v0 }
  0x17   : > { %439 = vmatprep.subr.bf16.mxu1 %v5328_v8  ;;  %457 = vmatprep.mubr.bf16.mxu1 %v5241_v0 }
  0x18   : > { %738 = vrot.lane.b32.xlu0 %v5317_v7, %s5242_s18  ;;  %440 = vmatpush1.bf16.msra.mxu1 %v5332_v9 }
  0x19   : > { %740 = vrot.lane.b32.xlu1 %v5307_v5, %s5242_s18  ;;  %480 = vmatprep.subr.bf16.mxu0 %v5338_v10 }
  0x1a   : > { %521 = vmatprep.subr.bf16.mxu1 %v5345_v11 }
  0x1c   : > { %742 = vrot.lane.b32.xlu0 %v5332_v9, %s5242_s18  ;;  %5048 = vmatmul.mubr.msk.bf16.vlgmr.msra.gmra.mxu0 %vm298_vm0, %v5313_v6 }
  0x1d   : > { %744 = vrot.lane.b32.xlu1 %v5328_v8, %s5242_s18  ;;  %481 = vmatpush1.bf16.msra.mxu0 %v5353_v12 }
  0x1e   : > { %5049 = vmatmul.mubr.msk.bf16.vlgmr.msra.gmra.mxu1 %vm298_vm0, %v5313_v6  ;;  %498 = vmatprep.mubr.bf16.mxu0 %v5241_v0 }
  0x1f   : > { %522 = vmatpush1.bf16.msra.mxu1 %v5362_v13  ;;  %539 = vmatprep.mubr.bf16.mxu1 %v5241_v0 }
  0x20   : > { %746 = vrot.lane.b32.xlu0 %v5353_v12, %s5242_s18  ;;  %562 = vmatprep.subr.bf16.mxu0 %v5366_v14 }
  0x21   : > { %748 = vrot.lane.b32.xlu1 %v5338_v10, %s5242_s18  ;;  %603 = vmatprep.subr.bf16.mxu1 %v5372_v15 }
  0x24   : > { %750 = vrot.lane.b32.xlu0 %v5362_v13, %s5242_s18  ;;  %5050 = vmatmul.mubr.msk.bf16.vlgmr.msra.gmra.mxu0 %vm298_vm0, %v5313_v6 }
  0x25   : > { %752 = vrot.lane.b32.xlu1 %v5345_v11, %s5242_s18  ;;  %563 = vmatpush1.bf16.msra.mxu0 %v5383_v16 }
  0x26   : > { %5051 = vmatmul.mubr.msk.bf16.vlgmr.msra.gmra.mxu1 %vm298_vm0, %v5313_v6  ;;  %580 = vmatprep.mubr.bf16.mxu0 %v5241_v0 }
  0x27   : > { %604 = vmatpush1.bf16.msra.mxu1 %v5392_v17  ;;  %621 = vmatprep.mubr.bf16.mxu1 %v5241_v0 }
  0x28   : > { %754 = vrot.lane.b32.xlu0 %v5383_v16, %s5242_s18  ;;  %644 = vmatprep.subr.bf16.mxu0 %v5396_v18 }
  0x29   : > { %756 = vrot.lane.b32.xlu1 %v5366_v14, %s5242_s18 }
  0x2c   : > { %758 = vrot.lane.b32.xlu0 %v5392_v17, %s5242_s18  ;;  %5052 = vmatmul.mubr.msk.bf16.vlgmr.msra.gmra.mxu0 %vm298_vm0, %v5313_v6 }
  0x2d   : > { %760 = vrot.lane.b32.xlu1 %v5372_v15, %s5242_s18  ;;  %645 = vmatpush1.bf16.msra.mxu0 %v5409_v19 }
  0x2e   : > { %5053 = vmatmul.mubr.msk.bf16.vlgmr.msra.gmra.mxu1 %vm298_vm0, %v5313_v6  ;;  %662 = vmatprep.mubr.bf16.mxu0 %v5241_v0 }
  0x2f   : > { %840 = vmatprep.mubr.bf16.mxu1 %v5241_v0 }
  0x30   : > { %762 = vrot.lane.b32.xlu0 %v5409_v19, %s5242_s18 }
  0x31   : > { %764 = vrot.lane.b32.xlu1 %v5396_v18, %s5242_s18 }
  0x34   : > { %766 = vrot.lane.b32.xlu0 %v5425_v20, %s5242_s18  ;;  %5054 = vmatmul.mubr.msk.bf16.vlgmr.msra.gmra.mxu0 %vm298_vm0, %v5313_v6 }
  0x35   : > { %1224 = vrot.lane.b32.xlu1 %v5290_v1, %s5243_s21  ;;  %881 = vmatprep.mubr.bf16.mxu0 %v5241_v0 }
  0x38   : > { %1226 = vrot.lane.b32.xlu0 %v5298_v3, %s5243_s21 }
  0x39   : > { %1222 = vrot.lane.b32.xlu1 %v5293_v2, %s5243_s21 }
  0x3c   : > { %1228 = vrot.lane.b32.xlu0 %v5301_v4, %s5243_s21 }
  0x3d   : > { %1230 = vrot.lane.b32.xlu1 %v5317_v7, %s5243_s21 }
  0x40   : > { %1232 = vrot.lane.b32.xlu0 %v5307_v5, %s5243_s21 }
  0x41   : > { %1234 = vrot.lane.b32.xlu1 %v5332_v9, %s5243_s21 }
  0x44   : > { %1236 = vrot.lane.b32.xlu0 %v5328_v8, %s5243_s21 }
  0x45   : > { %1238 = vrot.lane.b32.xlu1 %v5353_v12, %s5243_s21 }
  0x48   : > { %1240 = vrot.lane.b32.xlu0 %v5338_v10, %s5243_s21 }
  0x49   : > { %1242 = vrot.lane.b32.xlu1 %v5362_v13, %s5243_s21 }
  0x4c   : > { %1244 = vrot.lane.b32.xlu0 %v5345_v11, %s5243_s21 }
  0x4d   : > { %1246 = vrot.lane.b32.xlu1 %v5383_v16, %s5243_s21 }
  0x50   : > { %1248 = vrot.lane.b32.xlu0 %v5366_v14, %s5243_s21 }
  0x51   : > { %1250 = vrot.lane.b32.xlu1 %v5392_v17, %s5243_s21 }
  0x54   : > { %1252 = vrot.lane.b32.xlu0 %v5372_v15, %s5243_s21 }
  0x55   : > { %1254 = vrot.lane.b32.xlu1 %v5409_v19, %s5243_s21 }
  0x58   : > { %1256 = vrot.lane.b32.xlu0 %v5396_v18, %s5243_s21 }
  0x59   : > { %1258 = vrot.lane.b32.xlu1 %v5425_v20, %s5243_s21 }
  0x5c   : > { %1770 = vrot.lane.b32.xlu0 %v5290_v1, %s5244_s22 }
  0x5d   : > { %1772 = vrot.lane.b32.xlu1 %v5298_v3, %s5244_s22 }
  0x60   : > { %1768 = vrot.lane.b32.xlu0 %v5293_v2, %s5244_s22 }
  0x61   : > { %1774 = vrot.lane.b32.xlu1 %v5301_v4, %s5244_s22 }
  0x64   : > { %1776 = vrot.lane.b32.xlu0 %v5317_v7, %s5244_s22 }
  0x65   : > { %1778 = vrot.lane.b32.xlu1 %v5307_v5, %s5244_s22 }
  0x68   : > { %1780 = vrot.lane.b32.xlu0 %v5332_v9, %s5244_s22 }
  0x69   : > { %1782 = vrot.lane.b32.xlu1 %v5328_v8, %s5244_s22 }
  0x6c   : > { %1784 = vrot.lane.b32.xlu0 %v5353_v12, %s5244_s22 }
  0x6d   : > { %1786 = vrot.lane.b32.xlu1 %v5338_v10, %s5244_s22 }
  0x70   : > { %1788 = vrot.lane.b32.xlu0 %v5362_v13, %s5244_s22 }
  0x71   : > { %1790 = vrot.lane.b32.xlu1 %v5345_v11, %s5244_s22 }
  0x74   : > { %1792 = vrot.lane.b32.xlu0 %v5383_v16, %s5244_s22 }
  0x75   : > { %1794 = vrot.lane.b32.xlu1 %v5366_v14, %s5244_s22 }
  0x78   : > { %1796 = vrot.lane.b32.xlu0 %v5392_v17, %s5244_s22 }
  0x79   : > { %1798 = vrot.lane.b32.xlu1 %v5372_v15, %s5244_s22 }
  0x7c   : > { %1800 = vrot.lane.b32.xlu0 %v5409_v19, %s5244_s22 }
  0x7d   : > { %1802 = vrot.lane.b32.xlu1 %v5396_v18, %s5244_s22 }
  0x80   : > { %1804 = vrot.lane.b32.xlu0 %v5425_v20, %s5244_s22 }
  0x81   : > { %2271 = vrot.lane.b32.xlu1 %v5290_v1, %s5245_s23 }
  0x82   : > { %v733_v21 = vpop.permute.xlu0 %732 }
  0x83   : > { %v731_v22 = vpop.permute.xlu1 %730 }
  0x84   : > { %2273 = vrot.lane.b32.xlu0 %v5298_v3, %s5245_s23  ;;  %v769_v26 = vsel %vm768_vm1, %v731_v22, %v733_v21 }
  0x85   : > { %2269 = vrot.lane.b32.xlu1 %v5293_v2, %s5245_s23 }
  0x86   : > { %v735_v23 = vpop.permute.xlu0 %734 }
  0x87   : > { %v737_v24 = vpop.permute.xlu1 %736  ;;  %v770_v25 = vsel %vm768_vm1, %v733_v21, %v735_v23  ;;  %v5572_v21 = vld [vmem:[%s6496_s1 + $0x2] sm:$0x1] }
  0x88   : > { %822 = vmatprep.subr.bf16.mxu1 %v770_v25  ;;  %2275 = vrot.lane.b32.xlu0 %v5301_v4, %s5245_s23  ;;  %v771_v31 = vsel %vm768_vm1, %v735_v23, %v737_v24 }
  0x89   : > { %2277 = vrot.lane.b32.xlu1 %v5317_v7, %s5245_s23  ;;  %823 = vmatpush1.bf16.msra.mxu1 %v769_v26 }
  0x8a   : > { %v739_v28 = vpop.permute.xlu0 %738 }
  0x8b   : > { %v741_v29 = vpop.permute.xlu1 %740  ;;  %v772_v30 = vsel %vm768_vm1, %v737_v24, %v739_v28 }
  0x8c   : > { %2279 = vrot.lane.b32.xlu0 %v5307_v5, %s5245_s23  ;;  %5056 = vmatmul.mubr.msk.bf16.vlgmr.msra.gmra.mxu1 %vm298_vm0, %v5487_v27  ;;  %v773_v35 = vsel %vm768_vm1, %v739_v28, %v741_v29 }
  0x8d   : > { %2281 = vrot.lane.b32.xlu1 %v5332_v9, %s5245_s23  ;;  %863 = vmatprep.subr.bf16.mxu0 %v772_v30 }
  0x8e   : > { %864 = vmatpush1.bf16.msra.mxu0 %v771_v31  ;;  %v743_v32 = vpop.permute.xlu0 %742  ;;  %922 = vmatprep.mubr.bf16.mxu1 %v5241_v0 }
  0x8f   : > { %v745_v33 = vpop.permute.xlu1 %744  ;;  %v774_v34 = vsel %vm768_vm1, %v741_v29, %v743_v32 }
  0x90   : > { %2283 = vrot.lane.b32.xlu0 %v5328_v8, %s5245_s23  ;;  %904 = vmatprep.subr.bf16.mxu1 %v774_v34  ;;  %v775_v39 = vsel %vm768_vm1, %v743_v32, %v745_v33 }
  0x91   : > { %2285 = vrot.lane.b32.xlu1 %v5353_v12, %s5245_s23  ;;  %5057 = vmatmul.mubr.msk.bf16.vlgmr.msra.gmra.mxu0 %vm298_vm0, %v5487_v27 }
  0x92   : > { %905 = vmatpush1.bf16.msra.mxu1 %v773_v35  ;;  %v747_v36 = vpop.permute.xlu0 %746  ;;  %963 = vmatprep.mubr.bf16.mxu0 %v5241_v0 }
  0x93   : > { %v749_v37 = vpop.permute.xlu1 %748  ;;  %v776_v38 = vsel %vm768_vm1, %v745_v33, %v747_v36 }
  0x94   : > { %2287 = vrot.lane.b32.xlu0 %v5338_v10, %s5245_s23  ;;  %945 = vmatprep.subr.bf16.mxu0 %v776_v38  ;;  %v777_v43 = vsel %vm768_vm1, %v747_v36, %v749_v37 }
  0x95   : > { %2289 = vrot.lane.b32.xlu1 %v5362_v13, %s5245_s23  ;;  %5058 = vmatmul.mubr.msk.bf16.vlgmr.msra.gmra.mxu1 %vm298_vm0, %v5487_v27 }
  0x96   : > { %946 = vmatpush1.bf16.msra.mxu0 %v775_v39  ;;  %v751_v40 = vpop.permute.xlu0 %750  ;;  %1004 = vmatprep.mubr.bf16.mxu1 %v5241_v0 }
  0x97   : > { %v753_v41 = vpop.permute.xlu1 %752  ;;  %v778_v42 = vsel %vm768_vm1, %v749_v37, %v751_v40 }
  0x98   : > { %2291 = vrot.lane.b32.xlu0 %v5345_v11, %s5245_s23  ;;  %986 = vmatprep.subr.bf16.mxu1 %v778_v42  ;;  %v779_v47 = vsel %vm768_vm1, %v751_v40, %v753_v41 }
  0x99   : > { %2293 = vrot.lane.b32.xlu1 %v5383_v16, %s5245_s23  ;;  %5059 = vmatmul.mubr.msk.bf16.vlgmr.msra.gmra.mxu0 %vm298_vm0, %v5487_v27 }
  0x9a   : > { %987 = vmatpush1.bf16.msra.mxu1 %v777_v43  ;;  %v755_v44 = vpop.permute.xlu0 %754  ;;  %1045 = vmatprep.mubr.bf16.mxu0 %v5241_v0 }
  0x9b   : > { %v757_v45 = vpop.permute.xlu1 %756  ;;  %v780_v46 = vsel %vm768_vm1, %v753_v41, %v755_v44 }
  0x9c   : > { %2295 = vrot.lane.b32.xlu0 %v5366_v14, %s5245_s23  ;;  %1027 = vmatprep.subr.bf16.mxu0 %v780_v46  ;;  %v781_v51 = vsel %vm768_vm1, %v755_v44, %v757_v45 }
  0x9d   : > { %2297 = vrot.lane.b32.xlu1 %v5392_v17, %s5245_s23  ;;  %5060 = vmatmul.mubr.msk.bf16.vlgmr.msra.gmra.mxu1 %vm298_vm0, %v5487_v27 }
  0x9e   : > { %1028 = vmatpush1.bf16.msra.mxu0 %v779_v47  ;;  %v759_v48 = vpop.permute.xlu0 %758  ;;  %1086 = vmatprep.mubr.bf16.mxu1 %v5241_v0 }
  0x9f   : > { %v761_v49 = vpop.permute.xlu1 %760  ;;  %v782_v50 = vsel %vm768_vm1, %v757_v45, %v759_v48 }
  0xa0   : > { %2299 = vrot.lane.b32.xlu0 %v5372_v15, %s5245_s23  ;;  %1068 = vmatprep.subr.bf16.mxu1 %v782_v50  ;;  %v783_v55 = vsel %vm768_vm1, %v759_v48, %v761_v49 }
  0xa1   : > { %2301 = vrot.lane.b32.xlu1 %v5409_v19, %s5245_s23  ;;  %5061 = vmatmul.mubr.msk.bf16.vlgmr.msra.gmra.mxu0 %vm298_vm0, %v5487_v27 }
  0xa2   : > { %1069 = vmatpush1.bf16.msra.mxu1 %v781_v51  ;;  %v763_v52 = vpop.permute.xlu0 %762  ;;  %1127 = vmatprep.mubr.bf16.mxu0 %v5241_v0 }
  0xa3   : > { %v765_v53 = vpop.permute.xlu1 %764  ;;  %v784_v54 = vsel %vm768_vm1, %v761_v49, %v763_v52 }
  0xa4   : > { %2303 = vrot.lane.b32.xlu0 %v5396_v18, %s5245_s23  ;;  %1109 = vmatprep.subr.bf16.mxu0 %v784_v54  ;;  %v785_v59 = vsel %vm768_vm1, %v763_v52, %v765_v53 }
  0xa5   : > { %2305 = vrot.lane.b32.xlu1 %v5425_v20, %s5245_s23  ;;  %5062 = vmatmul.mubr.msk.bf16.vlgmr.msra.gmra.mxu1 %vm298_vm0, %v5487_v27 }
  0xa6   : > { %1110 = vmatpush1.bf16.msra.mxu0 %v783_v55  ;;  %v767_v56 = vpop.permute.xlu0 %766  ;;  %1168 = vmatprep.mubr.bf16.mxu1 %v5241_v0 }
  0xa7   : > { %v1225_v57 = vpop.permute.xlu1 %1224  ;;  %v786_v58 = vsel %vm768_vm1, %v765_v53, %v767_v56 }
  0xa8   : > { %2763 = vrot.lane.b32.xlu0 %v5290_v1, %s5246_s26  ;;  %1150 = vmatprep.subr.bf16.mxu1 %v786_v58 }
  0xa9   : > { %2765 = vrot.lane.b32.xlu1 %v5298_v3, %s5246_s26  ;;  %5063 = vmatmul.mubr.msk.bf16.vlgmr.msra.gmra.mxu0 %vm298_vm0, %v5487_v27 }
  0xaa   : > { %1151 = vmatpush1.bf16.msra.mxu1 %v785_v59  ;;  %v1227_v60 = vpop.permute.xlu0 %1226  ;;  %1332 = vmatprep.mubr.bf16.mxu0 %v5241_v0  ;;  %v5661_v59 = vld [vmem:[%s6496_s1 + $0x3] sm:$0x1] }
  0xab   : > { %v1223_v61 = vpop.permute.xlu1 %1222  ;;  %v1262_v62 = vsel %vm1260_vm2, %v1225_v57, %v1227_v60 }
  0xac   : > { %v1261_v63 = vsel %vm1260_vm2, %v1223_v61, %v1225_v57  ;;  %2761 = vrot.lane.b32.xlu0 %v5293_v2, %s5246_s26  ;;  %1314 = vmatprep.subr.bf16.mxu0 %v1262_v62 }
  0xad   : > { %2767 = vrot.lane.b32.xlu1 %v5301_v4, %s5246_s26  ;;  %5064 = vmatmul.mubr.msk.bf16.vlgmr.msra.gmra.mxu1 %vm298_vm0, %v5487_v27 }
  0xae   : > { %1315 = vmatpush1.bf16.msra.mxu0 %v1261_v63  ;;  %v1229_v6 = vpop.permute.xlu0 %1228  ;;  %1373 = vmatprep.mubr.bf16.mxu1 %v5241_v0 }
  0xaf   : > { %v1231_v22 = vpop.permute.xlu1 %1230  ;;  %v1263_v24 = vsel %vm1260_vm2, %v1227_v60, %v1229_v6 }
  0xb0   : > { %2769 = vrot.lane.b32.xlu0 %v5317_v7, %s5246_s26  ;;  %v1264_v23 = vsel %vm1260_vm2, %v1229_v6, %v1231_v22 }
  0xb1   : > { %2771 = vrot.lane.b32.xlu1 %v5307_v5, %s5246_s26  ;;  %5065 = vmatmul.mubr.msk.bf16.vlgmr.msra.gmra.mxu0 %vm298_vm0, %v5572_v21 }
  0xb2   : > { %1355 = vmatprep.subr.bf16.mxu1 %v1264_v23  ;;  %v1233_v25 = vpop.permute.xlu0 %1232  ;;  %1414 = vmatprep.mubr.bf16.mxu0 %v5241_v0 }
  0xb3   : > { %1356 = vmatpush1.bf16.msra.mxu1 %v1263_v24  ;;  %v1235_v26 = vpop.permute.xlu1 %1234  ;;  %v1265_v27 = vsel %vm1260_vm2, %v1231_v22, %v1233_v25 }
  0xb4   : > { %2773 = vrot.lane.b32.xlu0 %v5332_v9, %s5246_s26  ;;  %v1266_v28 = vsel %vm1260_vm2, %v1233_v25, %v1235_v26 }
  0xb5   : > { %2775 = vrot.lane.b32.xlu1 %v5328_v8, %s5246_s26  ;;  %1396 = vmatprep.subr.bf16.mxu0 %v1266_v28 }
  0xb6   : > { %5066 = vmatmul.mubr.msk.bf16.vlgmr.msra.gmra.mxu1 %vm298_vm0, %v5572_v21  ;;  %1397 = vmatpush1.bf16.msra.mxu0 %v1265_v27  ;;  %v1237_v29 = vpop.permute.xlu0 %1236 }
  0xb7   : > { %v1239_v30 = vpop.permute.xlu1 %1238  ;;  %1455 = vmatprep.mubr.bf16.mxu1 %v5241_v0  ;;  %v1267_v32 = vsel %vm1260_vm2, %v1235_v26, %v1237_v29 }
  0xb8   : > { %2777 = vrot.lane.b32.xlu0 %v5353_v12, %s5246_s26  ;;  %v1268_v31 = vsel %vm1260_vm2, %v1237_v29, %v1239_v30 }
  0xb9   : > { %2779 = vrot.lane.b32.xlu1 %v5338_v10, %s5246_s26  ;;  %5067 = vmatmul.mubr.msk.bf16.vlgmr.msra.gmra.mxu0 %vm298_vm0, %v5572_v21 }
  0xba   : > { %1437 = vmatprep.subr.bf16.mxu1 %v1268_v31  ;;  %v1241_v33 = vpop.permute.xlu0 %1240  ;;  %1496 = vmatprep.mubr.bf16.mxu0 %v5241_v0 }
  0xbb   : > { %1438 = vmatpush1.bf16.msra.mxu1 %v1267_v32  ;;  %v1243_v34 = vpop.permute.xlu1 %1242  ;;  %v1269_v35 = vsel %vm1260_vm2, %v1239_v30, %v1241_v33 }
  0xbc   : > { %2781 = vrot.lane.b32.xlu0 %v5362_v13, %s5246_s26  ;;  %v1270_v36 = vsel %vm1260_vm2, %v1241_v33, %v1243_v34 }
  0xbd   : > { %2783 = vrot.lane.b32.xlu1 %v5345_v11, %s5246_s26  ;;  %1478 = vmatprep.subr.bf16.mxu0 %v1270_v36 }
  0xbe   : > { %5068 = vmatmul.mubr.msk.bf16.vlgmr.msra.gmra.mxu1 %vm298_vm0, %v5572_v21  ;;  %1479 = vmatpush1.bf16.msra.mxu0 %v1269_v35  ;;  %v1245_v37 = vpop.permute.xlu0 %1244 }
  0xbf   : > { %v1247_v38 = vpop.permute.xlu1 %1246  ;;  %1537 = vmatprep.mubr.bf16.mxu1 %v5241_v0  ;;  %v1271_v40 = vsel %vm1260_vm2, %v1243_v34, %v1245_v37 }
  0xc0   : > { %2785 = vrot.lane.b32.xlu0 %v5383_v16, %s5246_s26  ;;  %v1272_v39 = vsel %vm1260_vm2, %v1245_v37, %v1247_v38 }
  0xc1   : > { %2787 = vrot.lane.b32.xlu1 %v5366_v14, %s5246_s26  ;;  %5069 = vmatmul.mubr.msk.bf16.vlgmr.msra.gmra.mxu0 %vm298_vm0, %v5572_v21 }
  0xc2   : > { %1519 = vmatprep.subr.bf16.mxu1 %v1272_v39  ;;  %v1249_v41 = vpop.permute.xlu0 %1248  ;;  %1578 = vmatprep.mubr.bf16.mxu0 %v5241_v0 }
  0xc3   : > { %1520 = vmatpush1.bf16.msra.mxu1 %v1271_v40  ;;  %v1251_v42 = vpop.permute.xlu1 %1250  ;;  %v1273_v43 = vsel %vm1260_vm2, %v1247_v38, %v1249_v41 }
  0xc4   : > { %2789 = vrot.lane.b32.xlu0 %v5392_v17, %s5246_s26  ;;  %v1274_v44 = vsel %vm1260_vm2, %v1249_v41, %v1251_v42 }
  0xc5   : > { %2791 = vrot.lane.b32.xlu1 %v5372_v15, %s5246_s26  ;;  %1560 = vmatprep.subr.bf16.mxu0 %v1274_v44 }
  0xc6   : > { %5070 = vmatmul.mubr.msk.bf16.vlgmr.msra.gmra.mxu1 %vm298_vm0, %v5572_v21  ;;  %1561 = vmatpush1.bf16.msra.mxu0 %v1273_v43  ;;  %v1253_v45 = vpop.permute.xlu0 %1252 }
  0xc7   : > { %v1255_v46 = vpop.permute.xlu1 %1254  ;;  %1619 = vmatprep.mubr.bf16.mxu1 %v5241_v0  ;;  %v1275_v48 = vsel %vm1260_vm2, %v1251_v42, %v1253_v45 }
  0xc8   : > { %2793 = vrot.lane.b32.xlu0 %v5409_v19, %s5246_s26  ;;  %v1276_v47 = vsel %vm1260_vm2, %v1253_v45, %v1255_v46 }
  0xc9   : > { %2795 = vrot.lane.b32.xlu1 %v5396_v18, %s5246_s26  ;;  %5071 = vmatmul.mubr.msk.bf16.vlgmr.msra.gmra.mxu0 %vm298_vm0, %v5572_v21 }
  0xca   : > { %1601 = vmatprep.subr.bf16.mxu1 %v1276_v47  ;;  %v1257_v49 = vpop.permute.xlu0 %1256  ;;  %1660 = vmatprep.mubr.bf16.mxu0 %v5241_v0 }
  0xcb   : > { %1602 = vmatpush1.bf16.msra.mxu1 %v1275_v48  ;;  %v1259_v50 = vpop.permute.xlu1 %1258  ;;  %v1277_v51 = vsel %vm1260_vm2, %v1255_v46, %v1257_v49 }
  0xcc   : > { %2797 = vrot.lane.b32.xlu0 %v5425_v20, %s5246_s26  ;;  %v1278_v52 = vsel %vm1260_vm2, %v1257_v49, %v1259_v50  ;;  %s6460_s26 = scalar_lea.vmem %s6498_s3, %s5158_s24 }
  0xcd   : > { %3309 = vrot.lane.b32.xlu1 %v5290_v1, %s5247_s29  ;;  %1642 = vmatprep.subr.bf16.mxu0 %v1278_v52 }
  0xce   : > { %5072 = vmatmul.mubr.msk.bf16.vlgmr.msra.gmra.mxu1 %vm298_vm0, %v5572_v21  ;;  %1643 = vmatpush1.bf16.msra.mxu0 %v1277_v51  ;;  %v1771_v53 = vpop.permute.xlu0 %1770 }
  0xcf   : > { %v1773_v54 = vpop.permute.xlu1 %1772  ;;  %1878 = vmatprep.mubr.bf16.mxu1 %v5241_v0 }
  0xd0   : > { %3311 = vrot.lane.b32.xlu0 %v5298_v3, %s5247_s29  ;;  %v1808_v55 = vsel %vm1806_vm3, %v1771_v53, %v1773_v54 }
  0xd1   : > { %3307 = vrot.lane.b32.xlu1 %v5293_v2, %s5247_s29  ;;  %5073 = vmatmul.mubr.msk.bf16.vlgmr.msra.gmra.mxu0 %vm298_vm0, %v5572_v21 }
  0xd2   : > { %1860 = vmatprep.subr.bf16.mxu1 %v1808_v55  ;;  %v1769_v56 = vpop.permute.xlu0 %1768  ;;  %1919 = vmatprep.mubr.bf16.mxu0 %v5241_v0 }
  0xd3   : > { %v1807_v57 = vsel %vm1806_vm3, %v1769_v56, %v1771_v53  ;;  %v1775_v58 = vpop.permute.xlu1 %1774 }
  0xd4   : > { %3313 = vrot.lane.b32.xlu0 %v5301_v4, %s5247_s29  ;;  %1861 = vmatpush1.bf16.msra.mxu1 %v1807_v57  ;;  %v5663_v60 = vpop.f32.mrf.mxu0  ;;  %v1809_v23 = vsel %vm1806_vm3, %v1773_v54, %v1775_v58 }
  0xd5   : > { %3315 = vrot.lane.b32.xlu1 %v5317_v7, %s5247_s29 }
  0xd6   : > { %v1777_v61 = vpop.permute.xlu0 %1776  ;;  %v5667_v62 = vpop.f32.mrf.mxu0 }
  0xd7   : > { %v1779_v63 = vpop.permute.xlu1 %1778  ;;  %5083 = vmatmul.mubr.msk.bf16.vlgmr.msra.gmra.mxu1 %vm298_vm0, %v5661_v59  ;;  %v1810_v6 = vsel %vm1806_vm3, %v1775_v58, %v1777_v61  ;;  %v689_v21 = vcombine.low %v5663_v60, %v5667_v62  ;;  %v5674_v22 = vpop.f32.mrf.mxu1 }
  0xd8   : > { %3317 = vrot.lane.b32.xlu0 %v5307_v5, %s5247_s29  ;;  %1901 = vmatprep.subr.bf16.mxu0 %v1810_v6  ;;  %v340_v24 = vpop.f32.mrf.mxu0  ;;  %v1811_v33 = vsel %vm1806_vm3, %v1777_v61, %v1779_v63 }
  0xd9   : > { %3319 = vrot.lane.b32.xlu1 %v5332_v9, %s5247_s29  ;;  %1902 = vmatpush1.bf16.msra.mxu0 %v1809_v23  ;;  %v5681_v25 = vpop.f32.mrf.mxu1 }
  0xda   : > { %v1781_v26 = vpop.permute.xlu0 %1780  ;;  %1960 = vmatprep.mubr.bf16.mxu1 %v5241_v0  ;;  %v690_v27 = vcombine.low %v5674_v22, %v5681_v25  ;;  %v341_v28 = vpop.f32.mrf.mxu0 }
  0xdb   : > { %v1783_v29 = vpop.permute.xlu1 %1782  ;;  %v1812_v30 = vsel %vm1806_vm3, %v1779_v63, %v1781_v26  ;;  %v381_v31 = vpop.f32.mrf.mxu1 }
  0xdc   : > { %3321 = vrot.lane.b32.xlu0 %v5328_v8, %s5247_s29  ;;  %5084 = vmatmul.mubr.msk.bf16.vlgmr.msra.gmra.mxu0 %vm298_vm0, %v5661_v59  ;;  %v5691_v32 = vpop.f32.mrf.mxu0  ;;  %v1813_v42 = vsel %vm1806_vm3, %v1781_v26, %v1783_v29 }
  0xdd   : > { %3323 = vrot.lane.b32.xlu1 %v5353_v12, %s5247_s29  ;;  %1942 = vmatprep.subr.bf16.mxu1 %v1812_v30  ;;  %v382_v34 = vpop.f32.mrf.mxu1 }
  0xde   : > { %1943 = vmatpush1.bf16.msra.mxu1 %v1811_v33  ;;  %v1785_v35 = vpop.permute.xlu0 %1784  ;;  %2001 = vmatprep.mubr.bf16.mxu0 %v5241_v0  ;;  %v5697_v36 = vpop.f32.mrf.mxu0 }
  0xdf   : > { %v1787_v37 = vpop.permute.xlu1 %1786  ;;  %v1814_v38 = vsel %vm1806_vm3, %v1783_v29, %v1785_v35  ;;  %v691_v39 = vcombine.low %v5691_v32, %v5697_v36  ;;  %v5702_v40 = vpop.f32.mrf.mxu1 }
  0xe0   : > { %3325 = vrot.lane.b32.xlu0 %v5338_v10, %s5247_s29  ;;  %1983 = vmatprep.subr.bf16.mxu0 %v1814_v38  ;;  %v422_v41 = vpop.f32.mrf.mxu0  ;;  %v1815_v51 = vsel %vm1806_vm3, %v1785_v35, %v1787_v37 }
  0xe1   : > { %3327 = vrot.lane.b32.xlu1 %v5362_v13, %s5247_s29  ;;  %5085 = vmatmul.mubr.msk.bf16.vlgmr.msra.gmra.mxu1 %vm298_vm0, %v5661_v59  ;;  %v5711_v43 = vpop.f32.mrf.mxu1 }
  0xe2   : > { %1984 = vmatpush1.bf16.msra.mxu0 %v1813_v42  ;;  %v1789_v44 = vpop.permute.xlu0 %1788  ;;  %2042 = vmatprep.mubr.bf16.mxu1 %v5241_v0  ;;  %v692_v45 = vcombine.low %v5702_v40, %v5711_v43  ;;  %v423_v46 = vpop.f32.mrf.mxu0 }
  0xe3   : > { %v1791_v47 = vpop.permute.xlu1 %1790  ;;  %v1816_v48 = vsel %vm1806_vm3, %v1787_v37, %v1789_v44  ;;  %v463_v49 = vpop.f32.mrf.mxu1 }
  0xe4   : > { %3329 = vrot.lane.b32.xlu0 %v5345_v11, %s5247_s29  ;;  %2024 = vmatprep.subr.bf16.mxu1 %v1816_v48  ;;  %v5719_v50 = vpop.f32.mrf.mxu0  ;;  %v1817_v63 = vsel %vm1806_vm3, %v1789_v44, %v1791_v47 }
  0xe5   : > { %3331 = vrot.lane.b32.xlu1 %v5383_v16, %s5247_s29  ;;  %5086 = vmatmul.mubr.msk.bf16.vlgmr.msra.gmra.mxu0 %vm298_vm0, %v5661_v59  ;;  %v464_v52 = vpop.f32.mrf.mxu1 }
  0xe6   : > { %2025 = vmatpush1.bf16.msra.mxu1 %v1815_v51  ;;  %v1793_v53 = vpop.permute.xlu0 %1792  ;;  %2083 = vmatprep.mubr.bf16.mxu0 %v5241_v0  ;;  %v5727_v54 = vpop.f32.mrf.mxu0 }
  0xe7   : > { %v1795_v55 = vpop.permute.xlu1 %1794  ;;  %v1818_v56 = vsel %vm1806_vm3, %v1791_v47, %v1793_v53  ;;  %v693_v57 = vcombine.low %v5719_v50, %v5727_v54  ;;  %v5732_v58 = vpop.f32.mrf.mxu1 }
  0xe8   : > { %3333 = vrot.lane.b32.xlu0 %v5366_v14, %s5247_s29  ;;  %2065 = vmatprep.subr.bf16.mxu0 %v1818_v56  ;;  %v504_v61 = vpop.f32.mrf.mxu0  ;;  %v1819_v33 = vsel %vm1806_vm3, %v1793_v53, %v1795_v55 }
  0xe9   : > { %3335 = vrot.lane.b32.xlu1 %v5392_v17, %s5247_s29  ;;  %5087 = vmatmul.mubr.msk.bf16.vlgmr.msra.gmra.mxu1 %vm298_vm0, %v5661_v59  ;;  %v5741_v6 = vpop.f32.mrf.mxu1 }
  0xea   : > { %2066 = vmatpush1.bf16.msra.mxu0 %v1817_v63  ;;  %v1797_v23 = vpop.permute.xlu0 %1796  ;;  %2124 = vmatprep.mubr.bf16.mxu1 %v5241_v0  ;;  %v694_v24 = vcombine.low %v5732_v58, %v5741_v6  ;;  %v505_v26 = vpop.f32.mrf.mxu0 }
  0xeb   : > { %v1799_v28 = vpop.permute.xlu1 %1798  ;;  %v1820_v29 = vsel %vm1806_vm3, %v1795_v55, %v1797_v23  ;;  %v545_v30 = vpop.f32.mrf.mxu1 }
  0xec   : > { %3337 = vrot.lane.b32.xlu0 %v5372_v15, %s5247_s29  ;;  %2106 = vmatprep.subr.bf16.mxu1 %v1820_v29  ;;  %v5749_v31 = vpop.f32.mrf.mxu0  ;;  %v1821_v47 = vsel %vm1806_vm3, %v1797_v23, %v1799_v28 }
  0xed   : > { %3339 = vrot.lane.b32.xlu1 %v5409_v19, %s5247_s29  ;;  %5088 = vmatmul.mubr.msk.bf16.vlgmr.msra.gmra.mxu0 %vm298_vm0, %v5661_v59  ;;  %v546_v34 = vpop.f32.mrf.mxu1 }
  0xee   : > { %2107 = vmatpush1.bf16.msra.mxu1 %v1819_v33  ;;  %v1801_v35 = vpop.permute.xlu0 %1800  ;;  %2165 = vmatprep.mubr.bf16.mxu0 %v5241_v0  ;;  %v5757_v37 = vpop.f32.mrf.mxu0 }
  0xef   : > { %v1803_v38 = vpop.permute.xlu1 %1802  ;;  %v1822_v41 = vsel %vm1806_vm3, %v1799_v28, %v1801_v35  ;;  %v695_v42 = vcombine.low %v5749_v31, %v5757_v37  ;;  %v5762_v44 = vpop.f32.mrf.mxu1 }
  0xf0   : > { %3341 = vrot.lane.b32.xlu0 %v5396_v18, %s5247_s29  ;;  %2147 = vmatprep.subr.bf16.mxu0 %v1822_v41  ;;  %v586_v46 = vpop.f32.mrf.mxu0  ;;  %v1823_v63 = vsel %vm1806_vm3, %v1801_v35, %v1803_v38  ;;  %v5802_v35 = vld [vmem:[%s6496_s1 + $0x4] sm:$0x1] }
  0xf1   : > { %3343 = vrot.lane.b32.xlu1 %v5425_v20, %s5247_s29  ;;  %5089 = vmatmul.mubr.msk.bf16.vlgmr.msra.gmra.mxu1 %vm298_vm0, %v5661_v59  ;;  %v5771_v48 = vpop.f32.mrf.mxu1 }
  0xf2   : > { %2148 = vmatpush1.bf16.msra.mxu0 %v1821_v47  ;;  %v1805_v49 = vpop.permute.xlu0 %1804  ;;  %2206 = vmatprep.mubr.bf16.mxu1 %v5241_v0  ;;  %v696_v51 = vcombine.low %v5762_v44, %v5771_v48  ;;  %v587_v52 = vpop.f32.mrf.mxu0 }
  0xf3   : > { %v2272_v53 = vpop.permute.xlu1 %2271  ;;  %v1824_v55 = vsel %vm1806_vm3, %v1803_v38, %v1805_v49  ;;  %v627_v56 = vpop.f32.mrf.mxu1 }
  0xf4   : > { %3810 = vrot.lane.b32.xlu0 %v5290_v1, %s5248_s5  ;;  %2188 = vmatprep.subr.bf16.mxu1 %v1824_v55  ;;  %v5779_v61 = vpop.f32.mrf.mxu0 }
  0xf5   : > { %3812 = vrot.lane.b32.xlu1 %v5298_v3, %s5248_s5  ;;  %5090 = vmatmul.mubr.msk.bf16.vlgmr.msra.gmra.mxu0 %vm298_vm0, %v5661_v59  ;;  %v628_v23 = vpop.f32.mrf.mxu1 }
  0xf6   : > { %2189 = vmatpush1.bf16.msra.mxu1 %v1823_v63  ;;  %v2274_v26 = vpop.permute.xlu0 %2273  ;;  %2379 = vmatprep.mubr.bf16.mxu0 %v5241_v0  ;;  %v5787_v28 = vpop.f32.mrf.mxu0 }
  0xf7   : > { %v2270_v1 = vpop.permute.xlu1 %2269  ;;  %v2309_v29 = vsel %vm2307_vm4, %v2272_v53, %v2274_v26  ;;  %v697_v30 = vcombine.low %v5779_v61, %v5787_v28 }
  0xf8   : > { %v2308_v33 = vsel %vm2307_vm4, %v2270_v1, %v2272_v53  ;;  %3808 = vrot.lane.b32.xlu0 %v5293_v2, %s5248_s5  ;;  %2361 = vmatprep.subr.bf16.mxu0 %v2309_v29  ;;  %v668_v3 = vpop.f32.mrf.mxu0 }
  0xf9   : > { %3814 = vrot.lane.b32.xlu1 %v5301_v4, %s5248_s5  ;;  %5091 = vmatmul.mubr.msk.bf16.vlgmr.msra.gmra.mxu1 %vm298_vm0, %v5661_v59 }
  0xfa   : > { %2362 = vmatpush1.bf16.msra.mxu0 %v2308_v33  ;;  %v2276_v34 = vpop.permute.xlu0 %2275  ;;  %2420 = vmatprep.mubr.bf16.mxu1 %v5241_v0  ;;  %v669_v38 = vpop.f32.mrf.mxu0 }
  0xfb   : > { %v2278_v41 = vpop.permute.xlu1 %2277  ;;  %v2310_v2 = vsel %vm2307_vm4, %v2274_v26, %v2276_v34 }
  0xfc   : > { %3816 = vrot.lane.b32.xlu0 %v5317_v7, %s5248_s5  ;;  %v2311_v4 = vsel %vm2307_vm4, %v2276_v34, %v2278_v41  ;;  %v5205_v34 = vld [vmem:[%s5287_s17 + $0x4] ss:$76 sps:$4 sm:$0xff]  }
  0xfd   : > { %3818 = vrot.lane.b32.xlu1 %v5307_v5, %s5248_s5  ;;  %5092 = vmatmul.mubr.msk.bf16.vlgmr.msra.gmra.mxu0 %vm298_vm0, %v5802_v35 }
  0xfe   : > { %2402 = vmatprep.subr.bf16.mxu1 %v2311_v4  ;;  %v2280_v59 = vpop.permute.xlu0 %2279  ;;  %2461 = vmatprep.mubr.bf16.mxu0 %v5241_v0 }
  0xff   : > { %2403 = vmatpush1.bf16.msra.mxu1 %v2310_v2  ;;  %v2312_v46 = vsel %vm2307_vm4, %v2278_v41, %v2280_v59  ;;  %v2282_v47 = vpop.permute.xlu1 %2281  ;;  %v5206_v41 = vld [vmem:[%s5287_s17 + $0x8] ss:$76 sps:$4 sm:$0xff]   ;;  %v5207_v2 = vld [vmem:[%s5287_s17] ss:$76 sps:$4 sm:$0xff]  }
 0x100   : > { %3820 = vrot.lane.b32.xlu0 %v5332_v9, %s5248_s5  ;;  %v2313_v7 = vsel %vm2307_vm4, %v2280_v59, %v2282_v47 }
 0x101   : > { %3822 = vrot.lane.b32.xlu1 %v5328_v8, %s5248_s5  ;;  %2443 = vmatprep.subr.bf16.mxu0 %v2313_v7  ;;  %v5891_v7 = vld [vmem:[%s6496_s1 + $0x5] sm:$0x1] }
 0x102   : > { %5093 = vmatmul.mubr.msk.bf16.vlgmr.msra.gmra.mxu1 %vm298_vm0, %v5802_v35  ;;  %2444 = vmatpush1.bf16.msra.mxu0 %v2312_v46  ;;  %v2284_v5 = vpop.permute.xlu0 %2283 }
 0x103   : > { %v2286_v49 = vpop.permute.xlu1 %2285  ;;  %2502 = vmatprep.mubr.bf16.mxu1 %v5241_v0  ;;  %v2314_v52 = vsel %vm2307_vm4, %v2282_v47, %v2284_v5  ;;  %v5208_v47 = vld [vmem:[%s5287_s17 + $0xc] ss:$76 sps:$4 sm:$0xff]  }
 0x104   : > { %3824 = vrot.lane.b32.xlu0 %v5353_v12, %s5248_s5  ;;  %v2315_v9 = vsel %vm2307_vm4, %v2284_v5, %v2286_v49  ;;  %v5209_v5 = vld [vmem:[%s5287_s17 + $0x10] ss:$76 sps:$4 sm:$0xff]  }
 0x105   : > { %3826 = vrot.lane.b32.xlu1 %v5338_v10, %s5248_s5  ;;  %5094 = vmatmul.mubr.msk.bf16.vlgmr.msra.gmra.mxu0 %vm298_vm0, %v5802_v35 }
 0x106   : > { %2484 = vmatprep.subr.bf16.mxu1 %v2315_v9  ;;  %v2288_v8 = vpop.permute.xlu0 %2287  ;;  %2543 = vmatprep.mubr.bf16.mxu0 %v5241_v0 }
 0x107   : > { %2485 = vmatpush1.bf16.msra.mxu1 %v2314_v52  ;;  %v2316_v53 = vsel %vm2307_vm4, %v2286_v49, %v2288_v8  ;;  %v2290_v55 = vpop.permute.xlu1 %2289 }
 0x108   : > { %3828 = vrot.lane.b32.xlu0 %v5362_v13, %s5248_s5  ;;  %v2317_v12 = vsel %vm2307_vm4, %v2288_v8, %v2290_v55  ;;  %v5210_v8 = vld [vmem:[%s5287_s17 + $0x14] ss:$76 sps:$4 sm:$0xff]  }
 0x109   : > { %3830 = vrot.lane.b32.xlu1 %v5345_v11, %s5248_s5  ;;  %2525 = vmatprep.subr.bf16.mxu0 %v2317_v12 }
 0x10a   : > { %5095 = vmatmul.mubr.msk.bf16.vlgmr.msra.gmra.mxu1 %vm298_vm0, %v5802_v35  ;;  %2526 = vmatpush1.bf16.msra.mxu0 %v2316_v53  ;;  %v2292_v10 = vpop.permute.xlu0 %2291  ;;  %v5211_v53 = vld [vmem:[%s5287_s17 + $0x18] ss:$76 sps:$4 sm:$0xff]  }
 0x10b   : > { %v2294_v56 = vpop.permute.xlu1 %2293  ;;  %2584 = vmatprep.mubr.bf16.mxu1 %v5241_v0  ;;  %v2318_v63 = vsel %vm2307_vm4, %v2290_v55, %v2292_v10 }
 0x10c   : > { %3832 = vrot.lane.b32.xlu0 %v5383_v16, %s5248_s5  ;;  %v2319_v13 = vsel %vm2307_vm4, %v2292_v10, %v2294_v56 }
 0x10d   : > { %3834 = vrot.lane.b32.xlu1 %v5366_v14, %s5248_s5  ;;  %5096 = vmatmul.mubr.msk.bf16.vlgmr.msra.gmra.mxu0 %vm298_vm0, %v5802_v35 }
 0x10e   : > { %2566 = vmatprep.subr.bf16.mxu1 %v2319_v13  ;;  %v2296_v11 = vpop.permute.xlu0 %2295  ;;  %2625 = vmatprep.mubr.bf16.mxu0 %v5241_v0  ;;  %v5213_v13 = vld [vmem:[%s5287_s17 + $0x20] ss:$76 sps:$4 sm:$0xff]  }
 0x10f   : > { %2567 = vmatpush1.bf16.msra.mxu1 %v2318_v63  ;;  %v2320_v23 = vsel %vm2307_vm4, %v2294_v56, %v2296_v11  ;;  %v2298_v26 = vpop.permute.xlu1 %2297  ;;  %v5212_v56 = vld [vmem:[%s5287_s17 + $0x1c] ss:$76 sps:$4 sm:$0xff]  }
 0x110   : > { %3836 = vrot.lane.b32.xlu0 %v5392_v17, %s5248_s5  ;;  %v2321_v16 = vsel %vm2307_vm4, %v2296_v11, %v2298_v26 }
 0x111   : > { %3838 = vrot.lane.b32.xlu1 %v5372_v15, %s5248_s5  ;;  %2607 = vmatprep.subr.bf16.mxu0 %v2321_v16  ;;  %v5214_v16 = vld [vmem:[%s5287_s17 + $0x24] ss:$76 sps:$4 sm:$0xff]  }
 0x112   : > { %5097 = vmatmul.mubr.msk.bf16.vlgmr.msra.gmra.mxu1 %vm298_vm0, %v5802_v35  ;;  %2608 = vmatpush1.bf16.msra.mxu0 %v2320_v23  ;;  %v2300_v14 = vpop.permute.xlu0 %2299 }
 0x113   : > { %v2302_v1 = vpop.permute.xlu1 %2301  ;;  %2666 = vmatprep.mubr.bf16.mxu1 %v5241_v0  ;;  %v2322_v29 = vsel %vm2307_vm4, %v2298_v26, %v2300_v14 }
 0x114   : > { %3840 = vrot.lane.b32.xlu0 %v5409_v19, %s5248_s5  ;;  %v2323_v17 = vsel %vm2307_vm4, %v2300_v14, %v2302_v1 }
 0x115   : > { %3842 = vrot.lane.b32.xlu1 %v5396_v18, %s5248_s5  ;;  %5098 = vmatmul.mubr.msk.bf16.vlgmr.msra.gmra.mxu0 %vm298_vm0, %v5802_v35 }
 0x116   : > { %2648 = vmatprep.subr.bf16.mxu1 %v2323_v17  ;;  %v2304_v15 = vpop.permute.xlu0 %2303  ;;  %2707 = vmatprep.mubr.bf16.mxu0 %v5241_v0 }
 0x117   : > { %2649 = vmatpush1.bf16.msra.mxu1 %v2322_v29  ;;  %v2324_v33 = vsel %vm2307_vm4, %v2302_v1, %v2304_v15  ;;  %v2306_v3 = vpop.permute.xlu1 %2305  ;;  %v5215_v1 = vld [vmem:[%s5287_s17 + $0x28] ss:$76 sps:$4 sm:$0xff]  }
 0x118   : > { %3844 = vrot.lane.b32.xlu0 %v5425_v20, %s5248_s5  ;;  %v2325_v19 = vsel %vm2307_vm4, %v2304_v15, %v2306_v3 }
 0x119   : > { %4302 = vrot.lane.b32.xlu1 %v5205_v34, %s5249_s8  ;;  %2689 = vmatprep.subr.bf16.mxu0 %v2325_v19  ;;  %v5217_v19 = vld [vmem:[%s5287_s17 + $0x30] ss:$76 sps:$4 sm:$0xff]  }
 0x11a   : > { %5099 = vmatmul.mubr.msk.bf16.vlgmr.msra.gmra.mxu1 %vm298_vm0, %v5802_v35  ;;  %2690 = vmatpush1.bf16.msra.mxu0 %v2324_v33  ;;  %v2764_v18 = vpop.permute.xlu0 %2763  ;;  %v5216_v33 = vld [vmem:[%s5287_s17 + $0x2c] ss:$76 sps:$4 sm:$0xff]  }
 0x11b   : > { %v2766_v38 = vpop.permute.xlu1 %2765  ;;  %2871 = vmatprep.mubr.bf16.mxu1 %v5241_v0 }
 0x11c   : > { %4304 = vrot.lane.b32.xlu0 %v5206_v41, %s5249_s8  ;;  %v2801_v20 = vsel %vm2799_vm5, %v2764_v18, %v2766_v38  ;;  %v5218_v41 = vld [vmem:[%s5287_s17 + $0x34] ss:$76 sps:$4 sm:$0xff]  }
 0x11d   : > { %4300 = vrot.lane.b32.xlu1 %v5207_v2, %s5249_s8  ;;  %5100 = vmatmul.mubr.msk.bf16.vlgmr.msra.gmra.mxu0 %vm298_vm0, %v5802_v35  ;;  %v5219_v2 = vld [vmem:[%s5287_s17 + $0x38] ss:$76 sps:$4 sm:$0xff]  }
 0x11e   : > { %2853 = vmatprep.subr.bf16.mxu1 %v2801_v20  ;;  %v2762_v4 = vpop.permute.xlu0 %2761  ;;  %2912 = vmatprep.mubr.bf16.mxu0 %v5241_v0 }
 0x11f   : > { %v2800_v59 = vsel %vm2799_vm5, %v2762_v4, %v2764_v18  ;;  %v2768_v46 = vpop.permute.xlu1 %2767 }
 0x120   : > { %4306 = vrot.lane.b32.xlu0 %v5208_v47, %s5249_s8  ;;  %2854 = vmatpush1.bf16.msra.mxu1 %v2800_v59  ;;  %v2802_v9 = vsel %vm2799_vm5, %v2766_v38, %v2768_v46  ;;  %v5220_v47 = vld [vmem:[%s5287_s17 + $0x3c] ss:$76 sps:$4 sm:$0xff]  }
 0x121   : > { %4308 = vrot.lane.b32.xlu1 %v5209_v5, %s5249_s8 }
 0x122   : > { %v2770_v35 = vpop.permute.xlu0 %2769 }
 0x123   : > { %v2772_v49 = vpop.permute.xlu1 %2771  ;;  %5101 = vmatmul.mubr.msk.bf16.vlgmr.msra.gmra.mxu1 %vm298_vm0, %v5891_v7  ;;  %v2803_v52 = vsel %vm2799_vm5, %v2768_v46, %v2770_v35 }
 0x124   : > { %4310 = vrot.lane.b32.xlu0 %v5210_v8, %s5249_s8  ;;  %2894 = vmatprep.subr.bf16.mxu0 %v2803_v52  ;;  %v2804_v63 = vsel %vm2799_vm5, %v2770_v35, %v2772_v49  ;;  %v5221_v35 = vld [vmem:[%s5287_s17 + $0x40] ss:$76 sps:$4 sm:$0xff]   ;;  %v5222_v8 = vld [vmem:[%s5287_s17 + $0x44] ss:$76 sps:$4 sm:$0xff]  }
 0x125   : > { %4312 = vrot.lane.b32.xlu1 %v5211_v53, %s5249_s8  ;;  %2895 = vmatpush1.bf16.msra.mxu0 %v2802_v9 }
 0x126   : > { %v2774_v55 = vpop.permute.xlu0 %2773  ;;  %2953 = vmatprep.mubr.bf16.mxu1 %v5241_v0 }
 0x127   : > { %v2776_v12 = vpop.permute.xlu1 %2775  ;;  %v2805_v10 = vsel %vm2799_vm5, %v2772_v49, %v2774_v55 }
 0x128   : > { %4314 = vrot.lane.b32.xlu0 %v5212_v56, %s5249_s8  ;;  %5102 = vmatmul.mubr.msk.bf16.vlgmr.msra.gmra.mxu0 %vm298_vm0, %v5891_v7  ;;  %v2806_v14 = vsel %vm2799_vm5, %v2774_v55, %v2776_v12  ;;  %v5223_v55 = vld [vmem:[%s5287_s17 + $0x48] ss:$76 sps:$4 sm:$0xff]  }
 0x129   : > { %4316 = vrot.lane.b32.xlu1 %v5213_v13, %s5249_s8  ;;  %2935 = vmatprep.subr.bf16.mxu1 %v2805_v10 }
 0x12a   : > { %2936 = vmatpush1.bf16.msra.mxu1 %v2804_v63  ;;  %v2778_v11 = vpop.permute.xlu0 %2777  ;;  %2994 = vmatprep.mubr.bf16.mxu0 %v5241_v0 }
 0x12b   : > { %v2780_v23 = vpop.permute.xlu1 %2779  ;;  %v2807_v26 = vsel %vm2799_vm5, %v2776_v12, %v2778_v11 }
 0x12c   : > { %4318 = vrot.lane.b32.xlu0 %v5214_v16, %s5249_s8  ;;  %2976 = vmatprep.subr.bf16.mxu0 %v2807_v26  ;;  %v2808_v3 = vsel %vm2799_vm5, %v2778_v11, %v2780_v23 }
 0x12d   : > { %4320 = vrot.lane.b32.xlu1 %v5215_v1, %s5249_s8  ;;  %5103 = vmatmul.mubr.msk.bf16.vlgmr.msra.gmra.mxu1 %vm298_vm0, %v5891_v7 }
 0x12e   : > { %2977 = vmatpush1.bf16.msra.mxu0 %v2806_v14  ;;  %v2782_v29 = vpop.permute.xlu0 %2781  ;;  %3035 = vmatprep.mubr.bf16.mxu1 %v5241_v0  ;;  %v5970_v14 = vld [vmem:[%s6496_s1 + $0x6] sm:$0x1] }
 0x12f   : > { %v2784_v17 = vpop.permute.xlu1 %2783  ;;  %v2809_v15 = vsel %vm2799_vm5, %v2780_v23, %v2782_v29 }
 0x130   : > { %4322 = vrot.lane.b32.xlu0 %v5216_v33, %s5249_s8  ;;  %3017 = vmatprep.subr.bf16.mxu1 %v2809_v15  ;;  %v2810_v20 = vsel %vm2799_vm5, %v2782_v29, %v2784_v17 }
 0x131   : > { %4324 = vrot.lane.b32.xlu1 %v5217_v19, %s5249_s8  ;;  %5104 = vmatmul.mubr.msk.bf16.vlgmr.msra.gmra.mxu0 %vm298_vm0, %v5891_v7 }
 0x132   : > { %3018 = vmatpush1.bf16.msra.mxu1 %v2808_v3  ;;  %v2786_v34 = vpop.permute.xlu0 %2785  ;;  %3076 = vmatprep.mubr.bf16.mxu0 %v5241_v0  ;;  %v5982_v3 = vld [vmem:[%s6497_s2] sm:$0x77] }
 0x133   : > { %v2788_v18 = vpop.permute.xlu1 %2787  ;;  %v2811_v38 = vsel %vm2799_vm5, %v2784_v17, %v2786_v34 }
 0x134   : > { %4326 = vrot.lane.b32.xlu0 %v5218_v41, %s5249_s8  ;;  %3058 = vmatprep.subr.bf16.mxu0 %v2811_v38  ;;  %v2812_v5 = vsel %vm2799_vm5, %v2786_v34, %v2788_v18  ;;  %v707_v41 = vmul.f32 %v689_v21, %v5982_v3 }
 0x135   : > { %4328 = vrot.lane.b32.xlu1 %v5219_v2, %s5249_s8  ;;  %5105 = vmatmul.mubr.msk.bf16.vlgmr.msra.gmra.mxu1 %vm298_vm0, %v5891_v7 }
 0x136   : > { %3059 = vmatpush1.bf16.msra.mxu0 %v2810_v20  ;;  %v2790_v4 = vpop.permute.xlu0 %2789  ;;  %3117 = vmatprep.mubr.bf16.mxu1 %v5241_v0 }
 0x137   : > { %v2792_v59 = vpop.permute.xlu1 %2791  ;;  %v2813_v46 = vsel %vm2799_vm5, %v2788_v18, %v2790_v4 }
 0x138   : > { %4330 = vrot.lane.b32.xlu0 %v5220_v47, %s5249_s8  ;;  %3099 = vmatprep.subr.bf16.mxu1 %v2813_v46  ;;  %v2814_v53 = vsel %vm2799_vm5, %v2790_v4, %v2792_v59  ;;  %v5997_v47 = vld [vmem:[%s6497_s2 + $0x8] sm:$0x77] }
 0x139   : > { %4332 = vrot.lane.b32.xlu1 %v5221_v35, %s5249_s8  ;;  %5106 = vmatmul.mubr.msk.bf16.vlgmr.msra.gmra.mxu0 %vm298_vm0, %v5891_v7 }
 0x13a   : > { %3100 = vmatpush1.bf16.msra.mxu1 %v2812_v5  ;;  %v2794_v49 = vpop.permute.xlu0 %2793  ;;  %3158 = vmatprep.mubr.bf16.mxu0 %v5241_v0 }
 0x13b   : > { %v2796_v52 = vpop.permute.xlu1 %2795  ;;  %v2815_v9 = vsel %vm2799_vm5, %v2792_v59, %v2794_v49 }
 0x13c   : > { %4334 = vrot.lane.b32.xlu0 %v5222_v8, %s5249_s8  ;;  %3140 = vmatprep.subr.bf16.mxu0 %v2815_v9  ;;  %v2816_v63 = vsel %vm2799_vm5, %v2794_v49, %v2796_v52  ;;  %v708_v9 = vmul.f32 %v690_v27, %v5997_v47 }
 0x13d   : > { %4336 = vrot.lane.b32.xlu1 %v5223_v55, %s5249_s8  ;;  %5107 = vmatmul.mubr.msk.bf16.vlgmr.msra.gmra.mxu1 %vm298_vm0, %v5891_v7  ;;  %v6013_v55 = vld [vmem:[%s6497_s2 + $0x10] sm:$0x77] }
 0x13e   : > { %3141 = vmatpush1.bf16.msra.mxu0 %v2814_v53  ;;  %v2798_v12 = vpop.permute.xlu0 %2797  ;;  %3199 = vmatprep.mubr.bf16.mxu1 %v5241_v0 }
 0x13f   : > { %v3310_v10 = vpop.permute.xlu1 %3309  ;;  %v2817_v56 = vsel %vm2799_vm5, %v2796_v52, %v2798_v12 }
 0x140   : > { %3181 = vmatprep.subr.bf16.mxu1 %v2817_v56 }
 0x141   : > { %5108 = vmatmul.mubr.msk.bf16.vlgmr.msra.gmra.mxu0 %vm298_vm0, %v5891_v7  ;;  %3182 = vmatpush1.bf16.msra.mxu1 %v2816_v63 }
 0x142   : > { %v3312_v13 = vpop.permute.xlu0 %3311  ;;  %3417 = vmatprep.mubr.bf16.mxu0 %v5241_v0 }
 0x143   : > { %v3308_v11 = vpop.permute.xlu1 %3307  ;;  %v3347_v23 = vsel %vm3345_vm6, %v3310_v10, %v3312_v13 }
 0x144   : > { %v3346_v26 = vsel %vm3345_vm6, %v3308_v11, %v3310_v10  ;;  %3399 = vmatprep.subr.bf16.mxu0 %v3347_v23 }
 0x145   : > { %5109 = vmatmul.mubr.msk.bf16.vlgmr.msra.gmra.mxu1 %vm298_vm0, %v5891_v7  ;;  %3400 = vmatpush1.bf16.msra.mxu0 %v3346_v26 }
 0x146   : > { %v3314_v16 = vpop.permute.xlu0 %3313  ;;  %3458 = vmatprep.mubr.bf16.mxu1 %v5241_v0 }
 0x147   : > { %v3348_v1 = vsel %vm3345_vm6, %v3312_v13, %v3314_v16  ;;  %v3316_v29 = vpop.permute.xlu1 %3315  ;;  %v709_v13 = vmul.f32 %v691_v39, %v6013_v55 }
 0x148   : > { %v3349_v17 = vsel %vm3345_vm6, %v3314_v16, %v3316_v29 }
 0x149   : > { %5119 = vmatmul.mubr.msk.bf16.vlgmr.msra.gmra.mxu0 %vm298_vm0, %v5970_v14  ;;  %3440 = vmatprep.subr.bf16.mxu1 %v3349_v17 }
 0x14a   : > { %3441 = vmatpush1.bf16.msra.mxu1 %v3348_v1  ;;  %v3318_v7 = vpop.permute.xlu0 %3317  ;;  %3499 = vmatprep.mubr.bf16.mxu0 %v5241_v0  ;;  %v6031_v1 = vld [vmem:[%s6497_s2 + $0x18] sm:$0x77] }
 0x14b   : > { %v3350_v15 = vsel %vm3345_vm6, %v3316_v29, %v3318_v7  ;;  %v3320_v33 = vpop.permute.xlu1 %3319 }
 0x14c   : > { %v842_v19 = vpop.f32.mrf.mxu1  ;;  %v3351_v34 = vsel %vm3345_vm6, %v3318_v7, %v3320_v33 }
 0x14d   : > { %5120 = vmatmul.mubr.msk.bf16.vlgmr.msra.gmra.mxu1 %vm298_vm0, %v5970_v14  ;;  %3481 = vmatprep.subr.bf16.mxu0 %v3351_v34  ;;  %v6045_v34 = vld [vmem:[%s6497_s2 + $0x20] sm:$0x77] }
 0x14e   : > { %3482 = vmatpush1.bf16.msra.mxu0 %v3350_v15  ;;  %v3322_v18 = vpop.permute.xlu0 %3321  ;;  %v844_v38 = vpop.f32.mrf.mxu1  ;;  %3540 = vmatprep.mubr.bf16.mxu1 %v5241_v0 }
 0x14f   : > { %v3352_v20 = vsel %vm3345_vm6, %v3320_v33, %v3322_v18  ;;  %v1195_v2 = vcombine.low %v842_v19, %v844_v38  ;;  %v3324_v4 = vpop.permute.xlu1 %3323  ;;  %v710_v19 = vmul.f32 %v692_v45, %v6031_v1 }
 0x150   : > { %v846_v59 = vpop.f32.mrf.mxu1  ;;  %v3353_v46 = vsel %vm3345_vm6, %v3322_v18, %v3324_v4 }
 0x151   : > { %v5999_v5 = vadd.f32 %v1195_v2, %v707_v41  ;;  %v883_v35 = vpop.f32.mrf.mxu0  ;;  %5121 = vmatmul.mubr.msk.bf16.vlgmr.msra.gmra.mxu0 %vm298_vm0, %v5970_v14  ;;  %3522 = vmatprep.subr.bf16.mxu1 %v3353_v46 }
 0x152   : > { %3523 = vmatpush1.bf16.msra.mxu1 %v3352_v20  ;;  %v3326_v60 = vpop.permute.xlu0 %3325  ;;  %v847_v62 = vpop.f32.mrf.mxu1  ;;  %3581 = vmatprep.mubr.bf16.mxu0 %v5241_v0 }
 0x153   : > { %v3354_v21 = vsel %vm3345_vm6, %v3324_v4, %v3326_v60  ;;  %v3328_v49 = vpop.permute.xlu1 %3327  ;;  %v885_v52 = vpop.f32.mrf.mxu0  ;;  %v711_v4 = vmul.f32 %v693_v57, %v6045_v34  ;;  %v6063_v62 = vld [vmem:[%s6497_s2 + $0x28] sm:$0x77] }
 0x154   : > { %v1196_v8 = vcombine.low %v883_v35, %v885_v52  ;;  %v3355_v53 = vsel %vm3345_vm6, %v3326_v60, %v3328_v49 }
 0x155   : > { %v887_v12 = vpop.f32.mrf.mxu0  ;;  %v924_v10 = vpop.f32.mrf.mxu1  ;;  %5122 = vmatmul.mubr.msk.bf16.vlgmr.msra.gmra.mxu1 %vm298_vm0, %v5970_v14  ;;  %3563 = vmatprep.subr.bf16.mxu0 %v3355_v53  ;;  %v712_v53 = vmul.f32 %v694_v24, %v6063_v62 }
 0x156   : > { %v6017_v56 = vadd.f32 %v1196_v8, %v708_v9  ;;  %3564 = vmatpush1.bf16.msra.mxu0 %v3354_v21  ;;  %v3330_v63 = vpop.permute.xlu0 %3329  ;;  %3622 = vmatprep.mubr.bf16.mxu1 %v5241_v0  ;;  %v6077_v12 = vld [vmem:[%s6497_s2 + $0x30] sm:$0x77] }
 0x157   : > { %v3356_v22 = vsel %vm3345_vm6, %v3328_v49, %v3330_v63  ;;  %v926_v25 = vpop.f32.mrf.mxu1  ;;  %v3332_v27 = vpop.permute.xlu1 %3331  ;;  %v713_v24 = vmul.f32 %v695_v42, %v6077_v12 }
 0x158   : > { %v1197_v11 = vcombine.low %v924_v10, %v926_v25  ;;  %v888_v23 = vpop.f32.mrf.mxu0  ;;  %v3357_v26 = vsel %vm3345_vm6, %v3330_v63, %v3332_v27 }
 0x159   : > { %v928_v16 = vpop.f32.mrf.mxu1  ;;  %5123 = vmatmul.mubr.msk.bf16.vlgmr.msra.gmra.mxu0 %vm298_vm0, %v5970_v14  ;;  %3604 = vmatprep.subr.bf16.mxu1 %v3357_v26 }
 0x15a   : > { %v6033_v29 = vadd.f32 %v1197_v11, %v709_v13  ;;  %v965_v17 = vpop.f32.mrf.mxu0  ;;  %3605 = vmatpush1.bf16.msra.mxu1 %v3356_v22  ;;  %v3334_v32 = vpop.permute.xlu0 %3333  ;;  %3663 = vmatprep.mubr.bf16.mxu0 %v5241_v0  ;;  %v6094_v16 = vld [vmem:[%s6497_s2 + $0x38] sm:$0x77] }
 0x15b   : > { %v3358_v36 = vsel %vm3345_vm6, %v3332_v27, %v3334_v32  ;;  %v929_v39 = vpop.f32.mrf.mxu1  ;;  %v3336_v7 = vpop.permute.xlu1 %3335 }
 0x15c   : > { %v967_v15 = vpop.f32.mrf.mxu0  ;;  %v3359_v33 = vsel %vm3345_vm6, %v3334_v32, %v3336_v7 }
 0x15d   : > { %v1198_v18 = vcombine.low %v965_v17, %v967_v15  ;;  %v1006_v38 = vpop.f32.mrf.mxu1  ;;  %5124 = vmatmul.mubr.msk.bf16.vlgmr.msra.gmra.mxu1 %vm298_vm0, %v5970_v14  ;;  %3645 = vmatprep.subr.bf16.mxu0 %v3359_v33  ;;  %v6112_v15 = vld [vmem:[%s6497_s2 + $0x40] sm:$0x77] }
 0x15e   : > { %v969_v41 = vpop.f32.mrf.mxu0  ;;  %3646 = vmatpush1.bf16.msra.mxu0 %v3358_v36  ;;  %v3338_v20 = vpop.permute.xlu0 %3337  ;;  %3704 = vmatprep.mubr.bf16.mxu1 %v5241_v0  ;;  %v715_v44 = vmul.f32 %v697_v30, %v6112_v15 }
 0x15f   : > { %v6050_v2 = vadd.f32 %v1198_v18, %v710_v19  ;;  %v3360_v40 = vsel %vm3345_vm6, %v3336_v7, %v3338_v20  ;;  %v1008_v43 = vpop.f32.mrf.mxu1  ;;  %v3340_v45 = vpop.permute.xlu1 %3339  ;;  %v714_v7 = vmul.f32 %v696_v51, %v6094_v16 }
 0x160   : > { %v1199_v59 = vcombine.low %v1006_v38, %v1008_v43  ;;  %v970_v46 = vpop.f32.mrf.mxu0  ;;  %v3361_v35 = vsel %vm3345_vm6, %v3338_v20, %v3340_v45 }
 0x161   : > { %v1010_v60 = vpop.f32.mrf.mxu1  ;;  %5125 = vmatmul.mubr.msk.bf16.vlgmr.msra.gmra.mxu0 %vm298_vm0, %v5970_v14  ;;  %3686 = vmatprep.subr.bf16.mxu1 %v3361_v35 }
 0x162   : > { %v6065_v21 = vadd.f32 %v1199_v59, %v711_v4  ;;  %v1047_v49 = vpop.f32.mrf.mxu0  ;;  %3687 = vmatpush1.bf16.msra.mxu1 %v3360_v40  ;;  %v3342_v50 = vpop.permute.xlu0 %3341  ;;  %3745 = vmatprep.mubr.bf16.mxu0 %v5241_v0 }
 0x163   : > { %v3362_v54 = vsel %vm3345_vm6, %v3340_v45, %v3342_v50  ;;  %v1011_v57 = vpop.f32.mrf.mxu1  ;;  %v3344_v52 = vpop.permute.xlu1 %3343 }
 0x164   : > { %v1049_v9 = vpop.f32.mrf.mxu0  ;;  %v3363_v8 = vsel %vm3345_vm6, %v3342_v50, %v3344_v52 }
 0x165   : > { %v1200_v10 = vcombine.low %v1047_v49, %v1049_v9  ;;  %v1088_v63 = vpop.f32.mrf.mxu1  ;;  %5126 = vmatmul.mubr.msk.bf16.vlgmr.msra.gmra.mxu1 %vm298_vm0, %v5970_v14  ;;  %3727 = vmatprep.subr.bf16.mxu0 %v3363_v8 }
 0x166   : > { %v1051_v22 = vpop.f32.mrf.mxu0  ;;  %3728 = vmatpush1.bf16.msra.mxu0 %v3362_v54  ;;  %v3811_v25 = vpop.permute.xlu0 %3810  ;;  %3918 = vmatprep.mubr.bf16.mxu1 %v5241_v0 }
 0x167   : > { %v6082_v27 = vadd.f32 %v1200_v10, %v712_v53  ;;  %v1090_v58 = vpop.f32.mrf.mxu1  ;;  %v3813_v6 = vpop.permute.xlu1 %3812 }
 0x168   : > { %v1201_v13 = vcombine.low %v1088_v63, %v1090_v58  ;;  %v1052_v11 = vpop.f32.mrf.mxu0  ;;  %v3848_v23 = vsel %vm3846_vm7, %v3811_v25, %v3813_v6 }
 0x169   : > { %v1092_v26 = vpop.f32.mrf.mxu1  ;;  %5127 = vmatmul.mubr.msk.bf16.vlgmr.msra.gmra.mxu0 %vm298_vm0, %v5970_v14  ;;  %3900 = vmatprep.subr.bf16.mxu1 %v3848_v23  ;;  %v6103_v14 = vld [vmem:[%s6496_s1 + $0x7] sm:$0x1] }
 0x16a   : > { %v6096_v17 = vadd.f32 %v1201_v13, %v713_v24  ;;  %v1129_v32 = vpop.f32.mrf.mxu0  ;;  %v3809_v36 = vpop.permute.xlu0 %3808  ;;  %3959 = vmatprep.mubr.bf16.mxu0 %v5241_v0 }
 0x16b   : > { %v3847_v31 = vsel %vm3846_vm7, %v3809_v36, %v3811_v25  ;;  %v1093_v37 = vpop.f32.mrf.mxu1  ;;  %v3815_v42 = vpop.permute.xlu1 %3814 }
 0x16c   : > { %v1131_v39 = vpop.f32.mrf.mxu0  ;;  %3901 = vmatpush1.bf16.msra.mxu1 %v3847_v31  ;;  %v3849_v48 = vsel %vm3846_vm7, %v3813_v6, %v3815_v42 }
 0x16d   : > { %v1202_v33 = vcombine.low %v1129_v32, %v1131_v39  ;;  %v1170_v19 = vpop.f32.mrf.mxu1 }
 0x16e   : > { %v1133_v18 = vpop.f32.mrf.mxu0  ;;  %v3817_v38 = vpop.permute.xlu0 %3816 }
 0x16f   : > { %v6114_v41 = vadd.f32 %v1202_v33, %v714_v7  ;;  %v1172_v20 = vpop.f32.mrf.mxu1  ;;  %v3819_v40 = vpop.permute.xlu1 %3818  ;;  %5128 = vmatmul.mubr.msk.bf16.vlgmr.msra.gmra.mxu1 %vm298_vm0, %v6103_v14  ;;  %v3850_v43 = vsel %vm3846_vm7, %v3815_v42, %v3817_v38 }
 0x170   : > { %v1203_v51 = vcombine.low %v1170_v19, %v1172_v20  ;;  %v1134_v45 = vpop.f32.mrf.mxu0  ;;  %3941 = vmatprep.subr.bf16.mxu0 %v3850_v43  ;;  %4000 = vmatprep.mubr.bf16.mxu1 %v5241_v0  ;;  %v3851_v61 = vsel %vm3846_vm7, %v3817_v38, %v3819_v40 }
 0x171   : > { %v1174_v4 = vpop.f32.mrf.mxu1  ;;  %3942 = vmatpush1.bf16.msra.mxu0 %v3849_v48 }
 0x172   : > { %v6125_v59 = vadd.f32 %v1203_v51, %v715_v44  ;;  %v1334_v46 = vpop.f32.mrf.mxu0  ;;  %v3821_v35 = vpop.permute.xlu0 %3820 }
 0x173   : > { %v1175_v60 = vpop.f32.mrf.mxu1  ;;  %v3823_v49 = vpop.permute.xlu1 %3822  ;;  %v3852_v50 = vsel %vm3846_vm7, %v3819_v40, %v3821_v35 }
 0x174   : > { %v1336_v28 = vpop.f32.mrf.mxu0  ;;  %5129 = vmatmul.mubr.msk.bf16.vlgmr.msra.gmra.mxu0 %vm298_vm0, %v6103_v14  ;;  %3982 = vmatprep.subr.bf16.mxu1 %v3852_v50  ;;  %v3853_v22 = vsel %vm3846_vm7, %v3821_v35, %v3823_v49 }
 0x175   : > { %v1687_v30 = vcombine.low %v1334_v46, %v1336_v28  ;;  %3983 = vmatpush1.bf16.msra.mxu1 %v3851_v61  ;;  %4041 = vmatprep.mubr.bf16.mxu0 %v5241_v0 }
 0x176   : > { %v1338_v54 = vpop.f32.mrf.mxu0  ;;  %v1375_v57 = vpop.f32.mrf.mxu1 }
 0x177   : > { %v1696_v52 = vrot.slane %v1687_v30, 6  ;;  %v3825_v9 = vpop.permute.xlu0 %3824  ;;  %v3827_v8 = vpop.permute.xlu1 %3826 }
 0x178   : > { %v1377_v53 = vpop.f32.mrf.mxu1  ;;  %v1339_v10 = vpop.f32.mrf.mxu0  ;;  %5130 = vmatmul.mubr.msk.bf16.vlgmr.msra.gmra.mxu1 %vm298_vm0, %v6103_v14  ;;  %v3854_v63 = vsel %vm3846_vm7, %v3823_v49, %v3825_v9  ;;  %v3855_v32 = vsel %vm3846_vm7, %v3825_v9, %v3827_v8 }
 0x179   : > { %v1714_v25 = vmul.f32 %v1696_v52, %v5982_v3  ;;  %v1688_v58 = vcombine.low %v1375_v57, %v1377_v53  ;;  %4023 = vmatprep.subr.bf16.mxu0 %v3854_v63  ;;  %4082 = vmatprep.mubr.bf16.mxu1 %v5241_v0 }
 0x17a   : > { %v1379_v6 = vpop.f32.mrf.mxu1  ;;  %v1416_v24 = vpop.f32.mrf.mxu0  ;;  %4024 = vmatpush1.bf16.msra.mxu0 %v3853_v22 }
 0x17b   : > { %v5074_v13 = vrot.slane %v1714_v25, 10  ;;  %v1697_v11 = vrot.slane %v1688_v58, 6  ;;  %v3829_v23 = vpop.permute.xlu0 %3828  ;;  %v3831_v26 = vpop.permute.xlu1 %3830 }
 0x17c   : > { %v1380_v36 = vpop.f32.mrf.mxu1  ;;  %v1418_v31 = vpop.f32.mrf.mxu0  ;;  %v3856_v37 = vsel %vm3846_vm7, %v3827_v8, %v3829_v23  ;;  %v3857_v43 = vsel %vm3846_vm7, %v3829_v23, %v3831_v26 }
 0x17d   : > { %v6141_v42 = vadd.f32 %v5074_v13, %v5999_v5  ;;  %v1715_v39 = vmul.f32 %v1697_v11, %v5997_v47  ;;  %v1689_v7 = vcombine.low %v1416_v24, %v1418_v31  ;;  %5131 = vmatmul.mubr.msk.bf16.vlgmr.msra.gmra.mxu0 %vm298_vm0, %v6103_v14  ;;  %4064 = vmatprep.subr.bf16.mxu1 %v3856_v37 }
 0x17e   : > { %v1420_v33 = vpop.f32.mrf.mxu0  ;;  %v1457_v19 = vpop.f32.mrf.mxu1  ;;  %4065 = vmatpush1.bf16.msra.mxu1 %v3855_v32  ;;  %4123 = vmatprep.mubr.bf16.mxu0 %v5241_v0 }
 0x17f   : > { %v5075_v18 = vrot.slane %v1715_v39, 10  ;;  %v1698_v38 = vrot.slane %v1689_v7, 6  ;;  %v3833_v20 = vpop.permute.xlu0 %3832  ;;  %v3835_v40 = vpop.permute.xlu1 %3834 }
 0x180   : > { %v1459_v5 = vpop.f32.mrf.mxu1  ;;  %v1421_v44 = vpop.f32.mrf.mxu0  ;;  %v3858_v48 = vsel %vm3846_vm7, %v3831_v26, %v3833_v20  ;;  %v3859_v28 = vsel %vm3846_vm7, %v3833_v20, %v3835_v40 }
 0x181   : > { %v6150_v51 = vadd.f32 %v5075_v18, %v6017_v56  ;;  %v1716_v45 = vmul.f32 %v1698_v38, %v6013_v55  ;;  %v1690_v4 = vcombine.low %v1457_v19, %v1459_v5  ;;  %5132 = vmatmul.mubr.msk.bf16.vlgmr.msra.gmra.mxu1 %vm298_vm0, %v6103_v14  ;;  %4105 = vmatprep.subr.bf16.mxu0 %v3858_v48 }
 0x182   : > { %v1461_v46 = vpop.f32.mrf.mxu1  ;;  %v1498_v35 = vpop.f32.mrf.mxu0  ;;  %4106 = vmatpush1.bf16.msra.mxu0 %v3857_v43  ;;  %4164 = vmatprep.mubr.bf16.mxu1 %v5241_v0 }
 0x183   : > { %v5076_v60 = vrot.slane %v1716_v45, 10  ;;  %v1699_v49 = vrot.slane %v1690_v4, 6  ;;  %v3837_v50 = vpop.permute.xlu0 %3836  ;;  %v3839_v61 = vpop.permute.xlu1 %3838 }
 0x184   : > { %v1462_v56 = vpop.f32.mrf.mxu1  ;;  %v1500_v30 = vpop.f32.mrf.mxu0  ;;  %v3860_v54 = vsel %vm3846_vm7, %v3835_v40, %v3837_v50  ;;  %v3861_v58 = vsel %vm3846_vm7, %v3837_v50, %v3839_v61 }
 0x185   : > { %v6159_v57 = vadd.f32 %v5076_v60, %v6033_v29  ;;  %v1717_v52 = vmul.f32 %v1699_v49, %v6031_v1  ;;  %v1691_v9 = vcombine.low %v1498_v35, %v1500_v30  ;;  %5133 = vmatmul.mubr.msk.bf16.vlgmr.msra.gmra.mxu0 %vm298_vm0, %v6103_v14  ;;  %4146 = vmatprep.subr.bf16.mxu1 %v3860_v54  ;;  %v6194_v56 = vld [vmem:[%s6496_s1 + $0x8] sm:$0x1] }
 0x186   : > { %v1502_v8 = vpop.f32.mrf.mxu0  ;;  %v1539_v53 = vpop.f32.mrf.mxu1  ;;  %4147 = vmatpush1.bf16.msra.mxu1 %v3859_v28  ;;  %4205 = vmatprep.mubr.bf16.mxu0 %v5241_v0 }
 0x187   : > { %v5077_v10 = vrot.slane %v1717_v52, 10  ;;  %v1700_v63 = vrot.slane %v1691_v9, 6  ;;  %v3841_v22 = vpop.permute.xlu0 %3840  ;;  %v3843_v25 = vpop.permute.xlu1 %3842 }
 0x188   : > { %v1541_v29 = vpop.f32.mrf.mxu1  ;;  %v1503_v6 = vpop.f32.mrf.mxu0  ;;  %v3862_v24 = vsel %vm3846_vm7, %v3839_v61, %v3841_v22  ;;  %v3863_v7 = vsel %vm3846_vm7, %v3841_v22, %v3843_v25 }
 0x189   : > { %v6168_v13 = vadd.f32 %v5077_v10, %v6050_v2  ;;  %v1718_v11 = vmul.f32 %v1700_v63, %v6045_v34  ;;  %v1692_v23 = vcombine.low %v1539_v53, %v1541_v29  ;;  %5134 = vmatmul.mubr.msk.bf16.vlgmr.msra.gmra.mxu1 %vm298_vm0, %v6103_v14  ;;  %4187 = vmatprep.subr.bf16.mxu0 %v3862_v24 }
 0x18a   : > { %v1543_v26 = vpop.f32.mrf.mxu1  ;;  %v1580_v32 = vpop.f32.mrf.mxu0  ;;  %4188 = vmatpush1.bf16.msra.mxu0 %v3861_v58  ;;  %4246 = vmatprep.mubr.bf16.mxu1 %v5241_v0 }
 0x18b   : > { %v5078_v36 = vrot.slane %v1718_v11, 10  ;;  %v1701_v31 = vrot.slane %v1692_v23, 6  ;;  %v3845_v37 = vpop.permute.xlu0 %3844  ;;  %v4303_v39 = vpop.permute.xlu1 %4302 }
 0x18c   : > { %v1544_v2 = vpop.f32.mrf.mxu1  ;;  %v1582_v33 = vpop.f32.mrf.mxu0  ;;  %v3864_v19 = vsel %vm3846_vm7, %v3843_v25, %v3845_v37 }
 0x18d   : > { %v6177_v18 = vadd.f32 %v5078_v36, %v6065_v21  ;;  %v1719_v38 = vmul.f32 %v1701_v31, %v6063_v62  ;;  %v1693_v20 = vcombine.low %v1580_v32, %v1582_v33  ;;  %5135 = vmatmul.mubr.msk.bf16.vlgmr.msra.gmra.mxu0 %vm298_vm0, %v6103_v14  ;;  %4228 = vmatprep.subr.bf16.mxu1 %v3864_v19 }
 0x18e   : > { %v1584_v40 = vpop.f32.mrf.mxu0  ;;  %v1621_v43 = vpop.f32.mrf.mxu1  ;;  %4229 = vmatpush1.bf16.msra.mxu1 %v3863_v7  ;;  %4410 = vmatprep.mubr.bf16.mxu0 %v5241_v0 }
 0x18f   : > { %v5079_v5 = vrot.slane %v1719_v38, 10  ;;  %v1702_v44 = vrot.slane %v1693_v20, 6  ;;  %v4305_v48 = vpop.permute.xlu0 %4304  ;;  %v4301_v45 = vpop.permute.xlu1 %4300 }
 0x190   : > { %v1623_v4 = vpop.f32.mrf.mxu1  ;;  %v4339_v21 = vsel %vm4338_vm8, %v4301_v45, %v4303_v39  ;;  %v1585_v46 = vpop.f32.mrf.mxu0  ;;  %v4340_v35 = vsel %vm4338_vm8, %v4303_v39, %v4305_v48 }
 0x191   : > { %v6186_v60 = vadd.f32 %v5079_v5, %v6082_v27  ;;  %v1720_v49 = vmul.f32 %v1702_v44, %v6077_v12  ;;  %v1694_v50 = vcombine.low %v1621_v43, %v1623_v4  ;;  %5136 = vmatmul.mubr.msk.bf16.vlgmr.msra.gmra.mxu1 %vm298_vm0, %v6103_v14  ;;  %4392 = vmatprep.subr.bf16.mxu0 %v4340_v35 }
 0x192   : > { %v1662_v61 = vpop.f32.mrf.mxu0  ;;  %4393 = vmatpush1.bf16.msra.mxu0 %v4339_v21  ;;  %v1625_v28 = vpop.f32.mrf.mxu1  ;;  %4451 = vmatprep.mubr.bf16.mxu1 %v5241_v0 }
 0x193   : > { %v5080_v30 = vrot.slane %v1720_v49, 10  ;;  %v1703_v27 = vrot.slane %v1694_v50, 6  ;;  %v4307_v54 = vpop.permute.xlu0 %4306  ;;  %v4309_v52 = vpop.permute.xlu1 %4308 }
 0x194   : > { %v4341_v9 = vsel %vm4338_vm8, %v4305_v48, %v4307_v54  ;;  %v1664_v8 = vpop.f32.mrf.mxu0  ;;  %v4342_v14 = vsel %vm4338_vm8, %v4307_v54, %v4309_v52  ;;  %v1626_v53 = vpop.f32.mrf.mxu1 }
 0x195   : > { %v6200_v10 = vadd.f32 %v5080_v30, %v6096_v17  ;;  %v1721_v63 = vmul.f32 %v1703_v27, %v6094_v16  ;;  %v1695_v22 = vcombine.low %v1662_v61, %v1664_v8  ;;  %5137 = vmatmul.mubr.msk.bf16.vlgmr.msra.gmra.mxu0 %vm298_vm0, %v6194_v56  ;;  %4433 = vmatprep.subr.bf16.mxu1 %v4342_v14 }
 0x196   : > { %4434 = vmatpush1.bf16.msra.mxu1 %v4341_v9  ;;  %v1666_v25 = vpop.f32.mrf.mxu0  ;;  %4492 = vmatprep.mubr.bf16.mxu0 %v5241_v0 }
 0x197   : > { %v5081_v58 = vrot.slane %v1721_v63, 10  ;;  %v1704_v29 = vrot.slane %v1695_v22, 6  ;;  %v4311_v6 = vpop.permute.xlu0 %4310  ;;  %v4313_v24 = vpop.permute.xlu1 %4312 }
 0x198   : > { %v4343_v11 = vsel %vm4338_vm8, %v4309_v52, %v4311_v6  ;;  %v1880_v23 = vpop.f32.mrf.mxu1  ;;  %v4344_v17 = vsel %vm4338_vm8, %v4311_v6, %v4313_v24  ;;  %v1667_v26 = vpop.f32.mrf.mxu0 }
 0x199   : > { %v6209_v32 = vadd.f32 %v5081_v58, %v6114_v41  ;;  %v1722_v36 = vmul.f32 %v1704_v29, %v6112_v15  ;;  %5138 = vmatmul.mubr.msk.bf16.vlgmr.msra.gmra.mxu1 %vm298_vm0, %v6194_v56  ;;  %4474 = vmatprep.subr.bf16.mxu0 %v4344_v17 }
 0x19a   : > { %v1882_v31 = vpop.f32.mrf.mxu1  ;;  %4475 = vmatpush1.bf16.msra.mxu0 %v4343_v11  ;;  %4533 = vmatprep.mubr.bf16.mxu1 %v5241_v0 }
 0x19b   : > { %v5082_v37 = vrot.slane %v1722_v36, 10  ;;  %v2233_v39 = vcombine.low %v1880_v23, %v1882_v31  ;;  %v4315_v7 = vpop.permute.xlu0 %4314  ;;  %v4317_v2 = vpop.permute.xlu1 %4316 }
 0x19c   : > { %v4345_v33 = vsel %vm4338_vm8, %v4313_v24, %v4315_v7  ;;  %v1884_v19 = vpop.f32.mrf.mxu1  ;;  %v1921_v38 = vpop.f32.mrf.mxu0  ;;  %v4346_v41 = vsel %vm4338_vm8, %v4315_v7, %v4317_v2 }
 0x19d   : > { %v6218_v20 = vadd.f32 %v5082_v37, %v6125_v59  ;;  %v2251_v40 = vmul.f32 %v2233_v39, %v5982_v3  ;;  %5139 = vmatmul.mubr.msk.bf16.vlgmr.msra.gmra.mxu0 %vm298_vm0, %v6194_v56  ;;  %4515 = vmatprep.subr.bf16.mxu1 %v4346_v41 }
 0x19e   : > { %4516 = vmatpush1.bf16.msra.mxu1 %v4345_v33  ;;  %v1885_v43 = vpop.f32.mrf.mxu1  ;;  %v1923_v5 = vpop.f32.mrf.mxu0  ;;  %4574 = vmatprep.mubr.bf16.mxu0 %v5241_v0 }
 0x19f   : > { %v4319_v44 = vpop.permute.xlu0 %4318  ;;  %v4321_v48 = vpop.permute.xlu1 %4320  ;;  %v2234_v45 = vcombine.low %v1921_v38, %v1923_v5  ;;  %v6225_v4 = vadd.f32 %v2251_v40, %v6141_v42 }
 0x1a0   : > { %v4347_v59 = vsel %vm4338_vm8, %v4317_v2, %v4319_v44  ;;  %v1925_v21 = vpop.f32.mrf.mxu0  ;;  %v4348_v46 = vsel %vm4338_vm8, %v4319_v44, %v4321_v48 }
 0x1a1   : > { %v2252_v35 = vmul.f32 %v2234_v45, %v5997_v47  ;;  %v1962_v49 = vpop.f32.mrf.mxu1  ;;  %5140 = vmatmul.mubr.msk.bf16.vlgmr.msra.gmra.mxu1 %vm298_vm0, %v6194_v56  ;;  %4556 = vmatprep.subr.bf16.mxu0 %v4348_v46 }
 0x1a2   : > { %4557 = vmatpush1.bf16.msra.mxu0 %v4347_v59  ;;  %v1926_v50 = vpop.f32.mrf.mxu0  ;;  %4615 = vmatprep.mubr.bf16.mxu1 %v5241_v0 }
 0x1a3   : > { %v4323_v61 = vpop.permute.xlu0 %4322  ;;  %v1964_v28 = vpop.f32.mrf.mxu1  ;;  %v6234_v42 = vadd.f32 %v2252_v35, %v6150_v51 }
 0x1a4   : > { %v4349_v30 = vsel %vm4338_vm8, %v4321_v48, %v4323_v61  ;;  %v2235_v27 = vcombine.low %v1962_v49, %v1964_v28  ;;  %v4325_v54 = vpop.permute.xlu1 %4324 }
 0x1a5   : > { %v1966_v52 = vpop.f32.mrf.mxu1  ;;  %v2003_v9 = vpop.f32.mrf.mxu0  ;;  %5141 = vmatmul.mubr.msk.bf16.vlgmr.msra.gmra.mxu0 %vm298_vm0, %v6194_v56  ;;  %v4350_v8 = vsel %vm4338_vm8, %v4323_v61, %v4325_v54 }
 0x1a6   : > { %v2253_v14 = vmul.f32 %v2235_v27, %v6013_v55  ;;  %4597 = vmatprep.subr.bf16.mxu1 %v4350_v8  ;;  %4656 = vmatprep.mubr.bf16.mxu0 %v5241_v0 }
 0x1a7   : > { %4598 = vmatpush1.bf16.msra.mxu1 %v4349_v30  ;;  %v4327_v53 = vpop.permute.xlu0 %4326  ;;  %v1967_v51 = vpop.f32.mrf.mxu1 }
 0x1a8   : > { %v4351_v63 = vsel %vm4338_vm8, %v4325_v54, %v4327_v53  ;;  %v4329_v22 = vpop.permute.xlu1 %4328  ;;  %v2005_v25 = vpop.f32.mrf.mxu0  ;;  %v6244_v58 = vadd.f32 %v2253_v14, %v6159_v57 }
 0x1a9   : > { %v2236_v29 = vcombine.low %v2003_v9, %v2005_v25  ;;  %v2044_v6 = vpop.f32.mrf.mxu1  ;;  %v4352_v24 = vsel %vm4338_vm8, %v4327_v53, %v4329_v22 }
 0x1aa   : > { %v2007_v11 = vpop.f32.mrf.mxu0  ;;  %5142 = vmatmul.mubr.msk.bf16.vlgmr.msra.gmra.mxu1 %vm298_vm0, %v6194_v56  ;;  %4638 = vmatprep.subr.bf16.mxu0 %v4352_v24 }
 0x1ab   : > { %v2254_v23 = vmul.f32 %v2236_v29, %v6031_v1  ;;  %4639 = vmatpush1.bf16.msra.mxu0 %v4351_v63  ;;  %v4331_v17 = vpop.permute.xlu0 %4330  ;;  %v2046_v26 = vpop.f32.mrf.mxu1  ;;  %4697 = vmatprep.mubr.bf16.mxu1 %v5241_v0 }
 0x1ac   : > { %v4353_v36 = vsel %vm4338_vm8, %v4329_v22, %v4331_v17  ;;  %v2237_v57 = vcombine.low %v2044_v6, %v2046_v26  ;;  %v4333_v31 = vpop.permute.xlu1 %4332  ;;  %v2008_v37 = vpop.f32.mrf.mxu0 }
 0x1ad   : > { %v2048_v39 = vpop.f32.mrf.mxu1  ;;  %v4354_v7 = vsel %vm4338_vm8, %v4331_v17, %v4333_v31  ;;  %v6254_v2 = vadd.f32 %v2254_v23, %v6168_v13 }
 0x1ae   : > { %v2255_v33 = vmul.f32 %v2237_v57, %v6045_v34  ;;  %v2085_v19 = vpop.f32.mrf.mxu0  ;;  %5143 = vmatmul.mubr.msk.bf16.vlgmr.msra.gmra.mxu0 %vm298_vm0, %v6194_v56  ;;  %4679 = vmatprep.subr.bf16.mxu1 %v4354_v7 }
 0x1af   : > { %4680 = vmatpush1.bf16.msra.mxu1 %v4353_v36  ;;  %v4335_v38 = vpop.permute.xlu0 %4334  ;;  %v2049_v41 = vpop.f32.mrf.mxu1  ;;  %4738 = vmatprep.mubr.bf16.mxu0 %v5241_v0 }
 0x1b0   : > { %v4355_v40 = vsel %vm4338_vm8, %v4333_v31, %v4335_v38  ;;  %v4337_v43 = vpop.permute.xlu1 %4336  ;;  %v2087_v5 = vpop.f32.mrf.mxu0  ;;  %v2264_v44 = vadd.f32 %v2255_v33, %v6177_v18 }
 0x1b1   : > { %v2238_v13 = vcombine.low %v2085_v19, %v2087_v5  ;;  %v2126_v48 = vpop.f32.mrf.mxu1  ;;  %v4356_v45 = vsel %vm4338_vm8, %v4335_v38, %v4337_v43 }
 0x1b2   : > { %v2089_v59 = vpop.f32.mrf.mxu0  ;;  %5144 = vmatmul.mubr.msk.bf16.vlgmr.msra.gmra.mxu1 %vm298_vm0, %v6194_v56  ;;  %4720 = vmatprep.subr.bf16.mxu0 %v4356_v45 }
 0x1b3   : > { %v2256_v21 = vmul.f32 %v2238_v13, %v6063_v62  ;;  %4721 = vmatpush1.bf16.msra.mxu0 %v4355_v40  ;;  %v2128_v46 = vpop.f32.mrf.mxu1 }
 0x1b4   : > { %v2090_v0 = vpop.f32.mrf.mxu0  ;;  %v2239_v35 = vcombine.low %v2126_v48, %v2128_v46 }
 0x1b5   : > { %v2130_v49 = vpop.f32.mrf.mxu1  ;;  %v2265_v50 = vadd.f32 %v2256_v21, %v6186_v60 }
 0x1b6   : > { %v2257_v18 = vmul.f32 %v2239_v35, %v6077_v12  ;;  %v2167_v61 = vpop.f32.mrf.mxu0  ;;  %5145 = vmatmul.mubr.msk.bf16.vlgmr.msra.gmra.mxu0 %vm298_vm0, %v6194_v56 }
 0x1b7   : > { %v2131_v28 = vpop.f32.mrf.mxu1 }
 0x1b8   : > { %v2169_v30 = vpop.f32.mrf.mxu0  ;;  %v2266_v27 = vadd.f32 %v2257_v18, %v6200_v10 }
 0x1b9   : > { %v2240_v54 = vcombine.low %v2167_v61, %v2169_v30  ;;  %v2208_v52 = vpop.f32.mrf.mxu1 }
 0x1ba   : > { %v2171_v9 = vpop.f32.mrf.mxu0 }
 0x1bb   : > { %v2258_v8 = vmul.f32 %v2240_v54, %v6094_v16  ;;  %v2210_v14 = vpop.f32.mrf.mxu1 }
 0x1bc   : > { %v2172_v53 = vpop.f32.mrf.mxu0  ;;  %v2241_v51 = vcombine.low %v2208_v52, %v2210_v14 }
 0x1bd   : > { %v2212_v63 = vpop.f32.mrf.mxu1  ;;  %v2267_v60 = vadd.f32 %v2258_v8, %v6209_v32 }
 0x1be   : > { %v2259_v22 = vmul.f32 %v2241_v51, %v6112_v15  ;;  %v2381_v25 = vpop.f32.mrf.mxu0 }
 0x1bf   : > { %v2213_v29 = vpop.f32.mrf.mxu1 }
 0x1c0   : > { %v2383_v56 = vpop.f32.mrf.mxu0  ;;  %v2268_v6 = vadd.f32 %v2259_v22, %v6218_v20 }
 0x1c1   : > { %v2734_v24 = vcombine.low %v2381_v25, %v2383_v56 }
 0x1c2   : > { %v2385_v10 = vpop.f32.mrf.mxu0  ;;  %v2422_v11 = vpop.f32.mrf.mxu1 }
 0x1c3   : > { %v6276_v23 = vadd.f32 %v2734_v24, %v6225_v4 }
 0x1c4   : > { %v2386_v17 = vpop.f32.mrf.mxu0  ;;  %v2424_v26 = vpop.f32.mrf.mxu1 }
 0x1c5   : > { %v2735_v36 = vcombine.low %v2422_v11, %v2424_v26 }
 0x1c6   : > { %v2426_v57 = vpop.f32.mrf.mxu1  ;;  %v2463_v31 = vpop.f32.mrf.mxu0 }
 0x1c7   : > { %v6279_v32 = vadd.f32 %v2735_v36, %v6234_v42 }
 0x1c8   : > { %v2427_v37 = vpop.f32.mrf.mxu1  ;;  %v2465_v39 = vpop.f32.mrf.mxu0 }
 0x1c9   : > { %v2736_v7 = vcombine.low %v2463_v31, %v2465_v39 }
 0x1ca   : > { %v2467_v33 = vpop.f32.mrf.mxu0  ;;  %v2504_v19 = vpop.f32.mrf.mxu1 }
 0x1cb   : > { %v6282_v20 = vadd.f32 %v2736_v7, %v6244_v58 }
 0x1cc   : > { %v2468_v38 = vpop.f32.mrf.mxu0  ;;  %v2506_v41 = vpop.f32.mrf.mxu1 }
 0x1cd   : > { %v2737_v4 = vcombine.low %v2504_v19, %v2506_v41 }
 0x1ce   : > { %v2508_v40 = vpop.f32.mrf.mxu1  ;;  %v2545_v43 = vpop.f32.mrf.mxu0 }
 0x1cf   : > { %v6285_v5 = vadd.f32 %v2737_v4, %v6254_v2 }
 0x1d0   : > { %v2509_v13 = vpop.f32.mrf.mxu1  ;;  %v2547_v48 = vpop.f32.mrf.mxu0 }
 0x1d1   : > { %v2738_v42 = vcombine.low %v2545_v43, %v2547_v48 }
 0x1d2   : > { %v2549_v45 = vpop.f32.mrf.mxu0  ;;  %v2586_v59 = vpop.f32.mrf.mxu1 }
 0x1d3   : > { %v6287_v21 = vadd.f32 %v2738_v42, %v2264_v44 }
 0x1d4   : > { %v2550_v46 = vpop.f32.mrf.mxu0  ;;  %v2588_v0 = vpop.f32.mrf.mxu1 }
 0x1d5   : > { %v2739_v35 = vcombine.low %v2586_v59, %v2588_v0 }
 0x1d6   : > { %v2590_v58 = vpop.f32.mrf.mxu1  ;;  %v2627_v49 = vpop.f32.mrf.mxu0 }
 0x1d7   : > { %v6289_v18 = vadd.f32 %v2739_v35, %v2265_v50 }
 0x1d8   : > { %v2591_v61 = vpop.f32.mrf.mxu1  ;;  %v2629_v28 = vpop.f32.mrf.mxu0 }
 0x1d9   : > { %v2740_v30 = vcombine.low %v2627_v49, %v2629_v28 }
 0x1da   : > { %v2631_v54 = vpop.f32.mrf.mxu0  ;;  %v2668_v2 = vpop.f32.mrf.mxu1 }
 0x1db   : > { %v6291_v52 = vadd.f32 %v2740_v30, %v2266_v27 }
 0x1dc   : > { %v2632_v9 = vpop.f32.mrf.mxu0  ;;  %v2670_v8 = vpop.f32.mrf.mxu1 }
 0x1dd   : > { %v2741_v14 = vcombine.low %v2668_v2, %v2670_v8 }
 0x1de   : > { %v2709_v53 = vpop.f32.mrf.mxu0  ;;  %v2672_v44 = vpop.f32.mrf.mxu1 }
 0x1df   : > { %v6293_v51 = vadd.f32 %v2741_v14, %v2267_v60 }
 0x1e0   : > { %v2711_v63 = vpop.f32.mrf.mxu0  ;;  %v2673_v22 = vpop.f32.mrf.mxu1 }
 0x1e1   : > { %v2742_v25 = vcombine.low %v2709_v53, %v2711_v63 }
 0x1e2   : > { %v2713_v29 = vpop.f32.mrf.mxu0 }
 0x1e3   : > { %v6295_v50 = vadd.f32 %v2742_v25, %v2268_v6  ;;  %v2873_v56 = vpop.f32.mrf.mxu1 }
 0x1e4   : > { %v2714_v24 = vpop.f32.mrf.mxu0 }
 0x1e5   : > { %v2875_v10 = vpop.f32.mrf.mxu1 }
 0x1e6   : > { %v3226_v11 = vcombine.low %v2873_v56, %v2875_v10 }
 0x1e7   : > { %v2877_v17 = vpop.f32.mrf.mxu1 }
 0x1e8   : > { %v3235_v27 = vrot.slane %v3226_v11, 6  ;;  %v2914_v26 = vpop.f32.mrf.mxu0 }
 0x1e9   : > { %v2878_v36 = vpop.f32.mrf.mxu1 }
 0x1ea   : > { %v3253_v57 = vmul.f32 %v3235_v27, %v5982_v3  ;;  %v2916_v31 = vpop.f32.mrf.mxu0 }
 0x1eb   : > { %v3227_v37 = vcombine.low %v2914_v26, %v2916_v31 }
 0x1ec   : > { %v5110_v60 = vrot.slane %v3253_v57, 10  ;;  %v2918_v39 = vpop.f32.mrf.mxu0 }
 0x1ed   : > { %v3236_v7 = vrot.slane %v3227_v37, 6  ;;  %v2955_v33 = vpop.f32.mrf.mxu1 }
 0x1ee   : > { %v6299_v19 = vadd.f32 %v5110_v60, %v6276_v23  ;;  %v2919_v6 = vpop.f32.mrf.mxu0 }
 0x1ef   : > { %v3254_v38 = vmul.f32 %v3236_v7, %v5997_v47  ;;  %v2957_v41 = vpop.f32.mrf.mxu1 }
 0x1f0   : > { %v3228_v4 = vcombine.low %v2955_v33, %v2957_v41 }
 0x1f1   : > { %v5111_v40 = vrot.slane %v3254_v38, 10  ;;  %v2959_v43 = vpop.f32.mrf.mxu1  ;;  %v2996_v13 = vpop.f32.mrf.mxu0 }
 0x1f2   : > { %v3237_v48 = vrot.slane %v3228_v4, 6 }
 0x1f3   : > { %v6303_v3 = vadd.f32 %v5111_v40, %v6279_v32  ;;  %v2960_v42 = vpop.f32.mrf.mxu1  ;;  %v2998_v45 = vpop.f32.mrf.mxu0 }
 0x1f4   : > { %v3255_v59 = vmul.f32 %v3237_v48, %v6013_v55  ;;  %v3229_v46 = vcombine.low %v2996_v13, %v2998_v45 }
 0x1f5   : > { %v3000_v0 = vpop.f32.mrf.mxu0  ;;  %v3037_v23 = vpop.f32.mrf.mxu1 }
 0x1f6   : > { %v5112_v35 = vrot.slane %v3255_v59, 10  ;;  %v3238_v58 = vrot.slane %v3229_v46, 6 }
 0x1f7   : > { %v3001_v49 = vpop.f32.mrf.mxu0  ;;  %v3039_v47 = vpop.f32.mrf.mxu1 }
 0x1f8   : > { %v6307_v61 = vadd.f32 %v5112_v35, %v6282_v20  ;;  %v3256_v28 = vmul.f32 %v3238_v58, %v6031_v1  ;;  %v3230_v30 = vcombine.low %v3037_v23, %v3039_v47 }
 0x1f9   : > { %v3041_v54 = vpop.f32.mrf.mxu1  ;;  %v3078_v32 = vpop.f32.mrf.mxu0 }
 0x1fa   : > { %v5113_v2 = vrot.slane %v3256_v28, 10  ;;  %v3239_v9 = vrot.slane %v3230_v30, 6  ;;  %v6343_v54 = vld [vmem:[%s6497_s2 + $0x8] sm:$0x77] }
 0x1fb   : > { %v3042_v8 = vpop.f32.mrf.mxu1  ;;  %v3080_v14 = vpop.f32.mrf.mxu0 }
 0x1fc   : > { %v6311_v55 = vadd.f32 %v5113_v2, %v6285_v5  ;;  %v3257_v53 = vmul.f32 %v3239_v9, %v6045_v34  ;;  %v3231_v44 = vcombine.low %v3078_v32, %v3080_v14 }
 0x1fd   : > { %v3082_v63 = vpop.f32.mrf.mxu0  ;;  %v3119_v22 = vpop.f32.mrf.mxu1 }
 0x1fe   : > { %v5114_v25 = vrot.slane %v3257_v53, 10  ;;  %v3240_v20 = vrot.slane %v3231_v44, 6 }
 0x1ff   : > { %v3083_v29 = vpop.f32.mrf.mxu0  ;;  %v3121_v56 = vpop.f32.mrf.mxu1 }
 0x200   : > { %v6315_v1 = vadd.f32 %v5114_v25, %v6287_v21  ;;  %v3258_v24 = vmul.f32 %v3240_v20, %v6063_v62  ;;  %v3232_v10 = vcombine.low %v3119_v22, %v3121_v56 }
 0x201   : > { %v3123_v11 = vpop.f32.mrf.mxu1  ;;  %v3160_v17 = vpop.f32.mrf.mxu0 }
 0x202   : > { %v5115_v27 = vrot.slane %v3258_v24, 10  ;;  %v3241_v5 = vrot.slane %v3232_v10, 6 }
 0x203   : > { %v3124_v26 = vpop.f32.mrf.mxu1  ;;  %v3162_v36 = vpop.f32.mrf.mxu0 }
 0x204   : > { %v6319_v34 = vadd.f32 %v5115_v27, %v6289_v18  ;;  %v3259_v57 = vmul.f32 %v3241_v5, %v6077_v12  ;;  %v3233_v31 = vcombine.low %v3160_v17, %v3162_v36 }
 0x205   : > { %v3164_v37 = vpop.f32.mrf.mxu0  ;;  %v3201_v60 = vpop.f32.mrf.mxu1 }
 0x206   : > { %v5116_v39 = vrot.slane %v3259_v57, 10  ;;  %v3242_v21 = vrot.slane %v3233_v31, 6 }
 0x207   : > { %v3165_v7 = vpop.f32.mrf.mxu0  ;;  %v3203_v33 = vpop.f32.mrf.mxu1 }
 0x208   : > { %v6323_v62 = vadd.f32 %v5116_v39, %v6291_v52  ;;  %v3260_v6 = vmul.f32 %v3242_v21, %v6094_v16  ;;  %v3234_v38 = vcombine.low %v3201_v60, %v3203_v33  ;;  %v6333_v52 = vld [vmem:[%s6497_s2] sm:$0x77] }
 0x209   : > { %v3205_v41 = vpop.f32.mrf.mxu1  ;;  %v3419_v4 = vpop.f32.mrf.mxu0 }
 0x20a   : > { %v5117_v40 = vrot.slane %v3260_v6, 10  ;;  %v3243_v18 = vrot.slane %v3234_v38, 6 }
 0x20b   : > { %v3206_v43 = vpop.f32.mrf.mxu1  ;;  %v3421_v13 = vpop.f32.mrf.mxu0 }
 0x20c   : > { %v6327_v48 = vadd.f32 %v5117_v40, %v6293_v51  ;;  %v3261_v42 = vmul.f32 %v3243_v18, %v6112_v15  ;;  %v3772_v45 = vcombine.low %v3419_v4, %v3421_v13 }
 0x20d   : > { %v3423_v59 = vpop.f32.mrf.mxu0  ;;  %v3460_v46 = vpop.f32.mrf.mxu1 }
 0x20e   : > { %v5118_v0 = vrot.slane %v3261_v42, 10  ;;  %v3790_v23 = vmul.f32 %v6333_v52, %v3772_v45 }
 0x20f   : > { %v3424_v35 = vpop.f32.mrf.mxu0  ;;  %v3462_v58 = vpop.f32.mrf.mxu1 }
 0x210   : > { %v3306_v49 = vadd.f32 %v5118_v0, %v6295_v50  ;;  %v3773_v47 = vcombine.low %v3460_v46, %v3462_v58  ;;  %v6338_v51 = vadd.f32 %v3790_v23, %v6299_v19  ;;  %v6352_v19 = vld [vmem:[%s6497_s2 + $0x10] sm:$0x77] }
 0x211   : > { %v3464_v28 = vpop.f32.mrf.mxu1  ;;  %v3501_v30 = vpop.f32.mrf.mxu0 }
 0x212   : > { %v3791_v32 = vmul.f32 %v6343_v54, %v3773_v47 }
 0x213   : > { %v3465_v2 = vpop.f32.mrf.mxu1  ;;  %v3503_v9 = vpop.f32.mrf.mxu0 }
 0x214   : > { %v3774_v8 = vcombine.low %v3501_v30, %v3503_v9  ;;  %v6347_v14 = vadd.f32 %v3791_v32, %v6303_v3  ;;  %v6361_v3 = vld [vmem:[%s6497_s2 + $0x18] sm:$0x77] }
 0x215   : > { %v3505_v50 = vpop.f32.mrf.mxu0  ;;  %v3542_v53 = vpop.f32.mrf.mxu1 }
 0x216   : > { %v3792_v44 = vmul.f32 %v6352_v19, %v3774_v8 }
 0x217   : > { %v3506_v63 = vpop.f32.mrf.mxu0  ;;  %v3544_v22 = vpop.f32.mrf.mxu1 }
 0x218   : > { %v3775_v25 = vcombine.low %v3542_v53, %v3544_v22  ;;  %v6356_v20 = vadd.f32 %v3792_v44, %v6307_v61  ;;  %v6370_v61 = vld [vmem:[%s6497_s2 + $0x20] sm:$0x77] }
 0x219   : > { %v3546_v29 = vpop.f32.mrf.mxu1  ;;  %v3583_v56 = vpop.f32.mrf.mxu0 }
 0x21a   : > { %v3793_v24 = vmul.f32 %v6361_v3, %v3775_v25 }
 0x21b   : > { %v3547_v10 = vpop.f32.mrf.mxu1  ;;  %v3585_v11 = vpop.f32.mrf.mxu0 }
 0x21c   : > { %v3776_v17 = vcombine.low %v3583_v56, %v3585_v11  ;;  %v6365_v27 = vadd.f32 %v3793_v24, %v6311_v55  ;;  %v6379_v55 = vld [vmem:[%s6497_s2 + $0x28] sm:$0x77] }
 0x21d   : > { %v3587_v5 = vpop.f32.mrf.mxu0  ;;  %v3624_v26 = vpop.f32.mrf.mxu1 }
 0x21e   : > { %v3794_v36 = vmul.f32 %v6370_v61, %v3776_v17 }
 0x21f   : > { %v3588_v57 = vpop.f32.mrf.mxu0  ;;  %v3626_v31 = vpop.f32.mrf.mxu1 }
 0x220   : > { %v3777_v37 = vcombine.low %v3624_v26, %v3626_v31  ;;  %v6374_v60 = vadd.f32 %v3794_v36, %v6315_v1 }
 0x221   : > { %v3628_v39 = vpop.f32.mrf.mxu1  ;;  %v3665_v21 = vpop.f32.mrf.mxu0 }
 0x222   : > { %v3795_v7 = vmul.f32 %v6379_v55, %v3777_v37 }
 0x223   : > { %v3629_v33 = vpop.f32.mrf.mxu1  ;;  %v3667_v6 = vpop.f32.mrf.mxu0 }
 0x224   : > { %v3778_v38 = vcombine.low %v3665_v21, %v3667_v6  ;;  %v6383_v41 = vadd.f32 %v3795_v7, %v6319_v34 }
 0x225   : > { %v3669_v4 = vpop.f32.mrf.mxu0  ;;  %v3706_v40 = vpop.f32.mrf.mxu1 }
 0x226   : > { %v3796_v1 = vmul.f32 %v3778_v38, %v6077_v12 }
 0x227   : > { %v3670_v18 = vpop.f32.mrf.mxu0  ;;  %v3708_v43 = vpop.f32.mrf.mxu1 }
 0x228   : > { %v3779_v13 = vcombine.low %v3706_v40, %v3708_v43  ;;  %v6387_v42 = vadd.f32 %v3796_v1, %v6323_v62 }
 0x229   : > { %v3747_v45 = vpop.f32.mrf.mxu0  ;;  %v3710_v59 = vpop.f32.mrf.mxu1 }
 0x22a   : > { %v3797_v46 = vmul.f32 %v3779_v13, %v6094_v16  ;;  %v5250_v13 = vmov 1966171168   ;;  %v4858_v59 = vlaneseq }
 0x22b   : > { %v3749_v0 = vpop.f32.mrf.mxu0  ;;  %v3711_v23 = vpop.f32.mrf.mxu1 }
 0x22c   : > { %v3780_v35 = vcombine.low %v3747_v45, %v3749_v0  ;;  %v6391_v34 = vadd.f32 %v3797_v46, %v6327_v48  ;;  %v4856_v45 = vunpack.c.l.s4 %v5250_v13  ;;  %vm4966_vm9 = vcmp.lt.s32.totalorder %v4858_v59, 256 }
 0x22d   : > { %v3751_v58 = vpop.f32.mrf.mxu0 }
 0x22e   : > { %v3798_v47 = vmul.f32 %v3780_v35, %v6112_v15 }
 0x22f   : > { %v3920_v12 = vpop.f32.mrf.mxu1  ;;  %v3752_v28 = vpop.f32.mrf.mxu0 }
 0x230   : > { %v6394_v30 = vadd.f32 %v3798_v47, %v3306_v49 }
 0x231   : > { %v3922_v32 = vpop.f32.mrf.mxu1 }
 0x232   : > { %v4273_v47 = vcombine.low %v3920_v12, %v3922_v32 }
 0x233   : > { %v3924_v62 = vpop.f32.mrf.mxu1 }
 0x234   : > { %v6396_v2 = vpop.f32.mrf.mxu0 }
 0x235   : > { %v3925_v9 = vpop.f32.mrf.mxu1 }
 0x236   : > { %v3963_v8 = vpop.f32.mrf.mxu0  ;;  %v4857_v9 = vunpack.c.0.s8 %v4856_v45 }
 0x238   : > { %v3965_v16 = vpop.f32.mrf.mxu0  ;;  %v6398_v50 = vpop.f32.mrf.mxu1 }
 0x239   : > { %v4859_v16 = vshrl.u32 %v4858_v59, 7 }
 0x23a   : > { %v3966_v53 = vpop.f32.mrf.mxu0  ;;  %v6400_v44 = vpop.f32.mrf.mxu1 }
 0x23b   : > { %v6431_v12 = vsub.s32 %v4857_v9, %v4859_v16 }
 0x23c   : > { %v4006_v48 = vpop.f32.mrf.mxu1 }
 0x23d   : > { %v6402_v63 = vpop.f32.mrf.mxu0 }
 0x23e   : > { %v4007_v15 = vpop.f32.mrf.mxu1 }
 0x23f   : > { %v6404_v22 = vpop.f32.mrf.mxu0  ;;  %v4274_v15 = vcombine.low %v6396_v2, %v3963_v8  ;;  %v4275_v8 = vcombine.low %v6398_v50, %v6400_v44 }
 0x241   : > { %v4047_v49 = vpop.f32.mrf.mxu0  ;;  %v6406_v25 = vpop.f32.mrf.mxu1 }
 0x243   : > { %v4048_v29 = vpop.f32.mrf.mxu0  ;;  %v6408_v56 = vpop.f32.mrf.mxu1 }
 0x245   : > { %v4088_v24 = vpop.f32.mrf.mxu1  ;;  %v6410_v10 = vpop.f32.mrf.mxu0 }
 0x247   : > { %v4089_v11 = vpop.f32.mrf.mxu1  ;;  %v6412_v17 = vpop.f32.mrf.mxu0 }
 0x249   : > { %v4129_v5 = vpop.f32.mrf.mxu0  ;;  %v6414_v26 = vpop.f32.mrf.mxu1 }
 0x24a   : > { %v4291_v5 = vadd.f32 %v4273_v47, %v6338_v51 }
 0x24b   : > { %v4130_v36 = vpop.f32.mrf.mxu0  ;;  %v6416_v57 = vpop.f32.mrf.mxu1 }
 0x24d   : > { %v4170_v31 = vpop.f32.mrf.mxu1  ;;  %v6418_v37 = vpop.f32.mrf.mxu0 }
 0x24f   : > { %v4171_v39 = vpop.f32.mrf.mxu1  ;;  %v6420_v21 = vpop.f32.mrf.mxu0 }
 0x250   : > { %v4292_v39 = vadd.f32 %v4274_v15, %v6347_v14 }
 0x251   : > { %v4211_v7 = vpop.f32.mrf.mxu0  ;;  %v6422_v33 = vpop.f32.mrf.mxu1 }
 0x253   : > { %v4212_v6 = vpop.f32.mrf.mxu0  ;;  %v6424_v38 = vpop.f32.mrf.mxu1 }
 0x255   : > { %v4252_v4 = vpop.f32.mrf.mxu1  ;;  %v4412_v40 = vpop.f32.mrf.mxu0 }
 0x257   : > { %v4253_v1 = vpop.f32.mrf.mxu1  ;;  %v4414_v18 = vpop.f32.mrf.mxu0 }
 0x258   : > { %v4765_v43 = vcombine.low %v4412_v40, %v4414_v18 }
 0x259   : > { %v4416_v46 = vpop.f32.mrf.mxu0  ;;  %v4453_v0 = vpop.f32.mrf.mxu1 }
 0x25a   : > { %v4774_v23 = vrot.slane %v4765_v43, 6 }
 0x25b   : > { %v4417_v35 = vpop.f32.mrf.mxu0  ;;  %v4455_v58 = vpop.f32.mrf.mxu1 }
 0x25c   : > { %v4792_v28 = vmul.f32 %v6333_v52, %v4774_v23  ;;  %v4766_v62 = vcombine.low %v4453_v0, %v4455_v58  ;;  %v4293_v58 = vadd.f32 %v4275_v8, %v6356_v20  ;;  %v4277_v20 = vcombine.low %v6406_v25, %v6408_v56 }
 0x25d   : > { %v4457_v53 = vpop.f32.mrf.mxu1  ;;  %v4494_v48 = vpop.f32.mrf.mxu0 }
 0x25e   : > { %v5146_v49 = vrot.slane %v4792_v28, 10  ;;  %v4775_v29 = vrot.slane %v4766_v62, 6 }
 0x25f   : > { %v4458_v24 = vpop.f32.mrf.mxu1  ;;  %v4496_v11 = vpop.f32.mrf.mxu0 }
 0x260   : > { %v4793_v36 = vmul.f32 %v6343_v54, %v4775_v29  ;;  %v4767_v31 = vcombine.low %v4494_v48, %v4496_v11  ;;  %v4837_v7 = vadd.f32 %v5146_v49, %v4291_v5  ;;  %v4276_v54 = vcombine.low %v6402_v63, %v6404_v22 }
 0x261   : > { %v4498_v52 = vpop.f32.mrf.mxu0  ;;  %v4535_v32 = vpop.f32.mrf.mxu1  ;;  %v4278_v11 = vcombine.low %v6410_v10, %v6412_v17 }
 0x262   : > { %v5147_v6 = vrot.slane %v4793_v36, 10  ;;  %v4776_v4 = vrot.slane %v4767_v31, 6  ;;  %v4861_v45 = vrot.slane %v4837_v7, %v6431_v12  ;;  %v4294_v28 = vadd.f32 %v4276_v54, %v6365_v27 }
 0x263   : > { %v4499_v40 = vpop.f32.mrf.mxu0  ;;  %v4537_v2 = vpop.f32.mrf.mxu1 }
 0x264   : > { %v4838_v1 = vadd.f32 %v5147_v6, %v4292_v39  ;;  %v4794_v51 = vmul.f32 %v6352_v19, %v4776_v4  ;;  %v4768_v18 = vcombine.low %v4535_v32, %v4537_v2  ;;  %v4295_v32 = vadd.f32 %v4277_v20, %v6374_v60 }
 0x265   : > { %v4539_v43 = vpop.f32.mrf.mxu1  ;;  %v4576_v13 = vpop.f32.mrf.mxu0  ;;  %v4296_v40 = vadd.f32 %v4278_v11, %v6383_v41  ;;  %v5230_v41 = vld [vmem:[%s6497_s2 + $0x30] sm:$0x77] }
 0x266   : > { %v4868_v14 = vrot.slane %v4838_v1, %v6431_v12  ;;  %v5148_v46 = vrot.slane %v4794_v51, 10  ;;  %v4777_v0 = vrot.slane %v4768_v18, 6  ;;  %v4279_v1 = vcombine.low %v6414_v26, %v6416_v57 }
 0x267   : > { %v4540_v23 = vpop.f32.mrf.mxu1  ;;  %v4578_v35 = vpop.f32.mrf.mxu0  ;;  %v4280_v43 = vcombine.low %v6418_v37, %v6420_v21 }
 0x268   : > { %v4883_v50 = vcombine.low %v4861_v45, %v4868_v14  ;;  %v4795_v44 = vmul.f32 %v6361_v3, %v4777_v0  ;;  %v4769_v19 = vcombine.low %v4576_v13, %v4578_v35  ;;  %v4839_v63 = vadd.f32 %v5148_v46, %v4293_v58 }
 0x269   : > { %v4580_v47 = vpop.f32.mrf.mxu0  ;;  %v4297_v35 = vadd.f32 %v4279_v1, %v6387_v42  ;;  %v4298_v21 = vadd.f32 %v4280_v43, %v6391_v34  ;;  %v5232_v42 = vld [vmem:[%s6497_s2 + $0x40] sm:$0x77] }
 0x26a   : > { %v5149_v22 = vrot.slane %v4795_v44, 10  ;;  %v4778_v62 = vrot.slane %v4769_v19, 6  ;;  %v4617_v9 = vpop.f32.mrf.mxu1  ;;  %v4875_v3 = vrot.slane %v4839_v63, %v6431_v12  ;;  %v4891_v39 = vrot.slane %v4883_v50, %v6431_v12  ;;  %v5231_v50 = vld [vmem:[%s6497_s2 + $0x38] sm:$0x77] }
 0x26b   : > { %v4581_v16 = vpop.f32.mrf.mxu0  ;;  %v4281_v47 = vcombine.low %v6422_v33, %v6424_v38 }
 0x26c   : > { %v4840_v53 = vadd.f32 %v5149_v22, %v4294_v28  ;;  %v4796_v48 = vmul.f32 %v6370_v61, %v4778_v62  ;;  %v4619_v15 = vpop.f32.mrf.mxu1 }
 0x26d   : > { %v4770_v49 = vcombine.low %v4617_v9, %v4619_v15 }
 0x26e   : > { %v4882_v29 = vrot.slane %v4840_v53, %v6431_v12  ;;  %v4621_v24 = vpop.f32.mrf.mxu1  ;;  %v4658_v27 = vpop.f32.mrf.mxu0  ;;  %v5150_v5 = vrot.slane %v4796_v48, 10  ;;  %v4299_v53 = vadd.f32 %v4281_v47, %v6394_v30 }
 0x26f   : > { %v4779_v36 = vrot.slane %v4770_v49, 6 }
 0x270   : > { %v4884_v31 = vcombine.low %v4875_v3, %v4882_v29  ;;  %v4622_v52 = vpop.f32.mrf.mxu1  ;;  %v4660_v61 = vpop.f32.mrf.mxu0  ;;  %v4841_v10 = vadd.f32 %v5150_v5, %v4295_v32 }
 0x271   : > { %v4797_v25 = vmul.f32 %v6379_v55, %v4779_v36  ;;  %v4771_v56 = vcombine.low %v4658_v27, %v4660_v61 }
 0x272   : > { %v4898_v7 = vrot.slane %v4884_v31, %v6431_v12  ;;  %v4662_v6 = vpop.f32.mrf.mxu0  ;;  %v4699_v4 = vpop.f32.mrf.mxu1  ;;  %v4906_v14 = vrot.slane %v4841_v10, %v6431_v12 }
 0x273   : > { %v5151_v17 = vrot.slane %v4797_v25, 10  ;;  %v4780_v60 = vrot.slane %v4771_v56, 6 }
 0x274   : > { %v4899_v2 = vcombine.low %v4891_v39, %v4898_v7  ;;  %v4663_v55 = vpop.f32.mrf.mxu0  ;;  %v4701_v8 = vpop.f32.mrf.mxu1 }
 0x275   : > { %v4842_v51 = vadd.f32 %v5151_v17, %v4296_v40  ;;  %v4798_v18 = vmul.f32 %v5230_v41, %v4780_v60  ;;  %v4772_v54 = vcombine.low %v4699_v4, %v4701_v8 }
 0x276   : > { %4962 = vst [vmem:[%s6460_s26] sm:$0xff] %v4899_v2  ;;  %v4703_v13 = vpop.f32.mrf.mxu1  ;;  %v4740_v45 = vpop.f32.mrf.mxu0 }
 0x277   : > { %v4913_v46 = vrot.slane %v4842_v51, %v6431_v12  ;;  %v5152_v0 = vrot.slane %v4798_v18, 10  ;;  %v4781_v23 = vrot.slane %v4772_v54, 6 }
 0x278   : > { %v4704_v26 = vpop.f32.mrf.mxu1  ;;  %v4742_v57 = vpop.f32.mrf.mxu0 }
 0x279   : > { %v4928_v58 = vcombine.low %v4906_v14, %v4913_v46  ;;  %v4799_v44 = vmul.f32 %v5231_v50, %v4781_v23  ;;  %v4773_v37 = vcombine.low %v4740_v45, %v4742_v57  ;;  %v4843_v28 = vadd.f32 %v5152_v0, %v4297_v35 }
 0x27a   : > { %v4744_v19 = vpop.f32.mrf.mxu0 }
 0x27b   : > { %v5153_v63 = vrot.slane %v4799_v44, 10  ;;  %v4782_v22 = vrot.slane %v4773_v37, 6  ;;  %v4920_v34 = vrot.slane %v4843_v28, %v6431_v12  ;;  %v4936_v20 = vrot.slane %v4928_v58, %v6431_v12 }
 0x27c   : > { %v4745_v62 = vpop.f32.mrf.mxu0 }
 0x27d   : > { %v4844_v9 = vadd.f32 %v5153_v63, %v4298_v21  ;;  %v4800_v16 = vmul.f32 %v5232_v42, %v4782_v22 }
 0x27f   : > { %v4927_v48 = vrot.slane %v4844_v9, %v6431_v12  ;;  %v5154_v15 = vrot.slane %v4800_v16, 10 }
 0x281   : > { %v4929_v33 = vcombine.low %v4920_v34, %v4927_v48  ;;  %v4845_v38 = vadd.f32 %v5154_v15, %v4299_v53 }
 0x283   : > { %v4943_v49 = vrot.slane %v4929_v33, %v6431_v12  ;;  %v4951_v3 = vrot.slane %v4845_v38, %v6431_v12 }
 0x285   : > { %v4944_v29 = vcombine.low %v4936_v20, %v4943_v49  ;;  %v4958_v24 = vrot.slane %v4951_v3, %v6431_v12 }
 0x287   : > { %4963 = vst [vmem:[%s6460_s26 + $0x8] sm:$0xff] %v4944_v29  ;;  %4968 = vst.msk [vmem:[%s6460_s26 + $0x10] sm:$0x3] %vm4966_vm9, %v4958_v24 }
 0x288 PF: > { %s13_s12 = sadd.s32 1, %s5239_s12  }
 0x289   : > { %p10_p4 = scmp.ge.s32.totalorder %s13_s12, 4  }
 0x28b   :  { %12 = sbr.rel (!%p10_p4) target bundleno = 1 (0x1), region = 62 }

</bundles_post_ra>
